<compile_context>
chip_gen: v5e
topology: v5e:2x2
jax: 0.10.0
libtpu: 0.0.40
codegen_flags: <defaults>
</compile_context>

<pallas_src>
import functools
import math

import jax
import jax.numpy as jnp
from jax.experimental import pallas as pl
from jax.experimental.pallas import tpu as pltpu


# ---------------------------------------------------------------------------
# In-kernel helpers (operate on jnp values resident in VMEM/vregs).
# Activation layout: (C, L) with L = H*W flattened row-major in lanes.
# ---------------------------------------------------------------------------
def _shift_lanes(a, s):
    """Zero-filled shift along the last (lane) axis: out[..., p] = a[..., p+s]."""
    if s == 0:
        return a
    L = a.shape[-1]
    z = jnp.zeros(a.shape[:-1] + (abs(s),), a.dtype)
    if s > 0:
        return jnp.concatenate([a[..., s:], z], axis=-1)
    return jnp.concatenate([z, a[..., : L + s]], axis=-1)


def _conv3x3(a, w9_ref, b_ref, mask_lr, W, relu):
    """'same'-padded 3x3 conv on a (C, H*W) activation as ONE MXU matmul.

    a9 row block order is (dy, dx) major/minor, matching the (O, 9C) weight.
    dx = -1/+1 contributions at the image edge are zeroed by the column masks
    (mask depends only on x = p mod W, so it commutes with whole-row shifts);
    dy out-of-range rows are zeroed by the zero-filled +-W lane shifts.
    """
    ml, mr = mask_lr
    base = jnp.concatenate(
        [_shift_lanes(a, -1) * ml, a, _shift_lanes(a, 1) * mr], axis=0)   # (3C, L)
    a9 = jnp.concatenate(
        [_shift_lanes(base, -W), base, _shift_lanes(base, W)], axis=0)    # (9C, L)
    acc = jnp.dot(w9_ref[...], a9, preferred_element_type=jnp.float32)    # (O, L)
    acc = acc + b_ref[...]
    if relu:
        acc = jnp.maximum(acc, 0.0)
    return acc.astype(jnp.bfloat16)


def _maxpool2x2(a, sel_ref, W):
    """2x2 / stride-2 max pool: 2x2 window max via two lane shifts, then the
    stride-2 spatial gather as an exact 0/1 selection matmul (MXU)."""
    rm = jnp.maximum(a, _shift_lanes(a, W))
    cm = jnp.maximum(rm, _shift_lanes(rm, 1))
    return jnp.dot(cm, sel_ref[...],
                   preferred_element_type=jnp.float32).astype(jnp.bfloat16)


def _conv_transpose2x2(a, wt_ref, b_ref, u_ref):
    """ConvTranspose2d(kernel=2, stride=2).

    wt_ref: (4, O, C) per-phase weights (phase k = 2*i + j); u_ref: (4, Ls, Lb)
    exact 0/1 scatter matrices mapping level-(s) positions to the 4 output
    phases of level-(s-1); b_ref: (O, 1) f32 (each output hit exactly once).
    """
    acc = None
    for k in range(4):
        t = jnp.dot(wt_ref[k], a, preferred_element_type=jnp.float32)      # (O, Ls)
        t = jnp.dot(t.astype(jnp.bfloat16), u_ref[k],
                    preferred_element_type=jnp.float32)                    # (O, Lb)
        acc = t if acc is None else acc + t
    return (acc + b_ref[...]).astype(jnp.bfloat16)


# ---------------------------------------------------------------------------
# The fused whole-network kernel (one grid step = one image).
# ---------------------------------------------------------------------------
def _unet_kernel(*refs, n_enc, n_dec, widths):
    o_ref = refs[-1]
    it = iter(refs[:-1])
    x_ref = next(it)
    enc = [tuple(next(it) for _ in range(4)) for _ in range(n_enc)]
    mask_refs = [next(it) for _ in range(n_enc)]
    sel_refs = [next(it) for _ in range(n_enc - 1)]
    ups = [tuple(next(it) for _ in range(3)) for _ in range(n_dec)]
    dec = [tuple(next(it) for _ in range(4)) for _ in range(n_dec)]
    hw_ref = next(it)
    hb_ref = next(it)

    # Hoist the per-level edge masks once.
    masks = [(m[0], m[1]) for m in mask_refs]            # each (1, L) bf16

    # ---- encoder ----
    h = x_ref[0]                                         # (C_in_pad, L0) bf16
    feats = []
    for i in range(n_enc):
        w1, b1, w2, b2 = enc[i]
        h = _conv3x3(h, w1, b1, masks[i], widths[i], relu=True)
        h = _conv3x3(h, w2, b2, masks[i], widths[i], relu=False)
        feats.append(h)
        if i + 1 < n_enc:
            h = _maxpool2x2(h, sel_refs[i], widths[i])
        # torch's Encoder also pools after the last block; that tensor is
        # unused by UNet.forward, so it is skipped (identical semantics).

    # ---- decoder ----
    h = feats[-1]
    for d in range(n_dec):
        wt, bt, um = ups[d]
        h = _conv_transpose2x2(h, wt, bt, um)
        lvl = n_enc - 2 - d
        h = jnp.concatenate([h, feats[lvl]], axis=0)     # fused torch.cat(dim=1)
        w1, b1, w2, b2 = dec[d]
        h = _conv3x3(h, w1, b1, masks[lvl], widths[lvl], relu=True)
        h = _conv3x3(h, w2, b2, masks[lvl], widths[lvl], relu=False)

    # ---- 1x1 head (lane-dense (O_head, H*W) store) ----
    out = jnp.dot(hw_ref[...], h, preferred_element_type=jnp.float32) + hb_ref[...]
    o_ref[0] = out.astype(o_ref.dtype)


# ---------------------------------------------------------------------------
# Host-side constant-matrix / weight-layout prep.
# ---------------------------------------------------------------------------
def _to_w9(w_oihw):
    """torch (O, C, 3, 3) -> (O, 9C) with columns ordered ((ky*3+kx)*C + c)."""
    O, C = w_oihw.shape[0], w_oihw.shape[1]
    return jnp.transpose(w_oihw, (0, 2, 3, 1)).reshape(O, 9 * C).astype(jnp.bfloat16)


def _edge_masks(H, W):
    """(2, 1, H*W) bf16: row 0 zeroes x==0 columns, row 1 zeroes x==W-1."""
    xs = jnp.arange(H * W) % W
    ml = (xs != 0)
    mr = (xs != W - 1)
    return jnp.stack([ml, mr]).astype(jnp.bfloat16)[:, None, :]


def _pool_select(H, W):
    """(H*W, (H//2)*(W//2)) 0/1 matrix selecting the 2x2-window anchors."""
    L, Wo = H * W, W // 2
    L4 = (H // 2) * Wo
    q = jnp.arange(L4)
    src = 2 * (q // Wo) * W + 2 * (q % Wo)
    return (jnp.arange(L)[:, None] == src[None, :]).astype(jnp.bfloat16)


def _upsample_scatter(Hs, Ws):
    """(4, Hs*Ws, 4*Hs*Ws) 0/1 scatter matrices for the 4 output phases."""
    Ls, Lb = Hs * Ws, (2 * Hs) * (2 * Ws)
    p = jnp.arange(Ls)
    ys, xs = p // Ws, p % Ws
    mats = []
    for i in range(2):
        for j in range(2):
            dst = (2 * ys + i) * (2 * Ws) + (2 * xs + j)
            mats.append((jnp.arange(Lb)[None, :] == dst[:, None]).astype(jnp.bfloat16))
    return jnp.stack(mats)


# ---------------------------------------------------------------------------
# Parameter init (deterministic, PyTorch-default-like uniform, torch layouts)
# ---------------------------------------------------------------------------
def _init_conv(key, out_ch, in_ch, kh, kw):
    k1, k2 = jax.random.split(key)
    bound = 1.0 / math.sqrt(in_ch * kh * kw)
    w = jax.random.uniform(k1, (out_ch, in_ch, kh, kw), jnp.float32, -bound, bound)
    b = jax.random.uniform(k2, (out_ch,), jnp.float32, -bound, bound)
    return {"w": w, "b": b}


def _init_convT(key, in_ch, out_ch, kh, kw):
    k1, k2 = jax.random.split(key)
    bound = 1.0 / math.sqrt(out_ch * kh * kw)
    w = jax.random.uniform(k1, (in_ch, out_ch, kh, kw), jnp.float32, -bound, bound)
    b = jax.random.uniform(k2, (out_ch,), jnp.float32, -bound, bound)
    return {"w": w, "b": b}


def _init_block(key, in_ch, out_ch):
    k1, k2 = jax.random.split(key)
    return {"conv1": _init_conv(k1, out_ch, in_ch, 3, 3),
            "conv2": _init_conv(k2, out_ch, out_ch, 3, 3)}


def init_unet_params(key, enc_chs, dec_chs, input_channel):
    keys = jax.random.split(key, 16)
    ki = iter(keys)
    return {
        "enc_blocks": [_init_block(next(ki), enc_chs[i], enc_chs[i + 1])
                       for i in range(len(enc_chs) - 1)],
        "upconvs": [_init_convT(next(ki), dec_chs[i], dec_chs[i + 1], 2, 2)
                    for i in range(len(dec_chs) - 1)],
        "dec_blocks": [_init_block(next(ki), dec_chs[i], dec_chs[i + 1])
                       for i in range(len(dec_chs) - 1)],
        "head": _init_conv(next(ki), input_channel, dec_chs[-1], 1, 1),
    }


# ---------------------------------------------------------------------------
# UNet forward: one fused pallas_call (mirrors the PyTorch module).
# ---------------------------------------------------------------------------
def unet_forward(params, x_nchw):
    N, C_in, H, W = x_nchw.shape
    n_enc = len(params["enc_blocks"])
    n_dec = len(params["dec_blocks"])
    assert len(params["upconvs"]) == n_dec and n_dec <= n_enc - 1
    assert H % (2 ** (n_enc - 1)) == 0 and W % (2 ** (n_enc - 1)) == 0

    widths = [W // (2 ** i) for i in range(n_enc)]
    heights = [H // (2 ** i) for i in range(n_enc)]
    Ls = [heights[i] * widths[i] for i in range(n_enc)]

    # NCHW -> (N, C, H*W) is a free reshape; pad C_in up to a multiple of 8 so
    # every sublane concat inside the kernel uses multiple-of-8 row blocks.
    Cp = max(8, -(-C_in // 8) * 8)
    x = x_nchw.reshape(N, C_in, H * W).astype(jnp.bfloat16)
    if Cp != C_in:
        x = jnp.pad(x, ((0, 0), (0, Cp - C_in), (0, 0)))

    args = [x]
    in_specs = [pl.BlockSpec((1, Cp, Ls[0]), lambda n: (n, 0, 0))]

    def add_const(arr):
        args.append(arr)
        nd = arr.ndim
        in_specs.append(pl.BlockSpec(arr.shape, lambda n, _nd=nd: (0,) * _nd))

    flops = 0

    # encoder block params
    for i, blk in enumerate(params["enc_blocks"]):
        w1 = blk["conv1"]["w"]
        if i == 0 and Cp != C_in:
            w1 = jnp.pad(w1, ((0, 0), (0, Cp - C_in), (0, 0), (0, 0)))
        add_const(_to_w9(w1))
        add_const(blk["conv1"]["b"].reshape(-1, 1).astype(jnp.float32))
        add_const(_to_w9(blk["conv2"]["w"]))
        add_const(blk["conv2"]["b"].reshape(-1, 1).astype(jnp.float32))
        O, Ci = blk["conv1"]["w"].shape[0], w1.shape[1]
        flops += 2 * Ls[i] * 9 * (Ci * O + O * O)

    # per-level edge masks
    for i in range(n_enc):
        add_const(_edge_masks(heights[i], widths[i]))

    # pool selection matrices
    for i in range(n_enc - 1):
        add_const(_pool_select(heights[i], widths[i]))
        C = params["enc_blocks"][i]["conv2"]["w"].shape[0]
        flops += 2 * C * Ls[i] * Ls[i + 1]

    # upconv params + scatter matrices
    for d, up in enumerate(params["upconvs"]):
        wt = up["w"]                                     # (C, O, 2, 2) torch layout
        Cc, O = wt.shape[0], wt.shape[1]
        add_const(jnp.transpose(wt, (2, 3, 1, 0)).reshape(4, O, Cc).astype(jnp.bfloat16))
        add_const(up["b"].reshape(-1, 1).astype(jnp.float32))
        lvl = n_enc - 1 - d
        add_const(_upsample_scatter(heights[lvl], widths[lvl]))
        flops += 2 * 4 * (O * Cc * Ls[lvl] + O * Ls[lvl] * Ls[lvl - 1])

    # decoder block params
    for d, blk in enumerate(params["dec_blocks"]):
        add_const(_to_w9(blk["conv1"]["w"]))
        add_const(blk["conv1"]["b"].reshape(-1, 1).astype(jnp.float32))
        add_const(_to_w9(blk["conv2"]["w"]))
        add_const(blk["conv2"]["b"].reshape(-1, 1).astype(jnp.float32))
        lvl = n_enc - 2 - d
        Ci, O = blk["conv1"]["w"].shape[1], blk["conv1"]["w"].shape[0]
        flops += 2 * Ls[lvl] * 9 * (Ci * O + O * O)

    # 1x1 head
    hw = params["head"]["w"][:, :, 0, 0].astype(jnp.bfloat16)       # (O_head, C)
    O_head = hw.shape[0]
    add_const(hw)
    add_const(params["head"]["b"].reshape(-1, 1).astype(jnp.float32))
    flops += 2 * O_head * hw.shape[1] * Ls[0]

    bytes_accessed = int(sum(int(a.size) * a.dtype.itemsize for a in args)
                         + N * O_head * Ls[0] * 4)

    out = pl.pallas_call(
        functools.partial(_unet_kernel, n_enc=n_enc, n_dec=n_dec, widths=widths),
        grid=(N,),
        in_specs=in_specs,
        out_specs=pl.BlockSpec((1, O_head, Ls[0]), lambda n: (n, 0, 0)),
        out_shape=jax.ShapeDtypeStruct((N, O_head, Ls[0]), jnp.float32),
        compiler_params=pltpu.CompilerParams(dimension_semantics=("parallel",)),
        cost_estimate=pl.CostEstimate(flops=int(N * flops), transcendentals=0,
                                      bytes_accessed=bytes_accessed),
    )(*args)

    # TODO(synk): F.interpolate(out, to_size) branch not implemented (to_size=None here).
    return out.reshape(N, O_head, H, W)                  # free reshape, f32 NCHW


# ---------------------------------------------------------------------------
if __name__ == "__main__":
    # Small UNet consistent with the module's configurable channel tuples.
    enc_chs = (3, 8, 16, 32)
    dec_chs = (32, 16, 8)
    input_channel = 3

    key = jax.random.PRNGKey(0)
    k_params, k_x = jax.random.split(key)
    params = init_unet_params(k_params, enc_chs, dec_chs, input_channel)

    x = jax.random.normal(k_x, (2, 3, 32, 32), jnp.float32)   # NCHW, like PyTorch

    fwd = jax.jit(unet_forward)
    out = jax.block_until_ready(fwd(params, x))

    assert out.shape == (2, 3, 32, 32), out.shape
    assert out.dtype == jnp.float32
    assert bool(jnp.all(jnp.isfinite(out)))
    print("KERNEL_OK")
</pallas_src>

<mosaic_0001>
module attributes {stable_mosaic.version = 11 : i64} {
  func.func @_unet_kernel(%arg0: i32, %arg1: memref<1x8x1024xbf16, #tpu.memory_space<vmem>>, %arg2: memref<8x72xbf16, #tpu.memory_space<vmem>>, %arg3: memref<8x1xf32, #tpu.memory_space<vmem>>, %arg4: memref<8x72xbf16, #tpu.memory_space<vmem>>, %arg5: memref<8x1xf32, #tpu.memory_space<vmem>>, %arg6: memref<16x72xbf16, #tpu.memory_space<vmem>>, %arg7: memref<16x1xf32, #tpu.memory_space<vmem>>, %arg8: memref<16x144xbf16, #tpu.memory_space<vmem>>, %arg9: memref<16x1xf32, #tpu.memory_space<vmem>>, %arg10: memref<32x144xbf16, #tpu.memory_space<vmem>>, %arg11: memref<32x1xf32, #tpu.memory_space<vmem>>, %arg12: memref<32x288xbf16, #tpu.memory_space<vmem>>, %arg13: memref<32x1xf32, #tpu.memory_space<vmem>>, %arg14: memref<2x1x1024xbf16, #tpu.memory_space<vmem>>, %arg15: memref<2x1x256xbf16, #tpu.memory_space<vmem>>, %arg16: memref<2x1x64xbf16, #tpu.memory_space<vmem>>, %arg17: memref<1024x256xbf16, #tpu.memory_space<vmem>>, %arg18: memref<256x64xbf16, #tpu.memory_space<vmem>>, %arg19: memref<4x16x32xbf16, #tpu.memory_space<vmem>>, %arg20: memref<16x1xf32, #tpu.memory_space<vmem>>, %arg21: memref<4x64x256xbf16, #tpu.memory_space<vmem>>, %arg22: memref<4x8x16xbf16, #tpu.memory_space<vmem>>, %arg23: memref<8x1xf32, #tpu.memory_space<vmem>>, %arg24: memref<4x256x1024xbf16, #tpu.memory_space<vmem>>, %arg25: memref<16x288xbf16, #tpu.memory_space<vmem>>, %arg26: memref<16x1xf32, #tpu.memory_space<vmem>>, %arg27: memref<16x144xbf16, #tpu.memory_space<vmem>>, %arg28: memref<16x1xf32, #tpu.memory_space<vmem>>, %arg29: memref<8x144xbf16, #tpu.memory_space<vmem>>, %arg30: memref<8x1xf32, #tpu.memory_space<vmem>>, %arg31: memref<8x72xbf16, #tpu.memory_space<vmem>>, %arg32: memref<8x1xf32, #tpu.memory_space<vmem>>, %arg33: memref<3x8xbf16, #tpu.memory_space<vmem>>, %arg34: memref<3x1xf32, #tpu.memory_space<vmem>>, %arg35: memref<1x3x1024xf32, #tpu.memory_space<vmem>>) attributes {dimension_semantics = [#tpu.dimension_semantics<parallel>], iteration_bounds = array<i64: 2>, scalar_prefetch = 0 : i64, scratch_operands = 0 : i64, tpu.core_type = #tpu.core_type<tc>, window_params = [{transform_indices = @transform_0, window_bounds = array<i64: 1, 8, 1024>}, {pipeline_mode = #tpu.pipeline_mode<synchronous>, transform_indices = @transform_1, window_bounds = array<i64: 8, 72>}, {pipeline_mode = #tpu.pipeline_mode<synchronous>, transform_indices = @transform_2, window_bounds = array<i64: 8, 1>}, {pipeline_mode = #tpu.pipeline_mode<synchronous>, transform_indices = @transform_3, window_bounds = array<i64: 8, 72>}, {pipeline_mode = #tpu.pipeline_mode<synchronous>, transform_indices = @transform_4, window_bounds = array<i64: 8, 1>}, {pipeline_mode = #tpu.pipeline_mode<synchronous>, transform_indices = @transform_5, window_bounds = array<i64: 16, 72>}, {pipeline_mode = #tpu.pipeline_mode<synchronous>, transform_indices = @transform_6, window_bounds = array<i64: 16, 1>}, {pipeline_mode = #tpu.pipeline_mode<synchronous>, transform_indices = @transform_7, window_bounds = array<i64: 16, 144>}, {pipeline_mode = #tpu.pipeline_mode<synchronous>, transform_indices = @transform_8, window_bounds = array<i64: 16, 1>}, {pipeline_mode = #tpu.pipeline_mode<synchronous>, transform_indices = @transform_9, window_bounds = array<i64: 32, 144>}, {pipeline_mode = #tpu.pipeline_mode<synchronous>, transform_indices = @transform_10, window_bounds = array<i64: 32, 1>}, {pipeline_mode = #tpu.pipeline_mode<synchronous>, transform_indices = @transform_11, window_bounds = array<i64: 32, 288>}, {pipeline_mode = #tpu.pipeline_mode<synchronous>, transform_indices = @transform_12, window_bounds = array<i64: 32, 1>}, {pipeline_mode = #tpu.pipeline_mode<synchronous>, transform_indices = @transform_13, window_bounds = array<i64: 2, 1, 1024>}, {pipeline_mode = #tpu.pipeline_mode<synchronous>, transform_indices = @transform_14, window_bounds = array<i64: 2, 1, 256>}, {pipeline_mode = #tpu.pipeline_mode<synchronous>, transform_indices = @transform_15, window_bounds = array<i64: 2, 1, 64>}, {pipeline_mode = #tpu.pipeline_mode<synchronous>, transform_indices = @transform_16, window_bounds = array<i64: 1024, 256>}, {pipeline_mode = #tpu.pipeline_mode<synchronous>, transform_indices = @transform_17, window_bounds = array<i64: 256, 64>}, {pipeline_mode = #tpu.pipeline_mode<synchronous>, transform_indices = @transform_18, window_bounds = array<i64: 4, 16, 32>}, {pipeline_mode = #tpu.pipeline_mode<synchronous>, transform_indices = @transform_19, window_bounds = array<i64: 16, 1>}, {pipeline_mode = #tpu.pipeline_mode<synchronous>, transform_indices = @transform_20, window_bounds = array<i64: 4, 64, 256>}, {pipeline_mode = #tpu.pipeline_mode<synchronous>, transform_indices = @transform_21, window_bounds = array<i64: 4, 8, 16>}, {pipeline_mode = #tpu.pipeline_mode<synchronous>, transform_indices = @transform_22, window_bounds = array<i64: 8, 1>}, {pipeline_mode = #tpu.pipeline_mode<synchronous>, transform_indices = @transform_23, window_bounds = array<i64: 4, 256, 1024>}, {pipeline_mode = #tpu.pipeline_mode<synchronous>, transform_indices = @transform_24, window_bounds = array<i64: 16, 288>}, {pipeline_mode = #tpu.pipeline_mode<synchronous>, transform_indices = @transform_25, window_bounds = array<i64: 16, 1>}, {pipeline_mode = #tpu.pipeline_mode<synchronous>, transform_indices = @transform_26, window_bounds = array<i64: 16, 144>}, {pipeline_mode = #tpu.pipeline_mode<synchronous>, transform_indices = @transform_27, window_bounds = array<i64: 16, 1>}, {pipeline_mode = #tpu.pipeline_mode<synchronous>, transform_indices = @transform_28, window_bounds = array<i64: 8, 144>}, {pipeline_mode = #tpu.pipeline_mode<synchronous>, transform_indices = @transform_29, window_bounds = array<i64: 8, 1>}, {pipeline_mode = #tpu.pipeline_mode<synchronous>, transform_indices = @transform_30, window_bounds = array<i64: 8, 72>}, {pipeline_mode = #tpu.pipeline_mode<synchronous>, transform_indices = @transform_31, window_bounds = array<i64: 8, 1>}, {pipeline_mode = #tpu.pipeline_mode<synchronous>, transform_indices = @transform_32, window_bounds = array<i64: 3, 8>}, {pipeline_mode = #tpu.pipeline_mode<synchronous>, transform_indices = @transform_33, window_bounds = array<i64: 3, 1>}, {transform_indices = @transform_34, window_bounds = array<i64: 1, 3, 1024>}]} {
    %c0 = arith.constant 0 : index
    %c0_0 = arith.constant 0 : index
    %c0_1 = arith.constant 0 : index
    %0 = vector.load %arg14[%c0, %c0_0, %c0_1] : memref<2x1x1024xbf16, #tpu.memory_space<vmem>>, vector<1x1x1024xbf16>
    %1 = vector.shape_cast %0 : vector<1x1x1024xbf16> to vector<1x1024xbf16>
    %c1 = arith.constant 1 : index
    %c0_2 = arith.constant 0 : index
    %c0_3 = arith.constant 0 : index
    %2 = vector.load %arg14[%c1, %c0_2, %c0_3] : memref<2x1x1024xbf16, #tpu.memory_space<vmem>>, vector<1x1x1024xbf16>
    %3 = vector.shape_cast %2 : vector<1x1x1024xbf16> to vector<1x1024xbf16>
    %c0_4 = arith.constant 0 : index
    %c0_5 = arith.constant 0 : index
    %c0_6 = arith.constant 0 : index
    %4 = vector.load %arg15[%c0_4, %c0_5, %c0_6] : memref<2x1x256xbf16, #tpu.memory_space<vmem>>, vector<1x1x256xbf16>
    %5 = vector.shape_cast %4 : vector<1x1x256xbf16> to vector<1x256xbf16>
    %c1_7 = arith.constant 1 : index
    %c0_8 = arith.constant 0 : index
    %c0_9 = arith.constant 0 : index
    %6 = vector.load %arg15[%c1_7, %c0_8, %c0_9] : memref<2x1x256xbf16, #tpu.memory_space<vmem>>, vector<1x1x256xbf16>
    %7 = vector.shape_cast %6 : vector<1x1x256xbf16> to vector<1x256xbf16>
    %c0_10 = arith.constant 0 : index
    %c0_11 = arith.constant 0 : index
    %c0_12 = arith.constant 0 : index
    %8 = vector.load %arg16[%c0_10, %c0_11, %c0_12] : memref<2x1x64xbf16, #tpu.memory_space<vmem>>, vector<1x1x64xbf16>
    %9 = vector.shape_cast %8 : vector<1x1x64xbf16> to vector<1x64xbf16>
    %c1_13 = arith.constant 1 : index
    %c0_14 = arith.constant 0 : index
    %c0_15 = arith.constant 0 : index
    %10 = vector.load %arg16[%c1_13, %c0_14, %c0_15] : memref<2x1x64xbf16, #tpu.memory_space<vmem>>, vector<1x1x64xbf16>
    %11 = vector.shape_cast %10 : vector<1x1x64xbf16> to vector<1x64xbf16>
    %c0_16 = arith.constant 0 : index
    %c0_17 = arith.constant 0 : index
    %c0_18 = arith.constant 0 : index
    %12 = vector.load %arg1[%c0_16, %c0_17, %c0_18] : memref<1x8x1024xbf16, #tpu.memory_space<vmem>>, vector<1x8x1024xbf16>
    %13 = vector.shape_cast %12 : vector<1x8x1024xbf16> to vector<8x1024xbf16>
    %cst = arith.constant 0.000000e+00 : bf16
    %14 = vector.broadcast %cst : bf16 to vector<8x1xbf16>
    %15 = vector.extract_strided_slice %13 {offsets = [0, 0], sizes = [8, 1023], strides = [1, 1]} : vector<8x1024xbf16> to vector<8x1023xbf16>
    %16 = tpu.concatenate %14, %15 in 1 : vector<8x1xbf16>, vector<8x1023xbf16> -> vector<8x1024xbf16>
    %17 = vector.broadcast %1 : vector<1x1024xbf16> to vector<8x1024xbf16>
    %18 = arith.mulf %16, %17 : vector<8x1024xbf16>
    %cst_19 = arith.constant 0.000000e+00 : bf16
    %19 = vector.broadcast %cst_19 : bf16 to vector<8x1xbf16>
    %20 = vector.extract_strided_slice %13 {offsets = [0, 1], sizes = [8, 1023], strides = [1, 1]} : vector<8x1024xbf16> to vector<8x1023xbf16>
    %21 = tpu.concatenate %20, %19 in 1 : vector<8x1023xbf16>, vector<8x1xbf16> -> vector<8x1024xbf16>
    %22 = vector.broadcast %3 : vector<1x1024xbf16> to vector<8x1024xbf16>
    %23 = arith.mulf %21, %22 : vector<8x1024xbf16>
    %24 = tpu.concatenate %18, %13, %23 in 0 : vector<8x1024xbf16>, vector<8x1024xbf16>, vector<8x1024xbf16> -> vector<24x1024xbf16>
    %cst_20 = arith.constant 0.000000e+00 : bf16
    %25 = vector.broadcast %cst_20 : bf16 to vector<24x32xbf16>
    %26 = vector.extract_strided_slice %24 {offsets = [0, 0], sizes = [24, 992], strides = [1, 1]} : vector<24x1024xbf16> to vector<24x992xbf16>
    %27 = tpu.concatenate %25, %26 in 1 : vector<24x32xbf16>, vector<24x992xbf16> -> vector<24x1024xbf16>
    %cst_21 = arith.constant 0.000000e+00 : bf16
    %28 = vector.broadcast %cst_21 : bf16 to vector<24x32xbf16>
    %29 = vector.extract_strided_slice %24 {offsets = [0, 32], sizes = [24, 992], strides = [1, 1]} : vector<24x1024xbf16> to vector<24x992xbf16>
    %30 = tpu.concatenate %29, %28 in 1 : vector<24x992xbf16>, vector<24x32xbf16> -> vector<24x1024xbf16>
    %31 = tpu.concatenate %27, %24, %30 in 0 : vector<24x1024xbf16>, vector<24x1024xbf16>, vector<24x1024xbf16> -> vector<72x1024xbf16>
    %c0_22 = arith.constant 0 : index
    %c0_23 = arith.constant 0 : index
    %32 = vector.load %arg2[%c0_22, %c0_23] : memref<8x72xbf16, #tpu.memory_space<vmem>>, vector<8x72xbf16>
    %cst_24 = arith.constant dense<0.000000e+00> : vector<8x1024xf32>
    %33 = tpu.matmul %32, %31, %cst_24 {dimension_numbers = #tpu.dot_dimension_numbers<[1], [0], [0], [1], [0, 0, 1, 1], [], []>} : vector<8x72xbf16>, vector<72x1024xbf16>, vector<8x1024xf32> -> vector<8x1024xf32>
    %c0_25 = arith.constant 0 : index
    %c0_26 = arith.constant 0 : index
    %34 = vector.load %arg3[%c0_25, %c0_26] : memref<8x1xf32, #tpu.memory_space<vmem>>, vector<8x1xf32>
    %35 = vector.broadcast %34 : vector<8x1xf32> to vector<8x1024xf32>
    %36 = arith.addf %33, %35 : vector<8x1024xf32>
    %cst_27 = arith.constant 0.000000e+00 : f32
    %37 = vector.broadcast %cst_27 : f32 to vector<8x1024xf32>
    %38 = arith.maximumf %36, %37 : vector<8x1024xf32>
    %39 = arith.truncf %38 : vector<8x1024xf32> to vector<8x1024xbf16>
    %cst_28 = arith.constant 0.000000e+00 : bf16
    %40 = vector.broadcast %cst_28 : bf16 to vector<8x1xbf16>
    %41 = vector.extract_strided_slice %39 {offsets = [0, 0], sizes = [8, 1023], strides = [1, 1]} : vector<8x1024xbf16> to vector<8x1023xbf16>
    %42 = tpu.concatenate %40, %41 in 1 : vector<8x1xbf16>, vector<8x1023xbf16> -> vector<8x1024xbf16>
    %43 = vector.broadcast %1 : vector<1x1024xbf16> to vector<8x1024xbf16>
    %44 = arith.mulf %42, %43 : vector<8x1024xbf16>
    %cst_29 = arith.constant 0.000000e+00 : bf16
    %45 = vector.broadcast %cst_29 : bf16 to vector<8x1xbf16>
    %46 = vector.extract_strided_slice %39 {offsets = [0, 1], sizes = [8, 1023], strides = [1, 1]} : vector<8x1024xbf16> to vector<8x1023xbf16>
    %47 = tpu.concatenate %46, %45 in 1 : vector<8x1023xbf16>, vector<8x1xbf16> -> vector<8x1024xbf16>
    %48 = vector.broadcast %3 : vector<1x1024xbf16> to vector<8x1024xbf16>
    %49 = arith.mulf %47, %48 : vector<8x1024xbf16>
    %50 = tpu.concatenate %44, %39, %49 in 0 : vector<8x1024xbf16>, vector<8x1024xbf16>, vector<8x1024xbf16> -> vector<24x1024xbf16>
    %cst_30 = arith.constant 0.000000e+00 : bf16
    %51 = vector.broadcast %cst_30 : bf16 to vector<24x32xbf16>
    %52 = vector.extract_strided_slice %50 {offsets = [0, 0], sizes = [24, 992], strides = [1, 1]} : vector<24x1024xbf16> to vector<24x992xbf16>
    %53 = tpu.concatenate %51, %52 in 1 : vector<24x32xbf16>, vector<24x992xbf16> -> vector<24x1024xbf16>
    %cst_31 = arith.constant 0.000000e+00 : bf16
    %54 = vector.broadcast %cst_31 : bf16 to vector<24x32xbf16>
    %55 = vector.extract_strided_slice %50 {offsets = [0, 32], sizes = [24, 992], strides = [1, 1]} : vector<24x1024xbf16> to vector<24x992xbf16>
    %56 = tpu.concatenate %55, %54 in 1 : vector<24x992xbf16>, vector<24x32xbf16> -> vector<24x1024xbf16>
    %57 = tpu.concatenate %53, %50, %56 in 0 : vector<24x1024xbf16>, vector<24x1024xbf16>, vector<24x1024xbf16> -> vector<72x1024xbf16>
    %c0_32 = arith.constant 0 : index
    %c0_33 = arith.constant 0 : index
    %58 = vector.load %arg4[%c0_32, %c0_33] : memref<8x72xbf16, #tpu.memory_space<vmem>>, vector<8x72xbf16>
    %cst_34 = arith.constant dense<0.000000e+00> : vector<8x1024xf32>
    %59 = tpu.matmul %58, %57, %cst_34 {dimension_numbers = #tpu.dot_dimension_numbers<[1], [0], [0], [1], [0, 0, 1, 1], [], []>} : vector<8x72xbf16>, vector<72x1024xbf16>, vector<8x1024xf32> -> vector<8x1024xf32>
    %c0_35 = arith.constant 0 : index
    %c0_36 = arith.constant 0 : index
    %60 = vector.load %arg5[%c0_35, %c0_36] : memref<8x1xf32, #tpu.memory_space<vmem>>, vector<8x1xf32>
    %61 = vector.broadcast %60 : vector<8x1xf32> to vector<8x1024xf32>
    %62 = arith.addf %59, %61 : vector<8x1024xf32>
    %63 = arith.truncf %62 : vector<8x1024xf32> to vector<8x1024xbf16>
    %cst_37 = arith.constant 0.000000e+00 : bf16
    %64 = vector.broadcast %cst_37 : bf16 to vector<8x32xbf16>
    %65 = vector.extract_strided_slice %63 {offsets = [0, 32], sizes = [8, 992], strides = [1, 1]} : vector<8x1024xbf16> to vector<8x992xbf16>
    %66 = tpu.concatenate %65, %64 in 1 : vector<8x992xbf16>, vector<8x32xbf16> -> vector<8x1024xbf16>
    %67 = arith.maximumf %63, %66 : vector<8x1024xbf16>
    %cst_38 = arith.constant 0.000000e+00 : bf16
    %68 = vector.broadcast %cst_38 : bf16 to vector<8x1xbf16>
    %69 = vector.extract_strided_slice %67 {offsets = [0, 1], sizes = [8, 1023], strides = [1, 1]} : vector<8x1024xbf16> to vector<8x1023xbf16>
    %70 = tpu.concatenate %69, %68 in 1 : vector<8x1023xbf16>, vector<8x1xbf16> -> vector<8x1024xbf16>
    %71 = arith.maximumf %67, %70 : vector<8x1024xbf16>
    %c0_39 = arith.constant 0 : index
    %c0_40 = arith.constant 0 : index
    %72 = vector.load %arg17[%c0_39, %c0_40] : memref<1024x256xbf16, #tpu.memory_space<vmem>>, vector<1024x256xbf16>
    %cst_41 = arith.constant dense<0.000000e+00> : vector<8x256xf32>
    %73 = tpu.matmul %71, %72, %cst_41 {dimension_numbers = #tpu.dot_dimension_numbers<[1], [0], [0], [1], [0, 0, 1, 1], [], []>} : vector<8x1024xbf16>, vector<1024x256xbf16>, vector<8x256xf32> -> vector<8x256xf32>
    %74 = arith.truncf %73 : vector<8x256xf32> to vector<8x256xbf16>
    %cst_42 = arith.constant 0.000000e+00 : bf16
    %75 = vector.broadcast %cst_42 : bf16 to vector<8x1xbf16>
    %76 = vector.extract_strided_slice %74 {offsets = [0, 0], sizes = [8, 255], strides = [1, 1]} : vector<8x256xbf16> to vector<8x255xbf16>
    %77 = tpu.concatenate %75, %76 in 1 : vector<8x1xbf16>, vector<8x255xbf16> -> vector<8x256xbf16>
    %78 = vector.broadcast %5 : vector<1x256xbf16> to vector<8x256xbf16>
    %79 = arith.mulf %77, %78 : vector<8x256xbf16>
    %cst_43 = arith.constant 0.000000e+00 : bf16
    %80 = vector.broadcast %cst_43 : bf16 to vector<8x1xbf16>
    %81 = vector.extract_strided_slice %74 {offsets = [0, 1], sizes = [8, 255], strides = [1, 1]} : vector<8x256xbf16> to vector<8x255xbf16>
    %82 = tpu.concatenate %81, %80 in 1 : vector<8x255xbf16>, vector<8x1xbf16> -> vector<8x256xbf16>
    %83 = vector.broadcast %7 : vector<1x256xbf16> to vector<8x256xbf16>
    %84 = arith.mulf %82, %83 : vector<8x256xbf16>
    %85 = tpu.concatenate %79, %74, %84 in 0 : vector<8x256xbf16>, vector<8x256xbf16>, vector<8x256xbf16> -> vector<24x256xbf16>
    %cst_44 = arith.constant 0.000000e+00 : bf16
    %86 = vector.broadcast %cst_44 : bf16 to vector<24x16xbf16>
    %87 = vector.extract_strided_slice %85 {offsets = [0, 0], sizes = [24, 240], strides = [1, 1]} : vector<24x256xbf16> to vector<24x240xbf16>
    %88 = tpu.concatenate %86, %87 in 1 : vector<24x16xbf16>, vector<24x240xbf16> -> vector<24x256xbf16>
    %cst_45 = arith.constant 0.000000e+00 : bf16
    %89 = vector.broadcast %cst_45 : bf16 to vector<24x16xbf16>
    %90 = vector.extract_strided_slice %85 {offsets = [0, 16], sizes = [24, 240], strides = [1, 1]} : vector<24x256xbf16> to vector<24x240xbf16>
    %91 = tpu.concatenate %90, %89 in 1 : vector<24x240xbf16>, vector<24x16xbf16> -> vector<24x256xbf16>
    %92 = tpu.concatenate %88, %85, %91 in 0 : vector<24x256xbf16>, vector<24x256xbf16>, vector<24x256xbf16> -> vector<72x256xbf16>
    %c0_46 = arith.constant 0 : index
    %c0_47 = arith.constant 0 : index
    %93 = vector.load %arg6[%c0_46, %c0_47] : memref<16x72xbf16, #tpu.memory_space<vmem>>, vector<16x72xbf16>
    %cst_48 = arith.constant dense<0.000000e+00> : vector<16x256xf32>
    %94 = tpu.matmul %93, %92, %cst_48 {dimension_numbers = #tpu.dot_dimension_numbers<[1], [0], [0], [1], [0, 0, 1, 1], [], []>} : vector<16x72xbf16>, vector<72x256xbf16>, vector<16x256xf32> -> vector<16x256xf32>
    %c0_49 = arith.constant 0 : index
    %c0_50 = arith.constant 0 : index
    %95 = vector.load %arg7[%c0_49, %c0_50] : memref<16x1xf32, #tpu.memory_space<vmem>>, vector<16x1xf32>
    %96 = vector.broadcast %95 : vector<16x1xf32> to vector<16x256xf32>
    %97 = arith.addf %94, %96 : vector<16x256xf32>
    %cst_51 = arith.constant 0.000000e+00 : f32
    %98 = vector.broadcast %cst_51 : f32 to vector<16x256xf32>
    %99 = arith.maximumf %97, %98 : vector<16x256xf32>
    %100 = arith.truncf %99 : vector<16x256xf32> to vector<16x256xbf16>
    %cst_52 = arith.constant 0.000000e+00 : bf16
    %101 = vector.broadcast %cst_52 : bf16 to vector<16x1xbf16>
    %102 = vector.extract_strided_slice %100 {offsets = [0, 0], sizes = [16, 255], strides = [1, 1]} : vector<16x256xbf16> to vector<16x255xbf16>
    %103 = tpu.concatenate %101, %102 in 1 : vector<16x1xbf16>, vector<16x255xbf16> -> vector<16x256xbf16>
    %104 = vector.broadcast %5 : vector<1x256xbf16> to vector<16x256xbf16>
    %105 = arith.mulf %103, %104 : vector<16x256xbf16>
    %cst_53 = arith.constant 0.000000e+00 : bf16
    %106 = vector.broadcast %cst_53 : bf16 to vector<16x1xbf16>
    %107 = vector.extract_strided_slice %100 {offsets = [0, 1], sizes = [16, 255], strides = [1, 1]} : vector<16x256xbf16> to vector<16x255xbf16>
    %108 = tpu.concatenate %107, %106 in 1 : vector<16x255xbf16>, vector<16x1xbf16> -> vector<16x256xbf16>
    %109 = vector.broadcast %7 : vector<1x256xbf16> to vector<16x256xbf16>
    %110 = arith.mulf %108, %109 : vector<16x256xbf16>
    %111 = tpu.concatenate %105, %100, %110 in 0 : vector<16x256xbf16>, vector<16x256xbf16>, vector<16x256xbf16> -> vector<48x256xbf16>
    %cst_54 = arith.constant 0.000000e+00 : bf16
    %112 = vector.broadcast %cst_54 : bf16 to vector<48x16xbf16>
    %113 = vector.extract_strided_slice %111 {offsets = [0, 0], sizes = [48, 240], strides = [1, 1]} : vector<48x256xbf16> to vector<48x240xbf16>
    %114 = tpu.concatenate %112, %113 in 1 : vector<48x16xbf16>, vector<48x240xbf16> -> vector<48x256xbf16>
    %cst_55 = arith.constant 0.000000e+00 : bf16
    %115 = vector.broadcast %cst_55 : bf16 to vector<48x16xbf16>
    %116 = vector.extract_strided_slice %111 {offsets = [0, 16], sizes = [48, 240], strides = [1, 1]} : vector<48x256xbf16> to vector<48x240xbf16>
    %117 = tpu.concatenate %116, %115 in 1 : vector<48x240xbf16>, vector<48x16xbf16> -> vector<48x256xbf16>
    %118 = tpu.concatenate %114, %111, %117 in 0 : vector<48x256xbf16>, vector<48x256xbf16>, vector<48x256xbf16> -> vector<144x256xbf16>
    %c0_56 = arith.constant 0 : index
    %c0_57 = arith.constant 0 : index
    %119 = vector.load %arg8[%c0_56, %c0_57] : memref<16x144xbf16, #tpu.memory_space<vmem>>, vector<16x144xbf16>
    %cst_58 = arith.constant dense<0.000000e+00> : vector<16x256xf32>
    %120 = tpu.matmul %119, %118, %cst_58 {dimension_numbers = #tpu.dot_dimension_numbers<[1], [0], [0], [1], [0, 0, 1, 1], [], []>} : vector<16x144xbf16>, vector<144x256xbf16>, vector<16x256xf32> -> vector<16x256xf32>
    %c0_59 = arith.constant 0 : index
    %c0_60 = arith.constant 0 : index
    %121 = vector.load %arg9[%c0_59, %c0_60] : memref<16x1xf32, #tpu.memory_space<vmem>>, vector<16x1xf32>
    %122 = vector.broadcast %121 : vector<16x1xf32> to vector<16x256xf32>
    %123 = arith.addf %120, %122 : vector<16x256xf32>
    %124 = arith.truncf %123 : vector<16x256xf32> to vector<16x256xbf16>
    %cst_61 = arith.constant 0.000000e+00 : bf16
    %125 = vector.broadcast %cst_61 : bf16 to vector<16x16xbf16>
    %126 = vector.extract_strided_slice %124 {offsets = [0, 16], sizes = [16, 240], strides = [1, 1]} : vector<16x256xbf16> to vector<16x240xbf16>
    %127 = tpu.concatenate %126, %125 in 1 : vector<16x240xbf16>, vector<16x16xbf16> -> vector<16x256xbf16>
    %128 = arith.maximumf %124, %127 : vector<16x256xbf16>
    %cst_62 = arith.constant 0.000000e+00 : bf16
    %129 = vector.broadcast %cst_62 : bf16 to vector<16x1xbf16>
    %130 = vector.extract_strided_slice %128 {offsets = [0, 1], sizes = [16, 255], strides = [1, 1]} : vector<16x256xbf16> to vector<16x255xbf16>
    %131 = tpu.concatenate %130, %129 in 1 : vector<16x255xbf16>, vector<16x1xbf16> -> vector<16x256xbf16>
    %132 = arith.maximumf %128, %131 : vector<16x256xbf16>
    %c0_63 = arith.constant 0 : index
    %c0_64 = arith.constant 0 : index
    %133 = vector.load %arg18[%c0_63, %c0_64] : memref<256x64xbf16, #tpu.memory_space<vmem>>, vector<256x64xbf16>
    %cst_65 = arith.constant dense<0.000000e+00> : vector<16x64xf32>
    %134 = tpu.matmul %132, %133, %cst_65 {dimension_numbers = #tpu.dot_dimension_numbers<[1], [0], [0], [1], [0, 0, 1, 1], [], []>} : vector<16x256xbf16>, vector<256x64xbf16>, vector<16x64xf32> -> vector<16x64xf32>
    %135 = arith.truncf %134 : vector<16x64xf32> to vector<16x64xbf16>
    %cst_66 = arith.constant 0.000000e+00 : bf16
    %136 = vector.broadcast %cst_66 : bf16 to vector<16x1xbf16>
    %137 = vector.extract_strided_slice %135 {offsets = [0, 0], sizes = [16, 63], strides = [1, 1]} : vector<16x64xbf16> to vector<16x63xbf16>
    %138 = tpu.concatenate %136, %137 in 1 : vector<16x1xbf16>, vector<16x63xbf16> -> vector<16x64xbf16>
    %139 = vector.broadcast %9 : vector<1x64xbf16> to vector<16x64xbf16>
    %140 = arith.mulf %138, %139 : vector<16x64xbf16>
    %cst_67 = arith.constant 0.000000e+00 : bf16
    %141 = vector.broadcast %cst_67 : bf16 to vector<16x1xbf16>
    %142 = vector.extract_strided_slice %135 {offsets = [0, 1], sizes = [16, 63], strides = [1, 1]} : vector<16x64xbf16> to vector<16x63xbf16>
    %143 = tpu.concatenate %142, %141 in 1 : vector<16x63xbf16>, vector<16x1xbf16> -> vector<16x64xbf16>
    %144 = vector.broadcast %11 : vector<1x64xbf16> to vector<16x64xbf16>
    %145 = arith.mulf %143, %144 : vector<16x64xbf16>
    %146 = tpu.concatenate %140, %135, %145 in 0 : vector<16x64xbf16>, vector<16x64xbf16>, vector<16x64xbf16> -> vector<48x64xbf16>
    %cst_68 = arith.constant 0.000000e+00 : bf16
    %147 = vector.broadcast %cst_68 : bf16 to vector<48x8xbf16>
    %148 = vector.extract_strided_slice %146 {offsets = [0, 0], sizes = [48, 56], strides = [1, 1]} : vector<48x64xbf16> to vector<48x56xbf16>
    %149 = tpu.concatenate %147, %148 in 1 : vector<48x8xbf16>, vector<48x56xbf16> -> vector<48x64xbf16>
    %cst_69 = arith.constant 0.000000e+00 : bf16
    %150 = vector.broadcast %cst_69 : bf16 to vector<48x8xbf16>
    %151 = vector.extract_strided_slice %146 {offsets = [0, 8], sizes = [48, 56], strides = [1, 1]} : vector<48x64xbf16> to vector<48x56xbf16>
    %152 = tpu.concatenate %151, %150 in 1 : vector<48x56xbf16>, vector<48x8xbf16> -> vector<48x64xbf16>
    %153 = tpu.concatenate %149, %146, %152 in 0 : vector<48x64xbf16>, vector<48x64xbf16>, vector<48x64xbf16> -> vector<144x64xbf16>
    %c0_70 = arith.constant 0 : index
    %c0_71 = arith.constant 0 : index
    %154 = vector.load %arg10[%c0_70, %c0_71] : memref<32x144xbf16, #tpu.memory_space<vmem>>, vector<32x144xbf16>
    %cst_72 = arith.constant dense<0.000000e+00> : vector<32x64xf32>
    %155 = tpu.matmul %154, %153, %cst_72 {dimension_numbers = #tpu.dot_dimension_numbers<[1], [0], [0], [1], [0, 0, 1, 1], [], []>} : vector<32x144xbf16>, vector<144x64xbf16>, vector<32x64xf32> -> vector<32x64xf32>
    %c0_73 = arith.constant 0 : index
    %c0_74 = arith.constant 0 : index
    %156 = vector.load %arg11[%c0_73, %c0_74] : memref<32x1xf32, #tpu.memory_space<vmem>>, vector<32x1xf32>
    %157 = vector.broadcast %156 : vector<32x1xf32> to vector<32x64xf32>
    %158 = arith.addf %155, %157 : vector<32x64xf32>
    %cst_75 = arith.constant 0.000000e+00 : f32
    %159 = vector.broadcast %cst_75 : f32 to vector<32x64xf32>
    %160 = arith.maximumf %158, %159 : vector<32x64xf32>
    %161 = arith.truncf %160 : vector<32x64xf32> to vector<32x64xbf16>
    %cst_76 = arith.constant 0.000000e+00 : bf16
    %162 = vector.broadcast %cst_76 : bf16 to vector<32x1xbf16>
    %163 = vector.extract_strided_slice %161 {offsets = [0, 0], sizes = [32, 63], strides = [1, 1]} : vector<32x64xbf16> to vector<32x63xbf16>
    %164 = tpu.concatenate %162, %163 in 1 : vector<32x1xbf16>, vector<32x63xbf16> -> vector<32x64xbf16>
    %165 = vector.broadcast %9 : vector<1x64xbf16> to vector<32x64xbf16>
    %166 = arith.mulf %164, %165 : vector<32x64xbf16>
    %cst_77 = arith.constant 0.000000e+00 : bf16
    %167 = vector.broadcast %cst_77 : bf16 to vector<32x1xbf16>
    %168 = vector.extract_strided_slice %161 {offsets = [0, 1], sizes = [32, 63], strides = [1, 1]} : vector<32x64xbf16> to vector<32x63xbf16>
    %169 = tpu.concatenate %168, %167 in 1 : vector<32x63xbf16>, vector<32x1xbf16> -> vector<32x64xbf16>
    %170 = vector.broadcast %11 : vector<1x64xbf16> to vector<32x64xbf16>
    %171 = arith.mulf %169, %170 : vector<32x64xbf16>
    %172 = tpu.concatenate %166, %161, %171 in 0 : vector<32x64xbf16>, vector<32x64xbf16>, vector<32x64xbf16> -> vector<96x64xbf16>
    %cst_78 = arith.constant 0.000000e+00 : bf16
    %173 = vector.broadcast %cst_78 : bf16 to vector<96x8xbf16>
    %174 = vector.extract_strided_slice %172 {offsets = [0, 0], sizes = [96, 56], strides = [1, 1]} : vector<96x64xbf16> to vector<96x56xbf16>
    %175 = tpu.concatenate %173, %174 in 1 : vector<96x8xbf16>, vector<96x56xbf16> -> vector<96x64xbf16>
    %cst_79 = arith.constant 0.000000e+00 : bf16
    %176 = vector.broadcast %cst_79 : bf16 to vector<96x8xbf16>
    %177 = vector.extract_strided_slice %172 {offsets = [0, 8], sizes = [96, 56], strides = [1, 1]} : vector<96x64xbf16> to vector<96x56xbf16>
    %178 = tpu.concatenate %177, %176 in 1 : vector<96x56xbf16>, vector<96x8xbf16> -> vector<96x64xbf16>
    %179 = tpu.concatenate %175, %172, %178 in 0 : vector<96x64xbf16>, vector<96x64xbf16>, vector<96x64xbf16> -> vector<288x64xbf16>
    %c0_80 = arith.constant 0 : index
    %c0_81 = arith.constant 0 : index
    %180 = vector.load %arg12[%c0_80, %c0_81] : memref<32x288xbf16, #tpu.memory_space<vmem>>, vector<32x288xbf16>
    %cst_82 = arith.constant dense<0.000000e+00> : vector<32x64xf32>
    %181 = tpu.matmul %180, %179, %cst_82 {dimension_numbers = #tpu.dot_dimension_numbers<[1], [0], [0], [1], [0, 0, 1, 1], [], []>} : vector<32x288xbf16>, vector<288x64xbf16>, vector<32x64xf32> -> vector<32x64xf32>
    %c0_83 = arith.constant 0 : index
    %c0_84 = arith.constant 0 : index
    %182 = vector.load %arg13[%c0_83, %c0_84] : memref<32x1xf32, #tpu.memory_space<vmem>>, vector<32x1xf32>
    %183 = vector.broadcast %182 : vector<32x1xf32> to vector<32x64xf32>
    %184 = arith.addf %181, %183 : vector<32x64xf32>
    %185 = arith.truncf %184 : vector<32x64xf32> to vector<32x64xbf16>
    %c0_85 = arith.constant 0 : index
    %c0_86 = arith.constant 0 : index
    %c0_87 = arith.constant 0 : index
    %186 = vector.load %arg19[%c0_85, %c0_86, %c0_87] : memref<4x16x32xbf16, #tpu.memory_space<vmem>>, vector<1x16x32xbf16>
    %187 = vector.shape_cast %186 : vector<1x16x32xbf16> to vector<16x32xbf16>
    %cst_88 = arith.constant dense<0.000000e+00> : vector<16x64xf32>
    %188 = tpu.matmul %187, %185, %cst_88 {dimension_numbers = #tpu.dot_dimension_numbers<[1], [0], [0], [1], [0, 0, 1, 1], [], []>} : vector<16x32xbf16>, vector<32x64xbf16>, vector<16x64xf32> -> vector<16x64xf32>
    %189 = arith.truncf %188 : vector<16x64xf32> to vector<16x64xbf16>
    %c0_89 = arith.constant 0 : index
    %c0_90 = arith.constant 0 : index
    %c0_91 = arith.constant 0 : index
    %190 = vector.load %arg21[%c0_89, %c0_90, %c0_91] : memref<4x64x256xbf16, #tpu.memory_space<vmem>>, vector<1x64x256xbf16>
    %191 = vector.shape_cast %190 : vector<1x64x256xbf16> to vector<64x256xbf16>
    %cst_92 = arith.constant dense<0.000000e+00> : vector<16x256xf32>
    %192 = tpu.matmul %189, %191, %cst_92 {dimension_numbers = #tpu.dot_dimension_numbers<[1], [0], [0], [1], [0, 0, 1, 1], [], []>} : vector<16x64xbf16>, vector<64x256xbf16>, vector<16x256xf32> -> vector<16x256xf32>
    %c1_93 = arith.constant 1 : index
    %c0_94 = arith.constant 0 : index
    %c0_95 = arith.constant 0 : index
    %193 = vector.load %arg19[%c1_93, %c0_94, %c0_95] : memref<4x16x32xbf16, #tpu.memory_space<vmem>>, vector<1x16x32xbf16>
    %194 = vector.shape_cast %193 : vector<1x16x32xbf16> to vector<16x32xbf16>
    %cst_96 = arith.constant dense<0.000000e+00> : vector<16x64xf32>
    %195 = tpu.matmul %194, %185, %cst_96 {dimension_numbers = #tpu.dot_dimension_numbers<[1], [0], [0], [1], [0, 0, 1, 1], [], []>} : vector<16x32xbf16>, vector<32x64xbf16>, vector<16x64xf32> -> vector<16x64xf32>
    %196 = arith.truncf %195 : vector<16x64xf32> to vector<16x64xbf16>
    %c1_97 = arith.constant 1 : index
    %c0_98 = arith.constant 0 : index
    %c0_99 = arith.constant 0 : index
    %197 = vector.load %arg21[%c1_97, %c0_98, %c0_99] : memref<4x64x256xbf16, #tpu.memory_space<vmem>>, vector<1x64x256xbf16>
    %198 = vector.shape_cast %197 : vector<1x64x256xbf16> to vector<64x256xbf16>
    %cst_100 = arith.constant dense<0.000000e+00> : vector<16x256xf32>
    %199 = tpu.matmul %196, %198, %cst_100 {dimension_numbers = #tpu.dot_dimension_numbers<[1], [0], [0], [1], [0, 0, 1, 1], [], []>} : vector<16x64xbf16>, vector<64x256xbf16>, vector<16x256xf32> -> vector<16x256xf32>
    %200 = arith.addf %192, %199 : vector<16x256xf32>
    %c2 = arith.constant 2 : index
    %c0_101 = arith.constant 0 : index
    %c0_102 = arith.constant 0 : index
    %201 = vector.load %arg19[%c2, %c0_101, %c0_102] : memref<4x16x32xbf16, #tpu.memory_space<vmem>>, vector<1x16x32xbf16>
    %202 = vector.shape_cast %201 : vector<1x16x32xbf16> to vector<16x32xbf16>
    %cst_103 = arith.constant dense<0.000000e+00> : vector<16x64xf32>
    %203 = tpu.matmul %202, %185, %cst_103 {dimension_numbers = #tpu.dot_dimension_numbers<[1], [0], [0], [1], [0, 0, 1, 1], [], []>} : vector<16x32xbf16>, vector<32x64xbf16>, vector<16x64xf32> -> vector<16x64xf32>
    %204 = arith.truncf %203 : vector<16x64xf32> to vector<16x64xbf16>
    %c2_104 = arith.constant 2 : index
    %c0_105 = arith.constant 0 : index
    %c0_106 = arith.constant 0 : index
    %205 = vector.load %arg21[%c2_104, %c0_105, %c0_106] : memref<4x64x256xbf16, #tpu.memory_space<vmem>>, vector<1x64x256xbf16>
    %206 = vector.shape_cast %205 : vector<1x64x256xbf16> to vector<64x256xbf16>
    %cst_107 = arith.constant dense<0.000000e+00> : vector<16x256xf32>
    %207 = tpu.matmul %204, %206, %cst_107 {dimension_numbers = #tpu.dot_dimension_numbers<[1], [0], [0], [1], [0, 0, 1, 1], [], []>} : vector<16x64xbf16>, vector<64x256xbf16>, vector<16x256xf32> -> vector<16x256xf32>
    %208 = arith.addf %200, %207 : vector<16x256xf32>
    %c3 = arith.constant 3 : index
    %c0_108 = arith.constant 0 : index
    %c0_109 = arith.constant 0 : index
    %209 = vector.load %arg19[%c3, %c0_108, %c0_109] : memref<4x16x32xbf16, #tpu.memory_space<vmem>>, vector<1x16x32xbf16>
    %210 = vector.shape_cast %209 : vector<1x16x32xbf16> to vector<16x32xbf16>
    %cst_110 = arith.constant dense<0.000000e+00> : vector<16x64xf32>
    %211 = tpu.matmul %210, %185, %cst_110 {dimension_numbers = #tpu.dot_dimension_numbers<[1], [0], [0], [1], [0, 0, 1, 1], [], []>} : vector<16x32xbf16>, vector<32x64xbf16>, vector<16x64xf32> -> vector<16x64xf32>
    %212 = arith.truncf %211 : vector<16x64xf32> to vector<16x64xbf16>
    %c3_111 = arith.constant 3 : index
    %c0_112 = arith.constant 0 : index
    %c0_113 = arith.constant 0 : index
    %213 = vector.load %arg21[%c3_111, %c0_112, %c0_113] : memref<4x64x256xbf16, #tpu.memory_space<vmem>>, vector<1x64x256xbf16>
    %214 = vector.shape_cast %213 : vector<1x64x256xbf16> to vector<64x256xbf16>
    %cst_114 = arith.constant dense<0.000000e+00> : vector<16x256xf32>
    %215 = tpu.matmul %212, %214, %cst_114 {dimension_numbers = #tpu.dot_dimension_numbers<[1], [0], [0], [1], [0, 0, 1, 1], [], []>} : vector<16x64xbf16>, vector<64x256xbf16>, vector<16x256xf32> -> vector<16x256xf32>
    %216 = arith.addf %208, %215 : vector<16x256xf32>
    %c0_115 = arith.constant 0 : index
    %c0_116 = arith.constant 0 : index
    %217 = vector.load %arg20[%c0_115, %c0_116] : memref<16x1xf32, #tpu.memory_space<vmem>>, vector<16x1xf32>
    %218 = vector.broadcast %217 : vector<16x1xf32> to vector<16x256xf32>
    %219 = arith.addf %216, %218 : vector<16x256xf32>
    %220 = arith.truncf %219 : vector<16x256xf32> to vector<16x256xbf16>
    %221 = tpu.concatenate %220, %124 in 0 : vector<16x256xbf16>, vector<16x256xbf16> -> vector<32x256xbf16>
    %cst_117 = arith.constant 0.000000e+00 : bf16
    %222 = vector.broadcast %cst_117 : bf16 to vector<32x1xbf16>
    %223 = vector.extract_strided_slice %221 {offsets = [0, 0], sizes = [32, 255], strides = [1, 1]} : vector<32x256xbf16> to vector<32x255xbf16>
    %224 = tpu.concatenate %222, %223 in 1 : vector<32x1xbf16>, vector<32x255xbf16> -> vector<32x256xbf16>
    %225 = vector.broadcast %5 : vector<1x256xbf16> to vector<32x256xbf16>
    %226 = arith.mulf %224, %225 : vector<32x256xbf16>
    %cst_118 = arith.constant 0.000000e+00 : bf16
    %227 = vector.broadcast %cst_118 : bf16 to vector<32x1xbf16>
    %228 = vector.extract_strided_slice %221 {offsets = [0, 1], sizes = [32, 255], strides = [1, 1]} : vector<32x256xbf16> to vector<32x255xbf16>
    %229 = tpu.concatenate %228, %227 in 1 : vector<32x255xbf16>, vector<32x1xbf16> -> vector<32x256xbf16>
    %230 = vector.broadcast %7 : vector<1x256xbf16> to vector<32x256xbf16>
    %231 = arith.mulf %229, %230 : vector<32x256xbf16>
    %232 = tpu.concatenate %226, %221, %231 in 0 : vector<32x256xbf16>, vector<32x256xbf16>, vector<32x256xbf16> -> vector<96x256xbf16>
    %cst_119 = arith.constant 0.000000e+00 : bf16
    %233 = vector.broadcast %cst_119 : bf16 to vector<96x16xbf16>
    %234 = vector.extract_strided_slice %232 {offsets = [0, 0], sizes = [96, 240], strides = [1, 1]} : vector<96x256xbf16> to vector<96x240xbf16>
    %235 = tpu.concatenate %233, %234 in 1 : vector<96x16xbf16>, vector<96x240xbf16> -> vector<96x256xbf16>
    %cst_120 = arith.constant 0.000000e+00 : bf16
    %236 = vector.broadcast %cst_120 : bf16 to vector<96x16xbf16>
    %237 = vector.extract_strided_slice %232 {offsets = [0, 16], sizes = [96, 240], strides = [1, 1]} : vector<96x256xbf16> to vector<96x240xbf16>
    %238 = tpu.concatenate %237, %236 in 1 : vector<96x240xbf16>, vector<96x16xbf16> -> vector<96x256xbf16>
    %239 = tpu.concatenate %235, %232, %238 in 0 : vector<96x256xbf16>, vector<96x256xbf16>, vector<96x256xbf16> -> vector<288x256xbf16>
    %c0_121 = arith.constant 0 : index
    %c0_122 = arith.constant 0 : index
    %240 = vector.load %arg25[%c0_121, %c0_122] : memref<16x288xbf16, #tpu.memory_space<vmem>>, vector<16x288xbf16>
    %cst_123 = arith.constant dense<0.000000e+00> : vector<16x256xf32>
    %241 = tpu.matmul %240, %239, %cst_123 {dimension_numbers = #tpu.dot_dimension_numbers<[1], [0], [0], [1], [0, 0, 1, 1], [], []>} : vector<16x288xbf16>, vector<288x256xbf16>, vector<16x256xf32> -> vector<16x256xf32>
    %c0_124 = arith.constant 0 : index
    %c0_125 = arith.constant 0 : index
    %242 = vector.load %arg26[%c0_124, %c0_125] : memref<16x1xf32, #tpu.memory_space<vmem>>, vector<16x1xf32>
    %243 = vector.broadcast %242 : vector<16x1xf32> to vector<16x256xf32>
    %244 = arith.addf %241, %243 : vector<16x256xf32>
    %cst_126 = arith.constant 0.000000e+00 : f32
    %245 = vector.broadcast %cst_126 : f32 to vector<16x256xf32>
    %246 = arith.maximumf %244, %245 : vector<16x256xf32>
    %247 = arith.truncf %246 : vector<16x256xf32> to vector<16x256xbf16>
    %cst_127 = arith.constant 0.000000e+00 : bf16
    %248 = vector.broadcast %cst_127 : bf16 to vector<16x1xbf16>
    %249 = vector.extract_strided_slice %247 {offsets = [0, 0], sizes = [16, 255], strides = [1, 1]} : vector<16x256xbf16> to vector<16x255xbf16>
    %250 = tpu.concatenate %248, %249 in 1 : vector<16x1xbf16>, vector<16x255xbf16> -> vector<16x256xbf16>
    %251 = vector.broadcast %5 : vector<1x256xbf16> to vector<16x256xbf16>
    %252 = arith.mulf %250, %251 : vector<16x256xbf16>
    %cst_128 = arith.constant 0.000000e+00 : bf16
    %253 = vector.broadcast %cst_128 : bf16 to vector<16x1xbf16>
    %254 = vector.extract_strided_slice %247 {offsets = [0, 1], sizes = [16, 255], strides = [1, 1]} : vector<16x256xbf16> to vector<16x255xbf16>
    %255 = tpu.concatenate %254, %253 in 1 : vector<16x255xbf16>, vector<16x1xbf16> -> vector<16x256xbf16>
    %256 = vector.broadcast %7 : vector<1x256xbf16> to vector<16x256xbf16>
    %257 = arith.mulf %255, %256 : vector<16x256xbf16>
    %258 = tpu.concatenate %252, %247, %257 in 0 : vector<16x256xbf16>, vector<16x256xbf16>, vector<16x256xbf16> -> vector<48x256xbf16>
    %cst_129 = arith.constant 0.000000e+00 : bf16
    %259 = vector.broadcast %cst_129 : bf16 to vector<48x16xbf16>
    %260 = vector.extract_strided_slice %258 {offsets = [0, 0], sizes = [48, 240], strides = [1, 1]} : vector<48x256xbf16> to vector<48x240xbf16>
    %261 = tpu.concatenate %259, %260 in 1 : vector<48x16xbf16>, vector<48x240xbf16> -> vector<48x256xbf16>
    %cst_130 = arith.constant 0.000000e+00 : bf16
    %262 = vector.broadcast %cst_130 : bf16 to vector<48x16xbf16>
    %263 = vector.extract_strided_slice %258 {offsets = [0, 16], sizes = [48, 240], strides = [1, 1]} : vector<48x256xbf16> to vector<48x240xbf16>
    %264 = tpu.concatenate %263, %262 in 1 : vector<48x240xbf16>, vector<48x16xbf16> -> vector<48x256xbf16>
    %265 = tpu.concatenate %261, %258, %264 in 0 : vector<48x256xbf16>, vector<48x256xbf16>, vector<48x256xbf16> -> vector<144x256xbf16>
    %c0_131 = arith.constant 0 : index
    %c0_132 = arith.constant 0 : index
    %266 = vector.load %arg27[%c0_131, %c0_132] : memref<16x144xbf16, #tpu.memory_space<vmem>>, vector<16x144xbf16>
    %cst_133 = arith.constant dense<0.000000e+00> : vector<16x256xf32>
    %267 = tpu.matmul %266, %265, %cst_133 {dimension_numbers = #tpu.dot_dimension_numbers<[1], [0], [0], [1], [0, 0, 1, 1], [], []>} : vector<16x144xbf16>, vector<144x256xbf16>, vector<16x256xf32> -> vector<16x256xf32>
    %c0_134 = arith.constant 0 : index
    %c0_135 = arith.constant 0 : index
    %268 = vector.load %arg28[%c0_134, %c0_135] : memref<16x1xf32, #tpu.memory_space<vmem>>, vector<16x1xf32>
    %269 = vector.broadcast %268 : vector<16x1xf32> to vector<16x256xf32>
    %270 = arith.addf %267, %269 : vector<16x256xf32>
    %271 = arith.truncf %270 : vector<16x256xf32> to vector<16x256xbf16>
    %c0_136 = arith.constant 0 : index
    %c0_137 = arith.constant 0 : index
    %c0_138 = arith.constant 0 : index
    %272 = vector.load %arg22[%c0_136, %c0_137, %c0_138] : memref<4x8x16xbf16, #tpu.memory_space<vmem>>, vector<1x8x16xbf16>
    %273 = vector.shape_cast %272 : vector<1x8x16xbf16> to vector<8x16xbf16>
    %cst_139 = arith.constant dense<0.000000e+00> : vector<8x256xf32>
    %274 = tpu.matmul %273, %271, %cst_139 {dimension_numbers = #tpu.dot_dimension_numbers<[1], [0], [0], [1], [0, 0, 1, 1], [], []>} : vector<8x16xbf16>, vector<16x256xbf16>, vector<8x256xf32> -> vector<8x256xf32>
    %275 = arith.truncf %274 : vector<8x256xf32> to vector<8x256xbf16>
    %c0_140 = arith.constant 0 : index
    %c0_141 = arith.constant 0 : index
    %c0_142 = arith.constant 0 : index
    %276 = vector.load %arg24[%c0_140, %c0_141, %c0_142] : memref<4x256x1024xbf16, #tpu.memory_space<vmem>>, vector<1x256x1024xbf16>
    %277 = vector.shape_cast %276 : vector<1x256x1024xbf16> to vector<256x1024xbf16>
    %cst_143 = arith.constant dense<0.000000e+00> : vector<8x1024xf32>
    %278 = tpu.matmul %275, %277, %cst_143 {dimension_numbers = #tpu.dot_dimension_numbers<[1], [0], [0], [1], [0, 0, 1, 1], [], []>} : vector<8x256xbf16>, vector<256x1024xbf16>, vector<8x1024xf32> -> vector<8x1024xf32>
    %c1_144 = arith.constant 1 : index
    %c0_145 = arith.constant 0 : index
    %c0_146 = arith.constant 0 : index
    %279 = vector.load %arg22[%c1_144, %c0_145, %c0_146] : memref<4x8x16xbf16, #tpu.memory_space<vmem>>, vector<1x8x16xbf16>
    %280 = vector.shape_cast %279 : vector<1x8x16xbf16> to vector<8x16xbf16>
    %cst_147 = arith.constant dense<0.000000e+00> : vector<8x256xf32>
    %281 = tpu.matmul %280, %271, %cst_147 {dimension_numbers = #tpu.dot_dimension_numbers<[1], [0], [0], [1], [0, 0, 1, 1], [], []>} : vector<8x16xbf16>, vector<16x256xbf16>, vector<8x256xf32> -> vector<8x256xf32>
    %282 = arith.truncf %281 : vector<8x256xf32> to vector<8x256xbf16>
    %c1_148 = arith.constant 1 : index
    %c0_149 = arith.constant 0 : index
    %c0_150 = arith.constant 0 : index
    %283 = vector.load %arg24[%c1_148, %c0_149, %c0_150] : memref<4x256x1024xbf16, #tpu.memory_space<vmem>>, vector<1x256x1024xbf16>
    %284 = vector.shape_cast %283 : vector<1x256x1024xbf16> to vector<256x1024xbf16>
    %cst_151 = arith.constant dense<0.000000e+00> : vector<8x1024xf32>
    %285 = tpu.matmul %282, %284, %cst_151 {dimension_numbers = #tpu.dot_dimension_numbers<[1], [0], [0], [1], [0, 0, 1, 1], [], []>} : vector<8x256xbf16>, vector<256x1024xbf16>, vector<8x1024xf32> -> vector<8x1024xf32>
    %286 = arith.addf %278, %285 : vector<8x1024xf32>
    %c2_152 = arith.constant 2 : index
    %c0_153 = arith.constant 0 : index
    %c0_154 = arith.constant 0 : index
    %287 = vector.load %arg22[%c2_152, %c0_153, %c0_154] : memref<4x8x16xbf16, #tpu.memory_space<vmem>>, vector<1x8x16xbf16>
    %288 = vector.shape_cast %287 : vector<1x8x16xbf16> to vector<8x16xbf16>
    %cst_155 = arith.constant dense<0.000000e+00> : vector<8x256xf32>
    %289 = tpu.matmul %288, %271, %cst_155 {dimension_numbers = #tpu.dot_dimension_numbers<[1], [0], [0], [1], [0, 0, 1, 1], [], []>} : vector<8x16xbf16>, vector<16x256xbf16>, vector<8x256xf32> -> vector<8x256xf32>
    %290 = arith.truncf %289 : vector<8x256xf32> to vector<8x256xbf16>
    %c2_156 = arith.constant 2 : index
    %c0_157 = arith.constant 0 : index
    %c0_158 = arith.constant 0 : index
    %291 = vector.load %arg24[%c2_156, %c0_157, %c0_158] : memref<4x256x1024xbf16, #tpu.memory_space<vmem>>, vector<1x256x1024xbf16>
    %292 = vector.shape_cast %291 : vector<1x256x1024xbf16> to vector<256x1024xbf16>
    %cst_159 = arith.constant dense<0.000000e+00> : vector<8x1024xf32>
    %293 = tpu.matmul %290, %292, %cst_159 {dimension_numbers = #tpu.dot_dimension_numbers<[1], [0], [0], [1], [0, 0, 1, 1], [], []>} : vector<8x256xbf16>, vector<256x1024xbf16>, vector<8x1024xf32> -> vector<8x1024xf32>
    %294 = arith.addf %286, %293 : vector<8x1024xf32>
    %c3_160 = arith.constant 3 : index
    %c0_161 = arith.constant 0 : index
    %c0_162 = arith.constant 0 : index
    %295 = vector.load %arg22[%c3_160, %c0_161, %c0_162] : memref<4x8x16xbf16, #tpu.memory_space<vmem>>, vector<1x8x16xbf16>
    %296 = vector.shape_cast %295 : vector<1x8x16xbf16> to vector<8x16xbf16>
    %cst_163 = arith.constant dense<0.000000e+00> : vector<8x256xf32>
    %297 = tpu.matmul %296, %271, %cst_163 {dimension_numbers = #tpu.dot_dimension_numbers<[1], [0], [0], [1], [0, 0, 1, 1], [], []>} : vector<8x16xbf16>, vector<16x256xbf16>, vector<8x256xf32> -> vector<8x256xf32>
    %298 = arith.truncf %297 : vector<8x256xf32> to vector<8x256xbf16>
    %c3_164 = arith.constant 3 : index
    %c0_165 = arith.constant 0 : index
    %c0_166 = arith.constant 0 : index
    %299 = vector.load %arg24[%c3_164, %c0_165, %c0_166] : memref<4x256x1024xbf16, #tpu.memory_space<vmem>>, vector<1x256x1024xbf16>
    %300 = vector.shape_cast %299 : vector<1x256x1024xbf16> to vector<256x1024xbf16>
    %cst_167 = arith.constant dense<0.000000e+00> : vector<8x1024xf32>
    %301 = tpu.matmul %298, %300, %cst_167 {dimension_numbers = #tpu.dot_dimension_numbers<[1], [0], [0], [1], [0, 0, 1, 1], [], []>} : vector<8x256xbf16>, vector<256x1024xbf16>, vector<8x1024xf32> -> vector<8x1024xf32>
    %302 = arith.addf %294, %301 : vector<8x1024xf32>
    %c0_168 = arith.constant 0 : index
    %c0_169 = arith.constant 0 : index
    %303 = vector.load %arg23[%c0_168, %c0_169] : memref<8x1xf32, #tpu.memory_space<vmem>>, vector<8x1xf32>
    %304 = vector.broadcast %303 : vector<8x1xf32> to vector<8x1024xf32>
    %305 = arith.addf %302, %304 : vector<8x1024xf32>
    %306 = arith.truncf %305 : vector<8x1024xf32> to vector<8x1024xbf16>
    %307 = tpu.concatenate %306, %63 in 0 : vector<8x1024xbf16>, vector<8x1024xbf16> -> vector<16x1024xbf16>
    %cst_170 = arith.constant 0.000000e+00 : bf16
    %308 = vector.broadcast %cst_170 : bf16 to vector<16x1xbf16>
    %309 = vector.extract_strided_slice %307 {offsets = [0, 0], sizes = [16, 1023], strides = [1, 1]} : vector<16x1024xbf16> to vector<16x1023xbf16>
    %310 = tpu.concatenate %308, %309 in 1 : vector<16x1xbf16>, vector<16x1023xbf16> -> vector<16x1024xbf16>
    %311 = vector.broadcast %1 : vector<1x1024xbf16> to vector<16x1024xbf16>
    %312 = arith.mulf %310, %311 : vector<16x1024xbf16>
    %cst_171 = arith.constant 0.000000e+00 : bf16
    %313 = vector.broadcast %cst_171 : bf16 to vector<16x1xbf16>
    %314 = vector.extract_strided_slice %307 {offsets = [0, 1], sizes = [16, 1023], strides = [1, 1]} : vector<16x1024xbf16> to vector<16x1023xbf16>
    %315 = tpu.concatenate %314, %313 in 1 : vector<16x1023xbf16>, vector<16x1xbf16> -> vector<16x1024xbf16>
    %316 = vector.broadcast %3 : vector<1x1024xbf16> to vector<16x1024xbf16>
    %317 = arith.mulf %315, %316 : vector<16x1024xbf16>
    %318 = tpu.concatenate %312, %307, %317 in 0 : vector<16x1024xbf16>, vector<16x1024xbf16>, vector<16x1024xbf16> -> vector<48x1024xbf16>
    %cst_172 = arith.constant 0.000000e+00 : bf16
    %319 = vector.broadcast %cst_172 : bf16 to vector<48x32xbf16>
    %320 = vector.extract_strided_slice %318 {offsets = [0, 0], sizes = [48, 992], strides = [1, 1]} : vector<48x1024xbf16> to vector<48x992xbf16>
    %321 = tpu.concatenate %319, %320 in 1 : vector<48x32xbf16>, vector<48x992xbf16> -> vector<48x1024xbf16>
    %cst_173 = arith.constant 0.000000e+00 : bf16
    %322 = vector.broadcast %cst_173 : bf16 to vector<48x32xbf16>
    %323 = vector.extract_strided_slice %318 {offsets = [0, 32], sizes = [48, 992], strides = [1, 1]} : vector<48x1024xbf16> to vector<48x992xbf16>
    %324 = tpu.concatenate %323, %322 in 1 : vector<48x992xbf16>, vector<48x32xbf16> -> vector<48x1024xbf16>
    %325 = tpu.concatenate %321, %318, %324 in 0 : vector<48x1024xbf16>, vector<48x1024xbf16>, vector<48x1024xbf16> -> vector<144x1024xbf16>
    %c0_174 = arith.constant 0 : index
    %c0_175 = arith.constant 0 : index
    %326 = vector.load %arg29[%c0_174, %c0_175] : memref<8x144xbf16, #tpu.memory_space<vmem>>, vector<8x144xbf16>
    %cst_176 = arith.constant dense<0.000000e+00> : vector<8x1024xf32>
    %327 = tpu.matmul %326, %325, %cst_176 {dimension_numbers = #tpu.dot_dimension_numbers<[1], [0], [0], [1], [0, 0, 1, 1], [], []>} : vector<8x144xbf16>, vector<144x1024xbf16>, vector<8x1024xf32> -> vector<8x1024xf32>
    %c0_177 = arith.constant 0 : index
    %c0_178 = arith.constant 0 : index
    %328 = vector.load %arg30[%c0_177, %c0_178] : memref<8x1xf32, #tpu.memory_space<vmem>>, vector<8x1xf32>
    %329 = vector.broadcast %328 : vector<8x1xf32> to vector<8x1024xf32>
    %330 = arith.addf %327, %329 : vector<8x1024xf32>
    %cst_179 = arith.constant 0.000000e+00 : f32
    %331 = vector.broadcast %cst_179 : f32 to vector<8x1024xf32>
    %332 = arith.maximumf %330, %331 : vector<8x1024xf32>
    %333 = arith.truncf %332 : vector<8x1024xf32> to vector<8x1024xbf16>
    %cst_180 = arith.constant 0.000000e+00 : bf16
    %334 = vector.broadcast %cst_180 : bf16 to vector<8x1xbf16>
    %335 = vector.extract_strided_slice %333 {offsets = [0, 0], sizes = [8, 1023], strides = [1, 1]} : vector<8x1024xbf16> to vector<8x1023xbf16>
    %336 = tpu.concatenate %334, %335 in 1 : vector<8x1xbf16>, vector<8x1023xbf16> -> vector<8x1024xbf16>
    %337 = vector.broadcast %1 : vector<1x1024xbf16> to vector<8x1024xbf16>
    %338 = arith.mulf %336, %337 : vector<8x1024xbf16>
    %cst_181 = arith.constant 0.000000e+00 : bf16
    %339 = vector.broadcast %cst_181 : bf16 to vector<8x1xbf16>
    %340 = vector.extract_strided_slice %333 {offsets = [0, 1], sizes = [8, 1023], strides = [1, 1]} : vector<8x1024xbf16> to vector<8x1023xbf16>
    %341 = tpu.concatenate %340, %339 in 1 : vector<8x1023xbf16>, vector<8x1xbf16> -> vector<8x1024xbf16>
    %342 = vector.broadcast %3 : vector<1x1024xbf16> to vector<8x1024xbf16>
    %343 = arith.mulf %341, %342 : vector<8x1024xbf16>
    %344 = tpu.concatenate %338, %333, %343 in 0 : vector<8x1024xbf16>, vector<8x1024xbf16>, vector<8x1024xbf16> -> vector<24x1024xbf16>
    %cst_182 = arith.constant 0.000000e+00 : bf16
    %345 = vector.broadcast %cst_182 : bf16 to vector<24x32xbf16>
    %346 = vector.extract_strided_slice %344 {offsets = [0, 0], sizes = [24, 992], strides = [1, 1]} : vector<24x1024xbf16> to vector<24x992xbf16>
    %347 = tpu.concatenate %345, %346 in 1 : vector<24x32xbf16>, vector<24x992xbf16> -> vector<24x1024xbf16>
    %cst_183 = arith.constant 0.000000e+00 : bf16
    %348 = vector.broadcast %cst_183 : bf16 to vector<24x32xbf16>
    %349 = vector.extract_strided_slice %344 {offsets = [0, 32], sizes = [24, 992], strides = [1, 1]} : vector<24x1024xbf16> to vector<24x992xbf16>
    %350 = tpu.concatenate %349, %348 in 1 : vector<24x992xbf16>, vector<24x32xbf16> -> vector<24x1024xbf16>
    %351 = tpu.concatenate %347, %344, %350 in 0 : vector<24x1024xbf16>, vector<24x1024xbf16>, vector<24x1024xbf16> -> vector<72x1024xbf16>
    %c0_184 = arith.constant 0 : index
    %c0_185 = arith.constant 0 : index
    %352 = vector.load %arg31[%c0_184, %c0_185] : memref<8x72xbf16, #tpu.memory_space<vmem>>, vector<8x72xbf16>
    %cst_186 = arith.constant dense<0.000000e+00> : vector<8x1024xf32>
    %353 = tpu.matmul %352, %351, %cst_186 {dimension_numbers = #tpu.dot_dimension_numbers<[1], [0], [0], [1], [0, 0, 1, 1], [], []>} : vector<8x72xbf16>, vector<72x1024xbf16>, vector<8x1024xf32> -> vector<8x1024xf32>
    %c0_187 = arith.constant 0 : index
    %c0_188 = arith.constant 0 : index
    %354 = vector.load %arg32[%c0_187, %c0_188] : memref<8x1xf32, #tpu.memory_space<vmem>>, vector<8x1xf32>
    %355 = vector.broadcast %354 : vector<8x1xf32> to vector<8x1024xf32>
    %356 = arith.addf %353, %355 : vector<8x1024xf32>
    %357 = arith.truncf %356 : vector<8x1024xf32> to vector<8x1024xbf16>
    %c0_189 = arith.constant 0 : index
    %c0_190 = arith.constant 0 : index
    %358 = vector.load %arg33[%c0_189, %c0_190] : memref<3x8xbf16, #tpu.memory_space<vmem>>, vector<3x8xbf16>
    %cst_191 = arith.constant dense<0.000000e+00> : vector<3x1024xf32>
    %359 = tpu.matmul %358, %357, %cst_191 {dimension_numbers = #tpu.dot_dimension_numbers<[1], [0], [0], [1], [0, 0, 1, 1], [], []>} : vector<3x8xbf16>, vector<8x1024xbf16>, vector<3x1024xf32> -> vector<3x1024xf32>
    %c0_192 = arith.constant 0 : index
    %c0_193 = arith.constant 0 : index
    %360 = vector.load %arg34[%c0_192, %c0_193] : memref<3x1xf32, #tpu.memory_space<vmem>>, vector<3x1xf32>
    %361 = vector.broadcast %360 : vector<3x1xf32> to vector<3x1024xf32>
    %362 = arith.addf %359, %361 : vector<3x1024xf32>
    %c0_194 = arith.constant 0 : index
    %c0_195 = arith.constant 0 : index
    %c0_196 = arith.constant 0 : index
    %363 = vector.load %arg35[%c0_194, %c0_195, %c0_196] : memref<1x3x1024xf32, #tpu.memory_space<vmem>>, vector<1x3x1024xf32>
    %364 = vector.shape_cast %363 : vector<1x3x1024xf32> to vector<3x1024xf32>
    %365 = vector.shape_cast %362 : vector<3x1024xf32> to vector<1x3x1024xf32>
    tpu.vector_store %arg35[%c0_194, %c0_195, %c0_196], %365 {strides = array<i32>} : memref<1x3x1024xf32, #tpu.memory_space<vmem>>, vector<1x3x1024xf32>,
    return
  }
  func.func @transform_0(%arg0: i32) -> (i32, i32, i32) {
    %c0_i32 = arith.constant 0 : i32
    %c0_i32_0 = arith.constant 0 : i32
    %c0_i32_1 = arith.constant 0 : i32
    return %arg0, %c0_i32, %c0_i32_0 : i32, i32, i32
  }
  func.func @transform_1(%arg0: i32) -> (i32, i32) {
    %c0_i32 = arith.constant 0 : i32
    %c0_i32_0 = arith.constant 0 : i32
    %c0_i32_1 = arith.constant 0 : i32
    return %c0_i32, %c0_i32_0 : i32, i32
  }
  func.func @transform_2(%arg0: i32) -> (i32, i32) {
    %c0_i32 = arith.constant 0 : i32
    %c0_i32_0 = arith.constant 0 : i32
    %c0_i32_1 = arith.constant 0 : i32
    return %c0_i32, %c0_i32_0 : i32, i32
  }
  func.func @transform_3(%arg0: i32) -> (i32, i32) {
    %c0_i32 = arith.constant 0 : i32
    %c0_i32_0 = arith.constant 0 : i32
    %c0_i32_1 = arith.constant 0 : i32
    return %c0_i32, %c0_i32_0 : i32, i32
  }
  func.func @transform_4(%arg0: i32) -> (i32, i32) {
    %c0_i32 = arith.constant 0 : i32
    %c0_i32_0 = arith.constant 0 : i32
    %c0_i32_1 = arith.constant 0 : i32
    return %c0_i32, %c0_i32_0 : i32, i32
  }
  func.func @transform_5(%arg0: i32) -> (i32, i32) {
    %c0_i32 = arith.constant 0 : i32
    %c0_i32_0 = arith.constant 0 : i32
    %c0_i32_1 = arith.constant 0 : i32
    return %c0_i32, %c0_i32_0 : i32, i32
  }
  func.func @transform_6(%arg0: i32) -> (i32, i32) {
    %c0_i32 = arith.constant 0 : i32
    %c0_i32_0 = arith.constant 0 : i32
    %c0_i32_1 = arith.constant 0 : i32
    return %c0_i32, %c0_i32_0 : i32, i32
  }
  func.func @transform_7(%arg0: i32) -> (i32, i32) {
    %c0_i32 = arith.constant 0 : i32
    %c0_i32_0 = arith.constant 0 : i32
    %c0_i32_1 = arith.constant 0 : i32
    return %c0_i32, %c0_i32_0 : i32, i32
  }
  func.func @transform_8(%arg0: i32) -> (i32, i32) {
    %c0_i32 = arith.constant 0 : i32
    %c0_i32_0 = arith.constant 0 : i32
    %c0_i32_1 = arith.constant 0 : i32
    return %c0_i32, %c0_i32_0 : i32, i32
  }
  func.func @transform_9(%arg0: i32) -> (i32, i32) {
    %c0_i32 = arith.constant 0 : i32
    %c0_i32_0 = arith.constant 0 : i32
    %c0_i32_1 = arith.constant 0 : i32
    return %c0_i32, %c0_i32_0 : i32, i32
  }
  func.func @transform_10(%arg0: i32) -> (i32, i32) {
    %c0_i32 = arith.constant 0 : i32
    %c0_i32_0 = arith.constant 0 : i32
    %c0_i32_1 = arith.constant 0 : i32
    return %c0_i32, %c0_i32_0 : i32, i32
  }
  func.func @transform_11(%arg0: i32) -> (i32, i32) {
    %c0_i32 = arith.constant 0 : i32
    %c0_i32_0 = arith.constant 0 : i32
    %c0_i32_1 = arith.constant 0 : i32
    return %c0_i32, %c0_i32_0 : i32, i32
  }
  func.func @transform_12(%arg0: i32) -> (i32, i32) {
    %c0_i32 = arith.constant 0 : i32
    %c0_i32_0 = arith.constant 0 : i32
    %c0_i32_1 = arith.constant 0 : i32
    return %c0_i32, %c0_i32_0 : i32, i32
  }
  func.func @transform_13(%arg0: i32) -> (i32, i32, i32) {
    %c0_i32 = arith.constant 0 : i32
    %c0_i32_0 = arith.constant 0 : i32
    %c0_i32_1 = arith.constant 0 : i32
    %c0_i32_2 = arith.constant 0 : i32
    return %c0_i32, %c0_i32_0, %c0_i32_1 : i32, i32, i32
  }
  func.func @transform_14(%arg0: i32) -> (i32, i32, i32) {
    %c0_i32 = arith.constant 0 : i32
    %c0_i32_0 = arith.constant 0 : i32
    %c0_i32_1 = arith.constant 0 : i32
    %c0_i32_2 = arith.constant 0 : i32
    return %c0_i32, %c0_i32_0, %c0_i32_1 : i32, i32, i32
  }
  func.func @transform_15(%arg0: i32) -> (i32, i32, i32) {
    %c0_i32 = arith.constant 0 : i32
    %c0_i32_0 = arith.constant 0 : i32
    %c0_i32_1 = arith.constant 0 : i32
    %c0_i32_2 = arith.constant 0 : i32
    return %c0_i32, %c0_i32_0, %c0_i32_1 : i32, i32, i32
  }
  func.func @transform_16(%arg0: i32) -> (i32, i32) {
    %c0_i32 = arith.constant 0 : i32
    %c0_i32_0 = arith.constant 0 : i32
    %c0_i32_1 = arith.constant 0 : i32
    return %c0_i32, %c0_i32_0 : i32, i32
  }
  func.func @transform_17(%arg0: i32) -> (i32, i32) {
    %c0_i32 = arith.constant 0 : i32
    %c0_i32_0 = arith.constant 0 : i32
    %c0_i32_1 = arith.constant 0 : i32
    return %c0_i32, %c0_i32_0 : i32, i32
  }
  func.func @transform_18(%arg0: i32) -> (i32, i32, i32) {
    %c0_i32 = arith.constant 0 : i32
    %c0_i32_0 = arith.constant 0 : i32
    %c0_i32_1 = arith.constant 0 : i32
    %c0_i32_2 = arith.constant 0 : i32
    return %c0_i32, %c0_i32_0, %c0_i32_1 : i32, i32, i32
  }
  func.func @transform_19(%arg0: i32) -> (i32, i32) {
    %c0_i32 = arith.constant 0 : i32
    %c0_i32_0 = arith.constant 0 : i32
    %c0_i32_1 = arith.constant 0 : i32
    return %c0_i32, %c0_i32_0 : i32, i32
  }
  func.func @transform_20(%arg0: i32) -> (i32, i32, i32) {
    %c0_i32 = arith.constant 0 : i32
    %c0_i32_0 = arith.constant 0 : i32
    %c0_i32_1 = arith.constant 0 : i32
    %c0_i32_2 = arith.constant 0 : i32
    return %c0_i32, %c0_i32_0, %c0_i32_1 : i32, i32, i32
  }
  func.func @transform_21(%arg0: i32) -> (i32, i32, i32) {
    %c0_i32 = arith.constant 0 : i32
    %c0_i32_0 = arith.constant 0 : i32
    %c0_i32_1 = arith.constant 0 : i32
    %c0_i32_2 = arith.constant 0 : i32
    return %c0_i32, %c0_i32_0, %c0_i32_1 : i32, i32, i32
  }
  func.func @transform_22(%arg0: i32) -> (i32, i32) {
    %c0_i32 = arith.constant 0 : i32
    %c0_i32_0 = arith.constant 0 : i32
    %c0_i32_1 = arith.constant 0 : i32
    return %c0_i32, %c0_i32_0 : i32, i32
  }
  func.func @transform_23(%arg0: i32) -> (i32, i32, i32) {
    %c0_i32 = arith.constant 0 : i32
    %c0_i32_0 = arith.constant 0 : i32
    %c0_i32_1 = arith.constant 0 : i32
    %c0_i32_2 = arith.constant 0 : i32
    return %c0_i32, %c0_i32_0, %c0_i32_1 : i32, i32, i32
  }
  func.func @transform_24(%arg0: i32) -> (i32, i32) {
    %c0_i32 = arith.constant 0 : i32
    %c0_i32_0 = arith.constant 0 : i32
    %c0_i32_1 = arith.constant 0 : i32
    return %c0_i32, %c0_i32_0 : i32, i32
  }
  func.func @transform_25(%arg0: i32) -> (i32, i32) {
    %c0_i32 = arith.constant 0 : i32
    %c0_i32_0 = arith.constant 0 : i32
    %c0_i32_1 = arith.constant 0 : i32
    return %c0_i32, %c0_i32_0 : i32, i32
  }
  func.func @transform_26(%arg0: i32) -> (i32, i32) {
    %c0_i32 = arith.constant 0 : i32
    %c0_i32_0 = arith.constant 0 : i32
    %c0_i32_1 = arith.constant 0 : i32
    return %c0_i32, %c0_i32_0 : i32, i32
  }
  func.func @transform_27(%arg0: i32) -> (i32, i32) {
    %c0_i32 = arith.constant 0 : i32
    %c0_i32_0 = arith.constant 0 : i32
    %c0_i32_1 = arith.constant 0 : i32
    return %c0_i32, %c0_i32_0 : i32, i32
  }
  func.func @transform_28(%arg0: i32) -> (i32, i32) {
    %c0_i32 = arith.constant 0 : i32
    %c0_i32_0 = arith.constant 0 : i32
    %c0_i32_1 = arith.constant 0 : i32
    return %c0_i32, %c0_i32_0 : i32, i32
  }
  func.func @transform_29(%arg0: i32) -> (i32, i32) {
    %c0_i32 = arith.constant 0 : i32
    %c0_i32_0 = arith.constant 0 : i32
    %c0_i32_1 = arith.constant 0 : i32
    return %c0_i32, %c0_i32_0 : i32, i32
  }
  func.func @transform_30(%arg0: i32) -> (i32, i32) {
    %c0_i32 = arith.constant 0 : i32
    %c0_i32_0 = arith.constant 0 : i32
    %c0_i32_1 = arith.constant 0 : i32
    return %c0_i32, %c0_i32_0 : i32, i32
  }
  func.func @transform_31(%arg0: i32) -> (i32, i32) {
    %c0_i32 = arith.constant 0 : i32
    %c0_i32_0 = arith.constant 0 : i32
    %c0_i32_1 = arith.constant 0 : i32
    return %c0_i32, %c0_i32_0 : i32, i32
  }
  func.func @transform_32(%arg0: i32) -> (i32, i32) {
    %c0_i32 = arith.constant 0 : i32
    %c0_i32_0 = arith.constant 0 : i32
    %c0_i32_1 = arith.constant 0 : i32
    return %c0_i32, %c0_i32_0 : i32, i32
  }
  func.func @transform_33(%arg0: i32) -> (i32, i32) {
    %c0_i32 = arith.constant 0 : i32
    %c0_i32_0 = arith.constant 0 : i32
    %c0_i32_1 = arith.constant 0 : i32
    return %c0_i32, %c0_i32_0 : i32, i32
  }
  func.func @transform_34(%arg0: i32) -> (i32, i32, i32) {
    %c0_i32 = arith.constant 0 : i32
    %c0_i32_0 = arith.constant 0 : i32
    %c0_i32_1 = arith.constant 0 : i32
    return %arg0, %c0_i32, %c0_i32_0 : i32, i32, i32
  }
}

</mosaic_0001>

<bundles_post_ra>
// kernel: unet_forward.1
= control target key start
LH: loop header
LB: loop body
LE: loop exit
PB: predicated region body
PF: predicated region fallthrough
CT: control target
= control target key end

     0   :  { %s15271_s6 = smov 1   ;;  %s15272_s10 = smov 2   ;;  %s19286_s0 = inlined_call_operand.smem [shape: u32[35], index: -1, kind: input, shape index: {}] }
   0x1   :  { %s15322_s5 = sld [smem:[%s19286_s0]]   ;;  %s15273_s14 = smov 3  }
   0x2   :  { %s15327_s9 = sld [smem:[%s19286_s0 + %s15271_s6]]   ;;  %s15274_s18 = smov 4  }
   0x3   :  { %s15332_s13 = sld [smem:[%s19286_s0 + %s15272_s10]]   ;;  %s15275_s22 = smov 5  }
   0x4   :  { %s15337_s17 = sld [smem:[%s19286_s0 + %s15273_s14]]   ;;  %s15276_s26 = smov 6  }
   0x5   :  { %s15342_s21 = sld [smem:[%s19286_s0 + %s15274_s18]]   ;;  %s15277_s30 = smov 7  }
   0x6   :  { %s15347_s25 = sld [smem:[%s19286_s0 + %s15275_s22]]   ;;  %s15278_s4 = smov 8  }
   0x7   :  { %19330 = sst [smem:[#allocation2_spill]] %s15322_s5  ;;  %s15279_s10 = smov 9  }
   0x8   :  { %s15352_s29 = sld [smem:[%s19286_s0 + %s15276_s26]]   ;;  %s15280_s15 = smov 10  }
   0x9   :  { %s15357_s3 = sld [smem:[%s19286_s0 + %s15277_s30]]   ;;  %s15281_s20 = smov 11  }
   0xa   :  { %s15362_s8 = sld [smem:[%s19286_s0 + %s15278_s4]]   ;;  %s15282_s26 = smov 12  }
   0xb   :  { %s15367_s14 = sld [smem:[%s19286_s0 + %s15279_s10]]   ;;  %s15283_s1 = smov 13  }
   0xc   :  { %s15372_s19 = sld [smem:[%s19286_s0 + %s15280_s15]]   ;;  %s15284_s7 = smov 14  }
   0xd   :  { %s15377_s24 = sld [smem:[%s19286_s0 + %s15281_s20]]   ;;  %s15285_s15 = smov 15  }
   0xe   :  { %s15382_s30 = sld [smem:[%s19286_s0 + %s15282_s26]]   ;;  %s15286_s22 = smov 16  }
   0xf   :  { %19331 = sst [smem:[#allocation3_spill]] %s15357_s3  ;;  %s15287_s28 = smov 17  }
  0x10   :  { %s15387_s6 = sld [smem:[%s19286_s0 + %s15283_s1]]  }
  0x11   :  { %19332 = sst [smem:[#allocation4_spill]] %s15367_s14 }
  0x12   :  { %19333 = sst [smem:[#allocation5_spill]] %s15372_s19 }
  0x13   :  { %19334 = sst [smem:[#allocation6_spill]] %s15377_s24 }
  0x14   :  { %19335 = sst [smem:[#allocation7_spill]] %s15382_s30 }
  0x15   :  { %s15392_s12 = sld [smem:[%s19286_s0 + %s15284_s7]]   ;;  %s15288_s7 = smov 18  }
  0x16   :  { %s15397_s20 = sld [smem:[%s19286_s0 + %s15285_s15]]   ;;  %s15289_s15 = smov 19  }
  0x17   :  { %s15402_s27 = sld [smem:[%s19286_s0 + %s15286_s22]]   ;;  %s15290_s22 = smov 20  }
  0x18   :  { %s15407_s4 = sld [smem:[%s19286_s0 + %s15287_s28]]   ;;  %s15291_s28 = smov 21  }
  0x19   :  { %s15412_s24 = sld [smem:[%s19286_s0 + %s15288_s7]]   ;;  %s15292_s7 = smov 22  }
  0x1a   :  { %s15417_s30 = sld [smem:[%s19286_s0 + %s15289_s15]]   ;;  %s15293_s15 = smov 23  }
  0x1b   :  { %s15422_s14 = sld [smem:[%s19286_s0 + %s15290_s22]]   ;;  %s15294_s22 = smov 24  }
  0x1c   :  { %s15427_s19 = sld [smem:[%s19286_s0 + %s15291_s28]]   ;;  %s15295_s28 = smov 25  }
  0x1e   :  { %19336 = sst [smem:[#allocation8_spill]] %s15407_s4 }
  0x1f   :  { %19337 = sst [smem:[#allocation9_spill]] %s15412_s24 }
  0x20   :  { %19338 = sst [smem:[#allocation10_spill]] %s15417_s30 }
  0x21   :  { %19339 = sst [smem:[#allocation11_spill]] %s15422_s14 }
  0x22   :  { %19340 = sst [smem:[#allocation12_spill]] %s15427_s19 }
  0x23   :  { %s15432_s24 = sld [smem:[%s19286_s0 + %s15292_s7]]   ;;  %s15296_s7 = smov 26  }
  0x24   :  { %s15437_s30 = sld [smem:[%s19286_s0 + %s15293_s15]]   ;;  %s15297_s15 = smov 27  }
  0x25   :  { %s15442_s14 = sld [smem:[%s19286_s0 + %s15294_s22]]   ;;  %s15298_s22 = smov 28  }
  0x26   :  { %s15447_s19 = sld [smem:[%s19286_s0 + %s15295_s28]]   ;;  %s15299_s28 = smov 29  }
  0x29   :  { %19341 = sst [smem:[#allocation13_spill]] %s15432_s24 }
  0x2a   :  { %19342 = sst [smem:[#allocation14_spill]] %s15437_s30 }
  0x2b   :  { %19343 = sst [smem:[#allocation15_spill]] %s15442_s14 }
  0x2c   :  { %19344 = sst [smem:[#allocation16_spill]] %s15447_s19 }
  0x2d   :  { %s15452_s24 = sld [smem:[%s19286_s0 + %s15296_s7]]   ;;  %s15300_s7 = smov 30  }
  0x2e   :  { %s15457_s30 = sld [smem:[%s19286_s0 + %s15297_s15]]   ;;  %s15301_s15 = smov 31  }
  0x2f   :  { %s15462_s14 = sld [smem:[%s19286_s0 + %s15298_s22]]   ;;  %s15302_s22 = smov 32  }
  0x30   :  { %s15467_s19 = sld [smem:[%s19286_s0 + %s15299_s28]]   ;;  %s15303_s28 = smov 33  }
  0x33   :  { %19345 = sst [smem:[#allocation17_spill]] %s15452_s24 }
  0x34   :  { %19346 = sst [smem:[#allocation18_spill]] %s15457_s30 }
  0x35   :  { %19347 = sst [smem:[#allocation19_spill]] %s15462_s14 }
  0x36   :  { %19348 = sst [smem:[#allocation20_spill]] %s15467_s19 }
  0x37   :  { %s15472_s24 = sld [smem:[%s19286_s0 + %s15300_s7]]   ;;  %s15304_s7 = smov 34  }
  0x38   :  { %s15477_s30 = sld [smem:[%s19286_s0 + %s15301_s15]]   ;;  %s15494_s15 = smov 0  }
  0x39   :  { %s15482_s14 = sld [smem:[%s19286_s0 + %s15302_s22]]  }
  0x3a   :  { %s15487_s19 = sld [smem:[%s19286_s0 + %s15303_s28]]  }
  0x3d   :  { %19349 = sst [smem:[#allocation21_spill]] %s15472_s24 }
  0x3e   :  { %s15492_s24 = sld [smem:[%s19286_s0 + %s15304_s7]]  }
  0x3f LB: > { %s19350_s4 = sld [smem:[#allocation8_spill]]  ;;  %s11098_s16 = sadd.s32 4294967295, %s15269_s15   ;;  %s15269_s15 = sphi %s15494_s15, %s79_s15  }
  0x40   : > { %s19351_s3 = sld [smem:[#allocation3_spill]]  ;;  %p11102_p0 = scmp.ge.s32.totalorder %s15269_s15, 1 }
  0x41   : > { %p947_p1 = scmp.lt.s32.totalorder %s15269_s15, 3 }
  0x43   : > { %p948_p2 = pnand %p11102_p0, %p947_p1 }
  0x45   : > { %951 = sbr.rel (%p948_p2) target bundleno = 6837 (0x1ab5), region = 156 }
  0x4a   : > { %p1033_p3 = scmp.lt.s32.totalorder %s11098_s16, 1  ;;  %s19352_s5 = sld [smem:[#allocation2_spill]]  ;;  %v15557_v20 = vld [vmem:[%s15387_s6] sm:$0xff]  ;;  %v15561_v21 = vld [vmem:[%s15387_s6 + $0x8] sm:$0xff]  ;;  %vm1191_vm0 = vcmask 1039360   ;;  %vm1093_vm1 = vcmask 7168  }
  0x4b   : > { %s19312_s22 = smov 127   ;;  %s19319_s23 = smov 1   ;;  %1114 = vst [vmem:[#allocation1] ss:$9 sm:$0xff] %v15557_v20  ;;  %v15583_v48 = vld [vmem:[%s15392_s12] sm:$0x3] }
  0x4c   : > { %s19404_s16 = smov (!%p1033_p3, %s11098_s16), 1  ;;  %s19303_s26 = smov 96   ;;  %vm1312_vm2 = vcmask 1043456   ;;  %vm1437_vm3 = vcmask 785408   ;;  %vm1377_vm4 = vcmask 261120   ;;  %vm1536_vm5 = vcmask 588800  }
  0x4d   : > { %s19300_s0 = sshll.u32 %s19404_s16, 5  ;;  %s19301_s28 = smov 32   ;;  %vm15881_vm6 = vmneg %vm1377_vm4  ;;  %vm3441_vm7 = vcmask 916480   ;;  %vm3423_vm8 = vcmask 130048   ;;  %vm3998_vm10 = vcmask 515072   ;;  %vm4048_vm11 = vcmask 457728  }
  0x4e   : > { %s19316_s1 = smov 112   ;;  %s19314_s2 = smov 16   ;;  %vm16712_vm9 = vmneg %vm3423_vm8  ;;  %vm4032_vm12 = vcmask 64512   ;;  %vm4531_vm14 = vcmask 523264  }
  0x4f   : > { %s15312_s7 = smov 120   ;;  %s19367_s10 = sld [smem:[#allocation5_spill]]  ;;  %vm16881_vm13 = vmneg %vm4032_vm12 }
  0x50   : > { %s1037_s18 = scalar_lea.vmem %s19352_s5, %s19300_s0  ;;  %s15313_s11 = smov 8  }
  0x51   : > { %v1055_v0 = vld [vmem:[%s1037_s18 + $0x10] sm:$0xff]  ;;  %v1054_v1 = vld [vmem:[%s1037_s18 + $0x8] sm:$0xff]  ;;  %v1056_v2 = vld [vmem:[%s1037_s18 + $0x18] sm:$0xff]  ;;  %s19371_s0 = sld [smem:[#allocation7_spill]] }
  0x52   : > { %v1065_v3 = vunpack.c.l.b16 %v1055_v0  ;;  %v1063_v4 = vunpack.c.l.b16 %v1054_v1  ;;  %v1067_v5 = vunpack.c.l.b16 %v1056_v2  ;;  %v1053_v9 = vld [vmem:[%s1037_s18] sm:$0xff]  ;;  %v1066_v10 = vunpack.c.h.b16 %v1055_v0  ;;  %v15565_v23 = vld [vmem:[#allocation1 + $0x9] sm:$0xff]  ;;  %v1117_v24 = vld [vmem:[#allocation1 + $0x12] sm:$0xff]  ;;  %s19368_s18 = sld [smem:[#allocation4_spill]] }
  0x53   : > { %v1064_v11 = vunpack.c.h.b16 %v1054_v1  ;;  %v1062_v12 = vunpack.c.h.b16 %v1053_v9  ;;  %v1061_v16 = vunpack.c.l.b16 %v1053_v9  ;;  %v1068_v18 = vunpack.c.h.b16 %v1056_v2  ;;  %v15563_v22 = vld [vmem:[#allocation1] sm:$0xff]  ;;  %v15569_v27 = vld [vmem:[#allocation1 + $0x2d] sm:$0xff]  ;;  %v15571_v28 = vld [vmem:[#allocation1 + $0x36] sm:$0xff]  ;;  %s19390_s5 = sld [smem:[#allocation19_spill]] }
  0x54   : > { %v15508_v6 = vpack.c.b16 %v1065_v3, %v1065_v3  ;;  %v15510_v7 = vpack.c.b16 %v1063_v4, %v1063_v4  ;;  %v15512_v8 = vpack.c.b16 %v1067_v5, %v1067_v5  ;;  %v15520_v13 = vpack.c.b16 %v1066_v10, %v1066_v10  ;;  %v1118_v25 = vld [vmem:[#allocation1 + $0x1b] sm:$0xff]  ;;  %v15567_v26 = vld [vmem:[#allocation1 + $0x24] sm:$0xff] }
  0x55   : > { %v15522_v14 = vpack.c.b16 %v1064_v11, %v1064_v11  ;;  %v15524_v15 = vpack.c.b16 %v1062_v12, %v1062_v12  ;;  %v15538_v17 = vpack.c.b16 %v1061_v16, %v1061_v16  ;;  %v15546_v19 = vpack.c.b16 %v1068_v18, %v1068_v18  ;;  %v15573_v29 = vld [vmem:[#allocation1 + $0x3f] sm:$0xff] }
  0x56   : > { %1183 = vrot.lane.b32.xlu1 %v15508_v6, %s19312_s22  ;;  %1179 = vrot.lane.b32.xlu0 %v15510_v7, %s19312_s22  ;;  %1211 = vst [vmem:[#allocation1] ss:$9 sm:$0xff] %v15561_v21  ;;  %v1129_v52 = vpack.i.b16 %v1117_v24, %v1117_v24  ;;  %v1132_v53 = vpack.i.b16 %v1118_v25, %v1118_v25 }
  0x57   : > { %1187 = vrot.lane.b32.xlu2 %v15512_v8, %s19312_s22  ;;  %v1135_v18 = vpack.i.b16 %v15567_v26, %v15567_v26 }
  0x58   : > { %v1131_v4 = vperm.slane %v1129_v52, 0  ;;  %v1134_v5 = vperm.slane %v1132_v53, 0 }
  0x5d   : > { %v1216_v31 = vld [vmem:[#allocation1 + $0x24] sm:$0xff]  ;;  %v1217_v33 = vld [vmem:[#allocation1 + $0x2d] sm:$0xff]  ;;  %v1215_v35 = vld [vmem:[#allocation1 + $0x1b] sm:$0xff] }
  0x5e   : > { %1185 = vrot.lane.b32.xlu1 %v15520_v13, %s19312_s22  ;;  %1181 = vrot.lane.b32.xlu0 %v15522_v14, %s19312_s22  ;;  %v1214_v34 = vld [vmem:[#allocation1 + $0x12] sm:$0xff]  ;;  %v1232_v38 = vpack.i.b16 %v1216_v31, %v1216_v31  ;;  %v1235_v39 = vpack.i.b16 %v1217_v33, %v1217_v33  ;;  %v1229_v41 = vpack.i.b16 %v1215_v35, %v1215_v35  ;;  %v1213_v46 = vld [vmem:[#allocation1 + $0x9] sm:$0xff]  ;;  %v1212_v47 = vld [vmem:[#allocation1] sm:$0xff]  ;;  %v15614_v31 = vunpack.c.l.bf16 %v1131_v4 }
  0x5f   : > { %1079 = vrot.lane.b32.xlu2 %v15524_v15, %s19319_s23  ;;  %v1226_v40 = vpack.i.b16 %v1214_v34, %v1214_v34  ;;  %v15585_v49 = vld [vmem:[#allocation1 + $0x36] sm:$0xff]  ;;  %v15587_v50 = vld [vmem:[#allocation1 + $0x3f] sm:$0xff]  ;;  %v1223_v16 = vpack.i.b16 %v1213_v46, %v1213_v46  ;;  %v15616_v33 = vunpack.c.l.bf16 %v1134_v5  ;;  %v1138_v34 = vpack.i.b16 %v15569_v27, %v15569_v27 }
  0x60   : > { %v1234_v42 = vperm.slane %v1232_v38, 0  ;;  %v1237_v43 = vperm.slane %v1235_v39, 0  ;;  %v1231_v45 = vperm.slane %v1229_v41, 0  ;;  %3355 = vst [vmem:[#allocation1] ss:$9 sm:$0xff] %v15583_v48  ;;  %v1220_v41 = vpack.i.b16 %v1212_v47, %v1212_v47 }
  0x61   : > { %v1228_v44 = vperm.slane %v1226_v40, 0  ;;  %v1123_v47 = vpack.i.b16 %v15563_v22, %v15563_v22  ;;  %v1126_v22 = vpack.i.b16 %v15565_v23, %v15565_v23 }
  0x62   : > { %v15592_v54 = vunpack.c.l.bf16 %v1234_v42  ;;  %v15594_v55 = vunpack.c.l.bf16 %v1237_v43  ;;  %v15598_v58 = vunpack.c.l.bf16 %v1231_v45  ;;  %v1225_v42 = vperm.slane %v1223_v16, 0 }
  0x63   : > { %v15596_v57 = vunpack.c.l.bf16 %v1228_v44  ;;  %v1137_v45 = vperm.slane %v1135_v18, 0  ;;  %v1125_v5 = vperm.slane %v1123_v47, 0  ;;  %v1128_v18 = vperm.slane %v1126_v22, 0 }
  0x64   : > { %19353 = vst [vmem:[#allocation22_spill] sm:$0xff] %v15592_v54 }
  0x65   : > { %19354 = vst [vmem:[#allocation23_spill] sm:$0xff] %v15594_v55  ;;  %v15650_v4 = vunpack.c.l.bf16 %v1137_v45  ;;  %v15675_v45 = vunpack.c.l.bf16 %v1128_v18 }
  0x66   : > { %1083 = vrot.lane.b32.xlu1 %v15522_v14, %s19319_s23  ;;  %1081 = vrot.lane.b32.xlu0 %v15510_v7, %s19319_s23  ;;  %19355 = vst [vmem:[#allocation24_spill] sm:$0xff] %v15596_v57 }
  0x67   : > { %1085 = vrot.lane.b32.xlu2 %v15508_v6, %s19319_s23  ;;  %19356 = vst [vmem:[#allocation25_spill] sm:$0xff] %v15598_v58 }
  0x68   : > { %19357 = vst [vmem:[#allocation26_spill] sm:$0xff] %v15650_v4 }
  0x6e   : > { %1087 = vrot.lane.b32.xlu0 %v15520_v13, %s19319_s23  ;;  %1175 = vrot.lane.b32.xlu1 %v15538_v17, %s19312_s22 }
  0x6f   : > { %1177 = vrot.lane.b32.xlu2 %v15524_v15, %s19312_s22 }
  0x76   : > { %1077 = vrot.lane.b32.xlu0 %v15538_v17, %s19319_s23  ;;  %1189 = vrot.lane.b32.xlu1 %v15546_v19, %s19312_s22 }
  0x77   : > { %1089 = vrot.lane.b32.xlu2 %v15512_v8, %s19319_s23 }
  0x7e   : > { %1091 = vrot.lane.b32.xlu0 %v15546_v19, %s19319_s23 }
  0xb1   : > { %v15576_v30 = vpop.permute.xlu2 %1187 }
  0xb9   : > { %v15578_v32 = vpop.permute.xlu2 %1079 }
  0xc1   : > { %v15589_v51 = vpop.permute.xlu2 %1085 }
  0xc8   : > { %v1184_v36 = vpop.permute.xlu1 %1183  ;;  %v15580_v37 = vpop.permute.xlu0 %1179 }
  0xc9   : > { %v1178_v43 = vpop.permute.xlu2 %1177 }
  0xd0   : > { %v1186_v56 = vpop.permute.xlu1 %1185  ;;  %v1182_v59 = vpop.permute.xlu0 %1181 }
  0xd1   : > { %v1196_v60 = vsel %vm1191_vm0, %v1184_v36, %v1186_v56  ;;  %v1197_v61 = vsel %vm1191_vm0, %v1186_v56, %v15576_v30  ;;  %v1194_v62 = vsel %vm1191_vm0, %v15580_v37, %v1182_v59  ;;  %v1195_v63 = vsel %vm1191_vm0, %v1182_v59, %v1184_v36 }
  0xd2   : > { %v1248_v0 = vunpack.c.l.bf16 %v1196_v60  ;;  %v1249_v1 = vunpack.c.l.bf16 %v1197_v61  ;;  %v1246_v2 = vunpack.c.l.bf16 %v1194_v62  ;;  %v1247_v3 = vunpack.c.l.bf16 %v1195_v63 }
  0xd3   : > { %v1140_v59 = vperm.slane %v1138_v34, 0  ;;  %v1193_v60 = vsel %vm1191_vm0, %v1178_v43, %v15580_v37  ;;  %v1222_v63 = vperm.slane %v1220_v41, 0  ;;  %v1238_v37 = vpack.i.b16 %v15585_v49, %v15585_v49 }
  0xd4   : > { %v1264_v9 = vmul.f32 %v15592_v54, %v1248_v0  ;;  %v1265_v10 = vmul.f32 %v15594_v55, %v1249_v1  ;;  %v1262_v11 = vmul.f32 %v15596_v57, %v1246_v2  ;;  %v1263_v12 = vmul.f32 %v15598_v58, %v1247_v3 }
  0xd5   : > { %v1241_v1 = vpack.i.b16 %v15587_v50, %v15587_v50  ;;  %v15648_v2 = vunpack.c.l.bf16 %v1225_v42  ;;  %v1245_v3 = vunpack.c.l.bf16 %v1193_v60  ;;  %v1144_v41 = vpack.i.b16 %v15573_v29, %v15573_v29 }
  0xd6   : > { %v1269_v24 = vpack.c.bf16 %v1263_v12, %v1262_v11  ;;  %v15612_v25 = vpack.c.bf16 %v1265_v10, %v1264_v9  ;;  %v15652_v9 = vunpack.c.l.bf16 %v1140_v59  ;;  %v15654_v11 = vunpack.c.l.bf16 %v1222_v63 }
  0xd7   : > { %v1243_v34 = vperm.slane %v1241_v1, 0 }
  0xd8   : > { %v1084_v35 = vpop.permute.xlu1 %1083  ;;  %v1082_v36 = vpop.permute.xlu0 %1081  ;;  %v1299_v38 = vunpack.c.h.b16 %v1269_v24  ;;  %v1300_v39 = vunpack.c.l.b16 %v15612_v25  ;;  %v1298_v40 = vunpack.c.l.b16 %v1269_v24  ;;  %19358 = vst [vmem:[#allocation27_spill] sm:$0xff] %v15652_v9  ;;  %v1240_v24 = vperm.slane %v1238_v37, 0 }
  0xd9   : > { %v1095_v26 = vsel %vm1093_vm1, %v15578_v32, %v1082_v36  ;;  %v1096_v44 = vsel %vm1093_vm1, %v1082_v36, %v1084_v35  ;;  %v1141_v36 = vpack.i.b16 %v15571_v28, %v15571_v28  ;;  %v15685_v59 = vunpack.c.l.bf16 %v1243_v34 }
  0xda   : > { %v1149_v46 = vunpack.c.l.bf16 %v1095_v26  ;;  %v1150_v52 = vunpack.c.l.bf16 %v1096_v44  ;;  %v15624_v53 = vpack.c.b16 %v1299_v38, %v1299_v38  ;;  %v15626_v27 = vpack.c.b16 %v1300_v39, %v1300_v39 }
  0xdb   : > { %v15628_v56 = vpack.c.b16 %v1298_v40, %v1298_v40  ;;  %v1261_v39 = vmul.f32 %v15648_v2, %v1245_v3  ;;  %v15660_v40 = vunpack.c.l.bf16 %v1125_v5  ;;  %19360 = vst [vmem:[#allocation29_spill] sm:$0xff] %v15685_v59 }
  0xdc   : > { %v1165_v61 = vmul.f32 %v15614_v31, %v1149_v46  ;;  %v1166_v62 = vmul.f32 %v15616_v33, %v1150_v52  ;;  %1427 = vrot.lane.b32.xlu2 %v15624_v53, %s19303_s26  ;;  %1429 = vrot.lane.b32.xlu0 %v15626_v27, %s19303_s26  ;;  %v15683_v52 = vunpack.c.l.bf16 %v1240_v24 }
  0xdd   : > { %1425 = vrot.lane.b32.xlu1 %v15628_v56, %s19303_s26  ;;  %v1478_v3 = vrot.slane %v15628_v56, 4 }
  0xde   : > { %v1172_v0 = vpack.c.bf16 %v1166_v62, %v1165_v61  ;;  %19359 = vst [vmem:[#allocation28_spill] sm:$0xff] %v15683_v52  ;;  %v1090_v61 = vpop.permute.xlu2 %1089  ;;  %v1146_v62 = vperm.slane %v1144_v41, 0 }
  0xe0   : > { %v1088_v10 = vpop.permute.xlu0 %1087  ;;  %v1176_v12 = vpop.permute.xlu1 %1175  ;;  %v1279_v23 = vunpack.c.h.b16 %v1172_v0  ;;  %v1278_v16 = vunpack.c.l.b16 %v1172_v0 }
  0xe1   : > { %v1192_v49 = vsel %vm1191_vm0, %v1176_v12, %v1178_v43  ;;  %v1097_v43 = vsel %vm1093_vm1, %v1084_v35, %v15589_v51  ;;  %v1098_v26 = vsel %vm1093_vm1, %v15589_v51, %v1088_v10  ;;  %v1480_v51 = vrot.slane %v15624_v53, 4 }
  0xe2   : > { %v1244_v50 = vunpack.c.l.bf16 %v1192_v49  ;;  %v1287_v38 = vpack.c.b16 %v1279_v23, %v1279_v23  ;;  %v1286_v42 = vpack.c.b16 %v1278_v16, %v1278_v16  ;;  %v1151_v47 = vunpack.c.l.bf16 %v1097_v43 }
  0xe3   : > { %v1152_v60 = vunpack.c.l.bf16 %v1098_v26 }
  0xe4   : > { %v1260_v44 = vmul.f32 %v15654_v11, %v1244_v50  ;;  %v15671_v28 = vsel %vm1312_vm2, %v1287_v38, %v15522_v14  ;;  %1365 = vrot.lane.b32.xlu0 %v15628_v56, %s19301_s28  ;;  %v15680_v35 = vsel %vm1312_vm2, %v1286_v42, %v15510_v7  ;;  %v1143_v14 = vperm.slane %v1141_v36, 0 }
  0xe5   : > { %v1469_v29 = vrot.slane %v15671_v28, 4  ;;  %v1468_v1 = vrot.slane %v15680_v35, 4  ;;  %v1168_v34 = vmul.f32 %v15652_v9, %v1152_v60  ;;  %v1099_v56 = vsel %vm1093_vm1, %v1088_v10, %v1090_v61 }
  0xe6   : > { %v1268_v46 = vpack.c.bf16 %v1261_v39, %v1260_v44  ;;  %v1167_v42 = vmul.f32 %v15650_v4, %v1151_v47  ;;  %v15714_v26 = vunpack.c.l.bf16 %v1143_v14  ;;  %v1153_v44 = vunpack.c.l.bf16 %v1099_v56 }
  0xe7   : > { %v15690_v63 = vsel %vm1312_vm2, %v1469_v29, %v1480_v51  ;;  %v15712_v43 = vsel %vm1312_vm2, %v1468_v1, %v1478_v3  ;;  %v15716_v60 = vunpack.c.l.bf16 %v1146_v62 }
  0xe8   : > { %v1078_v22 = vpop.permute.xlu0 %1077  ;;  %v1190_v7 = vpop.permute.xlu1 %1189  ;;  %v1297_v37 = vunpack.c.h.b16 %v1268_v46  ;;  %v1296_v0 = vunpack.c.l.b16 %v1268_v46  ;;  %19361 = vst [vmem:[#allocation30_spill] sm:$0xff] %v15714_v26  ;;  %v1173_v46 = vpack.c.bf16 %v1168_v34, %v1167_v42 }
  0xe9   : > { %v1094_v5 = vsel %vm1093_vm1, %v1078_v22, %v15578_v32  ;;  %v1111_v12 = vsel %vm1093_vm1, 0, %v1078_v22  ;;  %v1198_v23 = vsel %vm1191_vm0, %v15576_v30, %v1190_v7  ;;  %v1208_v16 = vsel %vm1191_vm0, %v1190_v7, 0  ;;  %19362 = vst [vmem:[#allocation31_spill] sm:$0xff] %v15716_v60 }
  0xea   : > { %v1147_v49 = vunpack.c.l.bf16 %v1111_v12  ;;  %v1148_v18 = vunpack.c.l.bf16 %v1094_v5  ;;  %v1250_v24 = vunpack.c.l.bf16 %v1198_v23  ;;  %v1251_v50 = vunpack.c.l.bf16 %v1208_v16 }
  0xeb   : > { %v1305_v36 = vpack.c.b16 %v1297_v37, %v1297_v37  ;;  %v1304_v38 = vpack.c.b16 %v1296_v0, %v1296_v0  ;;  %v1169_v5 = vmul.f32 %v15714_v26, %v1153_v44  ;;  %v1280_v16 = vunpack.c.l.b16 %v1173_v46 }
  0xec   : > { %v1163_v39 = vmul.f32 %v15660_v40, %v1147_v49  ;;  %v1164_v32 = vmul.f32 %v15675_v45, %v1148_v18  ;;  %v1266_v41 = vmul.f32 %v15683_v52, %v1250_v24  ;;  %v1267_v30 = vmul.f32 %v15685_v59, %v1251_v50 }
  0xed   : > { %1423 = vrot.lane.b32.xlu2 %v1305_v36, %s19303_s26  ;;  %1421 = vrot.lane.b32.xlu1 %v1304_v38, %s19303_s26  ;;  %v1474_v50 = vrot.slane %v1304_v38, 4 }
  0xee   : > { %v1171_v10 = vpack.c.bf16 %v1164_v32, %v1163_v39  ;;  %v1271_v51 = vpack.c.bf16 %v1267_v30, %v1266_v41  ;;  %v1476_v39 = vrot.slane %v1305_v36, 4  ;;  %v1288_v32 = vpack.c.b16 %v1280_v16, %v1280_v16 }
  0xf0   : > { %v1092_v22 = vpop.permute.xlu0 %1091  ;;  %v1303_v7 = vunpack.c.h.b16 %v1271_v51  ;;  %v1276_v47 = vunpack.c.l.b16 %v1171_v10  ;;  %v1277_v37 = vunpack.c.h.b16 %v1171_v10  ;;  %v15747_v44 = vsel %vm1312_vm2, %v1288_v32, %v15508_v6 }
  0xf1   : > { %v1100_v0 = vsel %vm1093_vm1, %v1090_v61, %v1092_v22  ;;  %v1302_v61 = vunpack.c.l.b16 %v1271_v51 }
  0xf2   : > { %v1154_v12 = vunpack.c.l.bf16 %v1100_v0  ;;  %v1311_v23 = vpack.c.b16 %v1303_v7, %v1303_v7  ;;  %v1284_v3 = vpack.c.b16 %v1276_v47, %v1276_v47  ;;  %v1285_v49 = vpack.c.b16 %v1277_v37, %v1277_v37 }
  0xf3   : > { %v1301_v37 = vunpack.c.h.b16 %v15612_v25  ;;  %v1281_v25 = vunpack.c.h.b16 %v1173_v46 }
  0xf4   : > { %v1170_v14 = vmul.f32 %v15716_v60, %v1154_v12  ;;  %1435 = vrot.lane.b32.xlu0 %v1311_v23, %s19303_s26  ;;  %v15724_v62 = vsel %vm1312_vm2, %v1284_v3, %v15538_v17  ;;  %v15732_v24 = vsel %vm1312_vm2, %v1285_v49, %v15524_v15  ;;  %v1310_v15 = vpack.c.b16 %v1302_v61, %v1302_v61 }
  0xf5   : > { %1363 = vrot.lane.b32.xlu2 %v1305_v36, %s19301_s28  ;;  %1367 = vrot.lane.b32.xlu1 %v15624_v53, %s19301_s28  ;;  %v1466_v18 = vrot.slane %v15724_v62, 4  ;;  %v1467_v56 = vrot.slane %v15732_v24, 4  ;;  %v1488_v7 = vrot.slane %v1311_v23, 4  ;;  %v1289_v0 = vpack.c.b16 %v1281_v25, %v1281_v25 }
  0xf6   : > { %v1174_v34 = vpack.c.bf16 %v1170_v14, %v1169_v5  ;;  %v1486_v47 = vrot.slane %v1310_v15, 4 }
  0xf7   : > { %v15738_v17 = vsel %vm1312_vm2, %v1466_v18, %v1474_v50  ;;  %v15743_v30 = vsel %vm1312_vm2, %v1467_v56, %v1476_v39  ;;  %v15800_v5 = vsel %vm1312_vm2, %v1289_v0, %v15520_v13 }
  0xf8   : > { %v1283_v41 = vunpack.c.h.b16 %v1174_v34  ;;  %v1282_v53 = vunpack.c.l.b16 %v1174_v34 }
  0xfa   : > { %v1291_v42 = vpack.c.b16 %v1283_v41, %v1283_v41  ;;  %v1290_v10 = vpack.c.b16 %v1282_v53, %v1282_v53 }
  0xfc   : > { %1413 = vrot.lane.b32.xlu0 %v15747_v44, %s19303_s26  ;;  %v15753_v36 = vsel %vm1312_vm2, %v1291_v42, %v15546_v19  ;;  %v15757_v51 = vsel %vm1312_vm2, %v1290_v10, %v15512_v8 }
  0xfd   : > { %1361 = vrot.lane.b32.xlu1 %v1304_v38, %s19301_s28  ;;  %1433 = vrot.lane.b32.xlu2 %v1310_v15, %s19303_s26  ;;  %v1473_v22 = vrot.slane %v15753_v36, 4  ;;  %v1472_v6 = vrot.slane %v15757_v51, 4  ;;  %v15774_v38 = vpack.c.b16 %v1301_v37, %v1301_v37 }
  0xff   : > { %v15767_v19 = vsel %vm1312_vm2, %v1473_v22, %v1488_v7  ;;  %v15772_v8 = vsel %vm1312_vm2, %v1472_v6, %v1486_v47 }
 0x104   : > { %1405 = vrot.lane.b32.xlu0 %v15724_v62, %s19303_s26 }
 0x105   : > { %1431 = vrot.lane.b32.xlu1 %v15774_v38, %s19303_s26  ;;  %1411 = vrot.lane.b32.xlu2 %v15671_v28, %s19303_s26 }
 0x10c   : > { %1375 = vrot.lane.b32.xlu0 %v1311_v23, %s19301_s28 }
 0x10d   : > { %1409 = vrot.lane.b32.xlu1 %v15680_v35, %s19303_s26  ;;  %1373 = vrot.lane.b32.xlu2 %v1310_v15, %s19301_s28 }
 0x114   : > { %1351 = vrot.lane.b32.xlu0 %v15671_v28, %s19301_s28 }
 0x115   : > { %1407 = vrot.lane.b32.xlu1 %v15732_v24, %s19303_s26  ;;  %1349 = vrot.lane.b32.xlu2 %v15680_v35, %s19301_s28 }
 0x11c   : > { %1419 = vrot.lane.b32.xlu0 %v15753_v36, %s19303_s26 }
 0x11d   : > { %1347 = vrot.lane.b32.xlu1 %v15732_v24, %s19301_s28  ;;  %1417 = vrot.lane.b32.xlu2 %v15757_v51, %s19303_s26 }
 0x124   : > { %1415 = vrot.lane.b32.xlu0 %v15800_v5, %s19303_s26 }
 0x125   : > { %1371 = vrot.lane.b32.xlu1 %v15774_v38, %s19301_s28  ;;  %1345 = vrot.lane.b32.xlu2 %v15724_v62, %s19301_s28 }
 0x12c   : > { %1359 = vrot.lane.b32.xlu0 %v15753_v36, %s19301_s28  ;;  %v1482_v36 = vrot.slane %v15626_v27, 4 }
 0x12d   : > { %1355 = vrot.lane.b32.xlu1 %v15800_v5, %s19301_s28  ;;  %1357 = vrot.lane.b32.xlu2 %v15757_v51, %s19301_s28 }
 0x135   : > { %1369 = vrot.lane.b32.xlu1 %v15626_v27, %s19301_s28  ;;  %1353 = vrot.lane.b32.xlu2 %v15747_v44, %s19301_s28 }
 0x136   : > { %v1428_v13 = vpop.permute.xlu2 %1427 }
 0x147   : > { %v1424_v46 = vpop.permute.xlu2 %1423 }
 0x14e   : > { %v15818_v12 = vpop.permute.xlu0 %1429 }
 0x14f   : > { %v1426_v23 = vpop.permute.xlu1 %1425  ;;  %v1448_v3 = vsel %vm1437_vm3, %v1428_v13, %v15818_v12  ;;  %v1364_v34 = vpop.permute.xlu2 %1363 }
 0x150   : > { %v1446_v16 = vsel %vm1437_vm3, %v1424_v46, %v1426_v23  ;;  %v1447_v49 = vsel %vm1437_vm3, %v1426_v23, %v1428_v13  ;;  %v1550_v14 = vsel %vm1312_vm2, %v1448_v3, 0 }
 0x151   : > { %v1544_v61 = vsel %vm1312_vm2, %v1446_v16, 0  ;;  %v1547_v50 = vsel %vm1312_vm2, %v1447_v49, 0  ;;  %1605 = vmatpush.bf16.msra.mxu3 %v1550_v14 }
 0x152   : > { %1579 = vmatpush.bf16.msra.mxu1 %v1544_v61  ;;  %1592 = vmatpush.bf16.msra.mxu2 %v1547_v50  ;;  %v1530_v50 = vld [vmem:[%s15332_s13] sm:$0xff] }
 0x156   : > { %v1366_v39 = vpop.permute.xlu0 %1365 }
 0x157   : > { %v15829_v15 = vpop.permute.xlu2 %1433  ;;  %v1386_v28 = vsel %vm1377_vm4, %v1364_v34, %v1366_v39 }
 0x15f   : > { %v1422_v32 = vpop.permute.xlu1 %1421  ;;  %v1412_v7 = vpop.permute.xlu2 %1411 }
 0x160   : > { %v1445_v41 = vsel %vm1437_vm3, %v1422_v32, %v1424_v46 }
 0x161   : > { %v1541_v53 = vsel %vm1312_vm2, %v1445_v41, 0 }
 0x162   : > { %1566 = vmatpush.bf16.msra.mxu0 %v1541_v53 }
 0x166   : > { %v1436_v42 = vpop.permute.xlu0 %1435 }
 0x167   : > { %v15831_v10 = vpop.permute.xlu1 %1367  ;;  %v15840_v13 = vpop.permute.xlu2 %1373 }
 0x168   : > { %v1387_v0 = vsel %vm1377_vm4, %v1366_v39, %v15831_v10 }
 0x169   : > { %v1511_v3 = vsel %vm1312_vm2, %v1387_v0, %v1469_v29  ;;  %v1464_v29 = vsel %vm1437_vm3, %v1436_v42, 0  ;;  %v15857_v0 = vld [vmem:[%s15327_s9] sm:$0xf] }
 0x16a   : > { %v1561_v39 = vsel %vm1312_vm2, %v1464_v29, 0 }
 0x16e   : > { %v15833_v47 = vpop.permute.xlu0 %1413 }
 0x16f   : > { %v1362_v37 = vpop.permute.xlu1 %1361  ;;  %v1441_v25 = vsel %vm1437_vm3, %v1412_v7, %v15833_v47  ;;  %v1350_v14 = vpop.permute.xlu2 %1349 }
 0x170   : > { %1606 = vmatpush.bf16.msra.mxu3 %v1441_v25 }
 0x174   : > { %1607 = vmatpush.bf16.msra.mxu3 %v15690_v63  ;;  %v15309_v63 = vmov 0  }
 0x175   : > { %15260 = vset.pattern.permute.xlu0 %v15309_v63  ;;  %15261 = vset.pattern.permute.xlu2 %v15309_v63 }
 0x176   : > { %v1406_v46 = vpop.permute.xlu0 %1405  ;;  %15262 = vset.pattern.permute.xlu1 %v15309_v63  ;;  %1533 = vperm.xlu0 %15260, %v1530_v50   ;;  %v1451_v63 = vsel %vm1437_vm3, %v15829_v15, %v1436_v42 }
 0x177   : > { %v1432_v23 = vpop.permute.xlu1 %1431 }
 0x178   : > { %1608 = vmatpush.bf16.msra.mxu3 %v1511_v3  ;;  %v1418_v3 = vpop.permute.xlu2 %1417  ;;  %v1449_v62 = vsel %vm1437_vm3, %v15818_v12, %v1432_v23 }
 0x179   : > { %v1553_v12 = vsel %vm1312_vm2, %v1449_v62, 0 }
 0x17e   : > { %v1376_v16 = vpop.permute.xlu0 %1375 }
 0x17f   : > { %v1410_v49 = vpop.permute.xlu1 %1409  ;;  %v1391_v24 = vsel %vm1377_vm4, %v15840_v13, %v1376_v16 }
 0x180   : > { %v1440_v61 = vsel %vm1437_vm3, %v1410_v49, %v1412_v7 }
 0x181   : > { %1593 = vmatpush.bf16.msra.mxu2 %v1440_v61 }
 0x185   : > { %1594 = vmatpush.bf16.msra.mxu2 %v15712_v43  ;;  %v1507_v43 = vsel %vm1312_vm2, %v1386_v28, %v1468_v1 }
 0x186   : > { %v15848_v32 = vpop.permute.xlu0 %1351 }
 0x187   : > { %v1408_v41 = vpop.permute.xlu1 %1407  ;;  %v1380_v53 = vsel %vm1377_vm4, %v1350_v14, %v15848_v32 }
 0x188   : > { %v1438_v7 = vsel %vm1437_vm3, %v1406_v46, %v1408_v41  ;;  %v1439_v25 = vsel %vm1437_vm3, %v1408_v41, %v1410_v49  ;;  %1609 = vmatpush.bf16.msra.mxu3 %v1380_v53  ;;  %v1404_v46 = vsel %vm1377_vm4, 0, %v1362_v37  ;;  %v1385_v49 = vsel %vm1377_vm4, %v1362_v37, %v1364_v34 }
 0x189   : > { %1567 = vmatpush.bf16.msra.mxu0 %v1438_v7  ;;  %1580 = vmatpush.bf16.msra.mxu1 %v1439_v25  ;;  %v1499_v50 = vsel %vm1312_vm2, %v1404_v46, %v1466_v18  ;;  %v1559_v34 = vsel %vm1312_vm2, %v1451_v63, 0  ;;  %v1450_v18 = vsel %vm1437_vm3, %v1432_v23, %v15829_v15  ;;  %v1470_v41 = vrot.slane %v15747_v44, 4 }
 0x18a   : > { %1595 = vmatpush.bf16.msra.mxu2 %v1507_v43  ;;  %v1556_v15 = vsel %vm1312_vm2, %v1450_v18, 0  ;;  %v1471_v53 = vrot.slane %v15800_v5, 4 }
 0x18b   : > { %11115 = vmatmul.msk.bf16.vlgmr.msra.gmra.mxu3 %vm1536_vm5, %v15857_v0  ;;  %v1483_v7 = vsel %vm1312_vm2, %v1470_v41, %v1482_v36 }
 0x18c   : > { %1657 = vmatpush.bf16.msrb.mxu3 %v1561_v39 }
 0x18d   : > { %1568 = vmatpush.bf16.msra.mxu0 %v15738_v17  ;;  %1581 = vmatpush.bf16.msra.mxu1 %v15743_v30  ;;  %v1503_v17 = vsel %vm1312_vm2, %v1385_v49, %v1467_v56  ;;  %v1346_v56 = vpop.permute.xlu2 %1345 }
 0x18e   : > { %v1420_v61 = vpop.permute.xlu0 %1419 }
 0x18f   : > { %v1348_v35 = vpop.permute.xlu1 %1347  ;;  %v1461_v1 = vsel %vm1437_vm3, %v1420_v61, 0  ;;  %v1444_v23 = vsel %vm1437_vm3, %v1418_v3, %v1420_v61 }
 0x190   : > { %v1379_v30 = vsel %vm1377_vm4, %v1348_v35, %v1350_v14  ;;  %1658 = vmatpush.bf16.msrb.mxu3 %v1461_v1  ;;  %v1378_v42 = vsel %vm1377_vm4, %v1346_v56, %v1348_v35  ;;  %v1527_v14 = vsel %vm1312_vm2, %v1391_v24, %v1473_v22 }
 0x191   : > { %1569 = vmatpush.bf16.msra.mxu0 %v1499_v50  ;;  %1582 = vmatpush.bf16.msra.mxu1 %v1503_v17 }
 0x192   : > { %1596 = vmatpush.bf16.msra.mxu2 %v1379_v30 }
 0x194   : > { %1659 = vmatpush.bf16.msrb.mxu3 %v15767_v19 }
 0x195   : > { %11114 = vmatmul.msk.bf16.vlgmr.msra.gmra.mxu2 %vm1536_vm5, %v15857_v0  ;;  %11111 = vmatpush.bf16.msk.msra.mxu0 %vm15881_vm6, %v1346_v56  ;;  %v1358_v25 = vpop.permute.xlu2 %1357 }
 0x196   : > { %1644 = vmatpush.bf16.msrb.mxu2 %v1559_v34  ;;  %1583 = vmatpush.bf16.msra.mxu1 %v1378_v42  ;;  %v1416_v16 = vpop.permute.xlu0 %1415 }
 0x197   : > { %v1372_v19 = vpop.permute.xlu1 %1371  ;;  %v1442_v28 = vsel %vm1437_vm3, %v15833_v47, %v1416_v16  ;;  %v1443_v29 = vsel %vm1437_vm3, %v1416_v16, %v1418_v3  ;;  %v1484_v47 = vrot.slane %v15774_v38, 4 }
 0x198   : > { %11112 = vmatmul.msk.bf16.vlgmr.msra.gmra.mxu0 %vm1536_vm5, %v15857_v0  ;;  %1660 = vmatpush.bf16.msrb.mxu3 %v1527_v14  ;;  %v1390_v22 = vsel %vm1377_vm4, %v1372_v19, %v15840_v13 }
 0x199   : > { %1618 = vmatpush.bf16.msrb.mxu0 %v1553_v12  ;;  %11113 = vmatmul.msk.bf16.vlgmr.msra.gmra.mxu1 %vm1536_vm5, %v15857_v0  ;;  %v1485_v44 = vsel %vm1312_vm2, %v1471_v53, %v1484_v47  ;;  %v1523_v5 = vsel %vm1312_vm2, %v1390_v22, %v1472_v6 }
 0x19a   : > { %1631 = vmatpush.bf16.msrb.mxu1 %v1556_v15  ;;  %1645 = vmatpush.bf16.msrb.mxu2 %v1444_v23 }
 0x19d   : > { %1619 = vmatpush.bf16.msrb.mxu0 %v1442_v28  ;;  %v1354_v46 = vpop.permute.xlu2 %1353 }
 0x19e   : > { %1632 = vmatpush.bf16.msrb.mxu1 %v1443_v29  ;;  %1646 = vmatpush.bf16.msrb.mxu2 %v15772_v8  ;;  %v1360_v43 = vpop.permute.xlu0 %1359  ;;  %v1381_v49 = vsel %vm1377_vm4, %v15848_v32, %v1354_v46 }
 0x19f   : > { %v1356_v8 = vpop.permute.xlu1 %1355  ;;  %v1384_v27 = vsel %vm1377_vm4, %v1358_v25, %v1360_v43 }
 0x1a0   : > { %1661 = vmatpush.bf16.msrb.mxu3 %v1384_v27  ;;  %v1383_v13 = vsel %vm1377_vm4, %v1356_v8, %v1358_v25  ;;  %v1382_v61 = vsel %vm1377_vm4, %v1354_v46, %v1356_v8 }
 0x1a1   : > { %1620 = vmatpush.bf16.msrb.mxu0 %v1483_v7 }
 0x1a2   : > { %1633 = vmatpush.bf16.msrb.mxu1 %v1485_v44  ;;  %1647 = vmatpush.bf16.msrb.mxu2 %v1523_v5 }
 0x1a3   : > { %11119 = vmatmul.msk.bf16.vlgmr.msrb.gmra.mxu3 %vm1536_vm5, %v15857_v0 }
 0x1a6   : > { %1648 = vmatpush.bf16.msrb.mxu2 %v1383_v13 }
 0x1a7   : > { %v1370_v38 = vpop.permute.xlu1 %1369 }
 0x1a8   : > { %v1388_v51 = vsel %vm1377_vm4, %v15831_v10, %v1370_v38  ;;  %v1389_v6 = vsel %vm1377_vm4, %v1370_v38, %v1372_v19 }
 0x1a9   : > { %11118 = vmatmul.msk.bf16.vlgmr.msrb.gmra.mxu2 %vm1536_vm5, %v15857_v0  ;;  %v1515_v39 = vsel %vm1312_vm2, %v1388_v51, %v1470_v41  ;;  %v1519_v3 = vsel %vm1312_vm2, %v1389_v6, %v1471_v53 }
 0x1aa   : > { %1621 = vmatpush.bf16.msrb.mxu0 %v1515_v39  ;;  %1634 = vmatpush.bf16.msrb.mxu1 %v1519_v3 }
 0x1ae   : > { %1622 = vmatpush.bf16.msrb.mxu0 %v1381_v49  ;;  %1635 = vmatpush.bf16.msrb.mxu1 %v1382_v61 }
 0x1b1   : > { %11116 = vmatmul.msk.bf16.vlgmr.msrb.gmra.mxu0 %vm1536_vm5, %v15857_v0  ;;  %11117 = vmatmul.msk.bf16.vlgmr.msrb.gmra.mxu1 %vm1536_vm5, %v15857_v0 }
 0x1e8   : > { %v1534_v35 = vpop.permute.xlu0 %1533 }
 0x20e   : > { %v1611_v10 = vpop.f32.mrf.mxu3 }
 0x20f   : > { %v1612_v18 = vadd.f32 %v1611_v10, %v1534_v35 }
 0x211   : > { %v1670_v12 = vmax.f32 %v1612_v18, 0.0 }
 0x215   : > { %v1572_v1 = vpop.f32.mrf.mxu0 }
 0x216   : > { %v1573_v63 = vadd.f32 %v1572_v1, %v1534_v35  ;;  %v1585_v50 = vpop.f32.mrf.mxu1  ;;  %v1613_v17 = vpop.f32.mrf.mxu3 }
 0x217   : > { %v1586_v30 = vadd.f32 %v1585_v50, %v1534_v35 }
 0x218   : > { %v1667_v34 = vmax.f32 %v1573_v63, 0.0  ;;  %v1598_v62 = vpop.f32.mrf.mxu2 }
 0x219   : > { %v1668_v32 = vmax.f32 %v1586_v30, 0.0  ;;  %v1599_v24 = vadd.f32 %v1598_v62, %v1534_v35 }
 0x21b   : > { %v1675_v56 = vpack.c.bf16 %v1668_v32, %v1667_v34  ;;  %v1669_v42 = vmax.f32 %v1599_v24, 0.0 }
 0x21d   : > { %v1574_v15 = vpop.f32.mrf.mxu0  ;;  %v1684_v23 = vunpack.c.h.b16 %v1675_v56  ;;  %v1683_v16 = vunpack.c.l.b16 %v1675_v56  ;;  %v1676_v0 = vpack.c.bf16 %v1670_v12, %v1669_v42 }
 0x21e   : > { %v1587_v19 = vpop.f32.mrf.mxu1 }
 0x21f   : > { %v15940_v14 = vpack.c.b16 %v1684_v23, %v1684_v23  ;;  %v15942_v28 = vpack.c.b16 %v1683_v16, %v1683_v16  ;;  %v1686_v41 = vunpack.c.h.b16 %v1676_v0  ;;  %v1685_v44 = vunpack.c.l.b16 %v1676_v0 }
 0x220   : > { %v1600_v29 = vpop.f32.mrf.mxu2 }
 0x221   : > { %1701 = vrot.lane.b32.xlu1 %v15940_v14, %s19319_s23  ;;  %1699 = vrot.lane.b32.xlu2 %v15942_v28, %s19319_s23  ;;  %v15950_v22 = vpack.c.b16 %v1686_v41, %v1686_v41  ;;  %v15958_v51 = vpack.c.b16 %v1685_v44, %v1685_v44 }
 0x222   : > { %1752 = vrot.lane.b32.xlu0 %v15942_v28, %s19312_s22 }
 0x226   : > { %v1663_v53 = vpop.f32.mrf.mxu3 }
 0x227   : > { %v1664_v36 = vadd.f32 %v1663_v53, %v1534_v35 }
 0x229   : > { %1754 = vrot.lane.b32.xlu1 %v15940_v14, %s19312_s22  ;;  %1758 = vrot.lane.b32.xlu2 %v15950_v22, %s19312_s22  ;;  %v1674_v7 = vmax.f32 %v1664_v36, 0.0 }
 0x22a   : > { %1705 = vrot.lane.b32.xlu0 %v15950_v22, %s19319_s23 }
 0x22c   : > { %v1650_v47 = vpop.f32.mrf.mxu2 }
 0x22d   : > { %v1651_v25 = vadd.f32 %v1650_v47, %v1534_v35 }
 0x22e   : > { %v1624_v8 = vpop.f32.mrf.mxu0  ;;  %v1637_v27 = vpop.f32.mrf.mxu1 }
 0x22f   : > { %v1673_v5 = vmax.f32 %v1651_v25, 0.0  ;;  %v1625_v13 = vadd.f32 %v1624_v8, %v1534_v35  ;;  %v1638_v38 = vadd.f32 %v1637_v27, %v1534_v35  ;;  %v1665_v6 = vpop.f32.mrf.mxu3 }
 0x231   : > { %v1678_v43 = vpack.c.bf16 %v1674_v7, %v1673_v5  ;;  %v1671_v3 = vmax.f32 %v1625_v13, 0.0  ;;  %v1672_v46 = vmax.f32 %v1638_v38, 0.0  ;;  %1756 = vrot.lane.b32.xlu1 %v15958_v51, %s19312_s22  ;;  %1703 = vrot.lane.b32.xlu2 %v15958_v51, %s19319_s23 }
 0x233   : > { %v1689_v39 = vunpack.c.l.b16 %v1678_v43  ;;  %v1677_v10 = vpack.c.bf16 %v1672_v46, %v1671_v3  ;;  %v1690_v63 = vunpack.c.h.b16 %v1678_v43 }
 0x234   : > { %v1652_v49 = vpop.f32.mrf.mxu2 }
 0x235   : > { %v15964_v61 = vpack.c.b16 %v1689_v39, %v1689_v39  ;;  %v1688_v35 = vunpack.c.h.b16 %v1677_v10  ;;  %v1687_v1 = vunpack.c.l.b16 %v1677_v10  ;;  %v15976_v62 = vpack.c.b16 %v1690_v63, %v1690_v63 }
 0x236   : > { %v1626_v50 = vpop.f32.mrf.mxu0  ;;  %v1639_v17 = vpop.f32.mrf.mxu1 }
 0x237   : > { %1764 = vrot.lane.b32.xlu0 %v15964_v61, %s19312_s22  ;;  %v15968_v30 = vpack.c.b16 %v1688_v35, %v1688_v35  ;;  %v15970_v34 = vpack.c.b16 %v1687_v1, %v1687_v1 }
 0x239   : > { %1762 = vrot.lane.b32.xlu2 %v15968_v30, %s19312_s22  ;;  %1760 = vrot.lane.b32.xlu1 %v15970_v34, %s19312_s22 }
 0x23f   : > { %1766 = vrot.lane.b32.xlu0 %v15976_v62, %s19312_s22 }
 0x241   : > { %1709 = vrot.lane.b32.xlu2 %v15968_v30, %s19319_s23  ;;  %1707 = vrot.lane.b32.xlu1 %v15970_v34, %s19319_s23 }
 0x249   : > { %1713 = vrot.lane.b32.xlu2 %v15976_v62, %s19319_s23  ;;  %1711 = vrot.lane.b32.xlu1 %v15964_v61, %s19319_s23 }
 0x27b   : > { %v1700_v32 = vpop.permute.xlu2 %1699 }
 0x27c   : > { %v1730_v24 = vsel %vm1093_vm1, 0, %v1700_v32 }
 0x27d   : > { %v1732_v56 = vunpack.c.l.bf16 %v1730_v24 }
 0x27f   : > { %v1740_v16 = vmul.f32 %v1732_v56, %v15660_v40 }
 0x283   : > { %v1759_v18 = vpop.permute.xlu2 %1758 }
 0x28b   : > { %v1704_v0 = vpop.permute.xlu2 %1703 }
 0x293   : > { %v1702_v42 = vpop.permute.xlu1 %1701  ;;  %v1763_v63 = vpop.permute.xlu2 %1762 }
 0x294   : > { %v1753_v12 = vpop.permute.xlu0 %1752  ;;  %v1715_v15 = vsel %vm1093_vm1, %v1700_v32, %v1702_v42  ;;  %v1716_v29 = vsel %vm1093_vm1, %v1702_v42, %v1704_v0 }
 0x295   : > { %v1733_v23 = vunpack.c.l.bf16 %v1715_v15  ;;  %v1734_v7 = vunpack.c.l.bf16 %v1716_v29 }
 0x297   : > { %v1741_v19 = vmul.f32 %v1733_v23, %v15675_v45  ;;  %v1742_v38 = vmul.f32 %v1734_v7, %v15614_v31 }
 0x299   : > { %v1748_v41 = vpack.c.bf16 %v1741_v19, %v1740_v16 }
 0x29b   : > { %v1755_v53 = vpop.permute.xlu1 %1754  ;;  %v1810_v36 = vunpack.c.h.b16 %v1748_v41  ;;  %v1809_v47 = vunpack.c.l.b16 %v1748_v41 }
 0x29c   : > { %v15993_v25 = vpop.permute.xlu0 %1705  ;;  %v1768_v39 = vsel %vm1191_vm0, %v1753_v12, %v1755_v53 }
 0x29d   : > { %v1717_v44 = vsel %vm1093_vm1, %v1704_v0, %v15993_v25  ;;  %v1818_v5 = vpack.c.b16 %v1810_v36, %v1810_v36  ;;  %v1817_v43 = vpack.c.b16 %v1809_v47, %v1809_v47  ;;  %v1785_v3 = vunpack.c.l.bf16 %v1768_v39 }
 0x29e   : > { %v1735_v8 = vunpack.c.l.bf16 %v1717_v44 }
 0x29f   : > { %v15999_v27 = vsel %vm1312_vm2, %v1818_v5, %v15940_v14  ;;  %v16003_v13 = vsel %vm1312_vm2, %v1817_v43, %v15942_v28  ;;  %v1793_v50 = vmul.f32 %v1785_v3, %v15654_v11  ;;  %v1710_v3 = vpop.permute.xlu2 %1709 }
 0x2a0   : > { %v1743_v6 = vmul.f32 %v1735_v8, %v15616_v33  ;;  %1879 = vrot.lane.b32.xlu1 %v15999_v27, %s19301_s28  ;;  %1937 = vrot.lane.b32.xlu0 %v15999_v27, %s19303_s26  ;;  %v1994_v47 = vrot.slane %v15999_v27, 4  ;;  %v1993_v5 = vrot.slane %v16003_v13, 4 }
 0x2a1   : > { %1935 = vrot.lane.b32.xlu2 %v16003_v13, %s19303_s26 }
 0x2a2   : > { %v1749_v14 = vpack.c.bf16 %v1743_v6, %v1742_v38 }
 0x2a3   : > { %v1757_v46 = vpop.permute.xlu1 %1756 }
 0x2a4   : > { %v1769_v28 = vsel %vm1191_vm0, %v1755_v53, %v1757_v46  ;;  %v1811_v49 = vunpack.c.l.b16 %v1749_v14  ;;  %v1770_v32 = vsel %vm1191_vm0, %v1757_v46, %v1759_v18  ;;  %v1812_v29 = vunpack.c.h.b16 %v1749_v14 }
 0x2a5   : > { %v1786_v10 = vunpack.c.l.bf16 %v1769_v28  ;;  %v1787_v42 = vunpack.c.l.bf16 %v1770_v32 }
 0x2a6   : > { %v1819_v1 = vpack.c.b16 %v1811_v49, %v1811_v49  ;;  %v1820_v46 = vpack.c.b16 %v1812_v29, %v1812_v29 }
 0x2a7   : > { %v1794_v17 = vmul.f32 %v1786_v10, %v15648_v2  ;;  %v1795_v43 = vmul.f32 %v1787_v42, %v15596_v57 }
 0x2a8   : > { %v16020_v24 = vsel %vm1312_vm2, %v1819_v1, %v15958_v51 }
 0x2a9   : > { %v1765_v35 = vpop.permute.xlu0 %1764  ;;  %1939 = vrot.lane.b32.xlu2 %v16020_v24, %s19303_s26  ;;  %v1801_v56 = vpack.c.bf16 %v1794_v17, %v1793_v50 }
 0x2aa   : > { %v1773_v12 = vsel %vm1191_vm0, %v1763_v63, %v1765_v35 }
 0x2ab   : > { %v1761_v15 = vpop.permute.xlu1 %1760  ;;  %v1830_v23 = vunpack.c.h.b16 %v1801_v56  ;;  %v1829_v16 = vunpack.c.l.b16 %v1801_v56  ;;  %v1790_v7 = vunpack.c.l.bf16 %v1773_v12 }
 0x2ac   : > { %v1771_v19 = vsel %vm1191_vm0, %v1759_v18, %v1761_v15  ;;  %v1772_v0 = vsel %vm1191_vm0, %v1761_v15, %v1763_v63 }
 0x2ad   : > { %v1788_v41 = vunpack.c.l.bf16 %v1771_v19  ;;  %v1789_v53 = vunpack.c.l.bf16 %v1772_v0  ;;  %v1838_v36 = vpack.c.b16 %v1830_v23, %v1830_v23  ;;  %v16027_v51 = vpack.c.b16 %v1829_v16, %v1829_v16 }
 0x2ae   : > { %v1798_v49 = vmul.f32 %v1790_v7, %v15594_v55  ;;  %v16058_v16 = vsel %vm1312_vm2, %v1820_v46, %v15950_v22  ;;  %v1995_v0 = vrot.slane %v16020_v24, 4 }
 0x2af   : > { %v1796_v8 = vmul.f32 %v1788_v41, %v15598_v58  ;;  %1953 = vrot.lane.b32.xlu1 %v1838_v36, %s19303_s26  ;;  %1951 = vrot.lane.b32.xlu0 %v16027_v51, %s19303_s26  ;;  %v1797_v38 = vmul.f32 %v1789_v53, %v15592_v54  ;;  %v2001_v39 = vrot.slane %v16027_v51, 4  ;;  %v2003_v14 = vrot.slane %v1838_v36, 4 }
 0x2b0   : > { %v1996_v22 = vrot.slane %v16058_v16, 4 }
 0x2b1   : > { %v1767_v44 = vpop.permute.xlu0 %1766  ;;  %1881 = vrot.lane.b32.xlu2 %v16020_v24, %s19301_s28  ;;  %v1802_v28 = vpack.c.bf16 %v1796_v8, %v1795_v43  ;;  %v16051_v1 = vsel %vm1312_vm2, %v1994_v47, %v2003_v14  ;;  %v1803_v12 = vpack.c.bf16 %v1798_v49, %v1797_v38 }
 0x2b2   : > { %v1774_v18 = vsel %vm1191_vm0, %v1765_v35, %v1767_v44  ;;  %v1783_v6 = vsel %vm1191_vm0, %v1767_v44, 0  ;;  %v16046_v35 = vsel %vm1312_vm2, %v1993_v5, %v2001_v39  ;;  %v1714_v39 = vpop.permute.xlu2 %1713 }
 0x2b3   : > { %v1791_v10 = vunpack.c.l.bf16 %v1774_v18  ;;  %v1792_v63 = vunpack.c.l.bf16 %v1783_v6  ;;  %v1708_v50 = vpop.permute.xlu1 %1707  ;;  %v1831_v17 = vunpack.c.l.b16 %v1802_v28  ;;  %v1832_v32 = vunpack.c.h.b16 %v1802_v28 }
 0x2b4   : > { %v1718_v56 = vsel %vm1093_vm1, %v15993_v25, %v1708_v50  ;;  %v1719_v42 = vsel %vm1093_vm1, %v1708_v50, %v1710_v3  ;;  %v1833_v43 = vunpack.c.l.b16 %v1803_v12  ;;  %v1834_v8 = vunpack.c.h.b16 %v1803_v12 }
 0x2b5   : > { %v1736_v15 = vunpack.c.l.bf16 %v1718_v56  ;;  %v1737_v23 = vunpack.c.l.bf16 %v1719_v42  ;;  %v1839_v19 = vpack.c.b16 %v1831_v17, %v1831_v17  ;;  %v1799_v29 = vmul.f32 %v1791_v10, %v15683_v52 }
 0x2b6   : > { %v1840_v41 = vpack.c.b16 %v1832_v32, %v1832_v32  ;;  %v1800_v53 = vmul.f32 %v1792_v63, %v15685_v59  ;;  %v1841_v50 = vpack.c.b16 %v1833_v43, %v1833_v43  ;;  %v1842_v17 = vpack.c.b16 %v1834_v8, %v1834_v8 }
 0x2b7   : > { %v1744_v7 = vmul.f32 %v1736_v15, %v15650_v4  ;;  %v1745_v25 = vmul.f32 %v1737_v23, %v15652_v9  ;;  %1895 = vrot.lane.b32.xlu1 %v1838_v36, %s19301_s28  ;;  %1941 = vrot.lane.b32.xlu0 %v16058_v16, %s19303_s26  ;;  %v2005_v44 = vrot.slane %v1839_v19, 4 }
 0x2b8   : > { %v2007_v18 = vrot.slane %v1840_v41, 4  ;;  %v1804_v28 = vpack.c.bf16 %v1800_v53, %v1799_v29  ;;  %v2011_v8 = vrot.slane %v1842_v17, 4 }
 0x2b9   : > { %v1750_v38 = vpack.c.bf16 %v1745_v25, %v1744_v7  ;;  %1897 = vrot.lane.b32.xlu2 %v1839_v19, %s19301_s28  ;;  %v16073_v6 = vsel %vm1312_vm2, %v1995_v0, %v2005_v44  ;;  %v2009_v44 = vrot.slane %v1841_v50, 4 }
 0x2ba   : > { %v16078_v36 = vsel %vm1312_vm2, %v1996_v22, %v2007_v18  ;;  %v1835_v29 = vunpack.c.l.b16 %v1804_v28  ;;  %v1836_v7 = vunpack.c.h.b16 %v1804_v28 }
 0x2bb   : > { %v1712_v14 = vpop.permute.xlu1 %1711  ;;  %v1813_v46 = vunpack.c.l.b16 %v1750_v38  ;;  %v1814_v49 = vunpack.c.h.b16 %v1750_v38 }
 0x2bc   : > { %v1720_v10 = vsel %vm1093_vm1, %v1710_v3, %v1712_v14  ;;  %v1721_v63 = vsel %vm1093_vm1, %v1712_v14, %v1714_v39  ;;  %v1844_v14 = vpack.c.b16 %v1836_v7, %v1836_v7 }
 0x2bd   : > { %v1738_v32 = vunpack.c.l.bf16 %v1720_v10  ;;  %v1739_v56 = vunpack.c.l.bf16 %v1721_v63  ;;  %v1821_v42 = vpack.c.b16 %v1813_v46, %v1813_v46  ;;  %v1822_v12 = vpack.c.b16 %v1814_v49, %v1814_v49 }
 0x2bf   : > { %v1746_v15 = vmul.f32 %v1738_v32, %v15714_v26  ;;  %v1747_v23 = vmul.f32 %v1739_v56, %v15716_v60  ;;  %1893 = vrot.lane.b32.xlu1 %v16027_v51, %s19301_s28  ;;  %1883 = vrot.lane.b32.xlu0 %v16058_v16, %s19301_s28  ;;  %v16090_v3 = vsel %vm1312_vm2, %v1821_v42, %v15970_v34  ;;  %v2015_v42 = vrot.slane %v1844_v14, 4 }
 0x2c0   : > { %v1997_v53 = vrot.slane %v16090_v3, 4  ;;  %v16095_v25 = vsel %vm1312_vm2, %v1822_v12, %v15968_v30  ;;  %v1843_v30 = vpack.c.b16 %v1835_v29, %v1835_v29 }
 0x2c1   : > { %v1751_v43 = vpack.c.bf16 %v1747_v23, %v1746_v15  ;;  %1959 = vrot.lane.b32.xlu2 %v1841_v50, %s19303_s26  ;;  %v1998_v51 = vrot.slane %v16095_v25, 4 }
 0x2c2   : > { %v16102_v34 = vsel %vm1312_vm2, %v1997_v53, %v2009_v44  ;;  %v2013_v56 = vrot.slane %v1843_v30, 4 }
 0x2c3   : > { %v1816_v18 = vunpack.c.h.b16 %v1751_v43  ;;  %v1815_v38 = vunpack.c.l.b16 %v1751_v43  ;;  %v16107_v39 = vsel %vm1312_vm2, %v1998_v51, %v2011_v8 }
 0x2c5   : > { %v1824_v46 = vpack.c.b16 %v1816_v18, %v1816_v18  ;;  %v1823_v28 = vpack.c.b16 %v1815_v38, %v1815_v38 }
 0x2c7   : > { %1957 = vrot.lane.b32.xlu1 %v1840_v41, %s19303_s26  ;;  %1955 = vrot.lane.b32.xlu0 %v1839_v19, %s19303_s26  ;;  %v16113_v49 = vsel %vm1312_vm2, %v1824_v46, %v15976_v62  ;;  %v16117_v10 = vsel %vm1312_vm2, %v1823_v28, %v15964_v61 }
 0x2c8   : > { %v2000_v63 = vrot.slane %v16113_v49, 4  ;;  %v1999_v32 = vrot.slane %v16117_v10, 4 }
 0x2c9   : > { %1877 = vrot.lane.b32.xlu2 %v16003_v13, %s19301_s28 }
 0x2ca   : > { %v16126_v19 = vsel %vm1312_vm2, %v1999_v32, %v2013_v56  ;;  %v16131_v62 = vsel %vm1312_vm2, %v2000_v63, %v2015_v42  ;;  %v16172_v42 = vld [vmem:[%s15337_s17] sm:$0xf] }
 0x2cf   : > { %1899 = vrot.lane.b32.xlu0 %v1840_v41, %s19301_s28  ;;  %1943 = vrot.lane.b32.xlu1 %v16090_v3, %s19303_s26 }
 0x2d1   : > { %1963 = vrot.lane.b32.xlu2 %v1843_v30, %s19303_s26 }
 0x2d7   : > { %1965 = vrot.lane.b32.xlu0 %v1844_v14, %s19303_s26  ;;  %1961 = vrot.lane.b32.xlu1 %v1842_v17, %s19303_s26 }
 0x2d9   : > { %1945 = vrot.lane.b32.xlu2 %v16095_v25, %s19303_s26 }
 0x2df   : > { %1903 = vrot.lane.b32.xlu0 %v1842_v17, %s19301_s28  ;;  %1905 = vrot.lane.b32.xlu1 %v1843_v30, %s19301_s28 }
 0x2e1   : > { %1907 = vrot.lane.b32.xlu2 %v1844_v14, %s19301_s28 }
 0x2e7   : > { %1949 = vrot.lane.b32.xlu1 %v16113_v49, %s19303_s26  ;;  %1947 = vrot.lane.b32.xlu0 %v16117_v10, %s19303_s26 }
 0x2e9   : > { %1889 = vrot.lane.b32.xlu2 %v16117_v10, %s19301_s28 }
 0x2ef   : > { %1887 = vrot.lane.b32.xlu1 %v16095_v25, %s19301_s28  ;;  %1901 = vrot.lane.b32.xlu0 %v1841_v50, %s19301_s28 }
 0x2f7   : > { %1885 = vrot.lane.b32.xlu1 %v16090_v3, %s19301_s28  ;;  %1891 = vrot.lane.b32.xlu0 %v16113_v49, %s19301_s28  ;;  %s19372_s28 = sld [smem:[#allocation10_spill]] }
 0x2fb   : > { %v1936_v61 = vpop.permute.xlu2 %1935 }
 0x303   : > { %v1940_v41 = vpop.permute.xlu2 %1939 }
 0x30b   : > { %v16157_v17 = vpop.permute.xlu2 %1881 }
 0x312   : > { %v1938_v12 = vpop.permute.xlu0 %1937  ;;  %v1880_v15 = vpop.permute.xlu1 %1879 }
 0x313   : > { %v1898_v44 = vpop.permute.xlu2 %1897  ;;  %v1967_v43 = vsel %vm1437_vm3, %v1936_v61, %v1938_v12 }
 0x31b   : > { %v1960_v38 = vpop.permute.xlu2 %1959 }
 0x321   : > { %v1952_v23 = vpop.permute.xlu0 %1951  ;;  %v1954_v29 = vpop.permute.xlu1 %1953 }
 0x322   : > { %v1974_v7 = vsel %vm1437_vm3, %v1952_v23, %v1954_v29 }
 0x323   : > { %v2067_v50 = vsel %vm1312_vm2, %v1974_v7, 0  ;;  %v1878_v56 = vpop.permute.xlu2 %1877 }
 0x324   : > { %2092 = vmatpush.bf16.msra.mxu0 %v2067_v50  ;;  %v1909_v24 = vsel %vm1377_vm4, %v1878_v56, %v1880_v15 }
 0x328   : > { %2093 = vmatpush.bf16.msra.mxu0 %v1967_v43 }
 0x329   : > { %v1942_v8 = vpop.permute.xlu0 %1941  ;;  %v1896_v18 = vpop.permute.xlu1 %1895 }
 0x32c   : > { %2094 = vmatpush.bf16.msra.mxu0 %v16046_v35 }
 0x331   : > { %v16163_v30 = vpop.permute.xlu0 %1883  ;;  %v1894_v14 = vpop.permute.xlu1 %1893 }
 0x332   : > { %v1934_v46 = vsel %vm1377_vm4, 0, %v1894_v14  ;;  %v1911_v16 = vsel %vm1377_vm4, %v16157_v17, %v16163_v30 }
 0x333   : > { %v2026_v28 = vsel %vm1312_vm2, %v1934_v46, %v1993_v5  ;;  %v1968_v46 = vsel %vm1437_vm3, %v1938_v12, %v1940_v41 }
 0x334   : > { %2095 = vmatpush.bf16.msra.mxu0 %v2026_v28 }
 0x338   : > { %11121 = vmatpush.bf16.msk.msra.mxu0 %vm15881_vm6, %v1878_v56 }
 0x339   : > { %v1956_v61 = vpop.permute.xlu0 %1955  ;;  %v1958_v23 = vpop.permute.xlu1 %1957 }
 0x33a   : > { %v1975_v35 = vsel %vm1437_vm3, %v1954_v29, %v1956_v61  ;;  %v1976_v7 = vsel %vm1437_vm3, %v1956_v61, %v1958_v23  ;;  %v1977_v50 = vsel %vm1437_vm3, %v1958_v23, %v1960_v38  ;;  %v1969_v29 = vsel %vm1437_vm3, %v1940_v41, %v1942_v8 }
 0x33b   : > { %v2070_v43 = vsel %vm1312_vm2, %v1975_v35, 0  ;;  %v2073_v13 = vsel %vm1312_vm2, %v1976_v7, 0  ;;  %v2076_v5 = vsel %vm1312_vm2, %v1977_v50, 0  ;;  %11122 = vmatmul.msk.bf16.vlgmr.msra.gmra.mxu0 %vm1536_vm5, %v16172_v42  ;;  %v1917_v35 = vsel %vm1377_vm4, %v1896_v18, %v1898_v44  ;;  %v1964_v50 = vpop.permute.xlu2 %1963 }
 0x33c   : > { %2105 = vmatpush.bf16.msra.mxu1 %v2070_v43  ;;  %2118 = vmatpush.bf16.msra.mxu2 %v2073_v13  ;;  %v1916_v7 = vsel %vm1377_vm4, %v1894_v14, %v1896_v18 }
 0x33d   : > { %2131 = vmatpush.bf16.msra.mxu3 %v2076_v5  ;;  %v2030_v12 = vsel %vm1312_vm2, %v1916_v7, %v1994_v47 }
 0x340   : > { %2106 = vmatpush.bf16.msra.mxu1 %v1968_v46  ;;  %2119 = vmatpush.bf16.msra.mxu2 %v1969_v29 }
 0x341   : > { %v16184_v28 = vpop.permute.xlu0 %1899  ;;  %v1944_v61 = vpop.permute.xlu1 %1943 }
 0x342   : > { %v1970_v23 = vsel %vm1437_vm3, %v1942_v8, %v1944_v61  ;;  %v1918_v41 = vsel %vm1377_vm4, %v1898_v44, %v16184_v28  ;;  %v2034_v8 = vsel %vm1312_vm2, %v1917_v35, %v1995_v0 }
 0x343   : > { %2132 = vmatpush.bf16.msra.mxu3 %v1970_v23  ;;  %v2038_v27 = vsel %vm1312_vm2, %v1918_v41, %v1996_v22  ;;  %v1946_v22 = vpop.permute.xlu2 %1945 }
 0x344   : > { %2107 = vmatpush.bf16.msra.mxu1 %v16051_v1  ;;  %2120 = vmatpush.bf16.msra.mxu2 %v16073_v6  ;;  %v1910_v6 = vsel %vm1377_vm4, %v1880_v15, %v16157_v17  ;;  %v1971_v56 = vsel %vm1437_vm3, %v1944_v61, %v1946_v22 }
 0x347   : > { %2133 = vmatpush.bf16.msra.mxu3 %v16078_v36 }
 0x348   : > { %2108 = vmatpush.bf16.msra.mxu1 %v2030_v12  ;;  %2121 = vmatpush.bf16.msra.mxu2 %v2034_v8 }
 0x349   : > { %v1966_v18 = vpop.permute.xlu0 %1965  ;;  %v1962_v1 = vpop.permute.xlu1 %1961 }
 0x34a   : > { %v1980_v14 = vsel %vm1437_vm3, %v1964_v50, %v1966_v18  ;;  %v1978_v44 = vsel %vm1437_vm3, %v1960_v38, %v1962_v1  ;;  %v1979_v36 = vsel %vm1437_vm3, %v1962_v1, %v1964_v50  ;;  %v1992_v13 = vsel %vm1437_vm3, %v1966_v18, 0  ;;  %v2057_v38 = vld [vmem:[%s15342_s21] sm:$0xff] }
 0x34b   : > { %2134 = vmatpush.bf16.msra.mxu3 %v2038_v27  ;;  %v2079_v47 = vsel %vm1312_vm2, %v1978_v44, 0  ;;  %v2082_v0 = vsel %vm1312_vm2, %v1979_v36, 0  ;;  %v2085_v43 = vsel %vm1312_vm2, %v1980_v14, 0  ;;  %v2087_v15 = vsel %vm1312_vm2, %v1992_v13, 0  ;;  %2060 = vperm.xlu2 %15261, %v2057_v38   ;;  %v1908_v7 = vpop.permute.xlu2 %1907 }
 0x34c   : > { %2109 = vmatpush.bf16.msra.mxu1 %v1909_v24  ;;  %2122 = vmatpush.bf16.msra.mxu2 %v1910_v6 }
 0x34d   : > { %2144 = vmatpush.bf16.msrb.mxu0 %v2079_v47 }
 0x34f   : > { %2135 = vmatpush.bf16.msra.mxu3 %v1911_v16  ;;  %11123 = vmatmul.msk.bf16.vlgmr.msra.gmra.mxu1 %vm1536_vm5, %v16172_v42 }
 0x350   : > { %2157 = vmatpush.bf16.msrb.mxu1 %v2082_v0  ;;  %2170 = vmatpush.bf16.msrb.mxu2 %v2085_v43 }
 0x351   : > { %11124 = vmatmul.msk.bf16.vlgmr.msra.gmra.mxu2 %vm1536_vm5, %v16172_v42  ;;  %2145 = vmatpush.bf16.msrb.mxu0 %v1971_v56  ;;  %v1904_v5 = vpop.permute.xlu0 %1903  ;;  %v1906_v46 = vpop.permute.xlu1 %1905 }
 0x352   : > { %11125 = vmatmul.msk.bf16.vlgmr.msra.gmra.mxu3 %vm1536_vm5, %v16172_v42  ;;  %v1921_v50 = vsel %vm1377_vm4, %v1904_v5, %v1906_v46 }
 0x353   : > { %2183 = vmatpush.bf16.msrb.mxu3 %v2087_v15  ;;  %v2050_v1 = vsel %vm1312_vm2, %v1921_v50, %v1999_v32 }
 0x355   : > { %2146 = vmatpush.bf16.msrb.mxu0 %v16102_v34  ;;  %v1922_v34 = vsel %vm1377_vm4, %v1906_v46, %v1908_v7 }
 0x359   : > { %v1948_v17 = vpop.permute.xlu0 %1947  ;;  %v1950_v29 = vpop.permute.xlu1 %1949 }
 0x35a   : > { %v1972_v23 = vsel %vm1437_vm3, %v1946_v22, %v1948_v17  ;;  %v1973_v35 = vsel %vm1437_vm3, %v1948_v17, %v1950_v29  ;;  %v1989_v61 = vsel %vm1437_vm3, %v1950_v29, 0 }
 0x35b   : > { %2158 = vmatpush.bf16.msrb.mxu1 %v1972_v23  ;;  %2171 = vmatpush.bf16.msrb.mxu2 %v1973_v35 }
 0x35c   : > { %2184 = vmatpush.bf16.msrb.mxu3 %v1989_v61 }
 0x35f   : > { %2159 = vmatpush.bf16.msrb.mxu1 %v16107_v39  ;;  %2172 = vmatpush.bf16.msrb.mxu2 %v16126_v19  ;;  %v2054_v39 = vsel %vm1312_vm2, %v1922_v34, %v2000_v63 }
 0x360   : > { %2185 = vmatpush.bf16.msrb.mxu3 %v16131_v62 }
 0x361   : > { %v1902_v41 = vpop.permute.xlu0 %1901  ;;  %v1888_v12 = vpop.permute.xlu1 %1887 }
 0x362   : > { %v1919_v8 = vsel %vm1377_vm4, %v16184_v28, %v1902_v41  ;;  %v1920_v18 = vsel %vm1377_vm4, %v1902_v41, %v1904_v5  ;;  %v1890_v28 = vpop.permute.xlu2 %1889 }
 0x363   : > { %2173 = vmatpush.bf16.msrb.mxu2 %v2050_v1  ;;  %v2042_v19 = vsel %vm1312_vm2, %v1919_v8, %v1997_v53  ;;  %v2046_v62 = vsel %vm1312_vm2, %v1920_v18, %v1998_v51  ;;  %v1914_v10 = vsel %vm1377_vm4, %v1888_v12, %v1890_v28 }
 0x364   : > { %2186 = vmatpush.bf16.msrb.mxu3 %v2054_v39  ;;  %2147 = vmatpush.bf16.msrb.mxu0 %v2042_v19 }
 0x365   : > { %2160 = vmatpush.bf16.msrb.mxu1 %v2046_v62 }
 0x367   : > { %2174 = vmatpush.bf16.msrb.mxu2 %v1914_v10 }
 0x369   : > { %v1892_v32 = vpop.permute.xlu0 %1891  ;;  %v1886_v6 = vpop.permute.xlu1 %1885 }
 0x36a   : > { %11128 = vmatmul.msk.bf16.vlgmr.msrb.gmra.mxu2 %vm1536_vm5, %v16172_v42  ;;  %v1912_v3 = vsel %vm1377_vm4, %v16163_v30, %v1886_v6  ;;  %v1913_v53 = vsel %vm1377_vm4, %v1886_v6, %v1888_v12  ;;  %v1915_v25 = vsel %vm1377_vm4, %v1890_v28, %v1892_v32 }
 0x36b   : > { %2148 = vmatpush.bf16.msrb.mxu0 %v1912_v3  ;;  %2161 = vmatpush.bf16.msrb.mxu1 %v1913_v53 }
 0x36c   : > { %2187 = vmatpush.bf16.msrb.mxu3 %v1915_v25 }
 0x36e   : > { %11126 = vmatmul.msk.bf16.vlgmr.msrb.gmra.mxu0 %vm1536_vm5, %v16172_v42  ;;  %11127 = vmatmul.msk.bf16.vlgmr.msrb.gmra.mxu1 %vm1536_vm5, %v16172_v42 }
 0x36f   : > { %11129 = vmatmul.msk.bf16.vlgmr.msrb.gmra.mxu3 %vm1536_vm5, %v16172_v42 }
 0x3a5   : > { %v2061_v63 = vpop.permute.xlu2 %2060 }
 0x3b8   : > { %v2098_v51 = vpop.f32.mrf.mxu0 }
 0x3b9   : > { %v16262_v30 = vadd.f32 %v2098_v51, %v2061_v63 }
 0x3c0   : > { %v2100_v49 = vpop.f32.mrf.mxu0 }
 0x3cc   : > { %v2111_v14 = vpop.f32.mrf.mxu1 }
 0x3cd   : > { %v16264_v44 = vadd.f32 %v2111_v14, %v2061_v63 }
 0x3cf   : > { %v2193_v36 = vpack.c.bf16 %v16264_v44, %v16262_v30 }
 0x3d1   : > { %v2201_v27 = vunpack.c.l.b16 %v2193_v36  ;;  %v2202_v17 = vunpack.c.h.b16 %v2193_v36 }
 0x3d3   : > { %v16268_v47 = vpack.c.b16 %v2201_v27, %v2201_v27  ;;  %v16280_v29 = vpack.c.b16 %v2202_v17, %v2202_v17 }
 0x3d4   : > { %v2124_v24 = vpop.f32.mrf.mxu2  ;;  %v2113_v43 = vpop.f32.mrf.mxu1 }
 0x3d5   : > { %v2125_v0 = vadd.f32 %v2124_v24, %v2061_v63  ;;  %v2137_v13 = vpop.f32.mrf.mxu3  ;;  %2217 = vrot.lane.b32.xlu0 %v16268_v47, %s19303_s26 }
 0x3d6   : > { %v2138_v42 = vadd.f32 %v2137_v13, %v2061_v63 }
 0x3d8   : > { %v2194_v16 = vpack.c.bf16 %v2138_v42, %v2125_v0 }
 0x3da   : > { %v2204_v22 = vunpack.c.h.b16 %v2194_v16  ;;  %v2203_v15 = vunpack.c.l.b16 %v2194_v16 }
 0x3dc   : > { %v2126_v38 = vpop.f32.mrf.mxu2  ;;  %v16272_v56 = vpack.c.b16 %v2204_v22, %v2204_v22  ;;  %v16274_v5 = vpack.c.b16 %v2203_v15, %v2203_v15 }
 0x3dd   : > { %v2139_v46 = vpop.f32.mrf.mxu3 }
 0x3de   : > { %2223 = vrot.lane.b32.xlu1 %v16272_v56, %s19303_s26  ;;  %2221 = vrot.lane.b32.xlu0 %v16274_v5, %s19303_s26 }
 0x3e6   : > { %2219 = vrot.lane.b32.xlu1 %v16280_v29, %s19303_s26 }
 0x3eb   : > { %v2150_v23 = vpop.f32.mrf.mxu0  ;;  %v2163_v35 = vpop.f32.mrf.mxu1 }
 0x3ec   : > { %v16284_v61 = vadd.f32 %v2150_v23, %v2061_v63  ;;  %v16286_v7 = vadd.f32 %v2163_v35, %v2061_v63 }
 0x3ed   : > { %v2176_v50 = vpop.f32.mrf.mxu2 }
 0x3ee   : > { %v2195_v34 = vpack.c.bf16 %v16286_v7, %v16284_v61  ;;  %v16292_v18 = vadd.f32 %v2176_v50, %v2061_v63 }
 0x3f0   : > { %v2205_v41 = vunpack.c.l.b16 %v2195_v34  ;;  %v2206_v10 = vunpack.c.h.b16 %v2195_v34 }
 0x3f2   : > { %v2189_v12 = vpop.f32.mrf.mxu3  ;;  %v16290_v8 = vpack.c.b16 %v2205_v41, %v2205_v41  ;;  %v16304_v51 = vpack.c.b16 %v2206_v10, %v2206_v10  ;;  %v14546_v10 = vld [vmem:[%s15402_s27 + $0x174] sm:$0xf0] }
 0x3f3   : > { %v16294_v1 = vadd.f32 %v2189_v12, %v2061_v63  ;;  %v2152_v39 = vpop.f32.mrf.mxu0  ;;  %v2165_v19 = vpop.f32.mrf.mxu1 }
 0x3f4   : > { %2225 = vrot.lane.b32.xlu2 %v16290_v8, %s19303_s26 }
 0x3f5   : > { %v2196_v62 = vpack.c.bf16 %v16294_v1, %v16292_v18  ;;  %v2178_v28 = vpop.f32.mrf.mxu2 }
 0x3f6   : > { %v11316_v28 = vld [vmem:[%s15402_s27 + $0x170] sm:$0xf] }
 0x3f7   : > { %v2208_v32 = vunpack.c.h.b16 %v2196_v62  ;;  %v2207_v6 = vunpack.c.l.b16 %v2196_v62 }
 0x3f9   : > { %v16300_v3 = vpack.c.b16 %v2208_v32, %v2208_v32  ;;  %v16302_v53 = vpack.c.b16 %v2207_v6, %v2207_v6  ;;  %v11317_v6 = vor.u32 %v14546_v10, %v11316_v28 }
 0x3fa   : > { %v2191_v25 = vpop.f32.mrf.mxu3 }
 0x3fb   : > { %2231 = vrot.lane.b32.xlu1 %v16300_v3, %s19303_s26  ;;  %2229 = vrot.lane.b32.xlu0 %v16302_v53, %s19303_s26  ;;  %v14544_v25 = vld [vmem:[%s15402_s27 + $0x164] sm:$0xf0] }
 0x3fc   : > { %2227 = vrot.lane.b32.xlu2 %v16304_v51, %s19303_s26  ;;  %3157 = vmatpush.bf16.msra.mxu2 %v11317_v6  ;;  %s19375_s26 = sld [smem:[#allocation9_spill]] }
 0x447   : > { %v2218_v49 = vpop.permute.xlu0 %2217 }
 0x44e   : > { %v2226_v63 = vpop.permute.xlu2 %2225 }
 0x450   : > { %v2222_v14 = vpop.permute.xlu0 %2221  ;;  %v2224_v36 = vpop.permute.xlu1 %2223 }
 0x451   : > { %v2235_v27 = vsel %vm1437_vm3, %v2222_v14, %v2224_v36  ;;  %v2236_v24 = vsel %vm1437_vm3, %v2224_v36, %v2226_v63 }
 0x452   : > { %v2260_v43 = vunpack.c.l.bf16 %v2235_v27  ;;  %v2261_v13 = vunpack.c.l.bf16 %v2236_v24  ;;  %v11252_v27 = vld [vmem:[%s15402_s27 + $0xf0] sm:$0xf]  ;;  %v14530_v24 = vld [vmem:[%s15402_s27 + $0xf4] sm:$0xf0] }
 0x454   : > { %v16314_v16 = vmax.f32 %v2125_v0, %v2260_v43  ;;  %v16316_v22 = vmax.f32 %v2138_v42, %v2261_v13  ;;  %v11253_v13 = vor.u32 %v14530_v24, %v11252_v27 }
 0x456   : > { %v2275_v15 = vpack.c.bf16 %v16316_v22, %v16314_v16  ;;  %3144 = vmatpush.bf16.msra.mxu1 %v11253_v13  ;;  %v11284_v13 = vld [vmem:[%s15402_s27 + $0x130] sm:$0xf] }
 0x458   : > { %v2220_v38 = vpop.permute.xlu1 %2219  ;;  %v2285_v46 = vunpack.c.h.b16 %v2275_v15  ;;  %v2284_v17 = vunpack.c.l.b16 %v2275_v15  ;;  %v11300_v15 = vld [vmem:[%s15402_s27 + $0x150] sm:$0xf] }
 0x459   : > { %v2233_v23 = vsel %vm1437_vm3, %v2218_v49, %v2220_v38  ;;  %v2234_v35 = vsel %vm1437_vm3, %v2220_v38, %v2222_v14  ;;  %v11188_v49 = vld [vmem:[%s15402_s27 + $0x70] sm:$0xf]  ;;  %v14514_v14 = vld [vmem:[%s15402_s27 + $0x74] sm:$0xf0]  ;;  %v11180_v38 = vld [vmem:[%s15402_s27 + $0x60] sm:$0xf] }
 0x45a   : > { %v2258_v50 = vunpack.c.l.bf16 %v2233_v23  ;;  %v2259_v34 = vunpack.c.l.bf16 %v2234_v35  ;;  %v2293_v0 = vpack.c.b16 %v2285_v46, %v2285_v46  ;;  %v2292_v42 = vpack.c.b16 %v2284_v17, %v2284_v17  ;;  %v14512_v46 = vld [vmem:[%s15402_s27 + $0x64] sm:$0xf0]  ;;  %v14542_v17 = vld [vmem:[%s15402_s27 + $0x154] sm:$0xf0]  ;;  %v11244_v35 = vld [vmem:[%s15402_s27 + $0xe0] sm:$0xf] }
 0x45b   : > { %v11189_v36 = vor.u32 %v14514_v14, %v11188_v49  ;;  %v11181_v23 = vor.u32 %v14512_v46, %v11180_v38  ;;  %v11301_v28 = vor.u32 %v14542_v17, %v11300_v15  ;;  %v14508_v49 = vld [vmem:[%s15402_s27 + $0x44] sm:$0xf0]  ;;  %v11228_v14 = vld [vmem:[%s15402_s27 + $0xc0] sm:$0xf]  ;;  %v14538_v15 = vld [vmem:[%s15402_s27 + $0x134] sm:$0xf0] }
 0x45c   : > { %v16323_v41 = vmax.f32 %v16262_v30, %v2258_v50  ;;  %v16326_v12 = vmax.f32 %v16264_v44, %v2259_v34  ;;  %2304 = vrot.lane.b32.xlu0 %v2293_v0, %s19312_s22  ;;  %2302 = vrot.lane.b32.xlu2 %v2292_v42, %s19312_s22  ;;  %v11308_v30 = vld [vmem:[%s15402_s27 + $0x160] sm:$0xf]  ;;  %v14528_v50 = vld [vmem:[%s15402_s27 + $0xe4] sm:$0xf0]  ;;  %v2228_v34 = vpop.permute.xlu2 %2227 }
 0x45d   : > { %v11309_v43 = vor.u32 %v14544_v25, %v11308_v30  ;;  %3131 = vmatpush.bf16.msra.mxu0 %v11189_v36  ;;  %v11245_v0 = vor.u32 %v14528_v50, %v11244_v35  ;;  %v11172_v42 = vld [vmem:[%s15402_s27 + $0x50] sm:$0xf]  ;;  %v2237_v10 = vsel %vm1437_vm3, %v2226_v63, %v2228_v34  ;;  %v11292_v30 = vld [vmem:[%s15402_s27 + $0x140] sm:$0xf]  ;;  %v14524_v36 = vld [vmem:[%s15402_s27 + $0xc4] sm:$0xf0] }
 0x45e   : > { %v2274_v39 = vpack.c.bf16 %v16326_v12, %v16323_v41  ;;  %v11164_v25 = vld [vmem:[%s15402_s27 + $0x40] sm:$0xf]  ;;  %v2262_v27 = vunpack.c.l.bf16 %v2237_v10  ;;  %v11229_v35 = vor.u32 %v14524_v36, %v11228_v14  ;;  %v11156_v50 = vld [vmem:[%s15402_s27 + $0x30] sm:$0xf] }
 0x45f   : > { %3158 = vmatpush.bf16.msra.mxu2 %v11309_v43  ;;  %3145 = vmatpush.bf16.msra.mxu1 %v11245_v0  ;;  %v11165_v38 = vor.u32 %v14508_v49, %v11164_v25  ;;  %v14506_v0 = vld [vmem:[%s15402_s27 + $0x34] sm:$0xf0]  ;;  %v14536_v25 = vld [vmem:[%s15402_s27 + $0x124] sm:$0xf0] }
 0x460   : > { %v2283_v19 = vunpack.c.h.b16 %v2274_v39  ;;  %v2282_v62 = vunpack.c.l.b16 %v2274_v39  ;;  %v14510_v39 = vld [vmem:[%s15402_s27 + $0x54] sm:$0xf0]  ;;  %v16369_v10 = vmax.f32 %v16284_v61, %v2262_v27  ;;  %v11157_v49 = vor.u32 %v14506_v0, %v11156_v50  ;;  %v11212_v50 = vld [vmem:[%s15402_s27 + $0xa0] sm:$0xf] }
 0x461   : > { %3132 = vmatpush.bf16.msra.mxu0 %v11181_v23 }
 0x462   : > { %v2291_v32 = vpack.c.b16 %v2283_v19, %v2283_v19  ;;  %v2290_v44 = vpack.c.b16 %v2282_v62, %v2282_v62  ;;  %v11236_v19 = vld [vmem:[%s15402_s27 + $0xd0] sm:$0xf]  ;;  %v14526_v62 = vld [vmem:[%s15402_s27 + $0xd4] sm:$0xf0] }
 0x463   : > { %v11237_v6 = vor.u32 %v14526_v62, %v11236_v19  ;;  %3159 = vmatpush.bf16.msra.mxu2 %v11301_v28  ;;  %v11220_v62 = vld [vmem:[%s15402_s27 + $0xb0] sm:$0xf]  ;;  %v14522_v28 = vld [vmem:[%s15402_s27 + $0xb4] sm:$0xf0] }
 0x464   : > { %2298 = vrot.lane.b32.xlu1 %v2290_v44, %s19312_s22  ;;  %2300 = vrot.lane.b32.xlu2 %v2291_v32, %s19312_s22  ;;  %v14540_v32 = vld [vmem:[%s15402_s27 + $0x144] sm:$0xf0]  ;;  %v11173_v44 = vor.u32 %v14510_v39, %v11172_v42  ;;  %v11221_v61 = vor.u32 %v14522_v28, %v11220_v62 }
 0x465   : > { %v11293_v24 = vor.u32 %v14540_v32, %v11292_v30  ;;  %3146 = vmatpush.bf16.msra.mxu1 %v11237_v6  ;;  %v11276_v6 = vld [vmem:[%s15402_s27 + $0x120] sm:$0xf] }
 0x466   : > { %3133 = vmatpush.bf16.msra.mxu0 %v11173_v44 }
 0x467   : > { %3160 = vmatpush.bf16.msra.mxu2 %v11293_v24 }
 0x469   : > { %3147 = vmatpush.bf16.msra.mxu1 %v11229_v35  ;;  %v14504_v35 = vld [vmem:[%s15402_s27 + $0x24] sm:$0xf0] }
 0x46a   : > { %3134 = vmatpush.bf16.msra.mxu0 %v11165_v38 }
 0x46d   : > { %v2230_v43 = vpop.permute.xlu0 %2229  ;;  %v2232_v63 = vpop.permute.xlu1 %2231  ;;  %3148 = vmatpush.bf16.msra.mxu1 %v11221_v61  ;;  %v14610_v61 = vld [vmem:[%s15402_s27 + $0x374] sm:$0xf0] }
 0x46e   : > { %v2238_v46 = vsel %vm1437_vm3, %v2228_v34, %v2230_v43  ;;  %v2239_v17 = vsel %vm1437_vm3, %v2230_v43, %v2232_v63  ;;  %v2248_v23 = vsel %vm1437_vm3, %v2232_v63, 0  ;;  %v11285_v34 = vor.u32 %v14538_v15, %v11284_v13  ;;  %3135 = vmatpush.bf16.msra.mxu0 %v11157_v49  ;;  %v14534_v43 = vld [vmem:[%s15402_s27 + $0x114] sm:$0xf0] }
 0x46f   : > { %v2263_v42 = vunpack.c.l.bf16 %v2238_v46  ;;  %v2264_v39 = vunpack.c.l.bf16 %v2239_v17  ;;  %v2265_v19 = vunpack.c.l.bf16 %v2248_v23  ;;  %v11148_v23 = vld [vmem:[%s15402_s27 + $0x20] sm:$0xf] }
 0x470   : > { %3161 = vmatpush.bf16.msra.mxu2 %v11285_v34  ;;  %v11149_v0 = vor.u32 %v14504_v35, %v11148_v23  ;;  %v11380_v34 = vld [vmem:[%s15402_s27 + $0x1f0] sm:$0xf]  ;;  %v14500_v23 = vld [vmem:[%s15402_s27 + $0x4] sm:$0xf0]  ;;  %v11196_v35 = vld [vmem:[%s15402_s27 + $0x80] sm:$0xf] }
 0x471   : > { %v16372_v30 = vmax.f32 %v16286_v7, %v2263_v42  ;;  %v16375_v32 = vmax.f32 %v16292_v18, %v2264_v39  ;;  %v16378_v44 = vmax.f32 %v16294_v1, %v2265_v19  ;;  %v11277_v18 = vor.u32 %v14536_v25, %v11276_v6  ;;  %v11268_v1 = vld [vmem:[%s15402_s27 + $0x110] sm:$0xf]  ;;  %v14520_v42 = vld [vmem:[%s15402_s27 + $0xa4] sm:$0xf0]  ;;  %v11260_v39 = vld [vmem:[%s15402_s27 + $0x100] sm:$0xf] }
 0x472   : > { %v11269_v38 = vor.u32 %v14534_v43, %v11268_v1  ;;  %v14532_v19 = vld [vmem:[%s15402_s27 + $0x104] sm:$0xf0]  ;;  %v11213_v62 = vor.u32 %v14520_v42, %v11212_v50  ;;  %v14562_v6 = vld [vmem:[%s15402_s27 + $0x1f4] sm:$0xf0]  ;;  %v11572_v25 = vld [vmem:[%s15402_s27 + $0x370] sm:$0xf]  ;;  %3136 = vmatpush.bf16.msra.mxu0 %v11149_v0 }
 0x473   : > { %v2276_v14 = vpack.c.bf16 %v16372_v30, %v16369_v10  ;;  %v2277_v7 = vpack.c.bf16 %v16378_v44, %v16375_v32  ;;  %v11261_v28 = vor.u32 %v14532_v19, %v11260_v39  ;;  %v11381_v49 = vor.u32 %v14562_v6, %v11380_v34  ;;  %v11372_v1 = vld [vmem:[%s15402_s27 + $0x1e0] sm:$0xf]  ;;  %v14516_v0 = vld [vmem:[%s15402_s27 + $0x84] sm:$0xf0]  ;;  %v11364_v42 = vld [vmem:[%s15402_s27 + $0x1d0] sm:$0xf] }
 0x474   : > { %3162 = vmatpush.bf16.msra.mxu2 %v11277_v18  ;;  %3149 = vmatpush.bf16.msra.mxu1 %v11213_v62  ;;  %v11573_v18 = vor.u32 %v14610_v61, %v11572_v25  ;;  %v14558_v39 = vld [vmem:[%s15402_s27 + $0x1d4] sm:$0xf0]  ;;  %v11197_v19 = vor.u32 %v14516_v0, %v11196_v35  ;;  %v11508_v6 = vld [vmem:[%s15402_s27 + $0x2f0] sm:$0xf] }
 0x475   : > { %v2286_v36 = vunpack.c.l.b16 %v2276_v14  ;;  %v2289_v27 = vunpack.c.h.b16 %v2277_v7  ;;  %v2288_v24 = vunpack.c.l.b16 %v2277_v7  ;;  %v2287_v46 = vunpack.c.h.b16 %v2276_v14  ;;  %v11140_v14 = vld [vmem:[%s15402_s27 + $0x10] sm:$0xf]  ;;  %v14502_v7 = vld [vmem:[%s15402_s27 + $0x14] sm:$0xf0]  ;;  %3170 = vmatpush.bf16.msra.mxu3 %v11381_v49 }
 0x476   : > { %v11365_v62 = vor.u32 %v14558_v39, %v11364_v42  ;;  %v14578_v34 = vld [vmem:[%s15402_s27 + $0x274] sm:$0xf0]  ;;  %v11556_v61 = vld [vmem:[%s15402_s27 + $0x350] sm:$0xf] }
 0x477   : > { %v2294_v63 = vpack.c.b16 %v2286_v36, %v2286_v36  ;;  %v2297_v13 = vpack.c.b16 %v2289_v27, %v2289_v27  ;;  %v2296_v15 = vpack.c.b16 %v2288_v24, %v2288_v24  ;;  %v2295_v17 = vpack.c.b16 %v2287_v46, %v2287_v46  ;;  %v11204_v27 = vld [vmem:[%s15402_s27 + $0x90] sm:$0xf]  ;;  %v14518_v24 = vld [vmem:[%s15402_s27 + $0x94] sm:$0xf0] }
 0x478   : > { %3163 = vmatpush.bf16.msra.mxu2 %v11269_v38  ;;  %v11141_v36 = vor.u32 %v14502_v7, %v11140_v14  ;;  %v11205_v43 = vor.u32 %v14518_v24, %v11204_v27  ;;  %v14594_v49 = vld [vmem:[%s15402_s27 + $0x2f4] sm:$0xf0]  ;;  %v14556_v27 = vld [vmem:[%s15402_s27 + $0x1c4] sm:$0xf0]  ;;  %v11436_v24 = vld [vmem:[%s15402_s27 + $0x260] sm:$0xf] }
 0x479   : > { %2306 = vrot.lane.b32.xlu0 %v2294_v63, %s19312_s22  ;;  %2312 = vrot.lane.b32.xlu2 %v2297_v13, %s19312_s22  ;;  %v14560_v63 = vld [vmem:[%s15402_s27 + $0x1e4] sm:$0xf0]  ;;  %v11564_v13 = vld [vmem:[%s15402_s27 + $0x360] sm:$0xf]  ;;  %v11509_v7 = vor.u32 %v14594_v49, %v11508_v6 }
 0x47a   : > { %2310 = vrot.lane.b32.xlu1 %v2296_v15, %s19312_s22  ;;  %v14608_v15 = vld [vmem:[%s15402_s27 + $0x364] sm:$0xf0]  ;;  %v11373_v38 = vor.u32 %v14560_v63, %v11372_v1  ;;  %3137 = vmatpush.bf16.msra.mxu0 %v11141_v36  ;;  %v14606_v14 = vld [vmem:[%s15402_s27 + $0x354] sm:$0xf0]  ;;  %v11356_v36 = vld [vmem:[%s15402_s27 + $0x1c0] sm:$0xf] }
 0x47b   : > { %v11565_v46 = vor.u32 %v14608_v15, %v11564_v13  ;;  %3150 = vmatpush.bf16.msra.mxu1 %v11205_v43  ;;  %v11357_v1 = vor.u32 %v14556_v27, %v11356_v36  ;;  %v14576_v43 = vld [vmem:[%s15402_s27 + $0x264] sm:$0xf0]  ;;  %v11500_v63 = vld [vmem:[%s15402_s27 + $0x2e0] sm:$0xf]  ;;  %v11428_v0 = vld [vmem:[%s15402_s27 + $0x250] sm:$0xf] }
 0x47c   : > { %3164 = vmatpush.bf16.msra.mxu2 %v11261_v28  ;;  %3171 = vmatpush.bf16.msra.mxu3 %v11373_v38  ;;  %v11444_v28 = vld [vmem:[%s15402_s27 + $0x270] sm:$0xf]  ;;  %v14592_v13 = vld [vmem:[%s15402_s27 + $0x2e4] sm:$0xf0]  ;;  %v11437_v15 = vor.u32 %v14576_v43, %v11436_v24  ;;  %v14574_v42 = vld [vmem:[%s15402_s27 + $0x254] sm:$0xf0] }
 0x47d   : > { %v11445_v25 = vor.u32 %v14578_v34, %v11444_v28  ;;  %v11501_v38 = vor.u32 %v14592_v13, %v11500_v63  ;;  %v11540_v28 = vld [vmem:[%s15402_s27 + $0x330] sm:$0xf]  ;;  %v11429_v34 = vor.u32 %v14574_v42, %v11428_v0  ;;  %v14602_v6 = vld [vmem:[%s15402_s27 + $0x334] sm:$0xf0]  ;;  %v14552_v49 = vld [vmem:[%s15402_s27 + $0x1a4] sm:$0xf0] }
 0x47e   : > { %v11484_v36 = vld [vmem:[%s15402_s27 + $0x2c0] sm:$0xf]  ;;  %v14588_v27 = vld [vmem:[%s15402_s27 + $0x2c4] sm:$0xf0]  ;;  %v14586_v42 = vld [vmem:[%s15402_s27 + $0x2b4] sm:$0xf0] }
 0x47f   : > { %3151 = vmatpush.bf16.msra.mxu1 %v11197_v19  ;;  %v11492_v19 = vld [vmem:[%s15402_s27 + $0x2d0] sm:$0xf]  ;;  %v11532_v24 = vld [vmem:[%s15402_s27 + $0x320] sm:$0xf]  ;;  %v11485_v13 = vor.u32 %v14588_v27, %v11484_v36  ;;  %v14584_v36 = vld [vmem:[%s15402_s27 + $0x2a4] sm:$0xf0] }
 0x480   : > { %3209 = vmatpush.bf16.msrb.mxu2 %v11573_v18  ;;  %3172 = vmatpush.bf16.msra.mxu3 %v11365_v62  ;;  %v11557_v18 = vor.u32 %v14606_v14, %v11556_v61  ;;  %v14590_v62 = vld [vmem:[%s15402_s27 + $0x2d4] sm:$0xf0]  ;;  %v11541_v14 = vor.u32 %v14602_v6, %v11540_v28  ;;  %v14548_v6 = vld [vmem:[%s15402_s27 + $0x184] sm:$0xf0]  ;;  %v11516_v27 = vld [vmem:[%s15402_s27 + $0x300] sm:$0xf] }
 0x481   : > { %2308 = vrot.lane.b32.xlu0 %v2295_v17, %s19312_s22  ;;  %v11132_v17 = vld [vmem:[%s15402_s27] sm:$0xf]  ;;  %v11493_v61 = vor.u32 %v14590_v62, %v11492_v19  ;;  %v14598_v19 = vld [vmem:[%s15402_s27 + $0x314] sm:$0xf0] }
 0x482   : > { %v11133_v50 = vor.u32 %v14500_v23, %v11132_v17  ;;  %v14604_v17 = vld [vmem:[%s15402_s27 + $0x344] sm:$0xf0]  ;;  %v11348_v23 = vld [vmem:[%s15402_s27 + $0x1b0] sm:$0xf] }
 0x483   : > { %3196 = vmatpush.bf16.msrb.mxu1 %v11509_v7  ;;  %v11420_v7 = vld [vmem:[%s15402_s27 + $0x240] sm:$0xf] }
 0x484   : > { %3210 = vmatpush.bf16.msrb.mxu2 %v11565_v46  ;;  %3138 = vmatpush.bf16.msra.mxu0 %v11133_v50  ;;  %v11548_v46 = vld [vmem:[%s15402_s27 + $0x340] sm:$0xf]  ;;  %v14554_v50 = vld [vmem:[%s15402_s27 + $0x1b4] sm:$0xf0] }
 0x485   : > { %v11549_v35 = vor.u32 %v14604_v17, %v11548_v46  ;;  %3173 = vmatpush.bf16.msra.mxu3 %v11357_v1  ;;  %v11349_v39 = vor.u32 %v14554_v50, %v11348_v23  ;;  %v14600_v1 = vld [vmem:[%s15402_s27 + $0x324] sm:$0xf0]  ;;  %v14550_v46 = vld [vmem:[%s15402_s27 + $0x194] sm:$0xf0]  ;;  %v11412_v23 = vld [vmem:[%s15402_s27 + $0x230] sm:$0xf] }
 0x486   : > { %v11476_v50 = vld [vmem:[%s15402_s27 + $0x2b0] sm:$0xf] }
 0x487   : > { %3197 = vmatpush.bf16.msrb.mxu1 %v11501_v38  ;;  %v11332_v38 = vld [vmem:[%s15402_s27 + $0x190] sm:$0xf]  ;;  %v11477_v62 = vor.u32 %v14586_v42, %v11476_v50  ;;  %v11628_v50 = vld [vmem:[%s15402_s27 + $0x3e0] sm:$0xf] }
 0x488   : > { %3183 = vmatpush.bf16.msrb.mxu0 %v11445_v25  ;;  %3211 = vmatpush.bf16.msrb.mxu2 %v11557_v18  ;;  %v11340_v25 = vld [vmem:[%s15402_s27 + $0x1a0] sm:$0xf]  ;;  %v14572_v18 = vld [vmem:[%s15402_s27 + $0x244] sm:$0xf0]  ;;  %v11333_v17 = vor.u32 %v14550_v46, %v11332_v38  ;;  %v11396_v38 = vld [vmem:[%s15402_s27 + $0x210] sm:$0xf] }
 0x489   : > { %3174 = vmatpush.bf16.msra.mxu3 %v11349_v39  ;;  %v11341_v43 = vor.u32 %v14552_v49, %v11340_v25  ;;  %v11421_v63 = vor.u32 %v14572_v18, %v11420_v7  ;;  %v11524_v39 = vld [vmem:[%s15402_s27 + $0x310] sm:$0xf]  ;;  %v11404_v49 = vld [vmem:[%s15402_s27 + $0x220] sm:$0xf]  ;;  %v14566_v46 = vld [vmem:[%s15402_s27 + $0x214] sm:$0xf0] }
 0x48a   : > { %v11525_v28 = vor.u32 %v14598_v19, %v11524_v39  ;;  %v11388_v19 = vld [vmem:[%s15402_s27 + $0x200] sm:$0xf] }
 0x48b   : > { %3198 = vmatpush.bf16.msrb.mxu1 %v11493_v61  ;;  %v14568_v61 = vld [vmem:[%s15402_s27 + $0x224] sm:$0xf0] }
 0x48c   : > { %3184 = vmatpush.bf16.msrb.mxu0 %v11437_v15  ;;  %3212 = vmatpush.bf16.msrb.mxu2 %v11549_v35  ;;  %v11533_v15 = vor.u32 %v14600_v1, %v11532_v24  ;;  %v14570_v35 = vld [vmem:[%s15402_s27 + $0x234] sm:$0xf0]  ;;  %v11405_v18 = vor.u32 %v14568_v61, %v11404_v49  ;;  %v14596_v24 = vld [vmem:[%s15402_s27 + $0x304] sm:$0xf0] }
 0x48d   : > { %3175 = vmatpush.bf16.msra.mxu3 %v11341_v43  ;;  %v11413_v0 = vor.u32 %v14570_v35, %v11412_v23  ;;  %v11517_v43 = vor.u32 %v14596_v24, %v11516_v27  ;;  %v11397_v23 = vor.u32 %v14566_v46, %v11396_v38  ;;  %v14582_v35 = vld [vmem:[%s15402_s27 + $0x294] sm:$0xf0]  ;;  %v14529_v27 = vld [vmem:[%s15402_s27 + $0xf4] sm:$0xf]  ;;  %v14527_v46 = vld [vmem:[%s15402_s27 + $0xe4] sm:$0xf] }
 0x48e   : > { %v14622_v49 = vld [vmem:[%s15402_s27 + $0x3d4] sm:$0xf0] }
 0x48f   : > { %3199 = vmatpush.bf16.msrb.mxu1 %v11485_v13  ;;  %v14626_v13 = vld [vmem:[%s15402_s27 + $0x3f4] sm:$0xf0] }
 0x490   : > { %3185 = vmatpush.bf16.msrb.mxu0 %v11429_v34  ;;  %3213 = vmatpush.bf16.msrb.mxu2 %v11541_v14  ;;  %v11324_v34 = vld [vmem:[%s15402_s27 + $0x180] sm:$0xf] }
 0x491   : > { %3176 = vmatpush.bf16.msra.mxu3 %v11333_v17  ;;  %v11325_v25 = vor.u32 %v14548_v6, %v11324_v34  ;;  %v11468_v14 = vld [vmem:[%s15402_s27 + $0x2a0] sm:$0xf]  ;;  %v11460_v17 = vld [vmem:[%s15402_s27 + $0x290] sm:$0xf]  ;;  %v14580_v34 = vld [vmem:[%s15402_s27 + $0x284] sm:$0xf0] }
 0x492   : > { %v11469_v1 = vor.u32 %v14584_v36, %v11468_v14  ;;  %v11461_v42 = vor.u32 %v14582_v35, %v11460_v17  ;;  %v11604_v35 = vld [vmem:[%s15402_s27 + $0x3b0] sm:$0xf] }
 0x493   : > { %3200 = vmatpush.bf16.msrb.mxu1 %v11477_v62  ;;  %v14564_v62 = vld [vmem:[%s15402_s27 + $0x204] sm:$0xf0] }
 0x494   : > { %3186 = vmatpush.bf16.msrb.mxu0 %v11421_v63  ;;  %3214 = vmatpush.bf16.msrb.mxu2 %v11533_v15  ;;  %v11636_v63 = vld [vmem:[%s15402_s27 + $0x3f0] sm:$0xf]  ;;  %v11389_v6 = vor.u32 %v14564_v62, %v11388_v19  ;;  %v11596_v19 = vld [vmem:[%s15402_s27 + $0x3a0] sm:$0xf]  ;;  %v14616_v62 = vld [vmem:[%s15402_s27 + $0x3a4] sm:$0xf0] }
 0x495   : > { %3177 = vmatpush.bf16.msra.mxu3 %v11325_v25  ;;  %v11637_v15 = vor.u32 %v14626_v13, %v11636_v63  ;;  %v11620_v25 = vld [vmem:[%s15402_s27 + $0x3d0] sm:$0xf]  ;;  %v14620_v63 = vld [vmem:[%s15402_s27 + $0x3c4] sm:$0xf0] }
 0x496   : > { %v11621_v36 = vor.u32 %v14622_v49, %v11620_v25  ;;  %v11230_v25 = vld [vmem:[%s15402_s27 + $0xc8] sm:$0xf0] }
 0x497   : > { %3201 = vmatpush.bf16.msrb.mxu1 %v11469_v1  ;;  %v11254_v1 = vld [vmem:[%s15402_s27 + $0xf8] sm:$0xf0] }
 0x498   : > { %3187 = vmatpush.bf16.msrb.mxu0 %v11413_v0  ;;  %3215 = vmatpush.bf16.msrb.mxu2 %v11525_v28  ;;  %v14624_v0 = vld [vmem:[%s15402_s27 + $0x3e4] sm:$0xf0]  ;;  %v11452_v28 = vld [vmem:[%s15402_s27 + $0x280] sm:$0xf] }
 0x499   : > { %3222 = vmatpush.bf16.msrb.mxu3 %v11637_v15  ;;  %v11629_v39 = vor.u32 %v14624_v0, %v11628_v50  ;;  %v11453_v14 = vor.u32 %v14580_v34, %v11452_v28  ;;  %v11257_v15 = vor.u32 %v14529_v27, %v11254_v1  ;;  %v14618_v50 = vld [vmem:[%s15402_s27 + $0x3b4] sm:$0xf0]  ;;  %v11597_v34 = vor.u32 %v14616_v62, %v11596_v19  ;;  %v11318_v1 = vld [vmem:[%s15402_s27 + $0x178] sm:$0xf0]  ;;  %v11214_v19 = vld [vmem:[%s15402_s27 + $0xa8] sm:$0xf0] }
 0x49a   : > { %v11605_v0 = vor.u32 %v14618_v50, %v11604_v35 }
 0x49b   : > { %3202 = vmatpush.bf16.msrb.mxu1 %v11461_v42  ;;  %v14525_v42 = vld [vmem:[%s15402_s27 + $0xd4] sm:$0xf] }
 0x49c   : > { %3188 = vmatpush.bf16.msrb.mxu0 %v11405_v18  ;;  %3216 = vmatpush.bf16.msrb.mxu2 %v11517_v43  ;;  %v11612_v43 = vld [vmem:[%s15402_s27 + $0x3c0] sm:$0xf] }
 0x49d   : > { %3223 = vmatpush.bf16.msrb.mxu3 %v11629_v39  ;;  %v11613_v38 = vor.u32 %v14620_v63, %v11612_v43  ;;  %v11238_v39 = vld [vmem:[%s15402_s27 + $0xd8] sm:$0xf0] }
 0x49e   : > { %v11241_v28 = vor.u32 %v14525_v42, %v11238_v39  ;;  %v14519_v39 = vld [vmem:[%s15402_s27 + $0xa4] sm:$0xf] }
 0x49f   : > { %3203 = vmatpush.bf16.msrb.mxu1 %v11453_v14  ;;  %v11588_v14 = vld [vmem:[%s15402_s27 + $0x390] sm:$0xf] }
 0x4a0   : > { %3189 = vmatpush.bf16.msrb.mxu0 %v11397_v23  ;;  %v11246_v23 = vld [vmem:[%s15402_s27 + $0xe8] sm:$0xf0] }
 0x4a1   : > { %3224 = vmatpush.bf16.msrb.mxu3 %v11621_v36 }
 0x4a4   : > { %3190 = vmatpush.bf16.msrb.mxu0 %v11389_v6  ;;  %v14523_v6 = vld [vmem:[%s15402_s27 + $0xc4] sm:$0xf] }
 0x4a5   : > { %3225 = vmatpush.bf16.msrb.mxu3 %v11613_v38  ;;  %v11233_v43 = vor.u32 %v14523_v6, %v11230_v25  ;;  %v11190_v25 = vld [vmem:[%s15402_s27 + $0x78] sm:$0xf0] }
 0x4a9   : > { %3226 = vmatpush.bf16.msrb.mxu3 %v11605_v0 }
 0x4ad   : > { %3227 = vmatpush.bf16.msrb.mxu3 %v11597_v34  ;;  %v14513_v34 = vld [vmem:[%s15402_s27 + $0x74] sm:$0xf] }
 0x4b6   : > { %v16459_v7 = vpop.permute.xlu2 %2302 }
 0x4be   : > { %v16478_v61 = vpop.permute.xlu2 %2300 }
 0x4bf   : > { %v2315_v18 = vsel %vm1191_vm0, %v16478_v61, %v16459_v7 }
 0x4c0   : > { %v2340_v24 = vunpack.c.l.bf16 %v2315_v18  ;;  %v14614_v18 = vld [vmem:[%s15402_s27 + $0x394] sm:$0xf0] }
 0x4c1   : > { %v11589_v63 = vor.u32 %v14614_v18, %v11588_v14  ;;  %v14541_v14 = vld [vmem:[%s15402_s27 + $0x154] sm:$0xf]  ;;  %v11302_v18 = vld [vmem:[%s15402_s27 + $0x158] sm:$0xf0] }
 0x4c2   : > { %v2348_v13 = vmax.f32 %v16326_v12, %v2340_v24  ;;  %v11249_v12 = vor.u32 %v14527_v46, %v11246_v23  ;;  %v14545_v24 = vld [vmem:[%s15402_s27 + $0x174] sm:$0xf]  ;;  %v11580_v46 = vld [vmem:[%s15402_s27 + $0x380] sm:$0xf]  ;;  %v14612_v23 = vld [vmem:[%s15402_s27 + $0x384] sm:$0xf0] }
 0x4c3   : > { %v11321_v35 = vor.u32 %v14545_v24, %v11318_v1  ;;  %3228 = vmatpush.bf16.msrb.mxu3 %v11589_v63  ;;  %v11581_v42 = vor.u32 %v14612_v23, %v11580_v46  ;;  %v11206_v24 = vld [vmem:[%s15402_s27 + $0x98] sm:$0xf0]  ;;  %v14511_v63 = vld [vmem:[%s15402_s27 + $0x64] sm:$0xf]  ;;  %v11294_v46 = vld [vmem:[%s15402_s27 + $0x148] sm:$0xf0] }
 0x4c4   : > { %v16489_v17 = vpack.c.bf16 %v2348_v13, %v2348_v13  ;;  %v14521_v13 = vld [vmem:[%s15402_s27 + $0xb4] sm:$0xf] }
 0x4c6   : > { %3152 = vmatmul.bf16.vlgmr.msra.gmra.mxu1 %v16489_v17 }
 0x4c7   : > { %3248 = vmatpush.bf16.msra.mxu1 %v11257_v15  ;;  %v11222_v15 = vld [vmem:[%s15402_s27 + $0xb8] sm:$0xf0]  ;;  %3229 = vmatpush.bf16.msrb.mxu3 %v11581_v42 }
 0x4c8   : > { %v11225_v0 = vor.u32 %v14521_v13, %v11222_v15  ;;  %v11182_v15 = vld [vmem:[%s15402_s27 + $0x68] sm:$0xf0]  ;;  %v11174_v42 = vld [vmem:[%s15402_s27 + $0x58] sm:$0xf0] }
 0x4cb   : > { %3249 = vmatpush.bf16.msra.mxu1 %v11249_v12  ;;  %v11310_v12 = vld [vmem:[%s15402_s27 + $0x168] sm:$0xf0] }
 0x4ce   : > { %v16501_v49 = vpop.permute.xlu0 %2304 }
 0x4cf   : > { %v2316_v36 = vsel %vm1191_vm0, %v16459_v7, %v16501_v49  ;;  %3250 = vmatpush.bf16.msra.mxu1 %v11241_v28  ;;  %v14543_v7 = vld [vmem:[%s15402_s27 + $0x164] sm:$0xf] }
 0x4d0   : > { %v2341_v27 = vunpack.c.l.bf16 %v2316_v36  ;;  %v11313_v28 = vor.u32 %v14543_v7, %v11310_v12  ;;  %v11217_v36 = vor.u32 %v14519_v39, %v11214_v19  ;;  %v11198_v7 = vld [vmem:[%s15402_s27 + $0x88] sm:$0xf0]  ;;  %v14537_v39 = vld [vmem:[%s15402_s27 + $0x134] sm:$0xf]  ;;  %v11286_v19 = vld [vmem:[%s15402_s27 + $0x138] sm:$0xf0] }
 0x4d2   : > { %v2349_v38 = vmax.f32 %v16314_v16, %v2341_v27  ;;  %v14517_v27 = vld [vmem:[%s15402_s27 + $0x94] sm:$0xf] }
 0x4d3   : > { %3251 = vmatpush.bf16.msra.mxu1 %v11233_v43  ;;  %v11305_v43 = vor.u32 %v14541_v14, %v11302_v18  ;;  %v11209_v23 = vor.u32 %v14517_v27, %v11206_v24  ;;  %v11278_v14 = vld [vmem:[%s15402_s27 + $0x128] sm:$0xf0]  ;;  %v14505_v27 = vld [vmem:[%s15402_s27 + $0x34] sm:$0xf]  ;;  %v11158_v24 = vld [vmem:[%s15402_s27 + $0x38] sm:$0xf0] }
 0x4d4   : > { %v16515_v50 = vpack.c.bf16 %v2349_v38, %v2349_v38  ;;  %v14539_v38 = vld [vmem:[%s15402_s27 + $0x144] sm:$0xf] }
 0x4d5   : > { %v11297_v12 = vor.u32 %v14539_v38, %v11294_v46  ;;  %v2313_v38 = vpop.permute.xlu2 %2312 }
 0x4d6   : > { %3165 = vmatmul.bf16.vlgmr.msra.gmra.mxu2 %v16515_v50  ;;  %v2299_v16 = vpop.permute.xlu1 %2298 }
 0x4d7   : > { %3261 = vmatpush.bf16.msra.mxu2 %v11321_v35  ;;  %v2314_v62 = vsel %vm1191_vm0, %v2299_v16, %v16478_v61  ;;  %3252 = vmatpush.bf16.msra.mxu1 %v11225_v0  ;;  %v11193_v61 = vor.u32 %v14513_v34, %v11190_v25  ;;  %v14515_v35 = vld [vmem:[%s15402_s27 + $0x84] sm:$0xf]  ;;  %v14509_v0 = vld [vmem:[%s15402_s27 + $0x54] sm:$0xf] }
 0x4d8   : > { %v2339_v6 = vunpack.c.l.bf16 %v2314_v62  ;;  %v11201_v16 = vor.u32 %v14515_v35, %v11198_v7  ;;  %v11177_v62 = vor.u32 %v14509_v0, %v11174_v42  ;;  %v14507_v34 = vld [vmem:[%s15402_s27 + $0x44] sm:$0xf]  ;;  %v11150_v7 = vld [vmem:[%s15402_s27 + $0x28] sm:$0xf0]  ;;  %v14561_v0 = vld [vmem:[%s15402_s27 + $0x1f4] sm:$0xf] }
 0x4d9   : > { %v14535_v25 = vld [vmem:[%s15402_s27 + $0x124] sm:$0xf]  ;;  %v11382_v42 = vld [vmem:[%s15402_s27 + $0x1f8] sm:$0xf0] }
 0x4da   : > { %v2347_v1 = vmax.f32 %v16323_v41, %v2339_v6  ;;  %v11185_v41 = vor.u32 %v14511_v63, %v11182_v15  ;;  %v11166_v6 = vld [vmem:[%s15402_s27 + $0x48] sm:$0xf0]  ;;  %v11161_v63 = vor.u32 %v14505_v27, %v11158_v24  ;;  %v14503_v35 = vld [vmem:[%s15402_s27 + $0x24] sm:$0xf] }
 0x4db   : > { %3262 = vmatpush.bf16.msra.mxu2 %v11313_v28  ;;  %3253 = vmatpush.bf16.msra.mxu1 %v11217_v36  ;;  %v11289_v28 = vor.u32 %v14537_v39, %v11286_v19  ;;  %v11169_v18 = vor.u32 %v14507_v34, %v11166_v6  ;;  %v11281_v36 = vor.u32 %v14535_v25, %v11278_v14  ;;  %v14531_v19 = vld [vmem:[%s15402_s27 + $0x104] sm:$0xf]  ;;  %v11574_v34 = vld [vmem:[%s15402_s27 + $0x378] sm:$0xf0]  ;;  %v14501_v14 = vld [vmem:[%s15402_s27 + $0x14] sm:$0xf] }
 0x4dc   : > { %v16532_v13 = vpack.c.bf16 %v2347_v1, %v2347_v1  ;;  %v14533_v1 = vld [vmem:[%s15402_s27 + $0x114] sm:$0xf]  ;;  %v11385_v25 = vor.u32 %v14561_v0, %v11382_v42  ;;  %v14559_v24 = vld [vmem:[%s15402_s27 + $0x1e4] sm:$0xf]  ;;  %v11134_v42 = vld [vmem:[%s15402_s27 + $0x8] sm:$0xf0] }
 0x4dd   : > { %v14499_v0 = vld [vmem:[%s15402_s27 + $0x4] sm:$0xf] }
 0x4de   : > { %3139 = vmatmul.bf16.vlgmr.msra.gmra.mxu0 %v16532_v13 }
 0x4df   : > { %3235 = vmatpush.bf16.msra.mxu0 %v11193_v61  ;;  %3263 = vmatpush.bf16.msra.mxu2 %v11305_v43  ;;  %v11270_v61 = vld [vmem:[%s15402_s27 + $0x118] sm:$0xf0] }
 0x4e0   : > { %3254 = vmatpush.bf16.msra.mxu1 %v11209_v23  ;;  %v11273_v15 = vor.u32 %v14533_v1, %v11270_v61  ;;  %v11374_v1 = vld [vmem:[%s15402_s27 + $0x1e8] sm:$0xf0] }
 0x4e3   : > { %3236 = vmatpush.bf16.msra.mxu0 %v11185_v41  ;;  %3264 = vmatpush.bf16.msra.mxu2 %v11297_v12 }
 0x4e4   : > { %3255 = vmatpush.bf16.msra.mxu1 %v11201_v16  ;;  %v11262_v16 = vld [vmem:[%s15402_s27 + $0x108] sm:$0xf0] }
 0x4e5   : > { %v11265_v27 = vor.u32 %v14531_v19, %v11262_v16  ;;  %v14557_v16 = vld [vmem:[%s15402_s27 + $0x1d4] sm:$0xf] }
 0x4e7   : > { %3237 = vmatpush.bf16.msra.mxu0 %v11177_v62  ;;  %3265 = vmatpush.bf16.msra.mxu2 %v11289_v28  ;;  %v14609_v28 = vld [vmem:[%s15402_s27 + $0x374] sm:$0xf] }
 0x4e8   : > { %v11577_v61 = vor.u32 %v14609_v28, %v11574_v34  ;;  %v11446_v28 = vld [vmem:[%s15402_s27 + $0x278] sm:$0xf0] }
 0x4eb   : > { %v2307_v43 = vpop.permute.xlu0 %2306  ;;  %3238 = vmatpush.bf16.msra.mxu0 %v11169_v18  ;;  %3266 = vmatpush.bf16.msra.mxu2 %v11281_v36  ;;  %v11142_v18 = vld [vmem:[%s15402_s27 + $0x18] sm:$0xf0] }
 0x4ec   : > { %v2317_v46 = vsel %vm1191_vm0, %v16501_v49, %v2307_v43  ;;  %v2311_v23 = vpop.permute.xlu1 %2310  ;;  %v11153_v49 = vor.u32 %v14503_v35, %v11150_v7  ;;  %v2329_v35 = vsel %vm1191_vm0, %v2313_v38, 0 }
 0x4ed   : > { %v2342_v41 = vunpack.c.l.bf16 %v2317_v46  ;;  %v2320_v12 = vsel %vm1191_vm0, %v2311_v23, %v2313_v38  ;;  %v11566_v46 = vld [vmem:[%s15402_s27 + $0x368] sm:$0xf0]  ;;  %v11366_v38 = vld [vmem:[%s15402_s27 + $0x1d8] sm:$0xf0] }
 0x4ee   : > { %v2345_v39 = vunpack.c.l.bf16 %v2320_v12  ;;  %v11377_v12 = vor.u32 %v14559_v24, %v11374_v1  ;;  %v11369_v24 = vor.u32 %v14557_v16, %v11366_v38  ;;  %v14553_v38 = vld [vmem:[%s15402_s27 + $0x1b4] sm:$0xf] }
 0x4ef   : > { %v2350_v62 = vmax.f32 %v16316_v22, %v2342_v41  ;;  %3239 = vmatpush.bf16.msra.mxu0 %v11161_v63  ;;  %3267 = vmatpush.bf16.msra.mxu2 %v11273_v15  ;;  %v14607_v15 = vld [vmem:[%s15402_s27 + $0x364] sm:$0xf] }
 0x4f0   : > { %v2353_v6 = vmax.f32 %v16375_v32, %v2345_v39  ;;  %v11145_v32 = vor.u32 %v14501_v14, %v11142_v18  ;;  %v11558_v14 = vld [vmem:[%s15402_s27 + $0x358] sm:$0xf0]  ;;  %v2346_v18 = vunpack.c.l.bf16 %v2329_v35  ;;  %v14591_v35 = vld [vmem:[%s15402_s27 + $0x2e4] sm:$0xf] }
 0x4f1   : > { %v16567_v36 = vpack.c.bf16 %v2350_v62, %v2350_v62  ;;  %v14577_v62 = vld [vmem:[%s15402_s27 + $0x274] sm:$0xf] }
 0x4f2   : > { %v16571_v22 = vpack.c.bf16 %v2353_v6, %v2353_v6 }
 0x4f3   : > { %3178 = vmatmul.bf16.vlgmr.msra.gmra.mxu3 %v16567_v36  ;;  %v2309_v63 = vpop.permute.xlu0 %2308  ;;  %3240 = vmatpush.bf16.msra.mxu0 %v11153_v49  ;;  %v11569_v49 = vor.u32 %v14607_v15, %v11566_v46  ;;  %v14555_v15 = vld [vmem:[%s15402_s27 + $0x1c4] sm:$0xf] }
 0x4f4   : > { %3274 = vmatpush.bf16.msra.mxu3 %v11385_v25  ;;  %v2318_v7 = vsel %vm1191_vm0, %v2307_v43, %v2309_v63  ;;  %v2319_v41 = vsel %vm1191_vm0, %v2309_v63, %v2311_v23  ;;  %3217 = vmatmul.bf16.vlgmr.msrb.gmra.mxu2 %v16571_v22  ;;  %v14593_v43 = vld [vmem:[%s15402_s27 + $0x2f4] sm:$0xf]  ;;  %v11510_v23 = vld [vmem:[%s15402_s27 + $0x2f8] sm:$0xf0]  ;;  %v11449_v63 = vor.u32 %v14577_v62, %v11446_v28 }
 0x4f5   : > { %v2343_v39 = vunpack.c.l.bf16 %v2318_v7  ;;  %v2344_v19 = vunpack.c.l.bf16 %v2319_v41  ;;  %3268 = vmatpush.bf16.msra.mxu2 %v11265_v27  ;;  %v14605_v25 = vld [vmem:[%s15402_s27 + $0x354] sm:$0xf]  ;;  %v11137_v27 = vor.u32 %v14499_v0, %v11134_v42  ;;  %v11438_v7 = vld [vmem:[%s15402_s27 + $0x268] sm:$0xf0]  ;;  %v11350_v62 = vld [vmem:[%s15402_s27 + $0x1b8] sm:$0xf0] }
 0x4f6   : > { %v11561_v46 = vor.u32 %v14605_v25, %v11558_v14  ;;  %v11502_v41 = vld [vmem:[%s15402_s27 + $0x2e8] sm:$0xf0]  ;;  %v11353_v25 = vor.u32 %v14553_v38, %v11350_v62  ;;  %v11414_v38 = vld [vmem:[%s15402_s27 + $0x238] sm:$0xf0]  ;;  %v14585_v62 = vld [vmem:[%s15402_s27 + $0x2b4] sm:$0xf] }
 0x4f7   : > { %v2351_v34 = vmax.f32 %v16369_v10, %v2343_v39  ;;  %v2352_v6 = vmax.f32 %v16372_v30, %v2344_v19  ;;  %3241 = vmatpush.bf16.msra.mxu0 %v11145_v32  ;;  %v11513_v10 = vor.u32 %v14593_v43, %v11510_v23  ;;  %v11358_v30 = vld [vmem:[%s15402_s27 + $0x1c8] sm:$0xf0]  ;;  %v14575_v32 = vld [vmem:[%s15402_s27 + $0x264] sm:$0xf]  ;;  %v2354_v39 = vmax.f32 %v16378_v44, %v2346_v18  ;;  %v11430_v43 = vld [vmem:[%s15402_s27 + $0x258] sm:$0xf0] }
 0x4f8   : > { %3275 = vmatpush.bf16.msra.mxu3 %v11377_v12  ;;  %v14603_v12 = vld [vmem:[%s15402_s27 + $0x344] sm:$0xf]  ;;  %v11550_v0 = vld [vmem:[%s15402_s27 + $0x348] sm:$0xf0]  ;;  %v11361_v42 = vor.u32 %v14555_v15, %v11358_v30  ;;  %v11441_v19 = vor.u32 %v14575_v32, %v11438_v7  ;;  %v11505_v16 = vor.u32 %v14591_v35, %v11502_v41  ;;  %v14589_v23 = vld [vmem:[%s15402_s27 + $0x2d4] sm:$0xf] }
 0x4f9   : > { %3313 = vmatpush.bf16.msrb.mxu2 %v11577_v61  ;;  %v16592_v1 = vpack.c.bf16 %v2351_v34, %v2351_v34  ;;  %v16594_v61 = vpack.c.bf16 %v2352_v6, %v2352_v6  ;;  %v11553_v28 = vor.u32 %v14603_v12, %v11550_v0  ;;  %v11494_v34 = vld [vmem:[%s15402_s27 + $0x2d8] sm:$0xf0]  ;;  %v14601_v6 = vld [vmem:[%s15402_s27 + $0x334] sm:$0xf]  ;;  %v16615_v14 = vpack.c.bf16 %v2354_v39, %v2354_v39  ;;  %v11422_v30 = vld [vmem:[%s15402_s27 + $0x248] sm:$0xf0] }
 0x4fa   : > { %v11542_v44 = vld [vmem:[%s15402_s27 + $0x338] sm:$0xf0]  ;;  %v14587_v32 = vld [vmem:[%s15402_s27 + $0x2c4] sm:$0xf]  ;;  %v11534_v35 = vld [vmem:[%s15402_s27 + $0x328] sm:$0xf0] }
 0x4fb   : > { %3191 = vmatmul.bf16.vlgmr.msrb.gmra.mxu0 %v16592_v1  ;;  %3204 = vmatmul.bf16.vlgmr.msrb.gmra.mxu1 %v16594_v61  ;;  %v11545_v15 = vor.u32 %v14601_v6, %v11542_v44  ;;  %v14599_v7 = vld [vmem:[%s15402_s27 + $0x324] sm:$0xf]  ;;  %v11334_v39 = vld [vmem:[%s15402_s27 + $0x198] sm:$0xf0]  ;;  %v11326_v44 = vld [vmem:[%s15402_s27 + $0x188] sm:$0xf0] }
 0x4fc   : > { %3242 = vmatpush.bf16.msra.mxu0 %v11137_v27  ;;  %3276 = vmatpush.bf16.msra.mxu3 %v11369_v24  ;;  %v11497_v27 = vor.u32 %v14589_v23, %v11494_v34  ;;  %v14551_v24 = vld [vmem:[%s15402_s27 + $0x1a4] sm:$0xf] }
 0x4fd   : > { %3314 = vmatpush.bf16.msrb.mxu2 %v11569_v49  ;;  %3300 = vmatpush.bf16.msrb.mxu1 %v11513_v10  ;;  %v14573_v49 = vld [vmem:[%s15402_s27 + $0x254] sm:$0xf]  ;;  %v14571_v10 = vld [vmem:[%s15402_s27 + $0x244] sm:$0xf] }
 0x4fe   : > { %v11433_v18 = vor.u32 %v14573_v49, %v11430_v43  ;;  %v11425_v12 = vor.u32 %v14571_v10, %v11422_v30  ;;  %v14597_v49 = vld [vmem:[%s15402_s27 + $0x314] sm:$0xf]  ;;  %v14547_v23 = vld [vmem:[%s15402_s27 + $0x184] sm:$0xf] }
 0x4ff   : > { %v14595_v10 = vld [vmem:[%s15402_s27 + $0x304] sm:$0xf]  ;;  %v14625_v30 = vld [vmem:[%s15402_s27 + $0x3f4] sm:$0xf] }
 0x500   : > { %3287 = vmatpush.bf16.msrb.mxu0 %v11449_v63  ;;  %3277 = vmatpush.bf16.msra.mxu3 %v11361_v42  ;;  %v11342_v63 = vld [vmem:[%s15402_s27 + $0x1a8] sm:$0xf0]  ;;  %v14549_v42 = vld [vmem:[%s15402_s27 + $0x194] sm:$0xf] }
 0x501   : > { %3315 = vmatpush.bf16.msrb.mxu2 %v11561_v46  ;;  %3301 = vmatpush.bf16.msrb.mxu1 %v11505_v16  ;;  %v11486_v46 = vld [vmem:[%s15402_s27 + $0x2c8] sm:$0xf0]  ;;  %v11345_v41 = vor.u32 %v14551_v24, %v11342_v63  ;;  %v11537_v16 = vor.u32 %v14599_v7, %v11534_v35  ;;  %v11337_v43 = vor.u32 %v14549_v42, %v11334_v39  ;;  %v14583_v24 = vld [vmem:[%s15402_s27 + $0x2a4] sm:$0xf]  ;;  %v11462_v42 = vld [vmem:[%s15402_s27 + $0x298] sm:$0xf0] }
 0x502   : > { %v11489_v0 = vor.u32 %v14587_v32, %v11486_v46  ;;  %v11470_v63 = vld [vmem:[%s15402_s27 + $0x2a8] sm:$0xf0]  ;;  %v11638_v32 = vld [vmem:[%s15402_s27 + $0x3f8] sm:$0xf0]  ;;  %v11329_v46 = vor.u32 %v14547_v23, %v11326_v44  ;;  %v14623_v39 = vld [vmem:[%s15402_s27 + $0x3e4] sm:$0xf] }
 0x503   : > { %3230 = vmatmul.bf16.vlgmr.msrb.gmra.mxu3 %v16615_v14  ;;  %v11473_v35 = vor.u32 %v14583_v24, %v11470_v63  ;;  %v14621_v23 = vld [vmem:[%s15402_s27 + $0x3d4] sm:$0xf] }
 0x504   : > { %3288 = vmatpush.bf16.msrb.mxu0 %v11441_v19  ;;  %3269 = vmatmul.bf16.vlgmr.msra.gmra.mxu2 %v16515_v50  ;;  %v14569_v19 = vld [vmem:[%s15402_s27 + $0x234] sm:$0xf]  ;;  %v11478_v50 = vld [vmem:[%s15402_s27 + $0x2b8] sm:$0xf0] }
 0x505   : > { %3316 = vmatpush.bf16.msrb.mxu2 %v11553_v28  ;;  %3278 = vmatpush.bf16.msra.mxu3 %v11353_v25  ;;  %v11526_v28 = vld [vmem:[%s15402_s27 + $0x318] sm:$0xf0]  ;;  %v11417_v34 = vor.u32 %v14569_v19, %v11414_v38  ;;  %v11481_v6 = vor.u32 %v14585_v62, %v11478_v50  ;;  %v14567_v25 = vld [vmem:[%s15402_s27 + $0x224] sm:$0xf]  ;;  %v11630_v19 = vld [vmem:[%s15402_s27 + $0x3e8] sm:$0xf0] }
 0x506   : > { %3302 = vmatpush.bf16.msrb.mxu1 %v11497_v27  ;;  %v11529_v27 = vor.u32 %v14597_v49, %v11526_v28  ;;  %v11633_v62 = vor.u32 %v14623_v39, %v11630_v19  ;;  %v14563_v50 = vld [vmem:[%s15402_s27 + $0x204] sm:$0xf]  ;;  %v11390_v49 = vld [vmem:[%s15402_s27 + $0x208] sm:$0xf0]  ;;  %v14617_v24 = vld [vmem:[%s15402_s27 + $0x3b4] sm:$0xf] }
 0x507   : > { %v14579_v28 = vld [vmem:[%s15402_s27 + $0x284] sm:$0xf] }
 0x508   : > { %3289 = vmatpush.bf16.msrb.mxu0 %v11433_v18  ;;  %v11406_v18 = vld [vmem:[%s15402_s27 + $0x228] sm:$0xf0] }
 0x509   : > { %3317 = vmatpush.bf16.msrb.mxu2 %v11545_v15  ;;  %3279 = vmatpush.bf16.msra.mxu3 %v11345_v41  ;;  %v11518_v15 = vld [vmem:[%s15402_s27 + $0x308] sm:$0xf0]  ;;  %v11409_v7 = vor.u32 %v14567_v25, %v11406_v18  ;;  %v14619_v18 = vld [vmem:[%s15402_s27 + $0x3c4] sm:$0xf] }
 0x50a   : > { %3303 = vmatpush.bf16.msrb.mxu1 %v11489_v0  ;;  %v11521_v41 = vor.u32 %v14595_v10, %v11518_v15  ;;  %v14581_v0 = vld [vmem:[%s15402_s27 + $0x294] sm:$0xf]  ;;  %v14615_v10 = vld [vmem:[%s15402_s27 + $0x3a4] sm:$0xf]  ;;  %v11598_v15 = vld [vmem:[%s15402_s27 + $0x3a8] sm:$0xf0] }
 0x50b   : > { %3243 = vmatmul.bf16.vlgmr.msra.gmra.mxu0 %v16532_v13  ;;  %3256 = vmatmul.bf16.vlgmr.msra.gmra.mxu1 %v16489_v17  ;;  %v14565_v13 = vld [vmem:[%s15402_s27 + $0x214] sm:$0xf]  ;;  %v11398_v17 = vld [vmem:[%s15402_s27 + $0x218] sm:$0xf0]  ;;  %v11465_v38 = vor.u32 %v14581_v0, %v11462_v42 }
 0x50c   : > { %3290 = vmatpush.bf16.msrb.mxu0 %v11425_v12  ;;  %v11641_v12 = vor.u32 %v14625_v30, %v11638_v32  ;;  %v11601_v30 = vor.u32 %v14615_v10, %v11598_v15  ;;  %v14613_v32 = vld [vmem:[%s15402_s27 + $0x394] sm:$0xf] }
 0x50d   : > { %3318 = vmatpush.bf16.msrb.mxu2 %v11537_v16  ;;  %3280 = vmatpush.bf16.msra.mxu3 %v11337_v43  ;;  %v11401_v16 = vor.u32 %v14565_v13, %v11398_v17  ;;  %v11454_v43 = vld [vmem:[%s15402_s27 + $0x288] sm:$0xf0] }
 0x50e   : > { %3304 = vmatpush.bf16.msrb.mxu1 %v11481_v6  ;;  %v11393_v6 = vor.u32 %v14563_v50, %v11390_v49  ;;  %v11457_v44 = vor.u32 %v14579_v28, %v11454_v43 }
 0x510   : > { %3291 = vmatpush.bf16.msrb.mxu0 %v11417_v34  ;;  %v11622_v34 = vld [vmem:[%s15402_s27 + $0x3d8] sm:$0xf0] }
 0x511   : > { %3319 = vmatpush.bf16.msrb.mxu2 %v11529_v27  ;;  %3281 = vmatpush.bf16.msra.mxu3 %v11329_v46  ;;  %v11625_v25 = vor.u32 %v14621_v23, %v11622_v34  ;;  %v11614_v27 = vld [vmem:[%s15402_s27 + $0x3c8] sm:$0xf0]  ;;  %v11590_v46 = vld [vmem:[%s15402_s27 + $0x398] sm:$0xf0] }
 0x512   : > { %3305 = vmatpush.bf16.msrb.mxu1 %v11473_v35  ;;  %v14611_v35 = vld [vmem:[%s15402_s27 + $0x384] sm:$0xf] }
 0x514   : > { %3292 = vmatpush.bf16.msrb.mxu0 %v11409_v7  ;;  %3282 = vmatmul.bf16.vlgmr.msra.gmra.mxu3 %v16567_v36  ;;  %v11617_v36 = vor.u32 %v14619_v18, %v11614_v27  ;;  %v11593_v7 = vor.u32 %v14613_v32, %v11590_v46 }
 0x515   : > { %3320 = vmatpush.bf16.msrb.mxu2 %v11521_v41  ;;  %3326 = vmatpush.bf16.msrb.mxu3 %v11641_v12  ;;  %v11582_v41 = vld [vmem:[%s15402_s27 + $0x388] sm:$0xf0] }
 0x516   : > { %3306 = vmatpush.bf16.msrb.mxu1 %v11465_v38  ;;  %v11585_v12 = vor.u32 %v14611_v35, %v11582_v41  ;;  %v3356_v35 = vld [vmem:[#allocation1] sm:$0xff]  ;;  %v3357_v41 = vld [vmem:[#allocation1 + $0x9] sm:$0xff] }
 0x518   : > { %3321 = vmatmul.bf16.vlgmr.msrb.gmra.mxu2 %v16571_v22  ;;  %3293 = vmatpush.bf16.msrb.mxu0 %v11401_v16  ;;  %v11606_v22 = vld [vmem:[%s15402_s27 + $0x3b8] sm:$0xf0] }
 0x519   : > { %3327 = vmatpush.bf16.msrb.mxu3 %v11633_v62  ;;  %v11609_v63 = vor.u32 %v14617_v24, %v11606_v22 }
 0x51a   : > { %3307 = vmatpush.bf16.msrb.mxu1 %v11457_v44 }
 0x51c   : > { %3294 = vmatpush.bf16.msrb.mxu0 %v11393_v6 }
 0x51d   : > { %3328 = vmatpush.bf16.msrb.mxu3 %v11625_v25  ;;  %3308 = vmatmul.bf16.vlgmr.msrb.gmra.mxu1 %v16594_v61 }
 0x51f   : > { %3295 = vmatmul.bf16.vlgmr.msrb.gmra.mxu0 %v16592_v1 }
 0x521   : > { %3329 = vmatpush.bf16.msrb.mxu3 %v11617_v36 }
 0x525   : > { %3330 = vmatpush.bf16.msrb.mxu3 %v11609_v63 }
 0x529   : > { %3331 = vmatpush.bf16.msrb.mxu3 %v11601_v30 }
 0x52d   : > { %3332 = vmatpush.bf16.msrb.mxu3 %v11593_v7 }
 0x531   : > { %3333 = vmatpush.bf16.msrb.mxu3 %v11585_v12 }
 0x534   : > { %3334 = vmatmul.bf16.vlgmr.msrb.gmra.mxu3 %v16615_v14 }
 0x543   : > { %v3153_v1 = vpop.f32.mrf.mxu1 }
 0x54b   : > { %v3155_v13 = vpop.f32.mrf.mxu1 }
 0x559   : > { %v3166_v61 = vpop.f32.mrf.mxu2 }
 0x55b   : > { %v3140_v17 = vpop.f32.mrf.mxu0 }
 0x55c   : > { %v3154_v0 = vadd.f32 %v3153_v1, %v3140_v17  ;;  %v16675_v1 = vld [vmem:[%s15392_s12 + $0x2] sm:$0x3] }
 0x55d   : > { %3381 = vst [vmem:[#allocation1] ss:$9 sm:$0xff] %v16675_v1 }
 0x55e   : > { %v3167_v42 = vadd.f32 %v3166_v61, %v3154_v0 }
 0x561   : > { %v3168_v39 = vpop.f32.mrf.mxu2 }
 0x563   : > { %v3142_v19 = vpop.f32.mrf.mxu0 }
 0x576   : > { %v3179_v16 = vpop.f32.mrf.mxu3 }
 0x577   : > { %v3218_v38 = vpop.f32.mrf.mxu2  ;;  %v3180_v13 = vadd.f32 %v3179_v16, %v3167_v42  ;;  %v3383_v42 = vld [vmem:[#allocation1 + $0x9] sm:$0xff]  ;;  %v3382_v16 = vld [vmem:[#allocation1] sm:$0xff] }
 0x578   : > { %v3192_v62 = vpop.f32.mrf.mxu0  ;;  %v3205_v50 = vpop.f32.mrf.mxu1  ;;  %3544 = vst [vmem:[#allocation1] ss:$9 sm:$0xff] %v15583_v48 }
 0x579   : > { %v3193_v17 = vadd.f32 %v3192_v62, %v3180_v13  ;;  %v3384_v62 = vpack.i.b16 %v3382_v16, %v3382_v16 }
 0x57b   : > { %v3206_v39 = vadd.f32 %v3205_v50, %v3193_v17 }
 0x57e   : > { %v3181_v49 = vpop.f32.mrf.mxu3 }
 0x57f   : > { %v3220_v28 = vpop.f32.mrf.mxu2  ;;  %v3219_v49 = vadd.f32 %v3218_v38, %v3206_v39  ;;  %v3387_v38 = vpack.i.b16 %v3383_v42, %v3383_v42 }
 0x580   : > { %v3194_v43 = vpop.f32.mrf.mxu0  ;;  %v3207_v23 = vpop.f32.mrf.mxu1 }
 0x586   : > { %v3231_v34 = vpop.f32.mrf.mxu3 }
 0x587   : > { %v3270_v6 = vpop.f32.mrf.mxu2  ;;  %v3232_v23 = vadd.f32 %v3231_v34, %v3219_v49  ;;  %v3389_v34 = vperm.slane %v3387_v38, 0 }
 0x588   : > { %v3244_v44 = vpop.f32.mrf.mxu0  ;;  %v3257_v14 = vpop.f32.mrf.mxu1 }
 0x589   : > { %v3258_v32 = vadd.f32 %v3257_v14, %v3244_v44 }
 0x58b   : > { %v3271_v12 = vadd.f32 %v3270_v6, %v3258_v32 }
 0x58e   : > { %v3233_v25 = vpop.f32.mrf.mxu3 }
 0x58f   : > { %v3272_v18 = vpop.f32.mrf.mxu2 }
 0x590   : > { %v3246_v27 = vpop.f32.mrf.mxu0  ;;  %v3259_v36 = vpop.f32.mrf.mxu1 }
 0x597   : > { %v3283_v24 = vpop.f32.mrf.mxu3 }
 0x598   : > { %v3284_v61 = vadd.f32 %v3283_v24, %v3271_v12  ;;  %v3386_v24 = vperm.slane %v3384_v62, 0 }
 0x59a   : > { %v3309_v10 = vpop.f32.mrf.mxu1 }
 0x59b   : > { %v3322_v22 = vpop.f32.mrf.mxu2 }
 0x59c   : > { %v3296_v63 = vpop.f32.mrf.mxu0 }
 0x59d   : > { %v3297_v0 = vadd.f32 %v3296_v63, %v3284_v61  ;;  %v3358_v63 = vpack.i.b16 %v3356_v35, %v3356_v35 }
 0x59f   : > { %v3285_v15 = vpop.f32.mrf.mxu3  ;;  %v3310_v19 = vadd.f32 %v3309_v10, %v3297_v0  ;;  %v3393_v10 = vunpack.c.l.bf16 %v3389_v34  ;;  %v3360_v61 = vperm.slane %v3358_v63, 0 }
 0x5a1   : > { %v3323_v28 = vadd.f32 %v3322_v22, %v3310_v19 }
 0x5a2   : > { %v3311_v7 = vpop.f32.mrf.mxu1 }
 0x5a3   : > { %v3324_v30 = vpop.f32.mrf.mxu2 }
 0x5a4   : > { %v3298_v46 = vpop.f32.mrf.mxu0  ;;  %v3392_v30 = vunpack.c.l.bf16 %v3386_v24 }
 0x5a5   : > { %v3361_v46 = vpack.i.b16 %v3357_v41, %v3357_v41 }
 0x5a7   : > { %v3363_v39 = vperm.slane %v3361_v46, 0 }
 0x5b7   : > { %v3335_v43 = vpop.f32.mrf.mxu3 }
 0x5b8   : > { %v3336_v44 = vadd.f32 %v3335_v43, %v3323_v28  ;;  %v3366_v28 = vunpack.c.l.bf16 %v3360_v61 }
 0x5ba   : > { %v3339_v14 = vpack.c.bf16 %v3336_v44, %v3232_v23  ;;  %v3367_v23 = vunpack.c.l.bf16 %v3363_v39 }
 0x5bc   : > { %v3342_v25 = vunpack.c.h.b16 %v3339_v14  ;;  %v3341_v18 = vunpack.c.l.b16 %v3339_v14 }
 0x5be   : > { %v3344_v27 = vpack.c.b16 %v3342_v25, %v3342_v25  ;;  %v3343_v6 = vpack.c.b16 %v3341_v18, %v3341_v18 }
 0x5bf   : > { %v3337_v36 = vpop.f32.mrf.mxu3 }
 0x5c0   : > { %3373 = vrot.lane.b32.xlu2 %v3344_v27, %s19312_s22  ;;  %3345 = vrot.lane.b32.xlu0 %v3343_v6, %s19319_s23 }
 0x5c1   : > { %3371 = vrot.lane.b32.xlu1 %v3343_v6, %s19312_s22 }
 0x5c9   : > { %3347 = vrot.lane.b32.xlu1 %v3344_v27, %s19319_s23 }
 0x61a   : > { %v3374_v50 = vpop.permute.xlu2 %3373 }
 0x61b   : > { %v3378_v22 = vsel %vm1191_vm0, %v3374_v50, 0 }
 0x61c   : > { %v3391_v15 = vunpack.c.l.bf16 %v3378_v22 }
 0x61e   : > { %v3395_v17 = vmul.f32 %v3393_v10, %v3391_v15 }
 0x632   : > { %v3346_v12 = vpop.permute.xlu0 %3345 }
 0x633   : > { %v3372_v32 = vpop.permute.xlu1 %3371  ;;  %v3352_v19 = vsel %vm1093_vm1, 0, %v3346_v12 }
 0x634   : > { %v3375_v7 = vsel %vm1191_vm0, %v3372_v32, %v3374_v50  ;;  %v3364_v43 = vunpack.c.l.bf16 %v3352_v19 }
 0x635   : > { %v3390_v13 = vunpack.c.l.bf16 %v3375_v7 }
 0x636   : > { %v3368_v42 = vmul.f32 %v3366_v28, %v3364_v43 }
 0x637   : > { %v3394_v0 = vmul.f32 %v3392_v30, %v3390_v13 }
 0x639   : > { %v3396_v49 = vpack.c.bf16 %v3395_v17, %v3394_v0 }
 0x63b   : > { %v3348_v35 = vpop.permute.xlu1 %3347  ;;  %v3404_v44 = vunpack.c.h.b16 %v3396_v49  ;;  %v3403_v14 = vunpack.c.l.b16 %v3396_v49 }
 0x63c   : > { %v3349_v25 = vsel %vm1093_vm1, %v3346_v12, %v3348_v35  ;;  %v3468_v12 = vld [vmem:[%s15352_s29] sm:$0xff] }
 0x63d   : > { %v3365_v41 = vunpack.c.l.bf16 %v3349_v25  ;;  %v3406_v18 = vpack.c.b16 %v3404_v44, %v3404_v44  ;;  %v3405_v36 = vpack.c.b16 %v3403_v14, %v3403_v14 }
 0x63f   : > { %v3369_v16 = vmul.f32 %v3367_v23, %v3365_v41  ;;  %3439 = vrot.lane.b32.xlu0 %v3406_v18, %s19316_s1  ;;  %3437 = vrot.lane.b32.xlu2 %v3405_v36, %s19316_s1  ;;  %v3455_v30 = vrot.slane %v3406_v18, 4  ;;  %v3453_v32 = vrot.slane %v3405_v36, 4 }
 0x641   : > { %v3370_v38 = vpack.c.bf16 %v3369_v16, %v3368_v42  ;;  %v14627_v16 = vld [vmem:[%s15347_s25] sm:$0xff] }
 0x643   : > { %v3399_v62 = vunpack.c.h.b16 %v3370_v38  ;;  %v3398_v50 = vunpack.c.l.b16 %v3370_v38 }
 0x645   : > { %v3401_v34 = vpack.c.b16 %v3399_v62, %v3399_v62  ;;  %v3400_v24 = vpack.c.b16 %v3398_v50, %v3398_v50 }
 0x647   : > { %3419 = vrot.lane.b32.xlu0 %v3405_v36, %s19314_s2  ;;  %v3412_v22 = vsel %vm1312_vm2, %v3401_v34, %v3344_v27  ;;  %v3409_v63 = vsel %vm1312_vm2, %v3400_v24, %v3343_v6  ;;  %v3469_v27 = vld [vmem:[%s15352_s29 + $0x8] sm:$0xff] }
 0x648   : > { %3435 = vrot.lane.b32.xlu2 %v3412_v22, %s19316_s1  ;;  %v3452_v10 = vrot.slane %v3412_v22, 4  ;;  %3433 = vrot.lane.b32.xlu1 %v3409_v63, %s19316_s1  ;;  %v3451_v15 = vrot.slane %v3409_v63, 4 }
 0x64a   : > { %v3456_v46 = vsel %vm1312_vm2, %v3452_v10, %v3455_v30  ;;  %v3454_v7 = vsel %vm1312_vm2, %v3451_v15, %v3453_v32 }
 0x64f   : > { %3417 = vrot.lane.b32.xlu0 %v3412_v22, %s19314_s2 }
 0x650   : > { %3415 = vrot.lane.b32.xlu2 %v3409_v63, %s19314_s2  ;;  %3421 = vrot.lane.b32.xlu1 %v3406_v18, %s19314_s2 }
 0x658   : > { %3477 = vperm.xlu2 %15261, %v3469_v27   ;;  %3472 = vperm.xlu1 %15262, %v3468_v12  }
 0x699   : > { %v3438_v6 = vpop.permute.xlu2 %3437 }
 0x6a2   : > { %v3436_v19 = vpop.permute.xlu2 %3435 }
 0x6a3   : > { %v3447_v49 = vsel %vm3441_vm7, %v3436_v19, 0 }
 0x6aa   : > { %v3416_v42 = vpop.permute.xlu2 %3415 }
 0x6b1   : > { %v3440_v13 = vpop.permute.xlu0 %3439 }
 0x6b2   : > { %v3443_v61 = vsel %vm3441_vm7, %v3438_v6, %v3440_v13  ;;  %v3450_v17 = vsel %vm3441_vm7, %v3440_v13, 0  ;;  %v3478_v63 = vpop.permute.xlu2 %3477 }
 0x6b3   : > { %v3489_v0 = vsel %vm1312_vm2, %v3443_v61, 0  ;;  %v3491_v39 = vsel %vm1312_vm2, %v3450_v17, 0 }
 0x6b4   : > { %3496 = vmatpush.bf16.msra.mxu0 %v3489_v0  ;;  %3510 = vmatpush.bf16.msra.mxu1 %v3491_v39 }
 0x6b8   : > { %3511 = vmatpush.bf16.msra.mxu1 %v3447_v49 }
 0x6b9   : > { %v3420_v43 = vpop.permute.xlu0 %3419 }
 0x6ba   : > { %v3434_v28 = vpop.permute.xlu1 %3433  ;;  %v3432_v35 = vsel %vm3423_vm8, 0, %v3420_v43 }
 0x6bb   : > { %v3442_v23 = vsel %vm3441_vm7, %v3434_v28, %v3436_v19  ;;  %v3460_v25 = vsel %vm1312_vm2, %v3432_v35, %v3451_v15  ;;  %v3545_v28 = vld [vmem:[#allocation1] sm:$0xff] }
 0x6bc   : > { %3497 = vmatpush.bf16.msra.mxu0 %v3442_v23  ;;  %3512 = vmatpush.bf16.msra.mxu1 %v3456_v46 }
 0x6c0   : > { %3498 = vmatpush.bf16.msra.mxu0 %v3454_v7 }
 0x6c1   : > { %v3418_v18 = vpop.permute.xlu0 %3417 }
 0x6c2   : > { %v3422_v44 = vpop.permute.xlu1 %3421  ;;  %v3424_v38 = vsel %vm3423_vm8, %v3416_v42, %v3418_v18 }
 0x6c3   : > { %v3425_v14 = vsel %vm3423_vm8, %v3420_v43, %v3422_v44  ;;  %v3546_v43 = vld [vmem:[#allocation1 + $0x9] sm:$0xff] }
 0x6c4   : > { %3499 = vmatpush.bf16.msra.mxu0 %v3460_v25  ;;  %v3464_v41 = vsel %vm1312_vm2, %v3425_v14, %v3452_v10  ;;  %3574 = vst [vmem:[#allocation1] ss:$9 sm:$0xff] %v16675_v1  ;;  %v3547_v25 = vpack.i.b16 %v3545_v28, %v3545_v28 }
 0x6c5   : > { %3513 = vmatpush.bf16.msra.mxu1 %v3464_v41  ;;  %v3550_v41 = vpack.i.b16 %v3546_v43, %v3546_v43 }
 0x6c6   : > { %v3549_v18 = vperm.slane %v3547_v25, 0 }
 0x6c8   : > { %11647 = vmatpush.bf16.msk.msra.mxu0 %vm16712_vm9, %v3416_v42  ;;  %v3552_v42 = vperm.slane %v3550_v41, 0 }
 0x6c9   : > { %3514 = vmatpush.bf16.msra.mxu1 %v3424_v38 }
 0x6ca   : > { %v3473_v34 = vpop.permute.xlu1 %3472 }
 0x6cb   : > { %11648 = vmatmul.msk.bf16.vlgmr.msra.gmra.mxu0 %vm1536_vm5, %v14627_v16  ;;  %v3575_v23 = vld [vmem:[#allocation1] sm:$0xff]  ;;  %v3576_v35 = vld [vmem:[#allocation1 + $0x9] sm:$0xff] }
 0x6cc   : > { %11649 = vmatmul.msk.bf16.vlgmr.msra.gmra.mxu1 %vm1536_vm5, %v14627_v16  ;;  %4902 = vst [vmem:[#allocation1] ss:$9 sm:$0xff] %v15583_v48 }
 0x6d3   : > { %v16740_v44 = vld [vmem:[#allocation1] sm:$0xff]  ;;  %v16742_v14 = vld [vmem:[#allocation1 + $0x9] sm:$0xff] }
 0x6d4   : > { %4951 = vst [vmem:[#allocation1] ss:$9 sm:$0xff] %v16675_v1 }
 0x748   : > { %v3502_v62 = vpop.f32.mrf.mxu0 }
 0x749   : > { %v3516_v50 = vpop.f32.mrf.mxu1  ;;  %v3503_v24 = vadd.f32 %v3502_v62, %v3473_v34  ;;  %v3577_v62 = vpack.i.b16 %v3575_v23, %v3575_v23 }
 0x74a   : > { %v3517_v22 = vadd.f32 %v3516_v50, %v3473_v34  ;;  %v3580_v50 = vpack.i.b16 %v3576_v35, %v3576_v35  ;;  %v16745_v34 = vunpack.c.l.bf16 %v3549_v18 }
 0x74b   : > { %v3521_v10 = vmax.f32 %v3503_v24, 0.0  ;;  %v16747_v24 = vunpack.c.l.bf16 %v3552_v42 }
 0x74c   : > { %v3522_v15 = vmax.f32 %v3517_v22, 0.0 }
 0x74e   : > { %v3525_v6 = vpack.c.bf16 %v3522_v15, %v3521_v10 }
 0x750   : > { %v3504_v30 = vpop.f32.mrf.mxu0  ;;  %v3529_v61 = vunpack.c.l.b16 %v3525_v6  ;;  %v3530_v17 = vunpack.c.h.b16 %v3525_v6 }
 0x751   : > { %v3505_v32 = vadd.f32 %v3504_v30, %v3478_v63  ;;  %v3518_v46 = vpop.f32.mrf.mxu1 }
 0x752   : > { %v3519_v7 = vadd.f32 %v3518_v46, %v3478_v63  ;;  %v3582_v46 = vperm.slane %v3580_v50, 0 }
 0x753   : > { %v3523_v27 = vmax.f32 %v3505_v32, 0.0  ;;  %v3579_v32 = vperm.slane %v3577_v62, 0 }
 0x754   : > { %v3524_v12 = vmax.f32 %v3519_v7, 0.0  ;;  %v16757_v28 = vunpack.c.l.bf16 %v3582_v46 }
 0x756   : > { %v3526_v13 = vpack.c.bf16 %v3524_v12, %v3523_v27 }
 0x758   : > { %v3531_v0 = vunpack.c.l.b16 %v3526_v13  ;;  %v3532_v39 = vunpack.c.h.b16 %v3526_v13 }
 0x75a   : > { %v16722_v19 = vpack.c.b16 %v3531_v0, %v3529_v61  ;;  %v16724_v49 = vpack.c.b16 %v3532_v39, %v3530_v17  ;;  %v16755_v39 = vunpack.c.l.bf16 %v3579_v32 }
 0x75c   : > { %3537 = vrot.lane.b32.xlu1 %v16724_v49, %s19319_s23  ;;  %3565 = vrot.lane.b32.xlu2 %v16722_v19, %s19312_s22 }
 0x75d   : > { %3535 = vrot.lane.b32.xlu0 %v16722_v19, %s19319_s23 }
 0x764   : > { %3648 = vrot.lane.b32.xlu1 %v16722_v19, %s19316_s1  ;;  %3650 = vrot.lane.b32.xlu2 %v16724_v49, %s19316_s1 }
 0x765   : > { %3567 = vrot.lane.b32.xlu0 %v16724_v49, %s19312_s22 }
 0x7b6   : > { %v3566_v16 = vpop.permute.xlu2 %3565 }
 0x7be   : > { %v3651_v17 = vpop.permute.xlu2 %3650 }
 0x7ce   : > { %v3538_v38 = vpop.permute.xlu1 %3537 }
 0x7cf   : > { %v3536_v22 = vpop.permute.xlu0 %3535 }
 0x7d0   : > { %v3539_v48 = vsel %vm1093_vm1, %v3536_v22, %v3538_v38  ;;  %v3542_v63 = vsel %vm1093_vm1, 0, %v3536_v22 }
 0x7d1   : > { %v3553_v10 = vunpack.c.l.bf16 %v3542_v63  ;;  %v3554_v15 = vunpack.c.l.bf16 %v3539_v48  ;;  %v3555_v1 = vunpack.c.h.bf16 %v3542_v63  ;;  %v3556_v30 = vunpack.c.h.bf16 %v3539_v48 }
 0x7d3   : > { %v3559_v7 = vmul.f32 %v16745_v34, %v3553_v10  ;;  %v3560_v27 = vmul.f32 %v16747_v24, %v3554_v15  ;;  %v3561_v6 = vmul.f32 %v16745_v34, %v3555_v1  ;;  %v3562_v12 = vmul.f32 %v16747_v24, %v3556_v30 }
 0x7d5   : > { %v3563_v13 = vpack.c.bf16 %v3560_v27, %v3559_v7  ;;  %v3564_v61 = vpack.c.bf16 %v3562_v12, %v3561_v6 }
 0x7d6   : > { %v3649_v0 = vpop.permute.xlu1 %3648 }
 0x7d7   : > { %v3657_v43 = vsel %vm3441_vm7, %v3649_v0, %v3651_v17  ;;  %v3568_v23 = vpop.permute.xlu0 %3567  ;;  %v3598_v35 = vunpack.c.h.b16 %v3563_v13  ;;  %v3600_v25 = vunpack.c.h.b16 %v3564_v61  ;;  %v3597_v41 = vunpack.c.l.b16 %v3563_v13  ;;  %v3673_v0 = vld [vmem:[%s15362_s8] sm:$0xff] }
 0x7d8   : > { %v3569_v18 = vsel %vm1191_vm0, %v3566_v16, %v3568_v23  ;;  %v3572_v42 = vsel %vm1191_vm0, %v3568_v23, 0  ;;  %3697 = vmatpush.bf16.msra.mxu2 %v3657_v43  ;;  %v3599_v38 = vunpack.c.l.b16 %v3564_v61  ;;  %v3674_v43 = vld [vmem:[%s15362_s8 + $0x8] sm:$0xff] }
 0x7d9   : > { %v3583_v62 = vunpack.c.l.bf16 %v3569_v18  ;;  %v3584_v50 = vunpack.c.l.bf16 %v3572_v42  ;;  %v3585_v22 = vunpack.c.h.bf16 %v3569_v18  ;;  %v3586_v48 = vunpack.c.h.bf16 %v3572_v42  ;;  %v14628_v18 = vld [vmem:[%s19351_s3 + $0x4] sm:$0xf]  ;;  %v11654_v42 = vld [vmem:[%s19351_s3 + $0x8] sm:$0xf0] }
 0x7da   : > { %v3602_v63 = vpack.c.b16 %v3600_v25, %v3598_v35  ;;  %v3601_v10 = vpack.c.b16 %v3599_v38, %v3597_v41 }
 0x7db   : > { %v3589_v15 = vmul.f32 %v16755_v39, %v3583_v62  ;;  %v3590_v1 = vmul.f32 %v16757_v28, %v3584_v50  ;;  %v3591_v30 = vmul.f32 %v16755_v39, %v3585_v22  ;;  %v3592_v32 = vmul.f32 %v16757_v28, %v3586_v48 }
 0x7dc   : > { %3646 = vrot.lane.b32.xlu1 %v3602_v63, %s19316_s1  ;;  %3644 = vrot.lane.b32.xlu0 %v3601_v10, %s19316_s1  ;;  %v11657_v22 = vor.u32 %v14628_v18, %v11654_v42  ;;  %v3666_v48 = vsel %vm3441_vm7, %v3651_v17, 0  ;;  %v11652_v17 = vld [vmem:[%s19351_s3] sm:$0xf] }
 0x7dd   : > { %v3593_v16 = vpack.c.bf16 %v3590_v1, %v3589_v15  ;;  %v3594_v46 = vpack.c.bf16 %v3592_v32, %v3591_v30  ;;  %v14629_v32 = vld [vmem:[%s19351_s3 + $0x4] sm:$0xf0]  ;;  %s19382_s3 = smov 16  }
 0x7df   : > { %v3610_v7 = vunpack.c.h.b16 %v3593_v16  ;;  %v3612_v27 = vunpack.c.h.b16 %v3594_v46  ;;  %v3609_v6 = vunpack.c.l.b16 %v3593_v16  ;;  %v3611_v12 = vunpack.c.l.b16 %v3594_v46 }
 0x7e0   : > { %v11653_v16 = vor.u32 %v14629_v32, %v11652_v17 }
 0x7e1   : > { %v3614_v13 = vpack.c.b16 %v3612_v27, %v3610_v7  ;;  %v3613_v61 = vpack.c.b16 %v3611_v12, %v3609_v6 }
 0x7e3   : > { %3652 = vrot.lane.b32.xlu2 %v3613_v61, %s19316_s1 }
 0x7e4   : > { %3654 = vrot.lane.b32.xlu0 %v3614_v13, %s19316_s1  ;;  %3625 = vrot.lane.b32.xlu1 %v3613_v61, %s19314_s2 }
 0x7eb   : > { %3627 = vrot.lane.b32.xlu2 %v3614_v13, %s19314_s2 }
 0x7ec   : > { %3621 = vrot.lane.b32.xlu0 %v16722_v19, %s19314_s2  ;;  %3623 = vrot.lane.b32.xlu1 %v16724_v49, %s19314_s2 }
 0x7f3   : > { %3617 = vrot.lane.b32.xlu2 %v3601_v10, %s19314_s2 }
 0x7f4   : > { %3619 = vrot.lane.b32.xlu0 %v3602_v63, %s19314_s2  ;;  %3677 = vperm.xlu1 %15262, %v3673_v0  }
 0x7fb   : > { %3682 = vperm.xlu2 %15261, %v3674_v43  }
 0x83d   : > { %v3653_v41 = vpop.permute.xlu2 %3652 }
 0x845   : > { %v3628_v1 = vpop.permute.xlu2 %3627 }
 0x84e   : > { %v3647_v23 = vpop.permute.xlu1 %3646  ;;  %v3645_v35 = vpop.permute.xlu0 %3644 }
 0x84f   : > { %v3656_v25 = vsel %vm3441_vm7, %v3645_v35, %v3647_v23  ;;  %v3663_v15 = vsel %vm3441_vm7, %v3647_v23, 0 }
 0x850   : > { %3698 = vmatpush.bf16.msra.mxu2 %v3656_v25 }
 0x854   : > { %3699 = vmatpush.bf16.msra.mxu2 %v3613_v61 }
 0x856   : > { %v3655_v38 = vpop.permute.xlu0 %3654  ;;  %v3626_v30 = vpop.permute.xlu1 %3625 }
 0x857   : > { %v3658_v62 = vsel %vm3441_vm7, %v3653_v41, %v3655_v38  ;;  %v3669_v50 = vsel %vm3441_vm7, %v3655_v38, 0  ;;  %v3631_v46 = vsel %vm3423_vm8, %v3626_v30, %v3628_v1 }
 0x858   : > { %3700 = vmatpush.bf16.msra.mxu2 %v16722_v19  ;;  %3718 = vmatpush.bf16.msra.mxu3 %v3658_v62 }
 0x859   : > { %3746 = vmatpush.bf16.msrb.mxu0 %v3669_v50 }
 0x85b   : > { %11664 = vmatmul.msk.bf16.vlgmr.msra.gmra.mxu3 %vm3423_vm8, %v11657_v22 }
 0x85c   : > { %3725 = vmatpush.bf16.msrb.mxu3 %v3666_v48  ;;  %3701 = vmatpush.bf16.msra.mxu2 %v3601_v10  ;;  %v3618_v10 = vpop.permute.xlu2 %3617 }
 0x85d   : > { %11665 = vmatmul.msk.bf16.vlgmr.msrb.gmra.mxu0 %vm3423_vm8, %v11657_v22 }
 0x85e   : > { %v3622_v19 = vpop.permute.xlu0 %3621  ;;  %v3624_v7 = vpop.permute.xlu1 %3623 }
 0x85f   : > { %v3630_v27 = vsel %vm3423_vm8, %v3622_v19, %v3624_v7  ;;  %v14645_v7 = vld [vmem:[%s19350_s4 + $0x78] sm:$0xff] }
 0x860   : > { %3726 = vmatpush.bf16.msrb.mxu3 %v3663_v15  ;;  %11659 = vmatpush.bf16.msk.msra.mxu2 %vm16712_vm9, %v3626_v30 }
 0x864   : > { %3727 = vmatpush.bf16.msrb.mxu3 %v3614_v13  ;;  %11661 = vmatpush.bf16.msk.msra.mxu2 %vm16712_vm9, %v3622_v19  ;;  %v3683_v41 = vpop.permute.xlu2 %3682 }
 0x866   : > { %v3620_v6 = vpop.permute.xlu0 %3619  ;;  %v3678_v23 = vpop.permute.xlu1 %3677 }
 0x867   : > { %v3629_v12 = vsel %vm3423_vm8, %v3618_v10, %v3620_v6  ;;  %v14643_v6 = vld [vmem:[%s19350_s4 + $0x68] sm:$0xff] }
 0x868   : > { %3728 = vmatpush.bf16.msrb.mxu3 %v16724_v49  ;;  %11663 = vmatpush.bf16.msk.msra.mxu2 %vm16712_vm9, %v3618_v10 }
 0x86b   : > { %3705 = vmatmul.bf16.vlgmr.msra.gmra.mxu2 %v11653_v16 }
 0x86c   : > { %3729 = vmatpush.bf16.msrb.mxu3 %v3602_v63  ;;  %3959 = vmatpush.bf16.msrb.mxu2 %v14645_v7 }
 0x870   : > { %3730 = vmatpush.bf16.msrb.mxu3 %v3631_v46 }
 0x874   : > { %3731 = vmatpush.bf16.msrb.mxu3 %v3630_v27  ;;  %v14644_v27 = vld [vmem:[%s19350_s4 + $0x70] sm:$0xff] }
 0x875   : > { %3960 = vmatpush.bf16.msrb.mxu2 %v14644_v27 }
 0x878   : > { %3732 = vmatpush.bf16.msrb.mxu3 %v3629_v12  ;;  %v14642_v12 = vld [vmem:[%s19350_s4 + $0x60] sm:$0xff] }
 0x879   : > { %3961 = vmatpush.bf16.msrb.mxu2 %v14643_v6  ;;  %v14635_v6 = vld [vmem:[%s19350_s4 + $0x28] sm:$0xff] }
 0x87b   : > { %3733 = vmatmul.bf16.vlgmr.msrb.gmra.mxu3 %v11653_v16 }
 0x87d   : > { %3962 = vmatpush.bf16.msrb.mxu2 %v14642_v12  ;;  %v14634_v12 = vld [vmem:[%s19350_s4 + $0x20] sm:$0xff] }
 0x8da   : > { %v3748_v0 = vpop.f32.mrf.mxu0 }
 0x8de   : > { %v3720_v49 = vpop.f32.mrf.mxu3 }
 0x8e2   : > { %v3750_v22 = vpop.f32.mrf.mxu0 }
 0x8e6   : > { %v3722_v13 = vpop.f32.mrf.mxu3 }
 0x8ee   : > { %v3706_v61 = vpop.f32.mrf.mxu2 }
 0x8ef   : > { %v3707_v25 = vadd.f32 %v3706_v61, %v3678_v23 }
 0x8f1   : > { %v3721_v62 = vadd.f32 %v3720_v49, %v3707_v25  ;;  %v14641_v49 = vld [vmem:[%s19350_s4 + $0x58] sm:$0xff] }
 0x8f2   : > { %3963 = vmatpush.bf16.msrb.mxu2 %v14641_v49  ;;  %v14633_v49 = vld [vmem:[%s19350_s4 + $0x18] sm:$0xff] }
 0x8f6   : > { %v3708_v35 = vpop.f32.mrf.mxu2 }
 0x8f7   : > { %v3709_v18 = vadd.f32 %v3708_v35, %v3683_v41 }
 0x8f9   : > { %v3723_v48 = vadd.f32 %v3722_v13, %v3709_v18  ;;  %v14640_v13 = vld [vmem:[%s19350_s4 + $0x50] sm:$0xff] }
 0x8fa   : > { %3964 = vmatpush.bf16.msrb.mxu2 %v14640_v13  ;;  %v14632_v13 = vld [vmem:[%s19350_s4 + $0x10] sm:$0xff] }
 0x8fe   : > { %v3734_v43 = vpop.f32.mrf.mxu3 }
 0x8ff   : > { %v3735_v63 = vadd.f32 %v3734_v43, %v3678_v23 }
 0x901   : > { %v3749_v42 = vadd.f32 %v3748_v0, %v3735_v63 }
 0x903   : > { %v3753_v15 = vpack.c.bf16 %v3749_v42, %v3721_v62 }
 0x905   : > { %v3757_v19 = vunpack.c.l.b16 %v3753_v15  ;;  %v3758_v17 = vunpack.c.h.b16 %v3753_v15 }
 0x906   : > { %v3736_v38 = vpop.f32.mrf.mxu3 }
 0x907   : > { %v3737_v50 = vadd.f32 %v3736_v38, %v3683_v41 }
 0x909   : > { %v3751_v1 = vadd.f32 %v3750_v22, %v3737_v50 }
 0x90b   : > { %v3754_v30 = vpack.c.bf16 %v3751_v1, %v3723_v48 }
 0x90d   : > { %v3759_v32 = vunpack.c.l.b16 %v3754_v30  ;;  %v3760_v10 = vunpack.c.h.b16 %v3754_v30 }
 0x90f   : > { %v16802_v16 = vpack.c.b16 %v3759_v32, %v3757_v19  ;;  %v16804_v46 = vpack.c.b16 %v3760_v10, %v3758_v17 }
 0x911   : > { %3765 = vrot.lane.b32.xlu1 %v16804_v46, %s19316_s1  ;;  %3763 = vrot.lane.b32.xlu0 %v16802_v16, %s19316_s1 }
 0x983   : > { %v3766_v61 = vpop.permute.xlu1 %3765  ;;  %v3764_v0 = vpop.permute.xlu0 %3763 }
 0x984   : > { %v16817_v43 = vsel %vm3441_vm7, %v3766_v61, 0  ;;  %v16820_v23 = vsel %vm3441_vm7, %v3764_v0, %v3766_v61  ;;  %v14631_v61 = vld [vmem:[%s19350_s4 + $0x8] sm:$0xff]  ;;  %v14630_v0 = vld [vmem:[%s19350_s4] sm:$0xff] }
 0x985   : > { %v3777_v63 = vunpack.c.l.bf16 %v16817_v43  ;;  %v3779_v35 = vunpack.c.h.bf16 %v16817_v43  ;;  %v3776_v25 = vunpack.c.l.bf16 %v16820_v23  ;;  %v3778_v41 = vunpack.c.h.bf16 %v16820_v23 }
 0x987   : > { %v3781_v18 = vmax.f32 %v3749_v42, %v3777_v63  ;;  %v3783_v38 = vmax.f32 %v3751_v1, %v3779_v35  ;;  %v3780_v50 = vmax.f32 %v3721_v62, %v3776_v25  ;;  %v3782_v22 = vmax.f32 %v3723_v48, %v3778_v41  ;;  %v14637_v42 = vld [vmem:[%s19350_s4 + $0x38] sm:$0xff]  ;;  %v14639_v62 = vld [vmem:[%s19350_s4 + $0x48] sm:$0xff]  ;;  %v14636_v48 = vld [vmem:[%s19350_s4 + $0x30] sm:$0xff] }
 0x988   : > { %3945 = vmatpush.bf16.msrb.mxu1 %v14637_v42  ;;  %3965 = vmatpush.bf16.msrb.mxu2 %v14639_v62  ;;  %v14638_v1 = vld [vmem:[%s19350_s4 + $0x40] sm:$0xff]  ;;  %s19383_s4 = sld [smem:[#allocation17_spill]] }
 0x989   : > { %v3784_v15 = vpack.c.bf16 %v3781_v18, %v3780_v50  ;;  %v3785_v30 = vpack.c.bf16 %v3783_v38, %v3782_v22 }
 0x98b   : > { %v3789_v19 = vunpack.c.h.b16 %v3784_v15  ;;  %v3791_v17 = vunpack.c.h.b16 %v3785_v30  ;;  %v3788_v32 = vunpack.c.l.b16 %v3784_v15  ;;  %v3790_v10 = vunpack.c.l.b16 %v3785_v30 }
 0x98c   : > { %3946 = vmatpush.bf16.msrb.mxu1 %v14636_v48  ;;  %3966 = vmatpush.bf16.msrb.mxu2 %v14638_v1 }
 0x98d   : > { %v3793_v7 = vpack.c.b16 %v3791_v17, %v3789_v19  ;;  %v3792_v27 = vpack.c.b16 %v3790_v10, %v3788_v32 }
 0x98f   : > { %3796 = vrot.lane.b32.xlu2 %v3793_v7, %s19312_s22  ;;  %3794 = vrot.lane.b32.xlu0 %v3792_v27, %s19312_s22 }
 0x990   : > { %3947 = vmatpush.bf16.msrb.mxu1 %v14635_v6 }
 0x994   : > { %3948 = vmatpush.bf16.msrb.mxu1 %v14634_v12 }
 0x998   : > { %3949 = vmatpush.bf16.msrb.mxu1 %v14633_v49 }
 0x99c   : > { %3950 = vmatpush.bf16.msrb.mxu1 %v14632_v13 }
 0x9a0   : > { %3951 = vmatpush.bf16.msrb.mxu1 %v14631_v61 }
 0x9a4   : > { %3952 = vmatpush.bf16.msrb.mxu1 %v14630_v0 }
 0x9e9   : > { %v3797_v63 = vpop.permute.xlu2 %3796 }
 0x9ea   : > { %v3801_v35 = vsel %vm1191_vm0, %v3797_v63, 0 }
 0x9eb   : > { %v3808_v25 = vunpack.c.l.bf16 %v3801_v35  ;;  %v3810_v41 = vunpack.c.h.bf16 %v3801_v35 }
 0x9ed   : > { %v3812_v15 = vmax.f32 %v3781_v18, %v3808_v25  ;;  %v3814_v30 = vmax.f32 %v3783_v38, %v3810_v41 }
 0x9ef   : > { %v3816_v19 = vpack.c.bf16 %v3814_v30, %v3812_v15 }
 0x9f1   : > { %3967 = vmatmul.bf16.vlgmr.msrb.gmra.mxu2 %v3816_v19 }
 0xa01   : > { %v3795_v17 = vpop.permute.xlu0 %3794 }
 0xa02   : > { %v3798_v32 = vsel %vm1191_vm0, %v3795_v17, %v3797_v63 }
 0xa03   : > { %v3807_v10 = vunpack.c.l.bf16 %v3798_v32  ;;  %v3809_v7 = vunpack.c.h.bf16 %v3798_v32 }
 0xa05   : > { %v3811_v27 = vmax.f32 %v3780_v50, %v3807_v10  ;;  %v3813_v42 = vmax.f32 %v3782_v22, %v3809_v7  ;;  %v11109_v50 = vld [vmem:[%s15397_s20 + $0x1] sm:$0x1] }
 0xa06   : > { %v4003_v22 = vpack.i.b16 %v11109_v50, %v11109_v50 }
 0xa07   : > { %v3815_v62 = vpack.c.bf16 %v3813_v42, %v3811_v27 }
 0xa08   : > { %v4005_v63 = vperm.slane %v4003_v22, 0 }
 0xa09   : > { %3953 = vmatmul.bf16.vlgmr.msrb.gmra.mxu1 %v3815_v62 }
 0xa0a   : > { %v16849_v25 = vunpack.c.l.bf16 %v4005_v63 }
 0xa74   : > { %v3968_v48 = vpop.f32.mrf.mxu2 }
 0xa7c   : > { %v3970_v12 = vpop.f32.mrf.mxu2 }
 0xa86   : > { %v3954_v1 = vpop.f32.mrf.mxu1 }
 0xa87   : > { %v3969_v6 = vadd.f32 %v3968_v48, %v3954_v1  ;;  %v1050_v48 = vld [vmem:[%s15397_s20] sm:$0x1]  ;;  %v4064_v1 = vld [vmem:[%s19367_s10 + $0x10] sm:$0xff] }
 0xa89   : > { %v3973_v13 = vpack.c.bf16 %v3969_v6, %v3969_v6  ;;  %v3986_v6 = vpack.i.b16 %v1050_v48, %v1050_v48  ;;  %v14646_v48 = vld [vmem:[%s19368_s18 + $0x4] sm:$0xf] }
 0xa8b   : > { %v3977_v61 = vunpack.c.l.b16 %v3973_v13 }
 0xa8e   : > { %v3956_v49 = vpop.f32.mrf.mxu1 }
 0xa8f   : > { %v3971_v18 = vadd.f32 %v3970_v12, %v3956_v49  ;;  %v3988_v12 = vperm.slane %v3986_v6, 0 }
 0xa91   : > { %v3974_v38 = vpack.c.bf16 %v3971_v18, %v3971_v18  ;;  %v16859_v18 = vunpack.c.l.bf16 %v3988_v12  ;;  %v14648_v12 = vld [vmem:[%s19368_s18 + $0x14] sm:$0xf] }
 0xa93   : > { %v3978_v0 = vunpack.c.l.b16 %v3974_v38 }
 0xa95   : > { %v16840_v35 = vpack.c.b16 %v3978_v0, %v3977_v61  ;;  %v4063_v61 = vld [vmem:[%s19367_s10 + $0x8] sm:$0xff] }
 0xa97   : > { %4044 = vrot.lane.b32.xlu0 %v16840_v35, %s15312_s7  ;;  %3996 = vrot.lane.b32.xlu2 %v16840_v35, %s19312_s22 }
 0xa98   : > { %3980 = vrot.lane.b32.xlu1 %v16840_v35, %s19319_s23 }
 0xaf1   : > { %v3997_v41 = vpop.permute.xlu2 %3996 }
 0xaf2   : > { %v4000_v15 = vsel %vm3998_vm10, %v3997_v41, 0 }
 0xaf3   : > { %v4006_v30 = vunpack.c.l.bf16 %v4000_v15  ;;  %v4007_v19 = vunpack.c.h.bf16 %v4000_v15 }
 0xaf5   : > { %v4009_v17 = vmul.f32 %v16849_v25, %v4006_v30  ;;  %v4010_v32 = vmul.f32 %v16849_v25, %v4007_v19 }
 0xaf7   : > { %v4011_v10 = vpack.c.bf16 %v4009_v17, %v4009_v17  ;;  %v4012_v7 = vpack.c.bf16 %v4010_v32, %v4010_v32 }
 0xaf9   : > { %v4022_v27 = vunpack.c.l.b16 %v4011_v10  ;;  %v4023_v42 = vunpack.c.l.b16 %v4012_v7  ;;  %v4062_v10 = vld [vmem:[%s19367_s10] sm:$0xff]  ;;  %v4065_v7 = vld [vmem:[%s19367_s10 + $0x18] sm:$0xff] }
 0xafb   : > { %v4024_v62 = vpack.c.b16 %v4023_v42, %v4022_v27 }
 0xafd   : > { %4046 = vrot.lane.b32.xlu0 %v4024_v62, %s15312_s7  ;;  %4030 = vrot.lane.b32.xlu2 %v4024_v62, %s15313_s11 }
 0xb05   : > { %4078 = vperm.xlu0 %15260, %v4064_v1   ;;  %v11734_v1 = vld [vmem:[%s19368_s18 + $0x8] sm:$0xf0] }
 0xb06   : > { %v11737_v6 = vor.u32 %v14646_v48, %v11734_v1 }
 0xb09   : > { %v4045_v49 = vpop.permute.xlu0 %4044 }
 0xb0a   : > { %v4053_v13 = vsel %vm4048_vm11, %v4045_v49, 0  ;;  %v3981_v38 = vpop.permute.xlu1 %3980  ;;  %v11742_v49 = vld [vmem:[%s19368_s18 + $0x18] sm:$0xf0] }
 0xb0b   : > { %v3983_v0 = vsel %vm1093_vm1, 0, %v3981_v38  ;;  %4110 = vmatpush.bf16.msra.mxu0 %v4053_v13  ;;  %v11745_v13 = vor.u32 %v14648_v12, %v11742_v49 }
 0xb0c   : > { %v3989_v50 = vunpack.c.l.bf16 %v3983_v0  ;;  %v3990_v22 = vunpack.c.h.bf16 %v3983_v0 }
 0xb0d   : > { %4073 = vperm.xlu0 %15260, %v4063_v61  }
 0xb0e   : > { %v3992_v63 = vmul.f32 %v16859_v18, %v3989_v50  ;;  %v3993_v41 = vmul.f32 %v16859_v18, %v3990_v22 }
 0xb10   : > { %v3994_v15 = vpack.c.bf16 %v3992_v63, %v3992_v63  ;;  %v3995_v30 = vpack.c.bf16 %v3993_v41, %v3993_v41  ;;  %v11732_v63 = vld [vmem:[%s19368_s18] sm:$0xf] }
 0xb12   : > { %v4015_v19 = vunpack.c.l.b16 %v3994_v15  ;;  %v4016_v17 = vunpack.c.l.b16 %v3995_v30  ;;  %v14649_v30 = vld [vmem:[%s19368_s18 + $0x14] sm:$0xf0] }
 0xb14   : > { %v4017_v32 = vpack.c.b16 %v4016_v17, %v4015_v19 }
 0xb16   : > { %4026 = vrot.lane.b32.xlu2 %v4017_v32, %s15313_s11  ;;  %4042 = vrot.lane.b32.xlu1 %v4017_v32, %s15312_s7 }
 0xb1e   : > { %4068 = vperm.xlu2 %15261, %v4062_v10   ;;  %4028 = vrot.lane.b32.xlu1 %v16840_v35, %s15313_s11 }
 0xb26   : > { %4083 = vperm.xlu1 %15262, %v4065_v7  }
 0xb57   : > { %v4031_v50 = vpop.permute.xlu2 %4030 }
 0xb6f   : > { %v4047_v27 = vpop.permute.xlu0 %4046 }
 0xb70   : > { %v4056_v42 = vsel %vm4048_vm11, %v4047_v27, 0  ;;  %v4027_v41 = vpop.permute.xlu2 %4026 }
 0xb71   : > { %4136 = vmatpush.bf16.msra.mxu3 %v4056_v42 }
 0xb74   : > { %11752 = vmatmul.msk.bf16.vlgmr.msra.gmra.mxu3 %vm3423_vm8, %v11737_v6 }
 0xb78   : > { %v4069_v10 = vpop.permute.xlu2 %4068 }
 0xb84   : > { %11753 = vmatmul.msk.bf16.gmra.mxu3 %vm3423_vm8, %v11745_v13 }
 0xb88   : > { %v4043_v38 = vpop.permute.xlu1 %4042 }
 0xb89   : > { %v4050_v61 = vsel %vm4048_vm11, %v4043_v38, 0 }
 0xb8a   : > { %4111 = vmatpush.bf16.msra.mxu0 %v4050_v61 }
 0xb8e   : > { %4112 = vmatpush.bf16.msra.mxu0 %v4024_v62  ;;  %v14647_v62 = vld [vmem:[%s19368_s18 + $0x4] sm:$0xf0] }
 0xb8f   : > { %v11733_v15 = vor.u32 %v14647_v62, %v11732_v63 }
 0xb90   : > { %v4029_v22 = vpop.permute.xlu1 %4028 }
 0xb92   : > { %4113 = vmatpush.bf16.msra.mxu0 %v16840_v35  ;;  %v11740_v35 = vld [vmem:[%s19368_s18 + $0x10] sm:$0xf] }
 0xb93   : > { %v11741_v19 = vor.u32 %v14649_v30, %v11740_v35 }
 0xb96   : > { %4114 = vmatpush.bf16.msra.mxu0 %v4017_v32  ;;  %v4079_v32 = vpop.permute.xlu0 %4078 }
 0xb9a   : > { %11747 = vmatpush.bf16.msk.msra.mxu0 %vm16881_vm13, %v4031_v50 }
 0xb9e   : > { %11749 = vmatpush.bf16.msk.msra.mxu0 %vm16881_vm13, %v4029_v22  ;;  %v4074_v1 = vpop.permute.xlu0 %4073 }
 0xba2   : > { %11751 = vmatpush.bf16.msk.msra.mxu0 %vm16881_vm13, %v4027_v41 }
 0xba5   : > { %4118 = vmatmul.bf16.vlgmr.msra.gmra.mxu0 %v11733_v15 }
 0xbb5   : > { %4123 = vmatmul.bf16.gmra.mxu0 %v11741_v19  ;;  %v4084_v19 = vpop.permute.xlu1 %4083 }
 0xbf7   : > { %v4138_v17 = vpop.f32.mrf.mxu3 }
 0xbff   : > { %v4140_v48 = vpop.f32.mrf.mxu3 }
 0xc07   : > { %v4143_v22 = vpop.f32.mrf.mxu3 }
 0xc22   : > { %v4119_v7 = vpop.f32.mrf.mxu0 }
 0xc23   : > { %v4120_v27 = vadd.f32 %v4119_v7, %v4069_v10 }
 0xc25   : > { %v4139_v42 = vadd.f32 %v4138_v17, %v4120_v27  ;;  %v4145_v27 = vpop.f32.mrf.mxu3 }
 0xc27   : > { %v4148_v12 = vmax.f32 %v4139_v42, 0.0 }
 0xc29   : > { %v4152_v38 = vpack.c.bf16 %v4148_v12, %v4148_v12 }
 0xc2a   : > { %v4121_v6 = vpop.f32.mrf.mxu0 }
 0xc2b   : > { %v4122_v49 = vadd.f32 %v4121_v6, %v4074_v1  ;;  %v4160_v62 = vunpack.c.l.b16 %v4152_v38 }
 0xc2d   : > { %v4141_v13 = vadd.f32 %v4140_v48, %v4122_v49 }
 0xc2f   : > { %v4149_v61 = vmax.f32 %v4141_v13, 0.0 }
 0xc31   : > { %v4153_v50 = vpack.c.bf16 %v4149_v61, %v4149_v61 }
 0xc32   : > { %v4124_v63 = vpop.f32.mrf.mxu0 }
 0xc33   : > { %v4161_v41 = vunpack.c.l.b16 %v4153_v50  ;;  %v4125_v15 = vadd.f32 %v4124_v63, %v4079_v32 }
 0xc35   : > { %v16895_v35 = vpack.c.b16 %v4161_v41, %v4160_v62  ;;  %v4144_v30 = vadd.f32 %v4143_v22, %v4125_v15 }
 0xc37   : > { %4166 = vrot.lane.b32.xlu2 %v16895_v35, %s19319_s23  ;;  %v4150_v10 = vmax.f32 %v4144_v30, 0.0 }
 0xc39   : > { %v4154_v48 = vpack.c.bf16 %v4150_v10, %v4150_v10 }
 0xc3a   : > { %v4126_v17 = vpop.f32.mrf.mxu0 }
 0xc3b   : > { %v4127_v7 = vadd.f32 %v4126_v17, %v4084_v19  ;;  %v4162_v12 = vunpack.c.l.b16 %v4154_v48 }
 0xc3d   : > { %v4146_v42 = vadd.f32 %v4145_v27, %v4127_v7 }
 0xc3f   : > { %v4151_v1 = vmax.f32 %v4146_v42, 0.0 }
 0xc41   : > { %v4155_v6 = vpack.c.bf16 %v4151_v1, %v4151_v1 }
 0xc43   : > { %v4163_v49 = vunpack.c.l.b16 %v4155_v6 }
 0xc45   : > { %v16899_v13 = vpack.c.b16 %v4163_v49, %v4162_v12 }
 0xc47   : > { %4272 = vrot.lane.b32.xlu2 %v16899_v13, %s15312_s7  ;;  %4190 = vrot.lane.b32.xlu0 %v16899_v13, %s19312_s22 }
 0xc48   : > { %4168 = vrot.lane.b32.xlu1 %v16899_v13, %s19319_s23 }
 0xc4f   : > { %4270 = vrot.lane.b32.xlu0 %v16895_v35, %s15312_s7 }
 0xc50   : > { %4188 = vrot.lane.b32.xlu1 %v16895_v35, %s19312_s22 }
 0xc91   : > { %v4167_v32 = vpop.permute.xlu2 %4166 }
 0xc92   : > { %v4171_v38 = vsel %vm1093_vm1, 0, %v4167_v32 }
 0xc93   : > { %v4176_v61 = vunpack.c.l.bf16 %v4171_v38  ;;  %v4177_v50 = vunpack.c.h.bf16 %v4171_v38 }
 0xc95   : > { %v4180_v22 = vmul.f32 %v4176_v61, %v16859_v18  ;;  %v4181_v63 = vmul.f32 %v4177_v50, %v16859_v18 }
 0xc97   : > { %v4184_v62 = vpack.c.bf16 %v4180_v22, %v4180_v22  ;;  %v4185_v41 = vpack.c.bf16 %v4181_v63, %v4181_v63 }
 0xc99   : > { %v4214_v15 = vunpack.c.l.b16 %v4184_v62  ;;  %v4215_v30 = vunpack.c.l.b16 %v4185_v41 }
 0xc9b   : > { %v4218_v19 = vpack.c.b16 %v4215_v30, %v4214_v15 }
 0xc9d   : > { %4266 = vrot.lane.b32.xlu2 %v4218_v19, %s15312_s7 }
 0xca1   : > { %v4273_v17 = vpop.permute.xlu2 %4272 }
 0xca2   : > { %v4288_v10 = vsel %vm4048_vm11, %v4273_v17, 0 }
 0xca3   : > { %4383 = vmatpush.bf16.msra.mxu2 %v4288_v10 }
 0xca5   : > { %4242 = vrot.lane.b32.xlu2 %v16899_v13, %s15313_s11 }
 0xcb9   : > { %v4191_v7 = vpop.permute.xlu0 %4190 }
 0xcba   : > { %v4196_v27 = vsel %vm3998_vm10, %v4191_v7, 0  ;;  %v4169_v42 = vpop.permute.xlu1 %4168 }
 0xcbb   : > { %v4200_v48 = vunpack.c.l.bf16 %v4196_v27  ;;  %v4201_v1 = vunpack.c.h.bf16 %v4196_v27  ;;  %v4174_v6 = vsel %vm1093_vm1, 0, %v4169_v42 }
 0xcbc   : > { %v4178_v12 = vunpack.c.l.bf16 %v4174_v6  ;;  %v4179_v49 = vunpack.c.h.bf16 %v4174_v6 }
 0xcbd   : > { %v4204_v32 = vmul.f32 %v4200_v48, %v16849_v25  ;;  %v4205_v38 = vmul.f32 %v4201_v1, %v16849_v25 }
 0xcbe   : > { %v4182_v61 = vmul.f32 %v4178_v12, %v16859_v18  ;;  %v4183_v50 = vmul.f32 %v4179_v49, %v16859_v18 }
 0xcbf   : > { %v4208_v22 = vpack.c.bf16 %v4204_v32, %v4204_v32  ;;  %v4209_v63 = vpack.c.bf16 %v4205_v38, %v4205_v38 }
 0xcc0   : > { %v4186_v62 = vpack.c.bf16 %v4182_v61, %v4182_v61  ;;  %v4187_v41 = vpack.c.bf16 %v4183_v50, %v4183_v50 }
 0xcc1   : > { %v4230_v15 = vunpack.c.l.b16 %v4208_v22  ;;  %v4231_v30 = vunpack.c.l.b16 %v4209_v63  ;;  %v4271_v17 = vpop.permute.xlu0 %4270  ;;  %v4306_v63 = vld [vmem:[%s19371_s0 + $0x10] sm:$0xff] }
 0xcc2   : > { %v4216_v10 = vunpack.c.l.b16 %v4186_v62  ;;  %v4217_v7 = vunpack.c.l.b16 %v4187_v41  ;;  %v4189_v27 = vpop.permute.xlu1 %4188  ;;  %v4285_v42 = vsel %vm4048_vm11, %v4271_v17, 0  ;;  %v4307_v41 = vld [vmem:[%s19371_s0 + $0x18] sm:$0xff]  ;;  %v4855_v17 = vld [vmem:[%s19372_s28 + $0x8] sm:$0xff] }
 0xcc3   : > { %v4193_v48 = vsel %vm3998_vm10, %v4189_v27, 0  ;;  %4384 = vmatpush.bf16.msra.mxu2 %v4285_v42  ;;  %v4233_v1 = vpack.c.b16 %v4231_v30, %v4230_v15  ;;  %v4854_v15 = vld [vmem:[%s19372_s28] sm:$0xff] }
 0xcc4   : > { %v4198_v6 = vunpack.c.l.bf16 %v4193_v48  ;;  %v4199_v12 = vunpack.c.h.bf16 %v4193_v48  ;;  %v4219_v18 = vpack.c.b16 %v4217_v7, %v4216_v10  ;;  %v4304_v30 = vld [vmem:[%s19371_s0] sm:$0xff] }
 0xcc5   : > { %4246 = vrot.lane.b32.xlu0 %v4233_v1, %s15313_s11  ;;  %v16951_v27 = vld [vmem:[#allocation1] sm:$0xff] }
 0xcc6   : > { %v4202_v49 = vmul.f32 %v4198_v6, %v16849_v25  ;;  %v4203_v32 = vmul.f32 %v4199_v12, %v16849_v25  ;;  %4238 = vrot.lane.b32.xlu2 %v4219_v18, %s15313_s11  ;;  %4268 = vrot.lane.b32.xlu1 %v4219_v18, %s15312_s7  ;;  %v4305_v25 = vld [vmem:[%s19371_s0 + $0x8] sm:$0xff]  ;;  %s19379_s0 = smov 112  }
 0xcc7   : > { %4364 = vmatpush.bf16.msra.mxu1 %v4219_v18 }
 0xcc8   : > { %v4206_v38 = vpack.c.bf16 %v4202_v49, %v4202_v49  ;;  %v4207_v61 = vpack.c.bf16 %v4203_v32, %v4203_v32 }
 0xcca   : > { %v4228_v50 = vunpack.c.l.b16 %v4206_v38  ;;  %v4229_v22 = vunpack.c.l.b16 %v4207_v61 }
 0xccb   : > { %4365 = vmatpush.bf16.msra.mxu1 %v4218_v19 }
 0xccc   : > { %v4232_v62 = vpack.c.b16 %v4229_v22, %v4228_v50 }
 0xccd   : > { %4240 = vrot.lane.b32.xlu0 %v16895_v35, %s15313_s11 }
 0xcce   : > { %4320 = vperm.xlu2 %15261, %v4306_v63   ;;  %4244 = vrot.lane.b32.xlu1 %v4232_v62, %s15313_s11 }
 0xcd5   : > { %4274 = vrot.lane.b32.xlu0 %v4232_v62, %s15312_s7 }
 0xcd6   : > { %4315 = vperm.xlu2 %15261, %v4305_v25   ;;  %4276 = vrot.lane.b32.xlu1 %v4233_v1, %s15312_s7  ;;  %s19373_s7 = sld [smem:[#allocation6_spill]] }
 0xcdc   : > { %v14650_v61 = vld [vmem:[%s19373_s7 + $0x4] sm:$0xf]  ;;  %v11758_v50 = vld [vmem:[%s19373_s7 + $0xc] sm:$0xf0]  ;;  %v14652_v22 = vld [vmem:[%s19373_s7 + $0x10] sm:$0xf0] }
 0xcdd   : > { %4325 = vperm.xlu0 %15260, %v4307_v41   ;;  %v11761_v25 = vor.u32 %v14650_v61, %v11758_v50  ;;  %v11756_v41 = vld [vmem:[%s19373_s7] sm:$0xf] }
 0xcde   : > { %4937 = vrot.lane.b32.xlu2 %v16802_v16, %s19312_s22  ;;  %4236 = vrot.lane.b32.xlu1 %v4218_v19, %s15313_s11  ;;  %v16953_v19 = vld [vmem:[#allocation1 + $0x9] sm:$0xff]  ;;  %s19374_s11 = sld [smem:[#allocation11_spill]] }
 0xcdf   : > { %9616 = vst [vmem:[#allocation1] ss:$9 sm:$0xff] %v15557_v20 }
 0xce4   : > { %v14671_v61 = vld [vmem:[%s19374_s11 + $0x64] sm:$0xf0]  ;;  %v14664_v60 = vld [vmem:[%s19374_s11 + $0x34] sm:$0xf0] }
 0xce5   : > { %4858 = vperm.xlu0 %15260, %v4854_v15   ;;  %v14651_v15 = vld [vmem:[%s19373_s7 + $0x8] sm:$0xf0] }
 0xce6   : > { %4310 = vperm.xlu1 %15262, %v4304_v30  }
 0xced   : > { %4939 = vrot.lane.b32.xlu0 %v16804_v46, %s19312_s22 }
 0xcee   : > { %4863 = vperm.xlu1 %15262, %v4855_v17   ;;  %v11757_v17 = vor.u32 %v14651_v15, %v11756_v41 }
 0xcf5   : > { %4888 = vrot.lane.b32.xlu0 %v16802_v16, %s19319_s23 }
 0xcf7   : > { %v4267_v48 = vpop.permute.xlu2 %4266 }
 0xcf8   : > { %v4279_v6 = vsel %vm4048_vm11, %v4267_v48, 0  ;;  %v14655_v48 = vld [vmem:[%s19373_s7 + $0x28] sm:$0xf0] }
 0xcff   : > { %v4243_v49 = vpop.permute.xlu2 %4242 }
 0xd20   : > { %v4239_v63 = vpop.permute.xlu2 %4238 }
 0xd37   : > { %v4247_v10 = vpop.permute.xlu0 %4246 }
 0xd38   : > { %v4269_v7 = vpop.permute.xlu1 %4268  ;;  %11779 = vmatpush.bf16.msk.msra.mxu1 %vm16881_vm13, %v4247_v10  ;;  %v14653_v10 = vld [vmem:[%s19373_s7 + $0x1c] sm:$0xf] }
 0xd39   : > { %v4282_v42 = vsel %vm4048_vm11, %v4269_v7, 0  ;;  %v11770_v7 = vld [vmem:[%s19373_s7 + $0x24] sm:$0xf0] }
 0xd3a   : > { %4385 = vmatpush.bf16.msra.mxu2 %v4282_v42  ;;  %v11776_v42 = vld [vmem:[%s19373_s7 + $0x20] sm:$0xf] }
 0xd3e   : > { %4386 = vmatpush.bf16.msra.mxu2 %v4279_v6  ;;  %v11768_v6 = vld [vmem:[%s19373_s7 + $0x18] sm:$0xf] }
 0xd3f   : > { %v4241_v12 = vpop.permute.xlu0 %4240 }
 0xd40   : > { %v4245_v18 = vpop.permute.xlu1 %4244 }
 0xd41   : > { %11781 = vmatpush.bf16.msk.msra.mxu1 %vm16881_vm13, %v4245_v18  ;;  %v11777_v18 = vor.u32 %v14655_v48, %v11776_v42  ;;  %v4321_v42 = vpop.permute.xlu2 %4320 }
 0xd42   : > { %4387 = vmatpush.bf16.msra.mxu2 %v4233_v1  ;;  %v11764_v1 = vld [vmem:[%s19373_s7 + $0x8] sm:$0xf] }
 0xd45   : > { %11783 = vmatpush.bf16.msk.msra.mxu1 %vm16881_vm13, %v4243_v49  ;;  %v11838_v49 = vld [vmem:[%s19374_s11 + $0x70] sm:$0xf] }
 0xd46   : > { %4388 = vmatpush.bf16.msra.mxu2 %v4232_v62 }
 0xd47   : > { %v4275_v38 = vpop.permute.xlu0 %4274 }
 0xd48   : > { %v4277_v20 = vpop.permute.xlu1 %4276  ;;  %v4291_v62 = vsel %vm4048_vm11, %v4275_v38, 0  ;;  %v11830_v38 = vld [vmem:[%s19374_s11 + $0x60] sm:$0xf] }
 0xd49   : > { %v4294_v32 = vsel %vm4048_vm11, %v4277_v20, 0  ;;  %11785 = vmatpush.bf16.msk.msra.mxu1 %vm16881_vm13, %v4241_v12  ;;  %v14654_v12 = vld [vmem:[%s19373_s7 + $0x20] sm:$0xf0]  ;;  %v14673_v20 = vld [vmem:[%s19374_s11 + $0x74] sm:$0xf0]  ;;  %v11831_v50 = vor.u32 %v14671_v61, %v11830_v38 }
 0xd4a   : > { %4389 = vmatpush.bf16.msra.mxu2 %v16899_v13  ;;  %4408 = vmatpush.bf16.msrb.mxu3 %v4294_v32  ;;  %v11765_v13 = vor.u32 %v14652_v22, %v11764_v1  ;;  %v11769_v0 = vor.u32 %v14654_v12, %v11768_v6  ;;  %v11839_v32 = vor.u32 %v14673_v20, %v11838_v49  ;;  %v11822_v1 = vld [vmem:[%s19374_s11 + $0x50] sm:$0xf]  ;;  %v14669_v22 = vld [vmem:[%s19374_s11 + $0x54] sm:$0xf0] }
 0xd4d   : > { %11787 = vmatpush.bf16.msk.msra.mxu1 %vm16881_vm13, %v4239_v63  ;;  %v11823_v63 = vor.u32 %v14669_v22, %v11822_v1 }
 0xd4e   : > { %4390 = vmatpush.bf16.msra.mxu2 %v16895_v35  ;;  %4409 = vmatpush.bf16.msrb.mxu3 %v4291_v62  ;;  %v11773_v35 = vor.u32 %v14653_v10, %v11770_v7  ;;  %v11814_v62 = vld [vmem:[%s19374_s11 + $0x40] sm:$0xf] }
 0xd50   : > { %v4237_v30 = vpop.permute.xlu1 %4236 }
 0xd51   : > { %11789 = vmatpush.bf16.msk.msra.mxu1 %vm16881_vm13, %v4237_v30  ;;  %4391 = vmatmul.bf16.vlgmr.msra.gmra.mxu2 %v11761_v25  ;;  %v14667_v25 = vld [vmem:[%s19374_s11 + $0x44] sm:$0xf0] }
 0xd52   : > { %11790 = vmatmul.msk.bf16.vlgmr.msrb.gmra.mxu3 %vm1377_vm4, %v11765_v13  ;;  %v11815_v15 = vor.u32 %v14667_v25, %v11814_v62 }
 0xd54   : > { %4372 = vmatmul.bf16.vlgmr.msra.gmra.mxu1 %v11757_v17 }
 0xd55   : > { %4539 = vmatpush.bf16.msrb.mxu1 %v11839_v32 }
 0xd58   : > { %v4311_v32 = vpop.permute.xlu1 %4310 }
 0xd59   : > { %4540 = vmatpush.bf16.msrb.mxu1 %v11831_v50 }
 0xd5d   : > { %4541 = vmatpush.bf16.msrb.mxu1 %v11823_v63 }
 0xd61   : > { %4396 = vmatmul.bf16.gmra.mxu2 %v11773_v35  ;;  %4542 = vmatpush.bf16.msrb.mxu1 %v11815_v15 }
 0xd62   : > { %11791 = vmatmul.msk.bf16.gmra.mxu3 %vm1377_vm4, %v11777_v18  ;;  %v4316_v18 = vpop.permute.xlu2 %4315 }
 0xd64   : > { %4377 = vmatmul.bf16.gmra.mxu1 %v11769_v0  ;;  %v4326_v0 = vpop.permute.xlu0 %4325 }
 0xdd1   : > { %v4373_v41 = vpop.f32.mrf.mxu1 }
 0xdd2   : > { %v4374_v61 = vadd.f32 %v4373_v41, %v4311_v32  ;;  %v11850_v32 = vld [vmem:[%s19374_s11 + $0x8] sm:$0xf0] }
 0xdd4   : > { %v4392_v13 = vpop.f32.mrf.mxu2 }
 0xdd5   : > { %v4411_v30 = vpop.f32.mrf.mxu3  ;;  %v4393_v25 = vadd.f32 %v4392_v13, %v4374_v61  ;;  %v11874_v13 = vld [vmem:[%s19374_s11 + $0x38] sm:$0xf0]  ;;  %v14665_v61 = vld [vmem:[%s19375_s26 + $0x8] sm:$0xff] }
 0xdd7   : > { %v4412_v41 = vadd.f32 %v4411_v30, %v4393_v25 }
 0xdd9   : > { %v4375_v17 = vpop.f32.mrf.mxu1 }
 0xdda   : > { %v4376_v49 = vadd.f32 %v4375_v17, %v4316_v18 }
 0xddc   : > { %v4394_v10 = vpop.f32.mrf.mxu2 }
 0xddd   : > { %v4413_v7 = vpop.f32.mrf.mxu3  ;;  %v4395_v22 = vadd.f32 %v4394_v10, %v4376_v49 }
 0xddf   : > { %v4414_v17 = vadd.f32 %v4413_v7, %v4395_v22  ;;  %v14661_v7 = vld [vmem:[%s19374_s11 + $0x24] sm:$0xf] }
 0xde1   : > { %v4378_v48 = vpop.f32.mrf.mxu1  ;;  %v4421_v10 = vpack.c.bf16 %v4414_v17, %v4412_v41  ;;  %v14672_v17 = vld [vmem:[%s19374_s11 + $0x74] sm:$0xf] }
 0xde2   : > { %v4379_v12 = vadd.f32 %v4378_v48, %v4321_v42  ;;  %v11872_v48 = vld [vmem:[%s19374_s11 + $0x30] sm:$0xf] }
 0xde3   : > { %v11873_v26 = vor.u32 %v14664_v60, %v11872_v48 }
 0xde4   : > { %v4397_v35 = vpop.f32.mrf.mxu2 }
 0xde5   : > { %v4416_v6 = vpop.f32.mrf.mxu3  ;;  %v4398_v50 = vadd.f32 %v4397_v35, %v4379_v12  ;;  %4610 = vmatpush.bf16.msra.mxu3 %v11873_v26  ;;  %v14656_v35 = vld [vmem:[%s19375_s26] sm:$0xff]  ;;  %v14663_v12 = vld [vmem:[%s19374_s11 + $0x34] sm:$0xf]  ;;  %v11866_v26 = vld [vmem:[%s19374_s11 + $0x28] sm:$0xf0] }
 0xde6   : > { %v11877_v60 = vor.u32 %v14663_v12, %v11874_v13  ;;  %v11869_v30 = vor.u32 %v14661_v7, %v11866_v26  ;;  %v14668_v13 = vld [vmem:[%s19374_s11 + $0x54] sm:$0xf]  ;;  %v14666_v26 = vld [vmem:[%s19374_s11 + $0x44] sm:$0xf] }
 0xde7   : > { %v4417_v15 = vadd.f32 %v4416_v6, %v4398_v50  ;;  %v14659_v6 = vld [vmem:[%s19374_s11 + $0x14] sm:$0xf]  ;;  %v11864_v50 = vld [vmem:[%s19374_s11 + $0x20] sm:$0xf] }
 0xde9   : > { %v4380_v20 = vpop.f32.mrf.mxu1 }
 0xdea   : > { %v4381_v38 = vadd.f32 %v4380_v20, %v4326_v0  ;;  %v11858_v0 = vld [vmem:[%s19374_s11 + $0x18] sm:$0xf0]  ;;  %v14657_v20 = vld [vmem:[%s19374_s11 + $0x4] sm:$0xf] }
 0xdeb   : > { %v11861_v49 = vor.u32 %v14659_v6, %v11858_v0 }
 0xdec   : > { %v4399_v1 = vpop.f32.mrf.mxu2 }
 0xded   : > { %v4400_v63 = vadd.f32 %v4399_v1, %v4381_v38  ;;  %v4418_v62 = vpop.f32.mrf.mxu3  ;;  %v11853_v38 = vor.u32 %v14657_v20, %v11850_v32  ;;  %v14662_v1 = vld [vmem:[%s19374_s11 + $0x24] sm:$0xf0] }
 0xdee   : > { %v11865_v22 = vor.u32 %v14662_v1, %v11864_v50  ;;  %v14674_v1 = vld [vmem:[%s19375_s26 + $0x10] sm:$0xff] }
 0xdef   : > { %v4419_v42 = vadd.f32 %v4418_v62, %v4400_v63  ;;  %v11856_v63 = vld [vmem:[%s19374_s11 + $0x10] sm:$0xf]  ;;  %v14660_v62 = vld [vmem:[%s19374_s11 + $0x14] sm:$0xf0] }
 0xdf0   : > { %4611 = vmatpush.bf16.msra.mxu3 %v11865_v22  ;;  %v11857_v25 = vor.u32 %v14660_v62, %v11856_v63  ;;  %v11921_v22 = vld [vmem:[%s19374_s11 + $0xb0] sm:$0xf]  ;;  %v14681_v63 = vld [vmem:[%s19374_s11 + $0xb4] sm:$0xf] }
 0xdf1   : > { %v4422_v18 = vpack.c.bf16 %v4419_v42, %v4417_v15  ;;  %v11848_v15 = vld [vmem:[%s19374_s11] sm:$0xf]  ;;  %v14658_v42 = vld [vmem:[%s19374_s11 + $0x4] sm:$0xf0] }
 0xdf2   : > { %v11849_v48 = vor.u32 %v14658_v42, %v11848_v15  ;;  %v11970_v15 = vld [vmem:[%s19374_s11 + $0xf0] sm:$0xf]  ;;  %v14691_v42 = vld [vmem:[%s19374_s11 + $0xf4] sm:$0xf0] }
 0xdf3   : > { %4439 = vmatpush.bf16.msrb.mxu0 %v4422_v18  ;;  %4651 = vmatpush.bf16.msra.mxu1 %v4422_v18 }
 0xdf4   : > { %4612 = vmatpush.bf16.msra.mxu3 %v11857_v25  ;;  %v11923_v25 = vld [vmem:[%s19374_s11 + $0xb8] sm:$0xf0] }
 0xdf7   : > { %4440 = vmatpush.bf16.msrb.mxu0 %v4421_v10  ;;  %4652 = vmatpush.bf16.msra.mxu1 %v4421_v10 }
 0xdf8   : > { %4613 = vmatpush.bf16.msra.mxu3 %v11849_v48  ;;  %v11926_v48 = vor.u32 %v14681_v63, %v11923_v25  ;;  %v14675_v63 = vld [vmem:[%s19374_s11 + $0x84] sm:$0xf]  ;;  %v11899_v25 = vld [vmem:[%s19374_s11 + $0x88] sm:$0xf0] }
 0xdfa   : > { %11796 = vmatmul.msk.bf16.vlgmr.msrb.gmra.mxu0 %vm1377_vm4, %v14656_v35  ;;  %v11832_v35 = vld [vmem:[%s19374_s11 + $0x68] sm:$0xf0] }
 0xdfb   : > { %4473 = vmatpush.bf16.msra.mxu0 %v4422_v18 }
 0xdfc   : > { %4730 = vmatpush.bf16.msrb.mxu3 %v11926_v48  ;;  %v11902_v48 = vor.u32 %v14675_v63, %v11899_v25 }
 0xdff   : > { %4474 = vmatpush.bf16.msra.mxu0 %v4421_v10 }
 0xe03   : > { %4624 = vmatpush.bf16.msrb.mxu0 %v11877_v60  ;;  %v11824_v60 = vld [vmem:[%s19374_s11 + $0x58] sm:$0xf0] }
 0xe04   : > { %v11827_v7 = vor.u32 %v14668_v13, %v11824_v60  ;;  %v11962_v13 = vld [vmem:[%s19374_s11 + $0xe0] sm:$0xf]  ;;  %v14689_v60 = vld [vmem:[%s19374_s11 + $0xe4] sm:$0xf0] }
 0xe07   : > { %4625 = vmatpush.bf16.msrb.mxu0 %v11869_v30  ;;  %v11816_v30 = vld [vmem:[%s19374_s11 + $0x48] sm:$0xf0] }
 0xe08   : > { %v11819_v6 = vor.u32 %v14666_v26, %v11816_v30  ;;  %v11963_v30 = vor.u32 %v14689_v60, %v11962_v13  ;;  %v11964_v13 = vld [vmem:[%s19374_s11 + $0xe8] sm:$0xf0] }
 0xe0a   : > { %11803 = vmatmul.msk.bf16.vlgmr.msra.gmra.mxu0 %vm1377_vm4, %v14665_v61  ;;  %v14683_v61 = vld [vmem:[%s19375_s26 + $0x18] sm:$0xff] }
 0xe0b   : > { %4626 = vmatpush.bf16.msrb.mxu0 %v11861_v49 }
 0xe0f   : > { %4627 = vmatpush.bf16.msrb.mxu0 %v11853_v38 }
 0xe13   : > { %4761 = vmatpush.bf16.msra.mxu0 %v4422_v18  ;;  %v11840_v18 = vld [vmem:[%s19374_s11 + $0x78] sm:$0xf0] }
 0xe14   : > { %v11843_v41 = vor.u32 %v14672_v17, %v11840_v18  ;;  %v11971_v17 = vor.u32 %v14691_v42, %v11970_v15  ;;  %v11913_v18 = vld [vmem:[%s19374_s11 + $0xa0] sm:$0xf]  ;;  %v14685_v42 = vld [vmem:[%s19374_s11 + $0xc4] sm:$0xf0] }
 0xe15   : > { %v11946_v15 = vld [vmem:[%s19374_s11 + $0xc0] sm:$0xf] }
 0xe16   : > { %4553 = vmatpush.bf16.msrb.mxu2 %v11843_v41  ;;  %v14680_v41 = vld [vmem:[%s19374_s11 + $0xa4] sm:$0xf0] }
 0xe17   : > { %4762 = vmatpush.bf16.msra.mxu0 %v4421_v10  ;;  %v14670_v10 = vld [vmem:[%s19374_s11 + $0x64] sm:$0xf] }
 0xe18   : > { %v11835_v12 = vor.u32 %v14670_v10, %v11832_v35  ;;  %v14679_v10 = vld [vmem:[%s19374_s11 + $0xa4] sm:$0xf]  ;;  %v11914_v35 = vor.u32 %v14680_v41, %v11913_v18  ;;  %v14690_v41 = vld [vmem:[%s19374_s11 + $0xf4] sm:$0xf] }
 0xe1a   : > { %4554 = vmatpush.bf16.msrb.mxu2 %v11835_v12  ;;  %v11915_v12 = vld [vmem:[%s19374_s11 + $0xa8] sm:$0xf0] }
 0xe1b   : > { %v11918_v26 = vor.u32 %v14679_v10, %v11915_v12  ;;  %v11972_v10 = vld [vmem:[%s19374_s11 + $0xf8] sm:$0xf0]  ;;  %v14688_v12 = vld [vmem:[%s19374_s11 + $0xe4] sm:$0xf] }
 0xe1c   : > { %v11967_v60 = vor.u32 %v14688_v12, %v11964_v13 }
 0xe1d   : > { %4731 = vmatpush.bf16.msrb.mxu3 %v11918_v26  ;;  %v14686_v26 = vld [vmem:[%s19374_s11 + $0xd4] sm:$0xf] }
 0xe1e   : > { %4555 = vmatpush.bf16.msrb.mxu2 %v11827_v7 }
 0xe22   : > { %4556 = vmatpush.bf16.msrb.mxu2 %v11819_v6  ;;  %v11905_v6 = vld [vmem:[%s19374_s11 + $0x90] sm:$0xf] }
 0xe77   : > { %v4442_v0 = vpop.f32.mrf.mxu0 }
 0xe7f   : > { %v4444_v49 = vpop.f32.mrf.mxu0 }
 0xe80   : > { %v4447_v20 = vpack.c.bf16 %v4444_v49, %v4442_v0  ;;  %v14678_v0 = vld [vmem:[%s19374_s11 + $0x94] sm:$0xf0]  ;;  %v14677_v49 = vld [vmem:[%s19374_s11 + $0x94] sm:$0xf] }
 0xe82   : > { %11878 = vmatmul.msk.bf16.vlgmr.msra.gmra.mxu3 %vm4531_vm14, %v4447_v20  ;;  %11879 = vmatmul.msk.bf16.vlgmr.msrb.gmra.mxu0 %vm4531_vm14, %v4447_v20  ;;  %v11906_v20 = vor.u32 %v14678_v0, %v11905_v6 }
 0xe83   : > { %5169 = vmatpush.bf16.msrb.mxu0 %v16820_v23  ;;  %v14682_v23 = vld [vmem:[%s19374_s11 + $0xb4] sm:$0xf0] }
 0xe84   : > { %v11922_v62 = vor.u32 %v14682_v23, %v11921_v22  ;;  %v11897_v22 = vld [vmem:[%s19374_s11 + $0x80] sm:$0xf]  ;;  %v14676_v23 = vld [vmem:[%s19374_s11 + $0x84] sm:$0xf0] }
 0xe86   : > { %4716 = vmatpush.bf16.msra.mxu2 %v11922_v62  ;;  %v11898_v62 = vor.u32 %v14676_v23, %v11897_v22 }
 0xe87   : > { %v4476_v32 = vpop.f32.mrf.mxu0 }
 0xe8a   : > { %4717 = vmatpush.bf16.msra.mxu2 %v11914_v35  ;;  %v11975_v35 = vor.u32 %v14690_v41, %v11972_v10 }
 0xe8e   : > { %4718 = vmatpush.bf16.msra.mxu2 %v11906_v20  ;;  %v14684_v20 = vld [vmem:[%s19374_s11 + $0xc4] sm:$0xf] }
 0xe8f   : > { %v4478_v38 = vpop.f32.mrf.mxu0 }
 0xe90   : > { %v4481_v50 = vpack.c.bf16 %v4478_v38, %v4476_v32  ;;  %v11907_v32 = vld [vmem:[%s19374_s11 + $0x98] sm:$0xf0]  ;;  %v11954_v38 = vld [vmem:[%s19374_s11 + $0xd0] sm:$0xf] }
 0xe92   : > { %11844 = vmatmul.msk.bf16.vlgmr.msrb.gmra.mxu1 %vm4531_vm14, %v4481_v50  ;;  %11845 = vmatmul.msk.bf16.vlgmr.msrb.gmra.mxu2 %vm4531_vm14, %v4481_v50  ;;  %v11910_v50 = vor.u32 %v14677_v49, %v11907_v32  ;;  %v11948_v32 = vld [vmem:[%s19374_s11 + $0xc8] sm:$0xf0] }
 0xe93   : > { %11935 = vmatmul.msk.bf16.vlgmr.msra.gmra.mxu0 %vm1377_vm4, %v14683_v61  ;;  %4826 = vmatpush.bf16.msrb.mxu1 %v11971_v17  ;;  %v14687_v61 = vld [vmem:[%s19374_s11 + $0xd4] sm:$0xf0]  ;;  %v11947_v17 = vor.u32 %v14685_v42, %v11946_v15 }
 0xe94   : > { %4732 = vmatpush.bf16.msrb.mxu3 %v11910_v50  ;;  %4719 = vmatpush.bf16.msra.mxu2 %v11898_v62 }
 0xe97   : > { %4827 = vmatpush.bf16.msrb.mxu1 %v11963_v30  ;;  %v11956_v30 = vld [vmem:[%s19374_s11 + $0xd8] sm:$0xf0] }
 0xe98   : > { %4733 = vmatpush.bf16.msrb.mxu3 %v11902_v48  ;;  %4840 = vmatpush.bf16.msrb.mxu2 %v11975_v35  ;;  %v11959_v49 = vor.u32 %v14686_v26, %v11956_v30 }
 0xe9c   : > { %4841 = vmatpush.bf16.msrb.mxu2 %v11967_v60 }
 0xea0   : > { %4842 = vmatpush.bf16.msrb.mxu2 %v11959_v49 }
 0xea2   : > { %11886 = vmatmul.msk.bf16.vlgmr.msra.gmra.mxu1 %vm1377_vm4, %v14674_v1  ;;  %v11955_v1 = vor.u32 %v14687_v61, %v11954_v38  ;;  %v11951_v38 = vor.u32 %v14684_v20, %v11948_v32 }
 0xea4   : > { %4828 = vmatpush.bf16.msrb.mxu1 %v11955_v1  ;;  %4843 = vmatpush.bf16.msrb.mxu2 %v11951_v38 }
 0xea8   : > { %4829 = vmatpush.bf16.msrb.mxu1 %v11947_v17 }
 0xeff   : > { %v17043_v7 = vpop.f32.mrf.mxu0 }
 0xf05   : > { %v4615_v25 = vpop.f32.mrf.mxu3 }
 0xf07   : > { %v4631_v18 = vpop.f32.mrf.mxu0 }
 0xf0d   : > { %v4617_v48 = vpop.f32.mrf.mxu3 }
 0xf0f   : > { %v4544_v6 = vpop.f32.mrf.mxu1 }
 0xf10   : > { %v4764_v0 = vpop.f32.mrf.mxu0  ;;  %v4616_v41 = vadd.f32 %v4615_v25, %v4544_v6 }
 0xf15   : > { %v4558_v62 = vpop.f32.mrf.mxu2 }
 0xf16   : > { %v4630_v13 = vadd.f32 %v17043_v7, %v4558_v62  ;;  %v4957_v7 = vpack.i.b16 %v16953_v19, %v16953_v19 }
 0xf17   : > { %v4546_v61 = vpop.f32.mrf.mxu1 }
 0xf18   : > { %v4766_v50 = vpop.f32.mrf.mxu0  ;;  %v4618_v49 = vadd.f32 %v4617_v48, %v4546_v61 }
 0xf19   : > { %v4769_v1 = vpack.c.bf16 %v4766_v50, %v4764_v0  ;;  %v4859_v0 = vpop.permute.xlu0 %4858 }
 0xf1b   : > { %11976 = vmatmul.msk.bf16.vlgmr.msrb.gmra.mxu1 %vm4531_vm14, %v4769_v1 }
 0xf1d   : > { %v4560_v15 = vpop.f32.mrf.mxu2 }
 0xf1f   : > { %v4654_v22 = vpop.f32.mrf.mxu1 }
 0xf21   : > { %v4940_v61 = vpop.permute.xlu0 %4939 }
 0xf27   : > { %v4656_v23 = vpop.f32.mrf.mxu1 }
 0xf28   : > { %v4659_v63 = vpack.c.bf16 %v4656_v23, %v4654_v22  ;;  %v4632_v22 = vadd.f32 %v4631_v18, %v4560_v15 }
 0xf2a   : > { %11927 = vmatmul.msk.bf16.vlgmr.msra.gmra.mxu2 %vm4531_vm14, %v4659_v63  ;;  %11928 = vmatmul.msk.bf16.vlgmr.msrb.gmra.mxu3 %vm4531_vm14, %v4659_v63 }
 0xf3a   : > { %11977 = vmatmul.msk.bf16.vlgmr.msrb.gmra.mxu2 %vm4531_vm14, %v4769_v1 }
 0xf98   : > { %v4831_v12 = vpop.f32.mrf.mxu1 }
 0xfa0   : > { %v4833_v63 = vpop.f32.mrf.mxu1 }
 0xfad   : > { %v4721_v42 = vpop.f32.mrf.mxu2  ;;  %v4735_v10 = vpop.f32.mrf.mxu3 }
 0xfae   : > { %v4740_v35 = vadd.f32 %v4721_v42, %v4616_v41  ;;  %v4741_v26 = vadd.f32 %v4735_v10, %v4630_v13  ;;  %v4954_v42 = vpack.i.b16 %v16951_v27, %v16951_v27  ;;  %v4864_v41 = vpop.permute.xlu1 %4863  ;;  %v4949_v13 = vsel %vm1191_vm0, %v4940_v61, 0 }
 0xfb0   : > { %v4850_v60 = vadd.f32 %v4831_v12, %v4740_v35  ;;  %v4956_v35 = vperm.slane %v4954_v42, 0  ;;  %v4959_v12 = vperm.slane %v4957_v7, 0 }
 0xfb2   : > { %v4866_v32 = vadd.f32 %v4859_v0, %v4850_v60 }
 0xfb5   : > { %v4723_v17 = vpop.f32.mrf.mxu2  ;;  %v4737_v1 = vpop.f32.mrf.mxu3 }
 0xfb6   : > { %v4742_v38 = vadd.f32 %v4723_v17, %v4618_v49  ;;  %v4743_v6 = vadd.f32 %v4737_v1, %v4632_v22  ;;  %v4938_v17 = vpop.permute.xlu2 %4937  ;;  %v4969_v49 = vunpack.c.l.bf16 %v4959_v12 }
 0xfb7   : > { %v4942_v15 = vsel %vm1191_vm0, %v4938_v17, %v4940_v61  ;;  %v4889_v17 = vpop.permute.xlu0 %4888 }
 0xfb8   : > { %v4852_v52 = vadd.f32 %v4833_v63, %v4742_v38  ;;  %v4966_v38 = vunpack.c.h.bf16 %v4942_v15 }
 0xfba   : > { %v4868_v48 = vadd.f32 %v4864_v41, %v4852_v52  ;;  %v4964_v52 = vunpack.c.l.bf16 %v4942_v15 }
 0xfbd   : > { %v4845_v30 = vpop.f32.mrf.mxu2 }
 0xfbe   : > { %v4851_v20 = vadd.f32 %v4845_v30, %v4741_v26 }
 0xfc0   : > { %v4867_v50 = vadd.f32 %v4859_v0, %v4851_v20  ;;  %v4968_v0 = vunpack.c.l.bf16 %v4956_v35  ;;  %v4908_v35 = vpack.i.b16 %v16742_v14, %v16742_v14 }
 0xfc2   : > { %v4870_v23 = vpack.c.bf16 %v4867_v50, %v4866_v32  ;;  %v4965_v32 = vunpack.c.l.bf16 %v4949_v13  ;;  %v4967_v50 = vunpack.c.h.bf16 %v4949_v13  ;;  %v4974_v1 = vmul.f32 %v4968_v0, %v4964_v52 }
 0xfc3   : > { %v4910_v13 = vperm.slane %v4908_v35, 0 }
 0xfc4   : > { %v4874_v60 = vunpack.c.l.b16 %v4870_v23  ;;  %v4875_v26 = vunpack.c.h.b16 %v4870_v23  ;;  %v4975_v22 = vmul.f32 %v4969_v49, %v4965_v32  ;;  %v4976_v23 = vmul.f32 %v4968_v0, %v4966_v38 }
 0xfc5   : > { %v4847_v25 = vpop.f32.mrf.mxu2  ;;  %v4977_v63 = vmul.f32 %v4969_v49, %v4967_v50  ;;  %v4920_v50 = vunpack.c.l.bf16 %v4910_v13 }
 0xfc6   : > { %v4853_v62 = vadd.f32 %v4847_v25, %v4743_v6  ;;  %v4980_v6 = vpack.c.bf16 %v4975_v22, %v4974_v1 }
 0xfc7   : > { %v4981_v25 = vpack.c.bf16 %v4977_v63, %v4976_v23 }
 0xfc8   : > { %v4869_v10 = vadd.f32 %v4864_v41, %v4853_v62  ;;  %v5010_v42 = vunpack.c.l.b16 %v4980_v6  ;;  %v5011_v41 = vunpack.c.h.b16 %v4980_v6 }
 0xfc9   : > { %v5012_v7 = vunpack.c.l.b16 %v4981_v25  ;;  %v5013_v61 = vunpack.c.h.b16 %v4981_v25 }
 0xfca   : > { %v4871_v18 = vpack.c.bf16 %v4869_v10, %v4868_v48 }
 0xfcb   : > { %v17092_v62 = vpack.c.b16 %v5012_v7, %v5010_v42  ;;  %v17096_v48 = vpack.c.b16 %v5013_v61, %v5011_v41 }
 0xfcc   : > { %v4876_v30 = vunpack.c.l.b16 %v4871_v18  ;;  %v4877_v27 = vunpack.c.h.b16 %v4871_v18  ;;  %v4905_v18 = vpack.i.b16 %v16740_v44, %v16740_v44  ;;  %v4900_v44 = vsel %vm1093_vm1, 0, %v4889_v17 }
 0xfcd   : > { %v4915_v13 = vunpack.c.l.bf16 %v4900_v44  ;;  %v4917_v59 = vunpack.c.h.bf16 %v4900_v44 }
 0xfce   : > { %v17076_v19 = vpack.c.b16 %v4876_v30, %v4874_v60  ;;  %v17078_v20 = vpack.c.b16 %v4877_v27, %v4875_v26  ;;  %v4907_v38 = vperm.slane %v4905_v18, 0 }
 0xfd0   : > { %4886 = vrot.lane.b32.xlu0 %v17078_v20, %s19319_s23  ;;  %4935 = vrot.lane.b32.xlu2 %v17078_v20, %s19312_s22  ;;  %v4919_v35 = vunpack.c.l.bf16 %v4907_v38 }
 0xfd1   : > { %4933 = vrot.lane.b32.xlu1 %v17076_v19, %s19312_s22  ;;  %s19376_s22 = sld [smem:[#allocation16_spill]] }
 0xfd2   : > { %v4927_v38 = vmul.f32 %v4919_v35, %v4917_v59 }
 0xfd8   : > { %5034 = vrot.lane.b32.xlu0 %v16802_v16, %s19314_s2  ;;  %4884 = vrot.lane.b32.xlu2 %v17076_v19, %s19319_s23 }
 0xfd9   : > { %4890 = vrot.lane.b32.xlu1 %v16804_v46, %s19319_s23 }
 0xfe1   : > { %5042 = vrot.lane.b32.xlu1 %v17092_v62, %s19314_s2 }
 0xfe9   : > { %5044 = vrot.lane.b32.xlu1 %v17096_v48, %s19314_s2 }
 0xff1   : > { %5036 = vrot.lane.b32.xlu1 %v16804_v46, %s19314_s2 }
 0xff9   : > { %5092 = vrot.lane.b32.xlu1 %v17092_v62, %s19316_s1 }
0x1001   : > { %5084 = vrot.lane.b32.xlu1 %v17076_v19, %s19316_s1 }
0x1009   : > { %5032 = vrot.lane.b32.xlu1 %v17078_v20, %s19314_s2 }
0x102a   : > { %v4936_v10 = vpop.permute.xlu2 %4935 }
0x102b   : > { %v4946_v12 = vsel %vm1191_vm0, %v4936_v10, 0 }
0x102c   : > { %v4961_v60 = vunpack.c.l.bf16 %v4946_v12  ;;  %v4963_v30 = vunpack.c.h.bf16 %v4946_v12 }
0x102e   : > { %v4971_v6 = vmul.f32 %v4969_v49, %v4961_v60  ;;  %v4973_v42 = vmul.f32 %v4969_v49, %v4963_v30 }
0x1032   : > { %v4885_v15 = vpop.permute.xlu2 %4884 }
0x1033   : > { %v4897_v27 = vsel %vm1093_vm1, 0, %v4885_v15 }
0x1034   : > { %v4911_v25 = vunpack.c.l.bf16 %v4897_v27  ;;  %v4913_v7 = vunpack.c.h.bf16 %v4897_v27 }
0x1036   : > { %v4921_v55 = vmul.f32 %v4919_v35, %v4911_v25 }
0x1042   : > { %v4887_v26 = vpop.permute.xlu0 %4886 }
0x1043   : > { %v4892_v52 = vsel %vm1093_vm1, %v4885_v15, %v4887_v26  ;;  %v4934_v32 = vpop.permute.xlu1 %4933 }
0x1044   : > { %v4912_v1 = vunpack.c.l.bf16 %v4892_v52  ;;  %v4941_v14 = vsel %vm1191_vm0, %v4934_v32, %v4936_v10  ;;  %v4914_v22 = vunpack.c.h.bf16 %v4892_v52  ;;  %v4923_v10 = vmul.f32 %v4919_v35, %v4913_v7 }
0x1045   : > { %v4960_v23 = vunpack.c.l.bf16 %v4941_v14  ;;  %v4962_v63 = vunpack.c.h.bf16 %v4941_v14 }
0x1046   : > { %v4922_v12 = vmul.f32 %v4920_v50, %v4912_v1  ;;  %v4924_v15 = vmul.f32 %v4920_v50, %v4914_v22 }
0x1047   : > { %v4970_v41 = vmul.f32 %v4968_v0, %v4960_v23  ;;  %v4972_v61 = vmul.f32 %v4968_v0, %v4962_v63  ;;  %v4925_v0 = vmul.f32 %v4919_v35, %v4915_v13 }
0x1048   : > { %v4929_v54 = vpack.c.bf16 %v4922_v12, %v4921_v55  ;;  %v4930_v9 = vpack.c.bf16 %v4924_v15, %v4923_v10 }
0x1049   : > { %v4978_v26 = vpack.c.bf16 %v4971_v6, %v4970_v41  ;;  %v4979_v18 = vpack.c.bf16 %v4973_v42, %v4972_v61 }
0x104a   : > { %v4987_v23 = vunpack.c.h.b16 %v4929_v54  ;;  %v4989_v63 = vunpack.c.h.b16 %v4930_v9  ;;  %v4986_v59 = vunpack.c.l.b16 %v4929_v54 }
0x104b   : > { %v5006_v52 = vunpack.c.l.b16 %v4978_v26  ;;  %v5008_v32 = vunpack.c.l.b16 %v4979_v18  ;;  %v4891_v14 = vpop.permute.xlu1 %4890  ;;  %v5007_v54 = vunpack.c.h.b16 %v4978_v26  ;;  %v5126_v26 = vld [vmem:[%s19376_s22 + $0x8] sm:$0xff] }
0x104c   : > { %v4893_v60 = vsel %vm1093_vm1, %v4889_v17, %v4891_v14  ;;  %v4995_v41 = vpack.c.b16 %v4989_v63, %v4987_v23 }
0x104d   : > { %v4916_v49 = vunpack.c.l.bf16 %v4893_v60  ;;  %v4918_v30 = vunpack.c.h.bf16 %v4893_v60  ;;  %v17118_v27 = vpack.c.b16 %v5008_v32, %v5006_v52 }
0x104f   : > { %v4926_v1 = vmul.f32 %v4920_v50, %v4916_v49  ;;  %v4928_v22 = vmul.f32 %v4920_v50, %v4918_v30  ;;  %5088 = vrot.lane.b32.xlu1 %v17118_v27, %s19316_s1  ;;  %v4988_v50 = vunpack.c.l.b16 %v4930_v9  ;;  %v5009_v9 = vunpack.c.h.b16 %v4979_v18  ;;  %v5125_v18 = vld [vmem:[%s19376_s22] sm:$0xff]  ;;  %v5035_v49 = vpop.permute.xlu0 %5034 }
0x1051   : > { %v4931_v44 = vpack.c.bf16 %v4926_v1, %v4925_v0  ;;  %v4932_v6 = vpack.c.bf16 %v4928_v22, %v4927_v38  ;;  %v4994_v35 = vpack.c.b16 %v4988_v50, %v4986_v59  ;;  %v17131_v10 = vpack.c.b16 %v5009_v9, %v5007_v54 }
0x1053   : > { %v4990_v25 = vunpack.c.l.b16 %v4931_v44  ;;  %v4991_v55 = vunpack.c.h.b16 %v4931_v44  ;;  %v4992_v42 = vunpack.c.l.b16 %v4932_v6  ;;  %v4993_v17 = vunpack.c.h.b16 %v4932_v6  ;;  %v5043_v7 = vpop.permute.xlu1 %5042 }
0x1055   : > { %v4997_v61 = vpack.c.b16 %v4993_v17, %v4991_v55  ;;  %v4996_v12 = vpack.c.b16 %v4992_v42, %v4990_v25 }
0x1057   : > { %5024 = vrot.lane.b32.xlu1 %v4995_v41, %s19314_s2  ;;  %5197 = vmatpush.bf16.msra.mxu2 %v4997_v61 }
0x1058   : > { %5080 = vrot.lane.b32.xlu2 %v4996_v12, %s19316_s1  ;;  %5026 = vrot.lane.b32.xlu0 %v4996_v12, %s19314_s2 }
0x1059   : > { %5155 = vmatpush.bf16.msra.mxu3 %v4996_v12 }
0x105b   : > { %5198 = vmatpush.bf16.msra.mxu2 %v4995_v41  ;;  %v5045_v15 = vpop.permute.xlu1 %5044 }
0x105c   : > { %v5051_v13 = vsel %vm3423_vm8, %v5043_v7, %v5045_v15 }
0x105d   : > { %5156 = vmatpush.bf16.msra.mxu3 %v4994_v35 }
0x105f   : > { %5199 = vmatpush.bf16.msra.mxu2 %v5051_v13 }
0x1060   : > { %5030 = vrot.lane.b32.xlu2 %v17076_v19, %s19314_s2  ;;  %5082 = vrot.lane.b32.xlu0 %v4997_v61, %s19316_s1 }
0x1061   : > { %11991 = vmatpush.bf16.msk.msra.mxu3 %vm16712_vm9, %v5043_v7 }
0x1063   : > { %v5037_v52 = vpop.permute.xlu1 %5036 }
0x1064   : > { %v5049_v7 = vsel %vm3423_vm8, %v5035_v49, %v5037_v52 }
0x1068   : > { %5086 = vrot.lane.b32.xlu2 %v17078_v20, %s19316_s1  ;;  %5040 = vrot.lane.b32.xlu0 %v17131_v10, %s19314_s2 }
0x106b   : > { %v5093_v14 = vpop.permute.xlu1 %5092 }
0x1070   : > { %5038 = vrot.lane.b32.xlu2 %v17118_v27, %s19314_s2  ;;  %5022 = vrot.lane.b32.xlu0 %v4994_v35, %s19314_s2 }
0x1073   : > { %v5085_v30 = vpop.permute.xlu1 %5084 }
0x1078   : > { %5094 = vrot.lane.b32.xlu2 %v17096_v48, %s19316_s1  ;;  %5078 = vrot.lane.b32.xlu0 %v4995_v41, %s19316_s1 }
0x107b   : > { %v5033_v25 = vpop.permute.xlu1 %5032 }
0x1080   : > { %5076 = vrot.lane.b32.xlu2 %v4994_v35, %s19316_s1  ;;  %5028 = vrot.lane.b32.xlu0 %v4997_v61, %s19314_s2  ;;  %s19377_s2 = sld [smem:[#allocation15_spill]] }
0x1086   : > { %v11980_v41 = vld [vmem:[%s19377_s2] sm:$0xf]  ;;  %v14693_v61 = vld [vmem:[%s19377_s2 + $0x8] sm:$0xf0]  ;;  %v11988_v12 = vld [vmem:[%s19377_s2 + $0x8] sm:$0xf] }
0x1087   : > { %v14694_v59 = vld [vmem:[%s19377_s2 + $0x10] sm:$0xf0]  ;;  %v11981_v13 = vor.u32 %v14693_v61, %v11980_v41 }
0x1088   : > { %5090 = vrot.lane.b32.xlu2 %v17131_v10, %s19316_s1  ;;  %5134 = vperm.xlu0 %15260, %v5126_v26   ;;  %v11989_v26 = vor.u32 %v14694_v59, %v11988_v12  ;;  %s19378_s1 = smov 127  }
0x1090   : > { %5129 = vperm.xlu2 %15261, %v5125_v18  }
0x10b2   : > { %v5081_v32 = vpop.permute.xlu2 %5080 }
0x10ba   : > { %v5031_v60 = vpop.permute.xlu2 %5030 }
0x10bb   : > { %v5048_v9 = vsel %vm3423_vm8, %v5031_v60, %v5033_v25 }
0x10c1   : > { %v5089_v50 = vpop.permute.xlu1 %5088 }
0x10c2   : > { %v5087_v0 = vpop.permute.xlu2 %5086 }
0x10c3   : > { %v5098_v38 = vsel %vm3441_vm7, %v5085_v30, %v5087_v0 }
0x10c4   : > { %5170 = vmatpush.bf16.msrb.mxu0 %v5098_v38 }
0x10ca   : > { %v5039_v1 = vpop.permute.xlu2 %5038  ;;  %v5027_v22 = vpop.permute.xlu0 %5026 }
0x10cb   : > { %11993 = vmatpush.bf16.msk.msra.mxu3 %vm16712_vm9, %v5039_v1 }
0x10cf   : > { %11995 = vmatpush.bf16.msk.msra.mxu3 %vm16712_vm9, %v5035_v49 }
0x10d2   : > { %v5095_v23 = vpop.permute.xlu2 %5094  ;;  %v5083_v63 = vpop.permute.xlu0 %5082 }
0x10d3   : > { %v5100_v44 = vsel %vm3441_vm7, %v5093_v14, %v5095_v23  ;;  %11997 = vmatpush.bf16.msk.msra.mxu3 %vm16712_vm9, %v5031_v60  ;;  %v5097_v6 = vsel %vm3441_vm7, %v5081_v32, %v5083_v63  ;;  %v5119_v18 = vsel %vm3441_vm7, %v5095_v23, 0  ;;  %v5113_v32 = vsel %vm3441_vm7, %v5087_v0, 0  ;;  %v5025_v0 = vpop.permute.xlu1 %5024  ;;  %v11982_v23 = vld [vmem:[%s19377_s2 + $0xc] sm:$0xf0] }
0x10d4   : > { %5171 = vmatpush.bf16.msrb.mxu0 %v5097_v6  ;;  %5189 = vmatpush.bf16.msra.mxu1 %v5100_v44  ;;  %v5110_v49 = vsel %vm3441_vm7, %v5083_v63, 0 }
0x10d7   : > { %11999 = vmatpush.bf16.msk.msra.mxu3 %vm16712_vm9, %v5027_v22 }
0x10da   : > { %v5077_v55 = vpop.permute.xlu2 %5076  ;;  %v5041_v42 = vpop.permute.xlu0 %5040 }
0x10db   : > { %v5050_v17 = vsel %vm3423_vm8, %v5039_v1, %v5041_v42 }
0x10dc   : > { %5200 = vmatpush.bf16.msra.mxu2 %v5050_v17 }
0x10e0   : > { %5201 = vmatpush.bf16.msra.mxu2 %v5049_v7 }
0x10e2   : > { %v5091_v35 = vpop.permute.xlu2 %5090  ;;  %v5023_v15 = vpop.permute.xlu0 %5022 }
0x10e3   : > { %12001 = vmatpush.bf16.msk.msra.mxu3 %vm16712_vm9, %v5023_v15  ;;  %v5099_v54 = vsel %vm3441_vm7, %v5089_v50, %v5091_v35  ;;  %v5116_v52 = vsel %vm3441_vm7, %v5091_v35, 0  ;;  %v5046_v1 = vsel %vm3423_vm8, %v5023_v15, %v5025_v0 }
0x10e4   : > { %5190 = vmatpush.bf16.msra.mxu1 %v5099_v54  ;;  %5202 = vmatpush.bf16.msra.mxu2 %v5048_v9 }
0x10e6   : > { %5163 = vmatmul.bf16.vlgmr.msra.gmra.mxu3 %v11981_v13 }
0x10e7   : > { %5231 = vmatpush.bf16.msrb.mxu3 %v5119_v18  ;;  %12002 = vmatmul.msk.bf16.vlgmr.msra.gmra.mxu1 %vm1377_vm4, %v11989_v26 }
0x10e8   : > { %5211 = vmatpush.bf16.msrb.mxu1 %v16817_v43 }
0x10ea   : > { %v5079_v14 = vpop.permute.xlu0 %5078  ;;  %v5130_v6 = vpop.permute.xlu2 %5129 }
0x10eb   : > { %5232 = vmatpush.bf16.msrb.mxu3 %v5116_v52  ;;  %v5096_v60 = vsel %vm3441_vm7, %v5077_v55, %v5079_v14  ;;  %v5107_v43 = vsel %vm3441_vm7, %v5079_v14, 0 }
0x10ec   : > { %5212 = vmatpush.bf16.msrb.mxu1 %v5113_v32  ;;  %5172 = vmatpush.bf16.msrb.mxu0 %v5096_v60 }
0x10f0   : > { %5213 = vmatpush.bf16.msrb.mxu1 %v5110_v49  ;;  %5173 = vmatpush.bf16.msrb.mxu0 %v17092_v62  ;;  %v14692_v62 = vld [vmem:[%s19377_s2 + $0x4] sm:$0xf]  ;;  %s19381_s2 = sld [smem:[#allocation13_spill]] }
0x10f1   : > { %v11985_v63 = vor.u32 %v14692_v62, %v11982_v23 }
0x10f2   : > { %v5029_v30 = vpop.permute.xlu0 %5028 }
0x10f3   : > { %v5047_v38 = vsel %vm3423_vm8, %v5027_v22, %v5029_v30 }
0x10f4   : > { %5214 = vmatpush.bf16.msrb.mxu1 %v5107_v43  ;;  %5174 = vmatpush.bf16.msrb.mxu0 %v17118_v27 }
0x10f5   : > { %5203 = vmatpush.bf16.msra.mxu2 %v5047_v38 }
0x10f6   : > { %12003 = vmatmul.msk.bf16.vlgmr.msrb.gmra.mxu3 %vm1377_vm4, %v11989_v26 }
0x10f8   : > { %5215 = vmatpush.bf16.msrb.mxu1 %v17096_v48  ;;  %5175 = vmatpush.bf16.msrb.mxu0 %v16802_v16 }
0x10f9   : > { %5204 = vmatpush.bf16.msra.mxu2 %v5046_v1 }
0x10fa   : > { %v5135_v41 = vpop.permute.xlu0 %5134 }
0x10fc   : > { %5216 = vmatpush.bf16.msrb.mxu1 %v17131_v10  ;;  %5205 = vmatmul.bf16.vlgmr.msra.gmra.mxu2 %v11981_v13 }
0x10fd   : > { %5176 = vmatpush.bf16.msrb.mxu0 %v17076_v19 }
0x1100   : > { %5217 = vmatpush.bf16.msrb.mxu1 %v16804_v46  ;;  %5177 = vmatmul.bf16.vlgmr.msrb.gmra.mxu0 %v11985_v63 }
0x1104   : > { %5218 = vmatpush.bf16.msrb.mxu1 %v17078_v20 }
0x1107   : > { %5219 = vmatmul.bf16.vlgmr.msrb.gmra.mxu1 %v11985_v63 }
0x1164   : > { %v5192_v27 = vpop.f32.mrf.mxu1 }
0x1169   : > { %v5164_v48 = vpop.f32.mrf.mxu3 }
0x116a   : > { %v5165_v17 = vadd.f32 %v5164_v48, %v5130_v6 }
0x116c   : > { %v5194_v44 = vpop.f32.mrf.mxu1 }
0x1171   : > { %v5166_v22 = vpop.f32.mrf.mxu3 }
0x1172   : > { %v5167_v19 = vadd.f32 %v5166_v22, %v5135_v41 }
0x1179   : > { %v5234_v42 = vpop.f32.mrf.mxu3 }
0x117d   : > { %v5178_v16 = vpop.f32.mrf.mxu0 }
0x117e   : > { %v5179_v61 = vadd.f32 %v5178_v16, %v5165_v17 }
0x117f   : > { %v5206_v25 = vpop.f32.mrf.mxu2 }
0x1180   : > { %v5207_v55 = vadd.f32 %v5206_v25, %v5130_v6  ;;  %v5193_v35 = vadd.f32 %v5192_v27, %v5179_v61 }
0x1181   : > { %v5236_v26 = vpop.f32.mrf.mxu3 }
0x1182   : > { %v5239_v18 = vmax.f32 %v5193_v35, 0.0 }
0x1184   : > { %v5220_v10 = vpop.f32.mrf.mxu1 }
0x1185   : > { %v5221_v7 = vadd.f32 %v5220_v10, %v5207_v55  ;;  %v5180_v46 = vpop.f32.mrf.mxu0 }
0x1186   : > { %v5181_v59 = vadd.f32 %v5180_v46, %v5167_v19 }
0x1187   : > { %v5235_v12 = vadd.f32 %v5234_v42, %v5221_v7  ;;  %v5208_v20 = vpop.f32.mrf.mxu2 }
0x1188   : > { %v5209_v50 = vadd.f32 %v5208_v20, %v5135_v41  ;;  %v5195_v54 = vadd.f32 %v5194_v44, %v5181_v59 }
0x1189   : > { %v5240_v13 = vmax.f32 %v5235_v12, 0.0 }
0x118a   : > { %v5241_v14 = vmax.f32 %v5195_v54, 0.0 }
0x118b   : > { %v5243_v32 = vpack.c.bf16 %v5240_v13, %v5239_v18 }
0x118c   : > { %v5222_v15 = vpop.f32.mrf.mxu1 }
0x118d   : > { %v5223_v9 = vadd.f32 %v5222_v15, %v5209_v50  ;;  %v5247_v43 = vunpack.c.l.b16 %v5243_v32  ;;  %v5248_v30 = vunpack.c.h.b16 %v5243_v32 }
0x118f   : > { %v5237_v52 = vadd.f32 %v5236_v26, %v5223_v9 }
0x1191   : > { %v5242_v60 = vmax.f32 %v5237_v52, 0.0 }
0x1193   : > { %v5244_v49 = vpack.c.bf16 %v5242_v60, %v5241_v14 }
0x1195   : > { %v5249_v38 = vunpack.c.l.b16 %v5244_v49  ;;  %v5250_v0 = vunpack.c.h.b16 %v5244_v49 }
0x1197   : > { %v17191_v1 = vpack.c.b16 %v5249_v38, %v5247_v43  ;;  %v17193_v62 = vpack.c.b16 %v5250_v0, %v5248_v30 }
0x1199   : > { %5255 = vrot.lane.b32.xlu2 %v17193_v62, %s19319_s23  ;;  %5272 = vrot.lane.b32.xlu0 %v17191_v1, %s19378_s1 }
0x119a   : > { %5253 = vrot.lane.b32.xlu1 %v17191_v1, %s19319_s23  ;;  %s19380_s23 = sld [smem:[#allocation18_spill]] }
0x11a1   : > { %5344 = vrot.lane.b32.xlu2 %v17191_v1, %s19379_s0  ;;  %5346 = vrot.lane.b32.xlu0 %v17193_v62, %s19379_s0 }
0x11a2   : > { %5274 = vrot.lane.b32.xlu1 %v17193_v62, %s19378_s1 }
0x11f3   : > { %v5256_v23 = vpop.permute.xlu2 %5255 }
0x11fb   : > { %v5345_v61 = vpop.permute.xlu2 %5344 }
0x120b   : > { %v5273_v63 = vpop.permute.xlu0 %5272 }
0x120c   : > { %v5254_v48 = vpop.permute.xlu1 %5253 }
0x120d   : > { %v5257_v27 = vsel %vm1093_vm1, %v5254_v48, %v5256_v23  ;;  %v5260_v22 = vsel %vm1093_vm1, 0, %v5254_v48 }
0x120e   : > { %v5262_v44 = vunpack.c.l.bf16 %v5260_v22  ;;  %v5263_v16 = vunpack.c.l.bf16 %v5257_v27  ;;  %v5264_v6 = vunpack.c.h.bf16 %v5260_v22  ;;  %v5265_v25 = vunpack.c.h.bf16 %v5257_v27  ;;  %v9505_v22 = vld [vmem:[%s19381_s2] sm:$0xff]  ;;  %s19386_s2 = smov 96  }
0x1210   : > { %v5266_v55 = vmul.f32 %v5262_v44, %v16745_v34  ;;  %v5267_v42 = vmul.f32 %v5263_v16, %v16747_v24  ;;  %v5268_v10 = vmul.f32 %v5264_v6, %v16745_v34  ;;  %v5269_v17 = vmul.f32 %v5265_v25, %v16747_v24  ;;  %v14695_v25 = vld [vmem:[%s19383_s4 + $0x4] sm:$0xf] }
0x1212   : > { %v5270_v7 = vpack.c.bf16 %v5267_v42, %v5266_v55  ;;  %v5271_v41 = vpack.c.bf16 %v5269_v17, %v5268_v10  ;;  %v12008_v55 = vld [vmem:[%s19383_s4 + $0x8] sm:$0xf0] }
0x1213   : > { %v5347_v19 = vpop.permute.xlu0 %5346  ;;  %v12011_v10 = vor.u32 %v14695_v25, %v12008_v55 }
0x1214   : > { %v5293_v46 = vunpack.c.l.b16 %v5270_v7  ;;  %v5294_v12 = vunpack.c.h.b16 %v5270_v7  ;;  %v5295_v59 = vunpack.c.l.b16 %v5271_v41  ;;  %v5296_v20 = vunpack.c.h.b16 %v5271_v41  ;;  %v5275_v50 = vpop.permute.xlu1 %5274 }
0x1215   : > { %v5353_v35 = vsel %vm3441_vm7, %v5345_v61, %v5347_v19  ;;  %v5362_v15 = vsel %vm3441_vm7, %v5347_v19, 0  ;;  %v5276_v13 = vsel %vm1191_vm0, %v5273_v63, %v5275_v50  ;;  %v5279_v54 = vsel %vm1191_vm0, %v5275_v50, 0  ;;  %v14696_v50 = vld [vmem:[%s19383_s4 + $0x4] sm:$0xf0] }
0x1216   : > { %v5281_v34 = vunpack.c.l.bf16 %v5276_v13  ;;  %v5282_v9 = vunpack.c.l.bf16 %v5279_v54  ;;  %v5283_v24 = vunpack.c.h.bf16 %v5276_v13  ;;  %v5284_v26 = vunpack.c.h.bf16 %v5279_v54  ;;  %5393 = vmatpush.bf16.msra.mxu0 %v5353_v35  ;;  %5421 = vmatpush.bf16.msra.mxu3 %v5362_v15 }
0x1217   : > { %v5298_v18 = vpack.c.b16 %v5296_v20, %v5294_v12  ;;  %v5297_v52 = vpack.c.b16 %v5295_v59, %v5293_v46  ;;  %v12006_v20 = vld [vmem:[%s19383_s4] sm:$0xf]  ;;  %s19389_s4 = sld [smem:[#allocation20_spill]] }
0x1218   : > { %v5285_v32 = vmul.f32 %v5281_v34, %v16755_v39  ;;  %v5286_v14 = vmul.f32 %v5282_v9, %v16757_v28  ;;  %v5287_v60 = vmul.f32 %v5283_v24, %v16755_v39  ;;  %v5288_v49 = vmul.f32 %v5284_v26, %v16757_v28  ;;  %v5369_v39 = vld [vmem:[%s19380_s23] sm:$0xff]  ;;  %v5370_v28 = vld [vmem:[%s19380_s23 + $0x8] sm:$0xff] }
0x1219   : > { %5342 = vrot.lane.b32.xlu2 %v5298_v18, %s19379_s0  ;;  %5340 = vrot.lane.b32.xlu1 %v5297_v52, %s19379_s0  ;;  %v12007_v13 = vor.u32 %v14696_v50, %v12006_v20 }
0x121a   : > { %v5289_v43 = vpack.c.bf16 %v5286_v14, %v5285_v32  ;;  %v5290_v30 = vpack.c.bf16 %v5288_v49, %v5287_v60 }
0x121c   : > { %v5305_v38 = vunpack.c.l.b16 %v5289_v43  ;;  %v5306_v0 = vunpack.c.h.b16 %v5289_v43  ;;  %v5307_v23 = vunpack.c.l.b16 %v5290_v30  ;;  %v5308_v63 = vunpack.c.h.b16 %v5290_v30 }
0x121e   : > { %v5310_v48 = vpack.c.b16 %v5308_v63, %v5306_v0  ;;  %v5309_v27 = vpack.c.b16 %v5307_v23, %v5305_v38 }
0x1220   : > { %5321 = vrot.lane.b32.xlu0 %v5309_v27, %s19382_s3 }
0x1221   : > { %5350 = vrot.lane.b32.xlu2 %v5310_v48, %s19379_s0  ;;  %5348 = vrot.lane.b32.xlu1 %v5309_v27, %s19379_s0  ;;  %s19385_s0 = sld [smem:[#allocation12_spill]] }
0x1228   : > { %5317 = vrot.lane.b32.xlu0 %v17191_v1, %s19382_s3 }
0x1229   : > { %5323 = vrot.lane.b32.xlu2 %v5310_v48, %s19382_s3  ;;  %5313 = vrot.lane.b32.xlu1 %v5297_v52, %s19382_s3 }
0x1230   : > { %5319 = vrot.lane.b32.xlu0 %v17193_v62, %s19382_s3 }
0x1231   : > { %5373 = vperm.xlu2 %15261, %v5369_v39   ;;  %5315 = vrot.lane.b32.xlu1 %v5298_v18, %s19382_s3  ;;  %s19384_s3 = sld [smem:[#allocation14_spill]] }
0x1237   : > { %v12379_v24 = vld [vmem:[%s19384_s3 + $0x5c0] sm:$0xf]  ;;  %v12317_v20 = vld [vmem:[%s19384_s3 + $0x560] sm:$0xf0] }
0x1238   : > { %5378 = vperm.xlu0 %15260, %v5370_v28   ;;  %v14885_v26 = vld [vmem:[%s19384_s3 + $0x5dc] sm:$0xf0] }
0x1239   : > { %9508 = vperm.xlu1 %15262, %v9505_v22   ;;  %v14877_v32 = vld [vmem:[%s19384_s3 + $0x59c] sm:$0xf0] }
0x123a   : > { %v12315_v60 = vld [vmem:[%s19384_s3 + $0x540] sm:$0xf] }
0x123b   : > { %v14869_v49 = vld [vmem:[%s19384_s3 + $0x55c] sm:$0xf0] }
0x123c   : > { %v12316_v39 = vor.u32 %v14869_v49, %v12315_v60  ;;  %v12283_v22 = vld [vmem:[%s19384_s3 + $0x500] sm:$0xf] }
0x1273   : > { %v5343_v44 = vpop.permute.xlu2 %5342 }
0x1274   : > { %v5359_v16 = vsel %vm3441_vm7, %v5343_v44, 0 }
0x1275   : > { %5422 = vmatpush.bf16.msra.mxu3 %v5359_v16 }
0x1279   : > { %5423 = vmatpush.bf16.msra.mxu3 %v5310_v48  ;;  %v14881_v48 = vld [vmem:[%s19384_s3 + $0x5c4] sm:$0xf] }
0x127b   : > { %v5351_v6 = vpop.permute.xlu2 %5350 }
0x127c   : > { %v5365_v42 = vsel %vm3441_vm7, %v5351_v6, 0 }
0x127d   : > { %5424 = vmatpush.bf16.msra.mxu3 %v17193_v62  ;;  %5442 = vmatpush.bf16.msra.mxu1 %v5365_v42  ;;  %v14873_v42 = vld [vmem:[%s19384_s3 + $0x584] sm:$0xf] }
0x1280   : > { %12019 = vmatmul.msk.bf16.vlgmr.msra.gmra.mxu1 %vm3423_vm8, %v12011_v10 }
0x1281   : > { %5425 = vmatpush.bf16.msra.mxu3 %v5298_v18  ;;  %v12380_v18 = vor.u32 %v14885_v26, %v12379_v24  ;;  %v12637_v24 = vld [vmem:[%s19384_s3 + $0x7e0] sm:$0xf0] }
0x1283   : > { %v5324_v41 = vpop.permute.xlu2 %5323 }
0x128b   : > { %v5341_v17 = vpop.permute.xlu1 %5340  ;;  %v5374_v14 = vpop.permute.xlu2 %5373 }
0x128c   : > { %v5352_v7 = vsel %vm3441_vm7, %v5341_v17, %v5343_v44  ;;  %v14861_v44 = vld [vmem:[%s19384_s3 + $0x51c] sm:$0xf0] }
0x128d   : > { %5394 = vmatpush.bf16.msra.mxu0 %v5352_v7  ;;  %v12284_v17 = vor.u32 %v14861_v44, %v12283_v22  ;;  %v12251_v7 = vld [vmem:[%s19384_s3 + $0x4c0] sm:$0xf]  ;;  %v12253_v22 = vld [vmem:[%s19384_s3 + $0x4e0] sm:$0xf0] }
0x1291   : > { %5395 = vmatpush.bf16.msra.mxu0 %v5309_v27  ;;  %v12381_v27 = vld [vmem:[%s19384_s3 + $0x5e0] sm:$0xf0] }
0x1292   : > { %v5322_v19 = vpop.permute.xlu0 %5321  ;;  %v12384_v25 = vor.u32 %v14881_v48, %v12381_v27  ;;  %v12605_v48 = vld [vmem:[%s19384_s3 + $0x7a0] sm:$0xf0] }
0x1293   : > { %v5349_v61 = vpop.permute.xlu1 %5348  ;;  %v5327_v46 = vsel %vm3423_vm8, %v5322_v19, %v5324_v41  ;;  %v14853_v41 = vld [vmem:[%s19384_s3 + $0x4dc] sm:$0xf0] }
0x1294   : > { %v5354_v12 = vsel %vm3441_vm7, %v5349_v61, %v5351_v6  ;;  %5426 = vmatpush.bf16.msra.mxu3 %v5327_v46  ;;  %v17277_v61 = vld [vmem:[%s19385_s0 + $0x4] sm:$0xf]  ;;  %v12252_v50 = vor.u32 %v14853_v41, %v12251_v7  ;;  %v14933_v7 = vld [vmem:[%s19384_s3 + $0x75c] sm:$0xf0] }
0x1295   : > { %5396 = vmatpush.bf16.msra.mxu0 %v17191_v1  ;;  %5414 = vmatpush.bf16.msrb.mxu2 %v5354_v12  ;;  %v14929_v41 = vld [vmem:[%s19384_s3 + $0x744] sm:$0xf] }
0x1298   : > { %12018 = vmatmul.msk.bf16.vlgmr.msrb.gmra.mxu2 %vm3423_vm8, %v12011_v10  ;;  %v12349_v10 = vld [vmem:[%s19384_s3 + $0x5a0] sm:$0xf0] }
0x1299   : > { %5397 = vmatpush.bf16.msra.mxu0 %v5297_v52  ;;  %v12347_v52 = vld [vmem:[%s19384_s3 + $0x580] sm:$0xf]  ;;  %v12352_v12 = vor.u32 %v14873_v42, %v12349_v10  ;;  %v12387_v42 = vld [vmem:[%s19384_s3 + $0x5c8] sm:$0xf] }
0x129a   : > { %v5318_v62 = vpop.permute.xlu0 %5317  ;;  %v12348_v36 = vor.u32 %v14877_v32, %v12347_v52  ;;  %v14857_v32 = vld [vmem:[%s19384_s3 + $0x504] sm:$0xf]  ;;  %v14886_v10 = vld [vmem:[%s19384_s3 + $0x5e4] sm:$0xf0] }
0x129b   : > { %v5314_v59 = vpop.permute.xlu1 %5313 }
0x129d   : > { %12013 = vmatpush.bf16.msk.msra.mxu0 %vm16712_vm9, %v5322_v19  ;;  %v5451_v19 = vld [vmem:[%s19385_s0] sm:$0xf] }
0x12a1   : > { %12015 = vmatpush.bf16.msk.msra.mxu0 %vm16712_vm9, %v5318_v62 }
0x12a2   : > { %v5320_v35 = vpop.permute.xlu0 %5319 }
0x12a3   : > { %v5326_v1 = vsel %vm3423_vm8, %v5318_v62, %v5320_v35  ;;  %v5316_v15 = vpop.permute.xlu1 %5315 }
0x12a4   : > { %5427 = vmatpush.bf16.msra.mxu3 %v5326_v1  ;;  %v5325_v54 = vsel %vm3423_vm8, %v5314_v59, %v5316_v15  ;;  %v12219_v1 = vld [vmem:[%s19384_s3 + $0x480] sm:$0xf] }
0x12a5   : > { %12017 = vmatpush.bf16.msk.msra.mxu0 %vm16712_vm9, %v5314_v59  ;;  %v14865_v59 = vld [vmem:[%s19384_s3 + $0x544] sm:$0xf]  ;;  %v14845_v15 = vld [vmem:[%s19384_s3 + $0x49c] sm:$0xf0] }
0x12a6   : > { %v12320_v52 = vor.u32 %v14865_v59, %v12317_v20  ;;  %v14841_v59 = vld [vmem:[%s19384_s3 + $0x484] sm:$0xf] }
0x12a7   : > { %v12221_v20 = vld [vmem:[%s19384_s3 + $0x4a0] sm:$0xf0] }
0x12a8   : > { %5401 = vmatmul.bf16.vlgmr.msra.gmra.mxu0 %v12007_v13  ;;  %5428 = vmatpush.bf16.msra.mxu3 %v5325_v54 }
0x12aa   : > { %v5379_v30 = vpop.permute.xlu0 %5378 }
0x12ab   : > { %5429 = vmatmul.bf16.vlgmr.msra.gmra.mxu3 %v12007_v13  ;;  %v12635_v13 = vld [vmem:[%s19384_s3 + $0x7c0] sm:$0xf] }
0x12ac   : > { %6413 = vmatpush.bf16.msrb.mxu3 %v12380_v18 }
0x12b0   : > { %6414 = vmatpush.bf16.msrb.mxu3 %v12348_v36  ;;  %v12285_v36 = vld [vmem:[%s19384_s3 + $0x520] sm:$0xf0] }
0x12b1   : > { %v12288_v27 = vor.u32 %v14857_v32, %v12285_v36 }
0x12b4   : > { %6415 = vmatpush.bf16.msrb.mxu3 %v12316_v39  ;;  %v14849_v39 = vld [vmem:[%s19384_s3 + $0x4c4] sm:$0xf] }
0x12b8   : > { %6416 = vmatpush.bf16.msrb.mxu3 %v12284_v17  ;;  %v12571_v17 = vld [vmem:[%s19384_s3 + $0x740] sm:$0xf] }
0x12bc   : > { %6417 = vmatpush.bf16.msrb.mxu3 %v12252_v50  ;;  %v12388_v50 = vor.u32 %v14886_v10, %v12387_v42  ;;  %v14905_v42 = vld [vmem:[%s19384_s3 + $0x684] sm:$0xf] }
0x12bd   : > { %v12477_v10 = vld [vmem:[%s19384_s3 + $0x6a0] sm:$0xf0] }
0x12fd   : > { %v5444_v63 = vpop.f32.mrf.mxu1 }
0x1305   : > { %v5446_v54 = vpop.f32.mrf.mxu1 }
0x131b   : > { %v5416_v34 = vpop.f32.mrf.mxu2 }
0x1323   : > { %v5418_v28 = vpop.f32.mrf.mxu2 }
0x1325   : > { %v5402_v9 = vpop.f32.mrf.mxu0 }
0x1326   : > { %v5403_v43 = vadd.f32 %v5402_v9, %v5374_v14  ;;  %v14945_v9 = vld [vmem:[%s19384_s3 + $0x7c4] sm:$0xf] }
0x1328   : > { %v5417_v16 = vadd.f32 %v5416_v34, %v5403_v43  ;;  %v14949_v34 = vld [vmem:[%s19384_s3 + $0x7dc] sm:$0xf0]  ;;  %v12640_v43 = vor.u32 %v14945_v9, %v12637_v24  ;;  %v12541_v9 = vld [vmem:[%s19384_s3 + $0x720] sm:$0xf0]  ;;  %v12224_v24 = vor.u32 %v14841_v59, %v12221_v20  ;;  %v12480_v59 = vor.u32 %v14905_v42, %v12477_v10  ;;  %v12259_v20 = vld [vmem:[%s19384_s3 + $0x4c8] sm:$0xf] }
0x1329   : > { %v12636_v49 = vor.u32 %v14949_v34, %v12635_v13  ;;  %v12539_v13 = vld [vmem:[%s19384_s3 + $0x700] sm:$0xf]  ;;  %v14921_v34 = vld [vmem:[%s19384_s3 + $0x704] sm:$0xf]  ;;  %v14850_v42 = vld [vmem:[%s19384_s3 + $0x4cc] sm:$0xf] }
0x132a   : > { %v12544_v36 = vor.u32 %v14921_v34, %v12541_v9  ;;  %v12325_v34 = vld [vmem:[%s19384_s3 + $0x568] sm:$0xf0] }
0x132b   : > { %v12261_v10 = vld [vmem:[%s19384_s3 + $0x4e8] sm:$0xf0] }
0x132d   : > { %v5404_v38 = vpop.f32.mrf.mxu0 }
0x132e   : > { %v5405_v0 = vadd.f32 %v5404_v38, %v5379_v30  ;;  %v5430_v23 = vpop.f32.mrf.mxu3  ;;  %v14837_v38 = vld [vmem:[%s19384_s3 + $0x45c] sm:$0xf0] }
0x132f   : > { %v5431_v46 = vadd.f32 %v5430_v23, %v5374_v14  ;;  %v12220_v14 = vor.u32 %v14845_v15, %v12219_v1  ;;  %v14941_v23 = vld [vmem:[%s19384_s3 + $0x79c] sm:$0xf0]  ;;  %v12355_v1 = vld [vmem:[%s19384_s3 + $0x588] sm:$0xf] }
0x1330   : > { %v5419_v6 = vadd.f32 %v5418_v28, %v5405_v0  ;;  %v12603_v0 = vld [vmem:[%s19384_s3 + $0x780] sm:$0xf]  ;;  %v14878_v15 = vld [vmem:[%s19384_s3 + $0x5a4] sm:$0xf0] }
0x1331   : > { %v5445_v26 = vadd.f32 %v5444_v63, %v5431_v46  ;;  %v14937_v63 = vld [vmem:[%s19384_s3 + $0x784] sm:$0xf]  ;;  %6418 = vmatpush.bf16.msrb.mxu3 %v12220_v14  ;;  %v12604_v44 = vor.u32 %v14941_v23, %v12603_v0  ;;  %v12323_v14 = vld [vmem:[%s19384_s3 + $0x548] sm:$0xf] }
0x1332   : > { %v17267_v55 = vpack.c.bf16 %v5419_v6, %v5417_v16  ;;  %v12608_v16 = vor.u32 %v14937_v63, %v12605_v48  ;;  %v12155_v6 = vld [vmem:[%s19384_s3 + $0x400] sm:$0xf]  ;;  %v12573_v46 = vld [vmem:[%s19384_s3 + $0x760] sm:$0xf0]  ;;  %v14882_v48 = vld [vmem:[%s19384_s3 + $0x5cc] sm:$0xf] }
0x1333   : > { %v14825_v23 = vld [vmem:[%s19384_s3 + $0x404] sm:$0xf] }
0x1334   : > { %5462 = vmatpush.bf16.msra.mxu2 %v17267_v55  ;;  %5623 = vmatpush.bf16.msrb.mxu1 %v17267_v55  ;;  %v12157_v63 = vld [vmem:[%s19384_s3 + $0x420] sm:$0xf0] }
0x1336   : > { %v5432_v62 = vpop.f32.mrf.mxu3 }
0x1337   : > { %v5433_v35 = vadd.f32 %v5432_v62, %v5379_v30  ;;  %12020 = vmatmul.msk.bf16.vlgmr.msra.gmra.mxu2 %vm3423_vm8, %v5451_v19  ;;  %12023 = vmatmul.msk.bf16.vlgmr.msrb.gmra.mxu1 %vm3423_vm8, %v17277_v61  ;;  %v12187_v30 = vld [vmem:[%s19384_s3 + $0x440] sm:$0xf] }
0x1338   : > { %6439 = vmatpush.bf16.msra.mxu1 %v12384_v25  ;;  %v12188_v28 = vor.u32 %v14837_v38, %v12187_v30  ;;  %v14829_v25 = vld [vmem:[%s19384_s3 + $0x41c] sm:$0xf0]  ;;  %v14913_v38 = vld [vmem:[%s19384_s3 + $0x6c4] sm:$0xf] }
0x1339   : > { %v5447_v18 = vadd.f32 %v5446_v54, %v5433_v35  ;;  %v12156_v62 = vor.u32 %v14829_v25, %v12155_v6  ;;  %v12576_v35 = vor.u32 %v14929_v41, %v12573_v46  ;;  %v14925_v54 = vld [vmem:[%s19384_s3 + $0x71c] sm:$0xf0]  ;;  %v14874_v41 = vld [vmem:[%s19384_s3 + $0x58c] sm:$0xf] }
0x133a   : > { %6419 = vmatpush.bf16.msrb.mxu3 %v12188_v28  ;;  %v12540_v32 = vor.u32 %v14925_v54, %v12539_v13  ;;  %v14917_v30 = vld [vmem:[%s19384_s3 + $0x6dc] sm:$0xf0]  ;;  %v12357_v46 = vld [vmem:[%s19384_s3 + $0x5a8] sm:$0xf0] }
0x133b   : > { %v17292_v60 = vpack.c.bf16 %v5447_v18, %v5445_v26  ;;  %v14833_v26 = vld [vmem:[%s19384_s3 + $0x444] sm:$0xf]  ;;  %v12475_v6 = vld [vmem:[%s19384_s3 + $0x680] sm:$0xf]  ;;  %v12360_v13 = vor.u32 %v14874_v41, %v12357_v46  ;;  %v14866_v54 = vld [vmem:[%s19384_s3 + $0x54c] sm:$0xf] }
0x133c   : > { %6440 = vmatpush.bf16.msra.mxu1 %v12352_v12  ;;  %v12256_v12 = vor.u32 %v14849_v39, %v12253_v22  ;;  %v12189_v18 = vld [vmem:[%s19384_s3 + $0x460] sm:$0xf0]  ;;  %v14909_v25 = vld [vmem:[%s19384_s3 + $0x69c] sm:$0xf0]  ;;  %v12229_v41 = vld [vmem:[%s19384_s3 + $0x4a8] sm:$0xf0] }
0x133d   : > { %5475 = vmatpush.bf16.msrb.mxu0 %v17292_v60  ;;  %5636 = vmatpush.bf16.msrb.mxu2 %v17292_v60  ;;  %v12192_v0 = vor.u32 %v14833_v26, %v12189_v18 }
0x133e   : > { %6420 = vmatpush.bf16.msrb.mxu3 %v12156_v62  ;;  %v12476_v62 = vor.u32 %v14909_v25, %v12475_v6 }
0x1340   : > { %6441 = vmatpush.bf16.msra.mxu1 %v12320_v52  ;;  %12021 = vmatmul.msk.bf16.vlgmr.msrb.gmra.mxu0 %vm3423_vm8, %v5451_v19  ;;  %v12572_v19 = vor.u32 %v14933_v7, %v12571_v17  ;;  %v12356_v52 = vor.u32 %v14878_v15, %v12355_v1  ;;  %v12160_v17 = vor.u32 %v14825_v23, %v12157_v63  ;;  %v14897_v1 = vld [vmem:[%s19384_s3 + $0x644] sm:$0xf]  ;;  %v14858_v23 = vld [vmem:[%s19384_s3 + $0x50c] sm:$0xf] }
0x1341   : > { %6426 = vmatpush.bf16.msra.mxu0 %v12636_v49  ;;  %6452 = vmatpush.bf16.msra.mxu2 %v12640_v43  ;;  %v14870_v49 = vld [vmem:[%s19384_s3 + $0x564] sm:$0xf0]  ;;  %v12507_v43 = vld [vmem:[%s19384_s3 + $0x6c0] sm:$0xf]  ;;  %v12445_v15 = vld [vmem:[%s19384_s3 + $0x660] sm:$0xf0] }
0x1342   : > { %6465 = vmatpush.bf16.msra.mxu3 %v12388_v50  ;;  %v12324_v39 = vor.u32 %v14870_v49, %v12323_v14  ;;  %v12508_v28 = vor.u32 %v14917_v30, %v12507_v43  ;;  %v14854_v50 = vld [vmem:[%s19384_s3 + $0x4e4] sm:$0xf0]  ;;  %v12448_v18 = vor.u32 %v14897_v1, %v12445_v15  ;;  %v14889_v14 = vld [vmem:[%s19384_s3 + $0x604] sm:$0xf]  ;;  %v12613_v1 = vld [vmem:[%s19384_s3 + $0x7a8] sm:$0xf0] }
0x1343   : > { %v12260_v9 = vor.u32 %v14854_v50, %v12259_v20  ;;  %v12413_v49 = vld [vmem:[%s19384_s3 + $0x620] sm:$0xf0]  ;;  %v12643_v43 = vld [vmem:[%s19384_s3 + $0x7c8] sm:$0xf] }
0x1344   : > { %6442 = vmatpush.bf16.msra.mxu1 %v12288_v27  ;;  %v12389_v27 = vld [vmem:[%s19384_s3 + $0x5e8] sm:$0xf0]  ;;  %v14950_v30 = vld [vmem:[%s19384_s3 + $0x7e4] sm:$0xf0] }
0x1345   : > { %6427 = vmatpush.bf16.msra.mxu0 %v12604_v44  ;;  %6453 = vmatpush.bf16.msra.mxu2 %v12608_v16  ;;  %v12291_v44 = vld [vmem:[%s19384_s3 + $0x508] sm:$0xf]  ;;  %v12392_v7 = vor.u32 %v14882_v48, %v12389_v27  ;;  %v12293_v48 = vld [vmem:[%s19384_s3 + $0x528] sm:$0xf0] }
0x1346   : > { %6466 = vmatpush.bf16.msra.mxu3 %v12356_v52  ;;  %v14862_v16 = vld [vmem:[%s19384_s3 + $0x524] sm:$0xf0]  ;;  %v12296_v6 = vor.u32 %v14858_v23, %v12293_v48 }
0x1347   : > { %12024 = vmatmul.msk.bf16.vlgmr.msrb.gmra.mxu2 %vm3423_vm8, %v17277_v61  ;;  %v12509_v61 = vld [vmem:[%s19384_s3 + $0x6e0] sm:$0xf0]  ;;  %v14846_v52 = vld [vmem:[%s19384_s3 + $0x4a4] sm:$0xf0] }
0x1348   : > { %6443 = vmatpush.bf16.msra.mxu1 %v12256_v12  ;;  %v12512_v22 = vor.u32 %v14913_v38, %v12509_v61  ;;  %v12292_v12 = vor.u32 %v14862_v16, %v12291_v44  ;;  %v14946_v38 = vld [vmem:[%s19384_s3 + $0x7cc] sm:$0xf]  ;;  %v12644_v44 = vor.u32 %v14950_v30, %v12643_v43  ;;  %v12611_v20 = vld [vmem:[%s19384_s3 + $0x788] sm:$0xf] }
0x1349   : > { %6428 = vmatpush.bf16.msra.mxu0 %v12572_v19  ;;  %6454 = vmatpush.bf16.msra.mxu2 %v12576_v35  ;;  %v12443_v19 = vld [vmem:[%s19384_s3 + $0x640] sm:$0xf]  ;;  %v12645_v61 = vld [vmem:[%s19384_s3 + $0x7e8] sm:$0xf0]  ;;  %v14942_v50 = vld [vmem:[%s19384_s3 + $0x7a4] sm:$0xf0] }
0x134a   : > { %6467 = vmatpush.bf16.msra.mxu3 %v12324_v39  ;;  %v14901_v35 = vld [vmem:[%s19384_s3 + $0x65c] sm:$0xf0]  ;;  %v12416_v39 = vor.u32 %v14889_v14, %v12413_v49  ;;  %v12648_v16 = vor.u32 %v14946_v38, %v12645_v61  ;;  %v12581_v14 = vld [vmem:[%s19384_s3 + $0x768] sm:$0xf0]  ;;  %v12547_v43 = vld [vmem:[%s19384_s3 + $0x708] sm:$0xf] }
0x134b   : > { %v12444_v26 = vor.u32 %v14901_v35, %v12443_v19  ;;  %v14938_v19 = vld [vmem:[%s19384_s3 + $0x78c] sm:$0xf]  ;;  %v12612_v35 = vor.u32 %v14942_v50, %v12611_v20  ;;  %v14926_v30 = vld [vmem:[%s19384_s3 + $0x724] sm:$0xf0] }
0x134c   : > { %6444 = vmatpush.bf16.msra.mxu1 %v12224_v24  ;;  %v12227_v24 = vld [vmem:[%s19384_s3 + $0x488] sm:$0xf]  ;;  %v12616_v15 = vor.u32 %v14938_v19, %v12613_v1  ;;  %v12548_v38 = vor.u32 %v14926_v30, %v12547_v43  ;;  %v14922_v61 = vld [vmem:[%s19384_s3 + $0x70c] sm:$0xf]  ;;  %v12331_v30 = vld [vmem:[%s19384_s3 + $0x550] sm:$0xf] }
0x134d   : > { %6429 = vmatpush.bf16.msra.mxu0 %v12540_v32  ;;  %6455 = vmatpush.bf16.msra.mxu2 %v12544_v36  ;;  %v12411_v32 = vld [vmem:[%s19384_s3 + $0x600] sm:$0xf]  ;;  %v12228_v63 = vor.u32 %v14846_v52, %v12227_v24  ;;  %v12165_v24 = vld [vmem:[%s19384_s3 + $0x428] sm:$0xf0]  ;;  %v14934_v52 = vld [vmem:[%s19384_s3 + $0x764] sm:$0xf0] }
0x134e   : > { %6468 = vmatpush.bf16.msra.mxu3 %v12292_v12  ;;  %v14893_v36 = vld [vmem:[%s19384_s3 + $0x61c] sm:$0xf0]  ;;  %v14834_v12 = vld [vmem:[%s19384_s3 + $0x44c] sm:$0xf]  ;;  %v14918_v48 = vld [vmem:[%s19384_s3 + $0x6e4] sm:$0xf0] }
0x134f   : > { %v12412_v27 = vor.u32 %v14893_v36, %v12411_v32  ;;  %v14930_v32 = vld [vmem:[%s19384_s3 + $0x74c] sm:$0xf]  ;;  %v14894_v20 = vld [vmem:[%s19384_s3 + $0x624] sm:$0xf0] }
0x1350   : > { %6445 = vmatpush.bf16.msra.mxu1 %v12192_v0  ;;  %v12328_v0 = vor.u32 %v14866_v54, %v12325_v34  ;;  %v14830_v54 = vld [vmem:[%s19384_s3 + $0x424] sm:$0xf0]  ;;  %v14826_v34 = vld [vmem:[%s19384_s3 + $0x40c] sm:$0xf]  ;;  %v12584_v49 = vor.u32 %v14930_v32, %v12581_v14  ;;  %v14879_v32 = vld [vmem:[%s19384_s3 + $0x5ac] sm:$0xf0] }
0x1351   : > { %6430 = vmatpush.bf16.msra.mxu0 %v12508_v28  ;;  %6456 = vmatpush.bf16.msra.mxu2 %v12512_v22  ;;  %v12195_v28 = vld [vmem:[%s19384_s3 + $0x448] sm:$0xf]  ;;  %v14890_v19 = vld [vmem:[%s19384_s3 + $0x60c] sm:$0xf]  ;;  %v12365_v14 = vld [vmem:[%s19384_s3 + $0x5b0] sm:$0xf0] }
0x1352   : > { %6469 = vmatpush.bf16.msra.mxu3 %v12260_v9  ;;  %v14838_v22 = vld [vmem:[%s19384_s3 + $0x464] sm:$0xf0] }
0x1353   : > { %v12196_v25 = vor.u32 %v14838_v22, %v12195_v28  ;;  %v12517_v28 = vld [vmem:[%s19384_s3 + $0x6e8] sm:$0xf0] }
0x1354   : > { %6446 = vmatpush.bf16.msra.mxu1 %v12160_v17  ;;  %v12264_v17 = vor.u32 %v14850_v42, %v12261_v10  ;;  %v12485_v42 = vld [vmem:[%s19384_s3 + $0x6a8] sm:$0xf0] }
0x1355   : > { %6431 = vmatpush.bf16.msra.mxu0 %v12476_v62  ;;  %6457 = vmatpush.bf16.msra.mxu2 %v12480_v59  ;;  %v12197_v62 = vld [vmem:[%s19384_s3 + $0x468] sm:$0xf0] }
0x1356   : > { %6470 = vmatpush.bf16.msra.mxu3 %v12228_v63  ;;  %v12200_v59 = vor.u32 %v14834_v12, %v12197_v62  ;;  %v12515_v63 = vld [vmem:[%s19384_s3 + $0x6c8] sm:$0xf]  ;;  %v12453_v12 = vld [vmem:[%s19384_s3 + $0x668] sm:$0xf0] }
0x1358   : > { %6491 = vmatpush.bf16.msrb.mxu1 %v12392_v7  ;;  %v14842_v7 = vld [vmem:[%s19384_s3 + $0x48c] sm:$0xf] }
0x1359   : > { %6432 = vmatpush.bf16.msra.mxu0 %v12444_v26  ;;  %6458 = vmatpush.bf16.msra.mxu2 %v12448_v18  ;;  %v12232_v46 = vor.u32 %v14842_v7, %v12229_v41  ;;  %v12168_v26 = vor.u32 %v14826_v34, %v12165_v24  ;;  %v12579_v18 = vld [vmem:[%s19384_s3 + $0x748] sm:$0xf]  ;;  %v12397_v34 = vld [vmem:[%s19384_s3 + $0x5f0] sm:$0xf0] }
0x135a   : > { %6471 = vmatpush.bf16.msra.mxu3 %v12196_v25  ;;  %v12580_v36 = vor.u32 %v14934_v52, %v12579_v18  ;;  %v14906_v25 = vld [vmem:[%s19384_s3 + $0x68c] sm:$0xf]  ;;  %v14902_v7 = vld [vmem:[%s19384_s3 + $0x664] sm:$0xf0]  ;;  %v12363_v18 = vld [vmem:[%s19384_s3 + $0x590] sm:$0xf] }
0x135b   : > { %v12488_v10 = vor.u32 %v14906_v25, %v12485_v42  ;;  %v12267_v25 = vld [vmem:[%s19384_s3 + $0x4d0] sm:$0xf] }
0x135c   : > { %6492 = vmatpush.bf16.msrb.mxu1 %v12360_v13  ;;  %v12163_v13 = vld [vmem:[%s19384_s3 + $0x408] sm:$0xf]  ;;  %v14855_v42 = vld [vmem:[%s19384_s3 + $0x4ec] sm:$0xf0] }
0x135d   : > { %6433 = vmatpush.bf16.msra.mxu0 %v12412_v27  ;;  %6459 = vmatpush.bf16.msra.mxu2 %v12416_v39  ;;  %v12164_v9 = vor.u32 %v14830_v54, %v12163_v13  ;;  %v14914_v27 = vld [vmem:[%s19384_s3 + $0x6cc] sm:$0xf]  ;;  %v12516_v39 = vor.u32 %v14918_v48, %v12515_v63  ;;  %v14887_v13 = vld [vmem:[%s19384_s3 + $0x5ec] sm:$0xf0]  ;;  %v14883_v54 = vld [vmem:[%s19384_s3 + $0x5d4] sm:$0xf] }
0x135e   : > { %v12520_v22 = vor.u32 %v14914_v27, %v12517_v28  ;;  %v12299_v27 = vld [vmem:[%s19384_s3 + $0x510] sm:$0xf] }
0x135f   : > { %6472 = vmatpush.bf16.msra.mxu3 %v12164_v9  ;;  %v14863_v28 = vld [vmem:[%s19384_s3 + $0x52c] sm:$0xf0] }
0x1360   : > { %6493 = vmatpush.bf16.msrb.mxu1 %v12328_v0  ;;  %v12549_v0 = vld [vmem:[%s19384_s3 + $0x728] sm:$0xf0] }
0x1361   : > { %6478 = vmatpush.bf16.msrb.mxu0 %v12644_v44  ;;  %6504 = vmatpush.bf16.msrb.mxu2 %v12648_v16  ;;  %v12552_v23 = vor.u32 %v14922_v61, %v12549_v0  ;;  %v12483_v44 = vld [vmem:[%s19384_s3 + $0x688] sm:$0xf]  ;;  %v14867_v61 = vld [vmem:[%s19384_s3 + $0x554] sm:$0xf] }
0x1362   : > { %v14910_v16 = vld [vmem:[%s19384_s3 + $0x6a4] sm:$0xf0]  ;;  %v12333_v0 = vld [vmem:[%s19384_s3 + $0x570] sm:$0xf0] }
0x1363   : > { %v12336_v48 = vor.u32 %v14867_v61, %v12333_v0  ;;  %v12171_v0 = vld [vmem:[%s19384_s3 + $0x410] sm:$0xf] }
0x1364   : > { %6494 = vmatpush.bf16.msrb.mxu1 %v12296_v6  ;;  %v12484_v6 = vor.u32 %v14910_v16, %v12483_v44  ;;  %v12301_v44 = vld [vmem:[%s19384_s3 + $0x530] sm:$0xf0]  ;;  %v12300_v16 = vor.u32 %v14863_v28, %v12299_v27  ;;  %v14888_v28 = vld [vmem:[%s19384_s3 + $0x5f4] sm:$0xf0] }
0x1365   : > { %6479 = vmatpush.bf16.msrb.mxu0 %v12612_v35  ;;  %6505 = vmatpush.bf16.msrb.mxu2 %v12616_v15  ;;  %v12421_v35 = vld [vmem:[%s19384_s3 + $0x628] sm:$0xf0]  ;;  %v12395_v15 = vld [vmem:[%s19384_s3 + $0x5d0] sm:$0xf]  ;;  %v12173_v27 = vld [vmem:[%s19384_s3 + $0x430] sm:$0xf0] }
0x1366   : > { %v12424_v1 = vor.u32 %v14890_v19, %v12421_v35  ;;  %v12396_v24 = vor.u32 %v14887_v13, %v12395_v15  ;;  %v14951_v19 = vld [vmem:[%s19384_s3 + $0x7ec] sm:$0xf0]  ;;  %v14947_v35 = vld [vmem:[%s19384_s3 + $0x7d4] sm:$0xf] }
0x1368   : > { %6495 = vmatpush.bf16.msrb.mxu1 %v12264_v17  ;;  %v12451_v17 = vld [vmem:[%s19384_s3 + $0x648] sm:$0xf] }
0x1369   : > { %6480 = vmatpush.bf16.msrb.mxu0 %v12580_v36  ;;  %6506 = vmatpush.bf16.msrb.mxu2 %v12584_v49  ;;  %v12452_v41 = vor.u32 %v14902_v7, %v12451_v17  ;;  %v14875_v36 = vld [vmem:[%s19384_s3 + $0x594] sm:$0xf]  ;;  %v12364_v49 = vor.u32 %v14879_v32, %v12363_v18 }
0x136a   : > { %v12368_v43 = vor.u32 %v14875_v36, %v12365_v14  ;;  %v12269_v17 = vld [vmem:[%s19384_s3 + $0x4f0] sm:$0xf0]  ;;  %v12619_v36 = vld [vmem:[%s19384_s3 + $0x790] sm:$0xf] }
0x136c   : > { %6496 = vmatpush.bf16.msrb.mxu1 %v12232_v46  ;;  %v14898_v46 = vld [vmem:[%s19384_s3 + $0x64c] sm:$0xf] }
0x136d   : > { %6481 = vmatpush.bf16.msrb.mxu0 %v12548_v38  ;;  %6507 = vmatpush.bf16.msrb.mxu2 %v12552_v23  ;;  %v12456_v62 = vor.u32 %v14898_v46, %v12453_v12  ;;  %v14871_v38 = vld [vmem:[%s19384_s3 + $0x56c] sm:$0xf0] }
0x136e   : > { %v12332_v63 = vor.u32 %v14871_v38, %v12331_v30  ;;  %v12235_v12 = vld [vmem:[%s19384_s3 + $0x490] sm:$0xf]  ;;  %v12621_v30 = vld [vmem:[%s19384_s3 + $0x7b0] sm:$0xf0] }
0x1370   : > { %6497 = vmatpush.bf16.msrb.mxu1 %v12200_v59  ;;  %v12419_v59 = vld [vmem:[%s19384_s3 + $0x608] sm:$0xf] }
0x1371   : > { %6482 = vmatpush.bf16.msrb.mxu0 %v12516_v39  ;;  %6508 = vmatpush.bf16.msrb.mxu2 %v12520_v22  ;;  %v12420_v50 = vor.u32 %v14894_v20, %v12419_v59  ;;  %v14859_v22 = vld [vmem:[%s19384_s3 + $0x514] sm:$0xf] }
0x1372   : > { %v14843_v59 = vld [vmem:[%s19384_s3 + $0x494] sm:$0xf] }
0x1373   : > { %v12237_v20 = vld [vmem:[%s19384_s3 + $0x4b0] sm:$0xf0] }
0x1374   : > { %6498 = vmatpush.bf16.msrb.mxu1 %v12168_v26  ;;  %v12400_v26 = vor.u32 %v14883_v54, %v12397_v34  ;;  %v12240_v13 = vor.u32 %v14843_v59, %v12237_v20  ;;  %v12203_v54 = vld [vmem:[%s19384_s3 + $0x450] sm:$0xf]  ;;  %v14880_v59 = vld [vmem:[%s19384_s3 + $0x5b4] sm:$0xf0] }
0x1375   : > { %6483 = vmatpush.bf16.msrb.mxu0 %v12484_v6  ;;  %6509 = vmatpush.bf16.msrb.mxu2 %v12488_v10  ;;  %v12304_v6 = vor.u32 %v14859_v22, %v12301_v44  ;;  %v14851_v10 = vld [vmem:[%s19384_s3 + $0x4d4] sm:$0xf]  ;;  %v14839_v34 = vld [vmem:[%s19384_s3 + $0x46c] sm:$0xf0] }
0x1376   : > { %v12272_v46 = vor.u32 %v14851_v10, %v12269_v17  ;;  %v12204_v38 = vor.u32 %v14839_v34, %v12203_v54  ;;  %v14931_v10 = vld [vmem:[%s19384_s3 + $0x754] sm:$0xf] }
0x1377   : > { %v12589_v17 = vld [vmem:[%s19384_s3 + $0x770] sm:$0xf0] }
0x1378   : > { %v14923_v54 = vld [vmem:[%s19384_s3 + $0x714] sm:$0xf] }
0x1379   : > { %6484 = vmatpush.bf16.msrb.mxu0 %v12452_v41  ;;  %6510 = vmatpush.bf16.msrb.mxu2 %v12456_v62  ;;  %v12268_v41 = vor.u32 %v14855_v42, %v12267_v25  ;;  %v14847_v62 = vld [vmem:[%s19384_s3 + $0x4ac] sm:$0xf0]  ;;  %v12557_v34 = vld [vmem:[%s19384_s3 + $0x730] sm:$0xf0] }
0x137a   : > { %v12236_v15 = vor.u32 %v14847_v62, %v12235_v12  ;;  %v12587_v25 = vld [vmem:[%s19384_s3 + $0x750] sm:$0xf]  ;;  %v12371_v62 = vld [vmem:[%s19384_s3 + $0x598] sm:$0xf] }
0x137b   : > { %v14935_v42 = vld [vmem:[%s19384_s3 + $0x76c] sm:$0xf0] }
0x137d   : > { %6485 = vmatpush.bf16.msrb.mxu0 %v12420_v50  ;;  %6511 = vmatpush.bf16.msrb.mxu2 %v12424_v1  ;;  %v12651_v50 = vld [vmem:[%s19384_s3 + $0x7d0] sm:$0xf]  ;;  %v12653_v1 = vld [vmem:[%s19384_s3 + $0x7f0] sm:$0xf0] }
0x137e   : > { %v12652_v18 = vor.u32 %v14951_v19, %v12651_v50  ;;  %v12656_v32 = vor.u32 %v14947_v35, %v12653_v1  ;;  %v12588_v50 = vor.u32 %v14935_v42, %v12587_v25  ;;  %v12592_v19 = vor.u32 %v14931_v10, %v12589_v17  ;;  %v14876_v35 = vld [vmem:[%s19384_s3 + $0x59c] sm:$0xf]  ;;  %v14911_v25 = vld [vmem:[%s19384_s3 + $0x6ac] sm:$0xf0]  ;;  %v14907_v42 = vld [vmem:[%s19384_s3 + $0x694] sm:$0xf] }
0x137f   : > { %v12373_v1 = vld [vmem:[%s19384_s3 + $0x5b8] sm:$0xf0]  ;;  %v12493_v10 = vld [vmem:[%s19384_s3 + $0x6b0] sm:$0xf0] }
0x13b4   : > { %v5625_v9 = vpop.f32.mrf.mxu1 }
0x13b5   : > { %v17408_v52 = vpack.c.bf16 %v5625_v9, %v5625_v9  ;;  %v14835_v9 = vld [vmem:[%s19384_s3 + $0x454] sm:$0xf] }
0x13b7   : > { %6421 = vmatmul.bf16.vlgmr.msrb.gmra.mxu3 %v17408_v52  ;;  %6447 = vmatmul.bf16.vlgmr.msra.gmra.mxu1 %v17408_v52 }
0x13b8   : > { %6517 = vmatpush.bf16.msrb.mxu3 %v12396_v24  ;;  %6543 = vmatpush.bf16.msra.mxu1 %v12400_v26  ;;  %v12205_v24 = vld [vmem:[%s19384_s3 + $0x470] sm:$0xf0] }
0x13b9   : > { %v12208_v61 = vor.u32 %v14835_v9, %v12205_v24  ;;  %v12372_v9 = vor.u32 %v14880_v59, %v12371_v62  ;;  %v12376_v24 = vor.u32 %v14876_v35, %v12373_v1  ;;  %v12277_v62 = vld [vmem:[%s19384_s3 + $0x4f8] sm:$0xf0]  ;;  %v14899_v35 = vld [vmem:[%s19384_s3 + $0x654] sm:$0xf] }
0x13ba   : > { %v17419_v23 = vpop.f32.mrf.mxu2  ;;  %v12461_v1 = vld [vmem:[%s19384_s3 + $0x670] sm:$0xf0] }
0x13bc   : > { %6518 = vmatpush.bf16.msrb.mxu3 %v12364_v49  ;;  %6544 = vmatpush.bf16.msra.mxu1 %v12368_v43  ;;  %v5627_v39 = vpop.f32.mrf.mxu1  ;;  %v14943_v49 = vld [vmem:[%s19384_s3 + $0x7ac] sm:$0xf0]  ;;  %v14939_v43 = vld [vmem:[%s19384_s3 + $0x794] sm:$0xf] }
0x13bd   : > { %v12403_v39 = vld [vmem:[%s19384_s3 + $0x5d8] sm:$0xf]  ;;  %v12620_v22 = vor.u32 %v14943_v49, %v12619_v36  ;;  %v12624_v44 = vor.u32 %v14939_v43, %v12621_v30  ;;  %v14868_v49 = vld [vmem:[%s19384_s3 + $0x55c] sm:$0xf]  ;;  %v12523_v30 = vld [vmem:[%s19384_s3 + $0x6d0] sm:$0xf] }
0x13be   : > { %v14872_v36 = vld [vmem:[%s19384_s3 + $0x574] sm:$0xf0]  ;;  %v12341_v43 = vld [vmem:[%s19384_s3 + $0x578] sm:$0xf0] }
0x13c0   : > { %6519 = vmatpush.bf16.msrb.mxu3 %v12332_v63  ;;  %6545 = vmatpush.bf16.msra.mxu1 %v12336_v48  ;;  %v14831_v63 = vld [vmem:[%s19384_s3 + $0x42c] sm:$0xf0]  ;;  %v14827_v48 = vld [vmem:[%s19384_s3 + $0x414] sm:$0xf] }
0x13c2   : > { %v5466_v7 = vpop.f32.mrf.mxu2 }
0x13c3   : > { %v12172_v7 = vor.u32 %v14831_v63, %v12171_v0  ;;  %v12525_v0 = vld [vmem:[%s19384_s3 + $0x6f0] sm:$0xf0] }
0x13c4   : > { %6520 = vmatpush.bf16.msrb.mxu3 %v12300_v16  ;;  %6546 = vmatpush.bf16.msra.mxu1 %v12304_v6  ;;  %v14884_v16 = vld [vmem:[%s19384_s3 + $0x5dc] sm:$0xf] }
0x13c5   : > { %v12405_v6 = vld [vmem:[%s19384_s3 + $0x5f8] sm:$0xf0] }
0x13c6   : > { %v12408_v12 = vor.u32 %v14884_v16, %v12405_v6  ;;  %v12491_v6 = vld [vmem:[%s19384_s3 + $0x690] sm:$0xf] }
0x13c7   : > { %6473 = vmatmul.bf16.vlgmr.msra.gmra.mxu3 %v17408_v52  ;;  %6499 = vmatmul.bf16.vlgmr.msrb.gmra.mxu1 %v17408_v52  ;;  %v12492_v59 = vor.u32 %v14911_v25, %v12491_v6 }
0x13c8   : > { %6521 = vmatpush.bf16.msrb.mxu3 %v12268_v41  ;;  %6547 = vmatpush.bf16.msra.mxu1 %v12272_v46  ;;  %v12176_v41 = vor.u32 %v14827_v48, %v12173_v27  ;;  %v12404_v46 = vor.u32 %v14888_v28, %v12403_v39  ;;  %v12344_v48 = vor.u32 %v14868_v49, %v12341_v43  ;;  %v12307_v27 = vld [vmem:[%s19384_s3 + $0x518] sm:$0xf]  ;;  %v14860_v28 = vld [vmem:[%s19384_s3 + $0x51c] sm:$0xf]  ;;  %v14891_v49 = vld [vmem:[%s19384_s3 + $0x614] sm:$0xf] }
0x13c9   : > { %v14864_v39 = vld [vmem:[%s19384_s3 + $0x534] sm:$0xf0]  ;;  %v12429_v43 = vld [vmem:[%s19384_s3 + $0x630] sm:$0xf0] }
0x13ca   : > { %v5638_v26 = vpop.f32.mrf.mxu2  ;;  %v12308_v17 = vor.u32 %v14864_v39, %v12307_v27  ;;  %v12211_v27 = vld [vmem:[%s19384_s3 + $0x458] sm:$0xf] }
0x13cb   : > { %v17444_v14 = vpack.c.bf16 %v5638_v26, %v5638_v26  ;;  %v12339_v26 = vld [vmem:[%s19384_s3 + $0x558] sm:$0xf] }
0x13cc   : > { %6522 = vmatpush.bf16.msrb.mxu3 %v12236_v15  ;;  %6548 = vmatpush.bf16.msra.mxu1 %v12240_v13  ;;  %v12555_v15 = vld [vmem:[%s19384_s3 + $0x710] sm:$0xf]  ;;  %v12340_v63 = vor.u32 %v14872_v36, %v12339_v26  ;;  %v14840_v39 = vld [vmem:[%s19384_s3 + $0x474] sm:$0xf0] }
0x13cd   : > { %6434 = vmatmul.bf16.vlgmr.msra.gmra.mxu0 %v17444_v14  ;;  %6460 = vmatmul.bf16.vlgmr.msra.gmra.mxu2 %v17444_v14  ;;  %v14927_v13 = vld [vmem:[%s19384_s3 + $0x72c] sm:$0xf0] }
0x13ce   : > { %6530 = vmatpush.bf16.msra.mxu0 %v12652_v18  ;;  %6556 = vmatpush.bf16.msra.mxu2 %v12656_v32  ;;  %v12556_v18 = vor.u32 %v14927_v13, %v12555_v15  ;;  %v12560_v32 = vor.u32 %v14923_v54, %v12557_v34  ;;  %v12243_v54 = vld [vmem:[%s19384_s3 + $0x498] sm:$0xf]  ;;  %v14895_v36 = vld [vmem:[%s19384_s3 + $0x62c] sm:$0xf0] }
0x13cf   : > { %v14848_v34 = vld [vmem:[%s19384_s3 + $0x4b4] sm:$0xf0] }
0x13d0   : > { %6523 = vmatpush.bf16.msrb.mxu3 %v12204_v38  ;;  %6549 = vmatpush.bf16.msra.mxu1 %v12208_v61  ;;  %v14919_v38 = vld [vmem:[%s19384_s3 + $0x6ec] sm:$0xf0]  ;;  %v14915_v61 = vld [vmem:[%s19384_s3 + $0x6d4] sm:$0xf] }
0x13d1   : > { %v12528_v16 = vor.u32 %v14915_v61, %v12525_v0  ;;  %v12244_v61 = vor.u32 %v14848_v34, %v12243_v54  ;;  %v12595_v54 = vld [vmem:[%s19384_s3 + $0x758] sm:$0xf] }
0x13d2   : > { %6531 = vmatpush.bf16.msra.mxu0 %v12620_v22  ;;  %6557 = vmatpush.bf16.msra.mxu2 %v12624_v44  ;;  %v5640_v20 = vpop.f32.mrf.mxu2  ;;  %v12309_v22 = vld [vmem:[%s19384_s3 + $0x538] sm:$0xf0]  ;;  %v12524_v44 = vor.u32 %v14919_v38, %v12523_v30  ;;  %v12659_v30 = vld [vmem:[%s19384_s3 + $0x7d8] sm:$0xf] }
0x13d3   : > { %v12496_v20 = vor.u32 %v14907_v42, %v12493_v10  ;;  %v14952_v38 = vld [vmem:[%s19384_s3 + $0x7f4] sm:$0xf0] }
0x13d4   : > { %6524 = vmatpush.bf16.msrb.mxu3 %v12172_v7  ;;  %6550 = vmatpush.bf16.msra.mxu1 %v12176_v41  ;;  %v12312_v7 = vor.u32 %v14860_v28, %v12309_v22  ;;  %v12275_v41 = vld [vmem:[%s19384_s3 + $0x4d8] sm:$0xf]  ;;  %v14836_v28 = vld [vmem:[%s19384_s3 + $0x45c] sm:$0xf]  ;;  %v12660_v6 = vor.u32 %v14952_v38, %v12659_v30  ;;  %v14745_v30 = vld [vmem:[%s19384_s3 + $0x184] sm:$0xf] }
0x13d5   : > { %v12213_v22 = vld [vmem:[%s19384_s3 + $0x478] sm:$0xf0]  ;;  %v12627_v42 = vld [vmem:[%s19384_s3 + $0x798] sm:$0xf]  ;;  %v12861_v38 = vld [vmem:[%s19384_s3 + $0x1a0] sm:$0xf0] }
0x13d6   : > { %6532 = vmatpush.bf16.msra.mxu0 %v12588_v50  ;;  %6558 = vmatpush.bf16.msra.mxu2 %v12592_v19  ;;  %v12459_v50 = vld [vmem:[%s19384_s3 + $0x650] sm:$0xf]  ;;  %v14944_v10 = vld [vmem:[%s19384_s3 + $0x7b4] sm:$0xf0] }
0x13d7   : > { %6525 = vmatmul.bf16.vlgmr.msrb.gmra.mxu3 %v17408_v52  ;;  %6551 = vmatmul.bf16.vlgmr.msra.gmra.mxu1 %v17408_v52  ;;  %v14903_v19 = vld [vmem:[%s19384_s3 + $0x66c] sm:$0xf0] }
0x13d8   : > { %6569 = vmatpush.bf16.msra.mxu3 %v12404_v46  ;;  %6595 = vmatpush.bf16.msrb.mxu1 %v12408_v12  ;;  %v14856_v46 = vld [vmem:[%s19384_s3 + $0x4f4] sm:$0xf0]  ;;  %v14852_v12 = vld [vmem:[%s19384_s3 + $0x4dc] sm:$0xf]  ;;  %v12460_v26 = vor.u32 %v14903_v19, %v12459_v50  ;;  %v12891_v50 = vld [vmem:[%s19384_s3 + $0x1c0] sm:$0xf] }
0x13d9   : > { %v12276_v15 = vor.u32 %v14856_v46, %v12275_v41  ;;  %v12280_v13 = vor.u32 %v14852_v12, %v12277_v62  ;;  %v12216_v41 = vor.u32 %v14836_v28, %v12213_v22  ;;  %v12629_v46 = vld [vmem:[%s19384_s3 + $0x7b8] sm:$0xf0]  ;;  %v12179_v12 = vld [vmem:[%s19384_s3 + $0x418] sm:$0xf]  ;;  %v14757_v19 = vld [vmem:[%s19384_s3 + $0x1dc] sm:$0xf0]  ;;  %v12864_v22 = vor.u32 %v14745_v30, %v12861_v38 }
0x13da   : > { %6533 = vmatpush.bf16.msra.mxu0 %v12556_v18  ;;  %6559 = vmatpush.bf16.msra.mxu2 %v12560_v32  ;;  %v12464_v18 = vor.u32 %v14899_v35, %v12461_v1  ;;  %v12427_v32 = vld [vmem:[%s19384_s3 + $0x610] sm:$0xf]  ;;  %v14832_v62 = vld [vmem:[%s19384_s3 + $0x434] sm:$0xf0]  ;;  %v14753_v35 = vld [vmem:[%s19384_s3 + $0x1c4] sm:$0xf] }
0x13db   : > { %v12893_v1 = vld [vmem:[%s19384_s3 + $0x1e0] sm:$0xf0]  ;;  %v12180_v34 = vor.u32 %v14832_v62, %v12179_v12  ;;  %v14904_v30 = vld [vmem:[%s19384_s3 + $0x674] sm:$0xf0]  ;;  %v14900_v38 = vld [vmem:[%s19384_s3 + $0x65c] sm:$0xf] }
0x13dc   : > { %6570 = vmatpush.bf16.msra.mxu3 %v12372_v9  ;;  %6596 = vmatpush.bf16.msrb.mxu1 %v12376_v24  ;;  %v14844_v9 = vld [vmem:[%s19384_s3 + $0x49c] sm:$0xf] }
0x13dd   : > { %6486 = vmatmul.bf16.vlgmr.msrb.gmra.mxu0 %v17444_v14  ;;  %6512 = vmatmul.bf16.vlgmr.msrb.gmra.mxu2 %v17444_v14  ;;  %v12245_v24 = vld [vmem:[%s19384_s3 + $0x4b8] sm:$0xf0] }
0x13de   : > { %6534 = vmatpush.bf16.msra.mxu0 %v12524_v44  ;;  %6560 = vmatpush.bf16.msra.mxu2 %v12528_v16  ;;  %v12248_v0 = vor.u32 %v14844_v9, %v12245_v24  ;;  %v12428_v44 = vor.u32 %v14895_v36, %v12427_v32  ;;  %v12432_v16 = vor.u32 %v14891_v49, %v12429_v43  ;;  %v14936_v24 = vld [vmem:[%s19384_s3 + $0x774] sm:$0xf0]  ;;  %v12859_v49 = vld [vmem:[%s19384_s3 + $0x180] sm:$0xf] }
0x13df   : > { %v12892_v32 = vor.u32 %v14757_v19, %v12891_v50  ;;  %v12896_v36 = vor.u32 %v14753_v35, %v12893_v1  ;;  %v14749_v43 = vld [vmem:[%s19384_s3 + $0x19c] sm:$0xf0]  ;;  %v14729_v50 = vld [vmem:[%s19384_s3 + $0x104] sm:$0xf]  ;;  %v12499_v1 = vld [vmem:[%s19384_s3 + $0x698] sm:$0xf] }
0x13e0   : > { %6571 = vmatpush.bf16.msra.mxu3 %v12340_v63  ;;  %6597 = vmatpush.bf16.msrb.mxu1 %v12344_v48  ;;  %v14948_v63 = vld [vmem:[%s19384_s3 + $0x7dc] sm:$0xf]  ;;  %v12860_v28 = vor.u32 %v14749_v43, %v12859_v49  ;;  %v12797_v19 = vld [vmem:[%s19384_s3 + $0x120] sm:$0xf0]  ;;  %v12467_v43 = vld [vmem:[%s19384_s3 + $0x658] sm:$0xf] }
0x13e1   : > { %v12661_v48 = vld [vmem:[%s19384_s3 + $0x7f8] sm:$0xf0] }
0x13e2   : > { %6535 = vmatpush.bf16.msra.mxu0 %v12492_v59  ;;  %6561 = vmatpush.bf16.msra.mxu2 %v12496_v20  ;;  %v12664_v25 = vor.u32 %v14948_v63, %v12661_v48  ;;  %v14828_v59 = vld [vmem:[%s19384_s3 + $0x41c] sm:$0xf]  ;;  %v12563_v63 = vld [vmem:[%s19384_s3 + $0x718] sm:$0xf] }
0x13e3   : > { %v12181_v20 = vld [vmem:[%s19384_s3 + $0x438] sm:$0xf0]  ;;  %v14928_v48 = vld [vmem:[%s19384_s3 + $0x734] sm:$0xf0] }
0x13e4   : > { %6572 = vmatpush.bf16.msra.mxu3 %v12308_v17  ;;  %6598 = vmatpush.bf16.msrb.mxu1 %v12312_v7  ;;  %v14940_v17 = vld [vmem:[%s19384_s3 + $0x79c] sm:$0xf]  ;;  %v12212_v7 = vor.u32 %v14840_v39, %v12211_v27  ;;  %v12184_v9 = vor.u32 %v14828_v59, %v12181_v20  ;;  %v12795_v59 = vld [vmem:[%s19384_s3 + $0x100] sm:$0xf] }
0x13e5   : > { %v14924_v27 = vld [vmem:[%s19384_s3 + $0x71c] sm:$0xf]  ;;  %v14733_v20 = vld [vmem:[%s19384_s3 + $0x11c] sm:$0xf0] }
0x13e6   : > { %6536 = vmatpush.bf16.msra.mxu0 %v12460_v26  ;;  %6562 = vmatpush.bf16.msra.mxu2 %v12464_v18  ;;  %v14932_v26 = vld [vmem:[%s19384_s3 + $0x75c] sm:$0xf] }
0x13e7   : > { %v12597_v18 = vld [vmem:[%s19384_s3 + $0x778] sm:$0xf0] }
0x13e8   : > { %6573 = vmatpush.bf16.msra.mxu3 %v12276_v15  ;;  %6599 = vmatpush.bf16.msrb.mxu1 %v12280_v13  ;;  %v12628_v15 = vor.u32 %v14944_v10, %v12627_v42  ;;  %v12632_v13 = vor.u32 %v14940_v17, %v12629_v46  ;;  %v12565_v39 = vld [vmem:[%s19384_s3 + $0x738] sm:$0xf0]  ;;  %v12564_v42 = vor.u32 %v14928_v48, %v12563_v63  ;;  %v12531_v17 = vld [vmem:[%s19384_s3 + $0x6d8] sm:$0xf]  ;;  %v12731_v48 = vld [vmem:[%s19384_s3 + $0x80] sm:$0xf] }
0x13e9   : > { %v12568_v10 = vor.u32 %v14924_v27, %v12565_v39  ;;  %v12533_v46 = vld [vmem:[%s19384_s3 + $0x6f8] sm:$0xf0]  ;;  %v14717_v27 = vld [vmem:[%s19384_s3 + $0x9c] sm:$0xf0]  ;;  %v14713_v39 = vld [vmem:[%s19384_s3 + $0x84] sm:$0xf] }
0x13ea   : > { %6537 = vmatpush.bf16.msra.mxu0 %v12428_v44  ;;  %6563 = vmatpush.bf16.msra.mxu2 %v12432_v16  ;;  %v12827_v44 = vld [vmem:[%s19384_s3 + $0x140] sm:$0xf] }
0x13eb   : > { %v14741_v16 = vld [vmem:[%s19384_s3 + $0x15c] sm:$0xf0] }
0x13ec   : > { %6574 = vmatpush.bf16.msra.mxu3 %v12244_v61  ;;  %6600 = vmatpush.bf16.msrb.mxu1 %v12248_v0  ;;  %v12596_v61 = vor.u32 %v14936_v24, %v12595_v54  ;;  %v12600_v0 = vor.u32 %v14932_v26, %v12597_v18  ;;  %v12828_v12 = vor.u32 %v14741_v16, %v12827_v44  ;;  %v12501_v54 = vld [vmem:[%s19384_s3 + $0x6b8] sm:$0xf0]  ;;  %v12763_v24 = vld [vmem:[%s19384_s3 + $0xc0] sm:$0xf]  ;;  %v14721_v18 = vld [vmem:[%s19384_s3 + $0xc4] sm:$0xf] }
0x13ed   : > { %6538 = vmatmul.bf16.vlgmr.msra.gmra.mxu0 %v17444_v14  ;;  %6564 = vmatmul.bf16.vlgmr.msra.gmra.mxu2 %v17444_v14  ;;  %v14725_v26 = vld [vmem:[%s19384_s3 + $0xdc] sm:$0xf0]  ;;  %v12435_v16 = vld [vmem:[%s19384_s3 + $0x618] sm:$0xf] }
0x13ee   : > { %6582 = vmatpush.bf16.msrb.mxu0 %v12660_v6  ;;  %6608 = vmatpush.bf16.msrb.mxu2 %v12664_v25  ;;  %v14737_v6 = vld [vmem:[%s19384_s3 + $0x144] sm:$0xf] }
0x13ef   : > { %v12829_v25 = vld [vmem:[%s19384_s3 + $0x160] sm:$0xf0] }
0x13f0   : > { %6575 = vmatpush.bf16.msra.mxu3 %v12212_v7  ;;  %6601 = vmatpush.bf16.msrb.mxu1 %v12216_v41  ;;  %v14920_v7 = vld [vmem:[%s19384_s3 + $0x6f4] sm:$0xf0]  ;;  %v14916_v41 = vld [vmem:[%s19384_s3 + $0x6dc] sm:$0xf]  ;;  %v12832_v62 = vor.u32 %v14737_v6, %v12829_v25 }
0x13f1   : > { %v12536_v35 = vor.u32 %v14916_v41, %v12533_v46  ;;  %v14896_v6 = vld [vmem:[%s19384_s3 + $0x634] sm:$0xf0]  ;;  %v14892_v25 = vld [vmem:[%s19384_s3 + $0x61c] sm:$0xf]  ;;  %v14817_v46 = vld [vmem:[%s19384_s3 + $0x3c4] sm:$0xf] }
0x13f2   : > { %6583 = vmatpush.bf16.msrb.mxu0 %v12628_v15  ;;  %6609 = vmatpush.bf16.msrb.mxu2 %v12632_v13  ;;  %v14912_v15 = vld [vmem:[%s19384_s3 + $0x6b4] sm:$0xf0]  ;;  %v14908_v13 = vld [vmem:[%s19384_s3 + $0x69c] sm:$0xf] }
0x13f3   : > { %v12504_v49 = vor.u32 %v14908_v13, %v12501_v54  ;;  %v13115_v13 = vld [vmem:[%s19384_s3 + $0x380] sm:$0xf] }
0x13f4   : > { %6576 = vmatpush.bf16.msra.mxu3 %v12180_v34  ;;  %6602 = vmatpush.bf16.msrb.mxu1 %v12184_v9  ;;  %v12796_v34 = vor.u32 %v14733_v20, %v12795_v59  ;;  %v12800_v9 = vor.u32 %v14729_v50, %v12797_v19  ;;  %v14709_v59 = vld [vmem:[%s19384_s3 + $0x5c] sm:$0xf0]  ;;  %v14705_v20 = vld [vmem:[%s19384_s3 + $0x44] sm:$0xf]  ;;  %v17583_v19 = vpop.f32.mrf.mxu0 }
0x13f5   : > { %v12701_v50 = vld [vmem:[%s19384_s3 + $0x60] sm:$0xf0]  ;;  %v14813_v54 = vld [vmem:[%s19384_s3 + $0x39c] sm:$0xf0] }
0x13f6   : > { %6584 = vmatpush.bf16.msrb.mxu0 %v12596_v61  ;;  %6610 = vmatpush.bf16.msrb.mxu2 %v12600_v0  ;;  %v12469_v61 = vld [vmem:[%s19384_s3 + $0x678] sm:$0xf0]  ;;  %v12764_v0 = vor.u32 %v14725_v26, %v12763_v24  ;;  %v12704_v24 = vor.u32 %v14705_v20, %v12701_v50  ;;  %v13117_v26 = vld [vmem:[%s19384_s3 + $0x3a0] sm:$0xf0] }
0x13f7   : > { %6577 = vmatmul.bf16.vlgmr.msra.gmra.mxu3 %v17408_v52  ;;  %6603 = vmatmul.bf16.vlgmr.msrb.gmra.mxu1 %v17408_v52  ;;  %v12532_v52 = vor.u32 %v14920_v7, %v12531_v17  ;;  %v12472_v44 = vor.u32 %v14900_v38, %v12469_v61  ;;  %v14821_v17 = vld [vmem:[%s19384_s3 + $0x3dc] sm:$0xf0]  ;;  %v12732_v7 = vor.u32 %v14717_v27, %v12731_v48  ;;  %v14754_v38 = vld [vmem:[%s19384_s3 + $0x1cc] sm:$0xf] }
0x13f8   : > { %7261 = vmatpush.bf16.msrb.mxu3 %v12892_v32  ;;  %7287 = vmatpush.bf16.msra.mxu1 %v12896_v36  ;;  %v12765_v32 = vld [vmem:[%s19384_s3 + $0xe0] sm:$0xf0]  ;;  %v12500_v36 = vor.u32 %v14912_v15, %v12499_v1  ;;  %v12901_v61 = vld [vmem:[%s19384_s3 + $0x1e8] sm:$0xf0]  ;;  %v13083_v48 = vld [vmem:[%s19384_s3 + $0x340] sm:$0xf] }
0x13f9   : > { %v12768_v63 = vor.u32 %v14721_v18, %v12765_v32  ;;  %v12667_v18 = vld [vmem:[%s19384_s3] sm:$0xf] }
0x13fa   : > { %6585 = vmatpush.bf16.msrb.mxu0 %v12564_v42  ;;  %6611 = vmatpush.bf16.msrb.mxu2 %v12568_v10  ;;  %v12437_v42 = vld [vmem:[%s19384_s3 + $0x638] sm:$0xf0]  ;;  %v13147_v10 = vld [vmem:[%s19384_s3 + $0x3c0] sm:$0xf] }
0x13fb   : > { %v13148_v1 = vor.u32 %v14821_v17, %v13147_v10  ;;  %v14701_v32 = vld [vmem:[%s19384_s3 + $0x1c] sm:$0xf0]  ;;  %v14750_v10 = vld [vmem:[%s19384_s3 + $0x1a4] sm:$0xf0]  ;;  %v14746_v17 = vld [vmem:[%s19384_s3 + $0x18c] sm:$0xf] }
0x13fc   : > { %7262 = vmatpush.bf16.msrb.mxu3 %v12860_v28  ;;  %7288 = vmatpush.bf16.msra.mxu1 %v12864_v22  ;;  %v12733_v28 = vld [vmem:[%s19384_s3 + $0xa0] sm:$0xf0]  ;;  %v12468_v22 = vor.u32 %v14904_v30, %v12467_v43  ;;  %v12899_v43 = vld [vmem:[%s19384_s3 + $0x1c8] sm:$0xf]  ;;  %v12668_v27 = vor.u32 %v14701_v32, %v12667_v18 }
0x13fd   : > { %v12736_v41 = vor.u32 %v14713_v39, %v12733_v28  ;;  %v14758_v30 = vld [vmem:[%s19384_s3 + $0x1e4] sm:$0xf0]  ;;  %v14805_v28 = vld [vmem:[%s19384_s3 + $0x35c] sm:$0xf0] }
0x13fe   : > { %6586 = vmatpush.bf16.msrb.mxu0 %v12532_v52  ;;  %6612 = vmatpush.bf16.msrb.mxu2 %v12536_v35  ;;  %v12436_v52 = vor.u32 %v14896_v6, %v12435_v16  ;;  %v12440_v35 = vor.u32 %v14892_v25, %v12437_v42  ;;  %v12900_v16 = vor.u32 %v14758_v30, %v12899_v43  ;;  %v12867_v25 = vld [vmem:[%s19384_s3 + $0x188] sm:$0xf]  ;;  %v5479_v42 = vpop.f32.mrf.mxu0  ;;  %v14730_v43 = vld [vmem:[%s19384_s3 + $0x10c] sm:$0xf] }
0x13ff   : > { %v12904_v6 = vor.u32 %v14754_v38, %v12901_v61  ;;  %v12868_v20 = vor.u32 %v14750_v10, %v12867_v25  ;;  %v12805_v30 = vld [vmem:[%s19384_s3 + $0x128] sm:$0xf0]  ;;  %v12955_v10 = vld [vmem:[%s19384_s3 + $0x240] sm:$0xf] }
0x1400   : > { %7263 = vmatpush.bf16.msrb.mxu3 %v12828_v12  ;;  %7289 = vmatpush.bf16.msra.mxu1 %v12832_v62  ;;  %v13149_v12 = vld [vmem:[%s19384_s3 + $0x3e0] sm:$0xf0]  ;;  %v12699_v62 = vld [vmem:[%s19384_s3 + $0x40] sm:$0xf] }
0x1401   : > { %v13152_v15 = vor.u32 %v14817_v46, %v13149_v12  ;;  %v13051_v12 = vld [vmem:[%s19384_s3 + $0x300] sm:$0xf] }
0x1402   : > { %6587 = vmatpush.bf16.msrb.mxu0 %v12500_v36  ;;  %6613 = vmatpush.bf16.msrb.mxu2 %v12504_v49  ;;  %v14697_v36 = vld [vmem:[%s19384_s3 + $0x4] sm:$0xf] }
0x1403   : > { %v12669_v49 = vld [vmem:[%s19384_s3 + $0x20] sm:$0xf0] }
0x1404   : > { %7264 = vmatpush.bf16.msrb.mxu3 %v12796_v34  ;;  %7290 = vmatpush.bf16.msra.mxu1 %v12800_v9  ;;  %v14809_v34 = vld [vmem:[%s19384_s3 + $0x384] sm:$0xf]  ;;  %v12700_v9 = vor.u32 %v14709_v59, %v12699_v62  ;;  %v12672_v39 = vor.u32 %v14697_v36, %v12669_v49  ;;  %v12803_v36 = vld [vmem:[%s19384_s3 + $0x108] sm:$0xf] }
0x1405   : > { %v14793_v62 = vld [vmem:[%s19384_s3 + $0x304] sm:$0xf]  ;;  %v14734_v49 = vld [vmem:[%s19384_s3 + $0x124] sm:$0xf0] }
0x1406   : > { %6588 = vmatpush.bf16.msrb.mxu0 %v12468_v22  ;;  %6614 = vmatpush.bf16.msrb.mxu2 %v12472_v44  ;;  %v14801_v22 = vld [vmem:[%s19384_s3 + $0x344] sm:$0xf] }
0x1407   : > { %v13085_v44 = vld [vmem:[%s19384_s3 + $0x360] sm:$0xf0] }
0x1408   : > { %7265 = vmatpush.bf16.msrb.mxu3 %v12764_v0  ;;  %7291 = vmatpush.bf16.msra.mxu1 %v12768_v63  ;;  %v13116_v0 = vor.u32 %v14813_v54, %v13115_v13  ;;  %v13120_v63 = vor.u32 %v14809_v34, %v13117_v26  ;;  %v13088_v46 = vor.u32 %v14801_v22, %v13085_v44  ;;  %v13053_v59 = vld [vmem:[%s19384_s3 + $0x320] sm:$0xf0]  ;;  %v12837_v13 = vld [vmem:[%s19384_s3 + $0x168] sm:$0xf0]  ;;  %v12771_v22 = vld [vmem:[%s19384_s3 + $0xc8] sm:$0xf] }
0x1409   : > { %v13056_v34 = vor.u32 %v14793_v62, %v13053_v59  ;;  %v13021_v26 = vld [vmem:[%s19384_s3 + $0x2e0] sm:$0xf0]  ;;  %v14726_v44 = vld [vmem:[%s19384_s3 + $0xe4] sm:$0xf0]  ;;  %v14714_v59 = vld [vmem:[%s19384_s3 + $0x8c] sm:$0xf] }
0x140a   : > { %6589 = vmatpush.bf16.msrb.mxu0 %v12436_v52  ;;  %6615 = vmatpush.bf16.msrb.mxu2 %v12440_v35  ;;  %v12835_v52 = vld [vmem:[%s19384_s3 + $0x148] sm:$0xf]  ;;  %v17614_v35 = vpack.c.bf16 %v17419_v23, %v17419_v23  ;;  %v14785_v23 = vld [vmem:[%s19384_s3 + $0x2c4] sm:$0xf] }
0x140b   : > { %v13024_v61 = vor.u32 %v14785_v23, %v13021_v26  ;;  %v14718_v62 = vld [vmem:[%s19384_s3 + $0xa4] sm:$0xf0]  ;;  %v14818_v26 = vld [vmem:[%s19384_s3 + $0x3cc] sm:$0xf] }
0x140c   : > { %7266 = vmatpush.bf16.msrb.mxu3 %v12732_v7  ;;  %7292 = vmatpush.bf16.msra.mxu1 %v12736_v41  ;;  %v12869_v7 = vld [vmem:[%s19384_s3 + $0x1a8] sm:$0xf0]  ;;  %v13084_v41 = vor.u32 %v14805_v28, %v13083_v48  ;;  %v14777_v48 = vld [vmem:[%s19384_s3 + $0x284] sm:$0xf]  ;;  %v12808_v28 = vor.u32 %v14730_v43, %v12805_v30 }
0x140d   : > { %6590 = vmatmul.bf16.vlgmr.msrb.gmra.mxu0 %v17444_v14  ;;  %6616 = vmatmul.bf16.vlgmr.msrb.gmra.mxu2 %v17444_v14  ;;  %v14797_v14 = vld [vmem:[%s19384_s3 + $0x31c] sm:$0xf0]  ;;  %v12872_v50 = vor.u32 %v14746_v17, %v12869_v7  ;;  %v14769_v7 = vld [vmem:[%s19384_s3 + $0x244] sm:$0xf]  ;;  %v12709_v43 = vld [vmem:[%s19384_s3 + $0x68] sm:$0xf0] }
0x140e   : > { %7274 = vmatpush.bf16.msra.mxu0 %v13148_v1  ;;  %7300 = vmatpush.bf16.msra.mxu2 %v13152_v15  ;;  %v14742_v1 = vld [vmem:[%s19384_s3 + $0x164] sm:$0xf0]  ;;  %v14738_v15 = vld [vmem:[%s19384_s3 + $0x14c] sm:$0xf]  ;;  %v13052_v54 = vor.u32 %v14797_v14, %v13051_v12  ;;  %v14773_v17 = vld [vmem:[%s19384_s3 + $0x25c] sm:$0xf0] }
0x140f   : > { %v12836_v18 = vor.u32 %v14742_v1, %v12835_v52  ;;  %v12840_v32 = vor.u32 %v14738_v15, %v12837_v13  ;;  %v12739_v14 = vld [vmem:[%s19384_s3 + $0x88] sm:$0xf]  ;;  %v12923_v1 = vld [vmem:[%s19384_s3 + $0x200] sm:$0xf]  ;;  %v14761_v13 = vld [vmem:[%s19384_s3 + $0x204] sm:$0xf] }
0x1410   : > { %7267 = vmatpush.bf16.msrb.mxu3 %v12700_v9  ;;  %7293 = vmatpush.bf16.msra.mxu1 %v12704_v24  ;;  %v13019_v9 = vld [vmem:[%s19384_s3 + $0x2c0] sm:$0xf] }
0x1411   : > { %v14789_v24 = vld [vmem:[%s19384_s3 + $0x2dc] sm:$0xf0] }
0x1412   : > { %7275 = vmatpush.bf16.msra.mxu0 %v13116_v0  ;;  %7301 = vmatpush.bf16.msra.mxu2 %v13120_v63  ;;  %v13020_v38 = vor.u32 %v14789_v24, %v13019_v9  ;;  %v12987_v0 = vld [vmem:[%s19384_s3 + $0x280] sm:$0xf]  ;;  %v14822_v9 = vld [vmem:[%s19384_s3 + $0x3e4] sm:$0xf0]  ;;  %v12740_v24 = vor.u32 %v14718_v62, %v12739_v14 }
0x1413   : > { %v14781_v63 = vld [vmem:[%s19384_s3 + $0x29c] sm:$0xf0] }
0x1414   : > { %7268 = vmatpush.bf16.msrb.mxu3 %v12668_v27  ;;  %7294 = vmatpush.bf16.msra.mxu1 %v12672_v39  ;;  %v12989_v27 = vld [vmem:[%s19384_s3 + $0x2a0] sm:$0xf0]  ;;  %v12804_v39 = vor.u32 %v14734_v49, %v12803_v36  ;;  %v12988_v25 = vor.u32 %v14781_v63, %v12987_v0  ;;  %v14765_v15 = vld [vmem:[%s19384_s3 + $0x21c] sm:$0xf0]  ;;  %v14710_v36 = vld [vmem:[%s19384_s3 + $0x64] sm:$0xf0] }
0x1415   : > { %v12992_v42 = vor.u32 %v14777_v48, %v12989_v27  ;;  %v14706_v49 = vld [vmem:[%s19384_s3 + $0x4c] sm:$0xf]  ;;  %v12924_v30 = vor.u32 %v14765_v15, %v12923_v1  ;;  %v13123_v63 = vld [vmem:[%s19384_s3 + $0x388] sm:$0xf]  ;;  %v12875_v15 = vld [vmem:[%s19384_s3 + $0x190] sm:$0xf] }
0x1416   : > { %7276 = vmatpush.bf16.msra.mxu0 %v13084_v41  ;;  %7302 = vmatpush.bf16.msra.mxu2 %v13088_v46  ;;  %v12957_v41 = vld [vmem:[%s19384_s3 + $0x260] sm:$0xf0]  ;;  %v12772_v46 = vor.u32 %v14726_v44, %v12771_v22  ;;  %v14814_v48 = vld [vmem:[%s19384_s3 + $0x3a4] sm:$0xf0]  ;;  %v14810_v27 = vld [vmem:[%s19384_s3 + $0x38c] sm:$0xf] }
0x1417   : > { %7269 = vmatmul.bf16.vlgmr.msrb.gmra.mxu3 %v17614_v35  ;;  %7295 = vmatmul.bf16.vlgmr.msra.gmra.mxu1 %v17614_v35  ;;  %v12960_v52 = vor.u32 %v14769_v7, %v12957_v41  ;;  %v13125_v22 = vld [vmem:[%s19384_s3 + $0x3a8] sm:$0xf0]  ;;  %v12675_v44 = vld [vmem:[%s19384_s3 + $0x8] sm:$0xf]  ;;  %v14755_v7 = vld [vmem:[%s19384_s3 + $0x1d4] sm:$0xf] }
0x1418   : > { %7313 = vmatpush.bf16.msra.mxu3 %v12900_v16  ;;  %7339 = vmatpush.bf16.msrb.mxu1 %v12904_v6  ;;  %v14722_v16 = vld [vmem:[%s19384_s3 + $0xcc] sm:$0xf]  ;;  %v12909_v41 = vld [vmem:[%s19384_s3 + $0x1f0] sm:$0xf0] }
0x1419   : > { %v12773_v6 = vld [vmem:[%s19384_s3 + $0xe8] sm:$0xf0]  ;;  %v12912_v1 = vor.u32 %v14755_v7, %v12909_v41  ;;  %v12995_v41 = vld [vmem:[%s19384_s3 + $0x288] sm:$0xf] }
0x141a   : > { %7277 = vmatpush.bf16.msra.mxu0 %v13052_v54  ;;  %7303 = vmatpush.bf16.msra.mxu2 %v13056_v34  ;;  %v12776_v12 = vor.u32 %v14722_v16, %v12773_v6  ;;  %v12925_v54 = vld [vmem:[%s19384_s3 + $0x220] sm:$0xf0]  ;;  %v13155_v34 = vld [vmem:[%s19384_s3 + $0x3c8] sm:$0xf]  ;;  %v17665_v6 = vpack.c.bf16 %v17583_v19, %v17583_v19 }
0x141b   : > { %v14702_v16 = vld [vmem:[%s19384_s3 + $0x24] sm:$0xf0] }
0x141c   : > { %7314 = vmatpush.bf16.msra.mxu3 %v12868_v20  ;;  %7340 = vmatpush.bf16.msrb.mxu1 %v12872_v50  ;;  %v12741_v20 = vld [vmem:[%s19384_s3 + $0xa8] sm:$0xf0]  ;;  %v12956_v50 = vor.u32 %v14773_v17, %v12955_v10  ;;  %v12907_v10 = vld [vmem:[%s19384_s3 + $0x1d0] sm:$0xf]  ;;  %v13091_v19 = vld [vmem:[%s19384_s3 + $0x348] sm:$0xf]  ;;  %v12676_v14 = vor.u32 %v14702_v16, %v12675_v44 }
0x141d   : > { %v12744_v23 = vor.u32 %v14714_v59, %v12741_v20  ;;  %v14759_v17 = vld [vmem:[%s19384_s3 + $0x1ec] sm:$0xf0]  ;;  %v14806_v59 = vld [vmem:[%s19384_s3 + $0x364] sm:$0xf0]  ;;  %v14802_v20 = vld [vmem:[%s19384_s3 + $0x34c] sm:$0xf] }
0x141e   : > { %7278 = vmatpush.bf16.msra.mxu0 %v13020_v38  ;;  %7304 = vmatpush.bf16.msra.mxu2 %v13024_v61  ;;  %v12928_v38 = vor.u32 %v14761_v13, %v12925_v54  ;;  %v13156_v61 = vor.u32 %v14822_v9, %v13155_v34  ;;  %v14751_v13 = vld [vmem:[%s19384_s3 + $0x1ac] sm:$0xf0]  ;;  %v14747_v54 = vld [vmem:[%s19384_s3 + $0x194] sm:$0xf]  ;;  %v13092_v9 = vor.u32 %v14806_v59, %v13091_v19  ;;  %v12997_v19 = vld [vmem:[%s19384_s3 + $0x2a8] sm:$0xf0] }
0x141f   : > { %v12877_v34 = vld [vmem:[%s19384_s3 + $0x1b0] sm:$0xf0]  ;;  %v12811_v16 = vld [vmem:[%s19384_s3 + $0x110] sm:$0xf] }
0x1420   : > { %7315 = vmatpush.bf16.msra.mxu3 %v12836_v18  ;;  %7341 = vmatpush.bf16.msrb.mxu1 %v12840_v32  ;;  %v13157_v18 = vld [vmem:[%s19384_s3 + $0x3e8] sm:$0xf0]  ;;  %v12707_v32 = vld [vmem:[%s19384_s3 + $0x48] sm:$0xf] }
0x1421   : > { %v13160_v0 = vor.u32 %v14818_v26, %v13157_v18  ;;  %v14798_v26 = vld [vmem:[%s19384_s3 + $0x324] sm:$0xf0]  ;;  %v14794_v18 = vld [vmem:[%s19384_s3 + $0x30c] sm:$0xf] }
0x1422   : > { %7279 = vmatpush.bf16.msra.mxu0 %v12988_v25  ;;  %7305 = vmatpush.bf16.msra.mxu2 %v12992_v42  ;;  %v14698_v25 = vld [vmem:[%s19384_s3 + $0xc] sm:$0xf] }
0x1423   : > { %v12677_v42 = vld [vmem:[%s19384_s3 + $0x28] sm:$0xf0] }
0x1424   : > { %7316 = vmatpush.bf16.msra.mxu3 %v12804_v39  ;;  %7342 = vmatpush.bf16.msrb.mxu1 %v12808_v28  ;;  %v12708_v39 = vor.u32 %v14710_v36, %v12707_v32  ;;  %v12712_v28 = vor.u32 %v14706_v49, %v12709_v43  ;;  %v12680_v62 = vor.u32 %v14698_v25, %v12677_v42  ;;  %v13061_v32 = vld [vmem:[%s19384_s3 + $0x328] sm:$0xf0]  ;;  %v12843_v43 = vld [vmem:[%s19384_s3 + $0x150] sm:$0xf]  ;;  %v14731_v42 = vld [vmem:[%s19384_s3 + $0x114] sm:$0xf] }
0x1425   : > { %v12876_v36 = vor.u32 %v14751_v13, %v12875_v15  ;;  %v12880_v49 = vor.u32 %v14747_v54, %v12877_v34  ;;  %v14735_v25 = vld [vmem:[%s19384_s3 + $0x12c] sm:$0xf0]  ;;  %v12963_v54 = vld [vmem:[%s19384_s3 + $0x248] sm:$0xf] }
0x1426   : > { %7280 = vmatpush.bf16.msra.mxu0 %v12956_v50  ;;  %7306 = vmatpush.bf16.msra.mxu2 %v12960_v52  ;;  %v13093_v50 = vld [vmem:[%s19384_s3 + $0x368] sm:$0xf0]  ;;  %v12908_v52 = vor.u32 %v14759_v17, %v12907_v10  ;;  %v12813_v10 = vld [vmem:[%s19384_s3 + $0x130] sm:$0xf0]  ;;  %v14774_v34 = vld [vmem:[%s19384_s3 + $0x264] sm:$0xf0] }
0x1427   : > { %v12816_v59 = vor.u32 %v14731_v42, %v12813_v10  ;;  %v12715_v42 = vld [vmem:[%s19384_s3 + $0x50] sm:$0xf] }
0x1428   : > { %7317 = vmatpush.bf16.msra.mxu3 %v12772_v46  ;;  %7343 = vmatpush.bf16.msrb.mxu1 %v12776_v12  ;;  %v13124_v46 = vor.u32 %v14814_v48, %v13123_v63  ;;  %v13128_v12 = vor.u32 %v14810_v27, %v13125_v22  ;;  %v13064_v63 = vor.u32 %v14794_v18, %v13061_v32  ;;  %v13027_v48 = vld [vmem:[%s19384_s3 + $0x2c8] sm:$0xf]  ;;  %v12747_v18 = vld [vmem:[%s19384_s3 + $0x90] sm:$0xf] }
0x1429   : > { %v14790_v27 = vld [vmem:[%s19384_s3 + $0x2e4] sm:$0xf0]  ;;  %v14719_v32 = vld [vmem:[%s19384_s3 + $0xac] sm:$0xf0] }
0x142a   : > { %7281 = vmatpush.bf16.msra.mxu0 %v12924_v30  ;;  %7307 = vmatpush.bf16.msra.mxu2 %v12928_v38  ;;  %v14743_v30 = vld [vmem:[%s19384_s3 + $0x16c] sm:$0xf0]  ;;  %v14739_v38 = vld [vmem:[%s19384_s3 + $0x154] sm:$0xf]  ;;  %v13028_v17 = vor.u32 %v14790_v27, %v13027_v48  ;;  %v12933_v48 = vld [vmem:[%s19384_s3 + $0x228] sm:$0xf0] }
0x142b   : > { %v12844_v22 = vor.u32 %v14743_v30, %v12843_v43  ;;  %v12964_v30 = vor.u32 %v14774_v34, %v12963_v54  ;;  %v13163_v27 = vld [vmem:[%s19384_s3 + $0x3d0] sm:$0xf]  ;;  %v14699_v54 = vld [vmem:[%s19384_s3 + $0x14] sm:$0xf] }
0x142c   : > { %7318 = vmatpush.bf16.msra.mxu3 %v12740_v24  ;;  %7344 = vmatpush.bf16.msrb.mxu1 %v12744_v23  ;;  %v13096_v24 = vor.u32 %v14802_v20, %v13093_v50  ;;  %v13059_v23 = vld [vmem:[%s19384_s3 + $0x308] sm:$0xf]  ;;  %v12779_v20 = vld [vmem:[%s19384_s3 + $0xd0] sm:$0xf]  ;;  %v12685_v34 = vld [vmem:[%s19384_s3 + $0x30] sm:$0xf0] }
0x142d   : > { %7282 = vmatmul.bf16.vlgmr.msra.gmra.mxu0 %v17665_v6  ;;  %7308 = vmatmul.bf16.vlgmr.msra.gmra.mxu2 %v17665_v6  ;;  %v14727_v50 = vld [vmem:[%s19384_s3 + $0xec] sm:$0xf0] }
0x142e   : > { %7326 = vmatpush.bf16.msrb.mxu0 %v13156_v61  ;;  %7352 = vmatpush.bf16.msrb.mxu2 %v13160_v0  ;;  %v12845_v61 = vld [vmem:[%s19384_s3 + $0x170] sm:$0xf0]  ;;  %v13060_v0 = vor.u32 %v14798_v26, %v13059_v23  ;;  %v12780_v23 = vor.u32 %v14727_v50, %v12779_v20  ;;  %v14711_v10 = vld [vmem:[%s19384_s3 + $0x6c] sm:$0xf0] }
0x142f   : > { %v12848_v44 = vor.u32 %v14739_v38, %v12845_v61  ;;  %v12931_v61 = vld [vmem:[%s19384_s3 + $0x208] sm:$0xf]  ;;  %v14811_v20 = vld [vmem:[%s19384_s3 + $0x394] sm:$0xf]  ;;  %v12716_v50 = vor.u32 %v14711_v10, %v12715_v42  ;;  %v13067_v10 = vld [vmem:[%s19384_s3 + $0x310] sm:$0xf] }
0x1430   : > { %7319 = vmatpush.bf16.msra.mxu3 %v12708_v39  ;;  %7345 = vmatpush.bf16.msrb.mxu1 %v12712_v28  ;;  %v14786_v39 = vld [vmem:[%s19384_s3 + $0x2cc] sm:$0xf] }
0x1431   : > { %v13029_v28 = vld [vmem:[%s19384_s3 + $0x2e8] sm:$0xf0] }
0x1432   : > { %7327 = vmatpush.bf16.msrb.mxu0 %v13124_v46  ;;  %7353 = vmatpush.bf16.msrb.mxu2 %v13128_v12  ;;  %v13032_v7 = vor.u32 %v14786_v39, %v13029_v28  ;;  %v14782_v46 = vld [vmem:[%s19384_s3 + $0x2a4] sm:$0xf0]  ;;  %v14778_v12 = vld [vmem:[%s19384_s3 + $0x28c] sm:$0xf]  ;;  %v14823_v39 = vld [vmem:[%s19384_s3 + $0x3ec] sm:$0xf0] }
0x1433   : > { %v12996_v15 = vor.u32 %v14782_v46, %v12995_v41  ;;  %v13000_v13 = vor.u32 %v14778_v12, %v12997_v19  ;;  %v13164_v12 = vor.u32 %v14823_v39, %v13163_v27 }
0x1434   : > { %7320 = vmatpush.bf16.msra.mxu3 %v12676_v14  ;;  %7346 = vmatpush.bf16.msrb.mxu1 %v12680_v62  ;;  %v17705_v14 = vpop.f32.mrf.mxu1  ;;  %v12812_v62 = vor.u32 %v14735_v25, %v12811_v16  ;;  %v14819_v16 = vld [vmem:[%s19384_s3 + $0x3d4] sm:$0xf] }
0x1435   : > { %v13165_v25 = vld [vmem:[%s19384_s3 + $0x3f0] sm:$0xf0] }
0x1436   : > { %7328 = vmatpush.bf16.msrb.mxu0 %v13092_v9  ;;  %7354 = vmatpush.bf16.msrb.mxu2 %v13096_v24  ;;  %v14770_v9 = vld [vmem:[%s19384_s3 + $0x24c] sm:$0xf]  ;;  %v13168_v19 = vor.u32 %v14819_v16, %v13165_v25  ;;  %v12885_v16 = vld [vmem:[%s19384_s3 + $0x1b8] sm:$0xf0] }
0x1437   : > { %7321 = vmatmul.bf16.vlgmr.msra.gmra.mxu3 %v17614_v35  ;;  %7347 = vmatmul.bf16.vlgmr.msrb.gmra.mxu1 %v17614_v35  ;;  %v12965_v24 = vld [vmem:[%s19384_s3 + $0x268] sm:$0xf0] }
0x1438   : > { %7365 = vmatpush.bf16.msrb.mxu3 %v12908_v52  ;;  %7391 = vmatpush.bf16.msra.mxu1 %v12912_v1  ;;  %v14723_v52 = vld [vmem:[%s19384_s3 + $0xd4] sm:$0xf]  ;;  %v12968_v38 = vor.u32 %v14770_v9, %v12965_v24  ;;  %v12915_v9 = vld [vmem:[%s19384_s3 + $0x1d8] sm:$0xf] }
0x1439   : > { %v12781_v1 = vld [vmem:[%s19384_s3 + $0xf0] sm:$0xf0] }
0x143a   : > { %7329 = vmatpush.bf16.msrb.mxu0 %v13060_v0  ;;  %7355 = vmatpush.bf16.msrb.mxu2 %v13064_v63  ;;  %v12784_v26 = vor.u32 %v14723_v52, %v12781_v1  ;;  %v17719_v43 = vpop.f32.mrf.mxu3  ;;  %v14766_v0 = vld [vmem:[%s19384_s3 + $0x224] sm:$0xf0]  ;;  %v14762_v63 = vld [vmem:[%s19384_s3 + $0x20c] sm:$0xf]  ;;  %v13133_v1 = vld [vmem:[%s19384_s3 + $0x3b0] sm:$0xf0] }
0x143b   : > { %v12932_v41 = vor.u32 %v14766_v0, %v12931_v61  ;;  %v12936_v46 = vor.u32 %v14762_v63, %v12933_v48  ;;  %v12688_v61 = vor.u32 %v14699_v54, %v12685_v34  ;;  %v14807_v0 = vld [vmem:[%s19384_s3 + $0x36c] sm:$0xf0]  ;;  %v14803_v63 = vld [vmem:[%s19384_s3 + $0x354] sm:$0xf] }
0x143c   : > { %7366 = vmatpush.bf16.msrb.mxu3 %v12876_v36  ;;  %7392 = vmatpush.bf16.msra.mxu1 %v12880_v49  ;;  %v14715_v36 = vld [vmem:[%s19384_s3 + $0x94] sm:$0xf]  ;;  %v6450_v28 = vpop.f32.mrf.mxu1  ;;  %v13035_v54 = vld [vmem:[%s19384_s3 + $0x2d0] sm:$0xf] }
0x143d   : > { %v12749_v49 = vld [vmem:[%s19384_s3 + $0xb0] sm:$0xf0]  ;;  %v12883_v28 = vld [vmem:[%s19384_s3 + $0x198] sm:$0xf] }
0x143e   : > { %7330 = vmatpush.bf16.msrb.mxu0 %v13028_v17  ;;  %7356 = vmatpush.bf16.msrb.mxu2 %v13032_v7  ;;  %v14707_v17 = vld [vmem:[%s19384_s3 + $0x54] sm:$0xf] }
0x143f   : > { %v12717_v7 = vld [vmem:[%s19384_s3 + $0x70] sm:$0xf0] }
0x1440   : > { %7367 = vmatpush.bf16.msrb.mxu3 %v12844_v22  ;;  %7393 = vmatpush.bf16.msra.mxu1 %v12848_v44  ;;  %v12748_v22 = vor.u32 %v14719_v32, %v12747_v18  ;;  %v12752_v44 = vor.u32 %v14715_v36, %v12749_v49  ;;  %v12720_v52 = vor.u32 %v14707_v17, %v12717_v7  ;;  %v12917_v18 = vld [vmem:[%s19384_s3 + $0x1f8] sm:$0xf0]  ;;  %v13099_v49 = vld [vmem:[%s19384_s3 + $0x350] sm:$0xf]  ;;  %v13101_v48 = vld [vmem:[%s19384_s3 + $0x370] sm:$0xf0] }
0x1441   : > { %v13136_v36 = vor.u32 %v14811_v20, %v13133_v1  ;;  %v13100_v25 = vor.u32 %v14807_v0, %v13099_v49  ;;  %v13104_v42 = vor.u32 %v14803_v63, %v13101_v48  ;;  %v14799_v17 = vld [vmem:[%s19384_s3 + $0x32c] sm:$0xf0]  ;;  %v14795_v7 = vld [vmem:[%s19384_s3 + $0x314] sm:$0xf]  ;;  %v14744_v20 = vld [vmem:[%s19384_s3 + $0x174] sm:$0xf0] }
0x1442   : > { %7331 = vmatpush.bf16.msrb.mxu0 %v12996_v15  ;;  %7357 = vmatpush.bf16.msrb.mxu2 %v13000_v13  ;;  %v12683_v15 = vld [vmem:[%s19384_s3 + $0x10] sm:$0xf]  ;;  %v6424_v24 = vpop.f32.mrf.mxu3  ;;  %v12821_v49 = vld [vmem:[%s19384_s3 + $0x138] sm:$0xf0] }
0x1443   : > { %v14703_v13 = vld [vmem:[%s19384_s3 + $0x2c] sm:$0xf0]  ;;  %v14787_v24 = vld [vmem:[%s19384_s3 + $0x2d4] sm:$0xf] }
0x1444   : > { %7368 = vmatpush.bf16.msrb.mxu3 %v12812_v62  ;;  %7394 = vmatpush.bf16.msra.mxu1 %v12816_v59  ;;  %v13131_v62 = vld [vmem:[%s19384_s3 + $0x390] sm:$0xf] }
0x1445   : > { %v14815_v59 = vld [vmem:[%s19384_s3 + $0x3ac] sm:$0xf0] }
0x1446   : > { %7332 = vmatpush.bf16.msrb.mxu0 %v12964_v30  ;;  %7358 = vmatpush.bf16.msrb.mxu2 %v12968_v38  ;;  %v13132_v32 = vor.u32 %v14815_v59, %v13131_v62  ;;  %v17746_v30 = vpop.f32.mrf.mxu1  ;;  %v12684_v38 = vor.u32 %v14703_v13, %v12683_v15  ;;  %v13068_v15 = vor.u32 %v14799_v17, %v13067_v10  ;;  %v13003_v0 = vld [vmem:[%s19384_s3 + $0x290] sm:$0xf]  ;;  %v14728_v10 = vld [vmem:[%s19384_s3 + $0xf4] sm:$0xf0]  ;;  %v14724_v17 = vld [vmem:[%s19384_s3 + $0xdc] sm:$0xf] }
0x1447   : > { %v14783_v48 = vld [vmem:[%s19384_s3 + $0x2ac] sm:$0xf0] }
0x1448   : > { %7369 = vmatpush.bf16.msrb.mxu3 %v12780_v23  ;;  %7395 = vmatpush.bf16.msra.mxu1 %v12784_v26  ;;  %v14760_v23 = vld [vmem:[%s19384_s3 + $0x1f4] sm:$0xf0]  ;;  %v14756_v26 = vld [vmem:[%s19384_s3 + $0x1dc] sm:$0xf] }
0x1449   : > { %v12916_v27 = vor.u32 %v14760_v23, %v12915_v9  ;;  %v12920_v39 = vor.u32 %v14756_v26, %v12917_v18  ;;  %v14791_v9 = vld [vmem:[%s19384_s3 + $0x2ec] sm:$0xf0]  ;;  %v13037_v23 = vld [vmem:[%s19384_s3 + $0x2f0] sm:$0xf0]  ;;  %v12819_v18 = vld [vmem:[%s19384_s3 + $0x118] sm:$0xf] }
0x144a   : > { %7333 = vmatpush.bf16.msrb.mxu0 %v12932_v41  ;;  %7359 = vmatpush.bf16.msrb.mxu2 %v12936_v46  ;;  %v13069_v41 = vld [vmem:[%s19384_s3 + $0x330] sm:$0xf0]  ;;  %v6435_v62 = vpop.f32.mrf.mxu0  ;;  %v17762_v59 = vpop.f32.mrf.mxu3 }
0x144b   : > { %v17768_v1 = vadd.f32 %v6435_v62, %v17719_v43  ;;  %v13072_v13 = vor.u32 %v14795_v7, %v13069_v41  ;;  %v12789_v7 = vld [vmem:[%s19384_s3 + $0xf8] sm:$0xf0]  ;;  %v14771_v62 = vld [vmem:[%s19384_s3 + $0x254] sm:$0xf] }
0x144c   : > { %7370 = vmatpush.bf16.msrb.mxu3 %v12748_v22  ;;  %7396 = vmatpush.bf16.msra.mxu1 %v12752_v44  ;;  %v14752_v22 = vld [vmem:[%s19384_s3 + $0x1b4] sm:$0xf0]  ;;  %v14748_v44 = vld [vmem:[%s19384_s3 + $0x19c] sm:$0xf] }
0x144d   : > { %7334 = vmatmul.bf16.vlgmr.msrb.gmra.mxu0 %v17665_v6  ;;  %7360 = vmatmul.bf16.vlgmr.msrb.gmra.mxu2 %v17665_v6  ;;  %v12884_v46 = vor.u32 %v14752_v22, %v12883_v28 }
0x144e   : > { %7378 = vmatpush.bf16.msra.mxu0 %v13164_v12  ;;  %7404 = vmatpush.bf16.msra.mxu2 %v13168_v19  ;;  %v12888_v12 = vor.u32 %v14748_v44, %v12885_v16  ;;  %v12851_v19 = vld [vmem:[%s19384_s3 + $0x158] sm:$0xf]  ;;  %v6502_v34 = vpop.f32.mrf.mxu1 }
0x144f   : > { %v12852_v43 = vor.u32 %v14744_v20, %v12851_v19  ;;  %v12787_v16 = vld [vmem:[%s19384_s3 + $0xd8] sm:$0xf]  ;;  %v14775_v19 = vld [vmem:[%s19384_s3 + $0x26c] sm:$0xf0]  ;;  %v12973_v20 = vld [vmem:[%s19384_s3 + $0x270] sm:$0xf0] }
0x1450   : > { %7371 = vmatpush.bf16.msrb.mxu3 %v12716_v50  ;;  %7397 = vmatpush.bf16.msra.mxu1 %v12720_v52  ;;  %v14740_v50 = vld [vmem:[%s19384_s3 + $0x15c] sm:$0xf]  ;;  %v6461_v63 = vpop.f32.mrf.mxu2 }
0x1451   : > { %v12853_v52 = vld [vmem:[%s19384_s3 + $0x178] sm:$0xf0]  ;;  %v17785_v28 = vadd.f32 %v6461_v63, %v17705_v14  ;;  %v13004_v14 = vor.u32 %v14783_v48, %v13003_v0  ;;  %v12723_v48 = vld [vmem:[%s19384_s3 + $0x58] sm:$0xf] }
0x1452   : > { %7379 = vmatpush.bf16.msra.mxu0 %v13132_v32  ;;  %7405 = vmatpush.bf16.msra.mxu2 %v13136_v36  ;;  %v12856_v26 = vor.u32 %v14740_v50, %v12853_v52  ;;  %v14736_v32 = vld [vmem:[%s19384_s3 + $0x134] sm:$0xf0]  ;;  %v14732_v36 = vld [vmem:[%s19384_s3 + $0x11c] sm:$0xf]  ;;  %v12788_v50 = vor.u32 %v14728_v10, %v12787_v16  ;;  %v12792_v52 = vor.u32 %v14724_v17, %v12789_v7 }
0x1453   : > { %v12820_v22 = vor.u32 %v14736_v32, %v12819_v18  ;;  %v12824_v44 = vor.u32 %v14732_v36, %v12821_v49  ;;  %v12757_v34 = vld [vmem:[%s19384_s3 + $0xb8] sm:$0xf0]  ;;  %v12941_v32 = vld [vmem:[%s19384_s3 + $0x230] sm:$0xf0]  ;;  %v13171_v36 = vld [vmem:[%s19384_s3 + $0x3d8] sm:$0xf] }
0x1454   : > { %7372 = vmatpush.bf16.msrb.mxu3 %v12684_v38  ;;  %7398 = vmatpush.bf16.msra.mxu1 %v12688_v61  ;;  %v13036_v38 = vor.u32 %v14791_v9, %v13035_v54  ;;  %v13040_v61 = vor.u32 %v14787_v24, %v13037_v23  ;;  %v14716_v54 = vld [vmem:[%s19384_s3 + $0x9c] sm:$0xf]  ;;  %v12976_v24 = vor.u32 %v14771_v62, %v12973_v20  ;;  %v12939_v23 = vld [vmem:[%s19384_s3 + $0x210] sm:$0xf]  ;;  %v14824_v49 = vld [vmem:[%s19384_s3 + $0x3f4] sm:$0xf0] }
0x1455   : > { %v14820_v0 = vld [vmem:[%s19384_s3 + $0x3dc] sm:$0xf]  ;;  %v13172_v7 = vor.u32 %v14824_v49, %v13171_v36 }
0x1456   : > { %7380 = vmatpush.bf16.msra.mxu0 %v13100_v25  ;;  %7406 = vmatpush.bf16.msra.mxu2 %v13104_v42  ;;  %v6437_v25 = vpop.f32.mrf.mxu0  ;;  %v6476_v42 = vpop.f32.mrf.mxu3  ;;  %v13173_v63 = vld [vmem:[%s19384_s3 + $0x3f8] sm:$0xf0] }
0x1457   : > { %7373 = vmatmul.bf16.vlgmr.msrb.gmra.mxu3 %v17614_v35  ;;  %7399 = vmatmul.bf16.vlgmr.msra.gmra.mxu1 %v17614_v35  ;;  %v14812_v20 = vld [vmem:[%s19384_s3 + $0x39c] sm:$0xf] }
0x1458   : > { %7417 = vmatpush.bf16.msra.mxu3 %v12916_v27  ;;  %7443 = vmatpush.bf16.msrb.mxu1 %v12920_v39  ;;  %v14779_v27 = vld [vmem:[%s19384_s3 + $0x294] sm:$0xf]  ;;  %v6463_v18 = vpop.f32.mrf.mxu2 }
0x1459   : > { %v13005_v39 = vld [vmem:[%s19384_s3 + $0x2b0] sm:$0xf0]  ;;  %v14804_v18 = vld [vmem:[%s19384_s3 + $0x35c] sm:$0xf] }
0x145a   : > { %7381 = vmatpush.bf16.msra.mxu0 %v13068_v15  ;;  %7407 = vmatpush.bf16.msra.mxu2 %v13072_v13  ;;  %v13008_v41 = vor.u32 %v14779_v27, %v13005_v39  ;;  %v12755_v15 = vld [vmem:[%s19384_s3 + $0x98] sm:$0xf] }
0x145b   : > { %v14720_v13 = vld [vmem:[%s19384_s3 + $0xb4] sm:$0xf0] }
0x145c   : > { %7418 = vmatpush.bf16.msra.mxu3 %v12884_v46  ;;  %7444 = vmatpush.bf16.msrb.mxu1 %v12888_v12  ;;  %v12971_v46 = vld [vmem:[%s19384_s3 + $0x250] sm:$0xf]  ;;  %v17792_v12 = vpop.f32.mrf.mxu1  ;;  %v14712_v39 = vld [vmem:[%s19384_s3 + $0x74] sm:$0xf0] }
0x145d   : > { %v12972_v9 = vor.u32 %v14775_v19, %v12971_v46  ;;  %v14816_v46 = vld [vmem:[%s19384_s3 + $0x3b4] sm:$0xf0]  ;;  %v12724_v19 = vor.u32 %v14712_v39, %v12723_v48  ;;  %v13077_v39 = vld [vmem:[%s19384_s3 + $0x338] sm:$0xf0] }
0x145e   : > { %7382 = vmatpush.bf16.msra.mxu0 %v13036_v38  ;;  %7408 = vmatpush.bf16.msra.mxu2 %v13040_v61  ;;  %v12756_v38 = vor.u32 %v14720_v13, %v12755_v15  ;;  %v12760_v61 = vor.u32 %v14716_v54, %v12757_v34  ;;  %v17810_v27 = vpop.f32.mrf.mxu3  ;;  %v6487_v16 = vpop.f32.mrf.mxu0  ;;  %v14704_v15 = vld [vmem:[%s19384_s3 + $0x34] sm:$0xf0]  ;;  %v14700_v13 = vld [vmem:[%s19384_s3 + $0x1c] sm:$0xf] }
0x145f   : > { %v17816_v10 = vadd.f32 %v6487_v16, %v17762_v59  ;;  %v12693_v59 = vld [vmem:[%s19384_s3 + $0x38] sm:$0xf0]  ;;  %v14800_v48 = vld [vmem:[%s19384_s3 + $0x334] sm:$0xf0] }
0x1460   : > { %7419 = vmatpush.bf16.msra.mxu3 %v12852_v43  ;;  %7445 = vmatpush.bf16.msrb.mxu1 %v12856_v26  ;;  %v14767_v43 = vld [vmem:[%s19384_s3 + $0x22c] sm:$0xf0]  ;;  %v14763_v26 = vld [vmem:[%s19384_s3 + $0x214] sm:$0xf]  ;;  %v13043_v16 = vld [vmem:[%s19384_s3 + $0x2d8] sm:$0xf] }
0x1461   : > { %v12940_v25 = vor.u32 %v14767_v43, %v12939_v23  ;;  %v12944_v42 = vor.u32 %v14763_v26, %v12941_v32  ;;  %v12696_v43 = vor.u32 %v14700_v13, %v12693_v59  ;;  %v14808_v26 = vld [vmem:[%s19384_s3 + $0x374] sm:$0xf0]  ;;  %v13109_v32 = vld [vmem:[%s19384_s3 + $0x378] sm:$0xf0] }
0x1462   : > { %7383 = vmatpush.bf16.msra.mxu0 %v13004_v14  ;;  %7409 = vmatpush.bf16.msra.mxu2 %v13008_v41  ;;  %v13176_v14 = vor.u32 %v14820_v0, %v13173_v63  ;;  %v13139_v41 = vld [vmem:[%s19384_s3 + $0x398] sm:$0xf]  ;;  %v13112_v0 = vor.u32 %v14804_v18, %v13109_v32 }
0x1463   : > { %v13140_v54 = vor.u32 %v14816_v46, %v13139_v41  ;;  %v13075_v63 = vld [vmem:[%s19384_s3 + $0x318] sm:$0xf] }
0x1464   : > { %7420 = vmatpush.bf16.msra.mxu3 %v12820_v22  ;;  %7446 = vmatpush.bf16.msrb.mxu1 %v12824_v44  ;;  %v14708_v22 = vld [vmem:[%s19384_s3 + $0x5c] sm:$0xf]  ;;  %v6554_v17 = vpop.f32.mrf.mxu1  ;;  %v14776_v59 = vld [vmem:[%s19384_s3 + $0x274] sm:$0xf0] }
0x1465   : > { %v12725_v44 = vld [vmem:[%s19384_s3 + $0x78] sm:$0xf0]  ;;  %v12947_v18 = vld [vmem:[%s19384_s3 + $0x218] sm:$0xf] }
0x1466   : > { %7384 = vmatpush.bf16.msra.mxu0 %v12972_v9  ;;  %7410 = vmatpush.bf16.msra.mxu2 %v12976_v24  ;;  %v12728_v62 = vor.u32 %v14708_v22, %v12725_v44  ;;  %v13107_v9 = vld [vmem:[%s19384_s3 + $0x358] sm:$0xf]  ;;  %v6513_v24 = vpop.f32.mrf.mxu2  ;;  %v6528_v49 = vpop.f32.mrf.mxu3  ;;  %v13076_v22 = vor.u32 %v14800_v48, %v13075_v63  ;;  %v14788_v17 = vld [vmem:[%s19384_s3 + $0x2dc] sm:$0xf] }
0x1467   : > { %v17831_v36 = vadd.f32 %v6513_v24, %v17746_v30  ;;  %v14796_v30 = vld [vmem:[%s19384_s3 + $0x31c] sm:$0xf]  ;;  %v14768_v32 = vld [vmem:[%s19384_s3 + $0x234] sm:$0xf0] }
0x1468   : > { %7421 = vmatpush.bf16.msra.mxu3 %v12788_v50  ;;  %7447 = vmatpush.bf16.msrb.mxu1 %v12792_v52  ;;  %v13141_v50 = vld [vmem:[%s19384_s3 + $0x3b8] sm:$0xf0]  ;;  %v12691_v52 = vld [vmem:[%s19384_s3 + $0x18] sm:$0xf]  ;;  %v13080_v44 = vor.u32 %v14796_v30, %v13077_v39  ;;  %v12948_v63 = vor.u32 %v14768_v32, %v12947_v18  ;;  %v14993_v18 = vld [vmem:[%s19384_s3 + $0x944] sm:$0xf] }
0x1469   : > { %v13144_v34 = vor.u32 %v14812_v20, %v13141_v50  ;;  %v12692_v23 = vor.u32 %v14704_v15, %v12691_v52  ;;  %v14784_v20 = vld [vmem:[%s19384_s3 + $0x2b4] sm:$0xf0]  ;;  %v14780_v50 = vld [vmem:[%s19384_s3 + $0x29c] sm:$0xf] }
0x146a   : > { %7385 = vmatpush.bf16.msra.mxu0 %v12940_v25  ;;  %7411 = vmatpush.bf16.msra.mxu2 %v12944_v42  ;;  %v14792_v42 = vld [vmem:[%s19384_s3 + $0x2f4] sm:$0xf0]  ;;  %v14764_v49 = vld [vmem:[%s19384_s3 + $0x21c] sm:$0xf] }
0x146b   : > { %v13044_v46 = vor.u32 %v14792_v42, %v13043_v16 }
0x146c   : > { %7422 = vmatpush.bf16.msra.mxu3 %v12756_v38  ;;  %7448 = vmatpush.bf16.msrb.mxu1 %v12760_v61  ;;  %v6489_v38 = vpop.f32.mrf.mxu0  ;;  %v13108_v61 = vor.u32 %v14808_v26, %v13107_v9 }
0x146d   : > { %7386 = vmatmul.bf16.vlgmr.msra.gmra.mxu0 %v17665_v6  ;;  %7412 = vmatmul.bf16.vlgmr.msra.gmra.mxu2 %v17665_v6  ;;  %v12949_v38 = vld [vmem:[%s19384_s3 + $0x238] sm:$0xf0] }
0x146e   : > { %7430 = vmatpush.bf16.msrb.mxu0 %v13172_v7  ;;  %7456 = vmatpush.bf16.msrb.mxu2 %v13176_v14  ;;  %v6515_v25 = vpop.f32.mrf.mxu2  ;;  %v13045_v7 = vld [vmem:[%s19384_s3 + $0x2f8] sm:$0xf0]  ;;  %v12952_v48 = vor.u32 %v14764_v49, %v12949_v38  ;;  %v13472_v38 = vld [vmem:[%s19384_s3 + $0x960] sm:$0xf0] }
0x1470   : > { %7423 = vmatpush.bf16.msra.mxu3 %v12724_v19  ;;  %7449 = vmatpush.bf16.msrb.mxu1 %v12728_v62  ;;  %v13048_v19 = vor.u32 %v14788_v17, %v13045_v7  ;;  %v13011_v62 = vld [vmem:[%s19384_s3 + $0x298] sm:$0xf] }
0x1471   : > { %v13012_v52 = vor.u32 %v14784_v20, %v13011_v62  ;;  %v13534_v20 = vld [vmem:[%s19384_s3 + $0x9c0] sm:$0xf] }
0x1472   : > { %7431 = vmatpush.bf16.msrb.mxu0 %v13140_v54  ;;  %7457 = vmatpush.bf16.msrb.mxu2 %v13144_v34  ;;  %v14772_v54 = vld [vmem:[%s19384_s3 + $0x25c] sm:$0xf] }
0x1473   : > { %v12981_v34 = vld [vmem:[%s19384_s3 + $0x278] sm:$0xf0] }
0x1474   : > { %7424 = vmatpush.bf16.msra.mxu3 %v12692_v23  ;;  %7450 = vmatpush.bf16.msrb.mxu1 %v12696_v43  ;;  %v6539_v14 = vpop.f32.mrf.mxu0  ;;  %v6604_v24 = vpop.f32.mrf.mxu1  ;;  %v12984_v26 = vor.u32 %v14772_v54, %v12981_v34  ;;  %v15001_v54 = vld [vmem:[%s19384_s3 + $0x984] sm:$0xf] }
0x1475   : > { %v17847_v41 = vadd.f32 %v6539_v14, %v17810_v27  ;;  %v12979_v27 = vld [vmem:[%s19384_s3 + $0x258] sm:$0xf] }
0x1476   : > { %7432 = vmatpush.bf16.msrb.mxu0 %v13108_v61  ;;  %7458 = vmatpush.bf16.msrb.mxu2 %v13112_v0  ;;  %v6565_v13 = vpop.f32.mrf.mxu2  ;;  %v12980_v43 = vor.u32 %v14776_v59, %v12979_v27  ;;  %v13177_v61 = vld [vmem:[%s19385_s0 + $0x8] sm:$0xf]  ;;  %v15005_v59 = vld [vmem:[%s19384_s3 + $0x99c] sm:$0xf0] }
0x1477   : > { %7425 = vmatmul.bf16.vlgmr.msra.gmra.mxu3 %v17614_v35  ;;  %7451 = vmatmul.bf16.vlgmr.msrb.gmra.mxu1 %v17614_v35  ;;  %v13013_v35 = vld [vmem:[%s19384_s3 + $0x2b8] sm:$0xf0]  ;;  %v17858_v9 = vadd.f32 %v6565_v13, %v17792_v12 }
0x1478   : > { %7481 = vmatpush.bf16.msrb.mxu3 %v17267_v55  ;;  %v13016_v15 = vor.u32 %v14780_v50, %v13013_v35  ;;  %v15013_v50 = vld [vmem:[%s19384_s3 + $0x9dc] sm:$0xf0]  ;;  %v15009_v35 = vld [vmem:[%s19384_s3 + $0x9c4] sm:$0xf] }
0x147a   : > { %7433 = vmatpush.bf16.msrb.mxu0 %v13076_v22  ;;  %7459 = vmatpush.bf16.msrb.mxu2 %v13080_v44  ;;  %v6578_v0 = vpop.f32.mrf.mxu3 }
0x147c   : > { %v6541_v23 = vpop.f32.mrf.mxu0  ;;  %v6606_v30 = vpop.f32.mrf.mxu1 }
0x147d   : > { %v13438_v30 = vld [vmem:[%s19384_s3 + $0x900] sm:$0xf] }
0x147e   : > { %7434 = vmatpush.bf16.msrb.mxu0 %v13044_v46  ;;  %7460 = vmatpush.bf16.msrb.mxu2 %v13048_v19  ;;  %v6567_v12 = vpop.f32.mrf.mxu2 }
0x1482   : > { %7435 = vmatpush.bf16.msrb.mxu0 %v13012_v52  ;;  %7461 = vmatpush.bf16.msrb.mxu2 %v13016_v15  ;;  %v6580_v39 = vpop.f32.mrf.mxu3  ;;  %v13535_v52 = vor.u32 %v15013_v50, %v13534_v20  ;;  %v13536_v15 = vld [vmem:[%s19384_s3 + $0x9e0] sm:$0xf0] }
0x1483   : > { %v14989_v39 = vld [vmem:[%s19384_s3 + $0x91c] sm:$0xf0]  ;;  %v13408_v20 = vld [vmem:[%s19384_s3 + $0x8e0] sm:$0xf0] }
0x1484   : > { %8271 = vmatpush.bf16.msra.mxu1 %v13535_v52 }
0x1486   : > { %7436 = vmatpush.bf16.msrb.mxu0 %v12980_v43  ;;  %7462 = vmatpush.bf16.msrb.mxu2 %v12984_v26  ;;  %v13470_v43 = vld [vmem:[%s19384_s3 + $0x940] sm:$0xf] }
0x1487   : > { %13178 = vmatmul.msk.bf16.vlgmr.msrb.gmra.mxu3 %vm3423_vm8, %v13177_v61  ;;  %v14997_v26 = vld [vmem:[%s19384_s3 + $0x95c] sm:$0xf0] }
0x1488   : > { %v13471_v49 = vor.u32 %v14997_v26, %v13470_v43  ;;  %v14969_v43 = vld [vmem:[%s19384_s3 + $0x884] sm:$0xf] }
0x1489   : > { %v13376_v26 = vld [vmem:[%s19384_s3 + $0x8a0] sm:$0xf0] }
0x148a   : > { %7437 = vmatpush.bf16.msrb.mxu0 %v12948_v63  ;;  %7463 = vmatpush.bf16.msrb.mxu2 %v12952_v48  ;;  %v6591_v22 = vpop.f32.mrf.mxu0  ;;  %v13475_v63 = vor.u32 %v14993_v18, %v13472_v38  ;;  %v13760_v38 = vld [vmem:[%s19384_s3 + $0xba0] sm:$0xf0] }
0x148b   : > { %v17869_v44 = vadd.f32 %v6591_v22, %v6578_v0  ;;  %v14985_v22 = vld [vmem:[%s19384_s3 + $0x904] sm:$0xf] }
0x148d   : > { %7438 = vmatmul.bf16.vlgmr.msrb.gmra.mxu0 %v17665_v6  ;;  %7464 = vmatmul.bf16.vlgmr.msrb.gmra.mxu2 %v17665_v6 }
0x148e   : > { %7494 = vmatpush.bf16.msra.mxu0 %v17292_v60 }
0x1490   : > { %v6617_v16 = vpop.f32.mrf.mxu2 }
0x1491   : > { %v17871_v25 = vadd.f32 %v6617_v16, %v6604_v24  ;;  %v13504_v24 = vld [vmem:[%s19384_s3 + $0x9a0] sm:$0xf0]  ;;  %v13439_v16 = vor.u32 %v14989_v39, %v13438_v30  ;;  %v13726_v30 = vld [vmem:[%s19384_s3 + $0xb40] sm:$0xf] }
0x1492   : > { %v6593_v7 = vpop.f32.mrf.mxu0  ;;  %v13507_v23 = vor.u32 %v15001_v54, %v13504_v24  ;;  %v14973_v54 = vld [vmem:[%s19384_s3 + $0x89c] sm:$0xf0] }
0x1493   : > { %v13406_v7 = vld [vmem:[%s19384_s3 + $0x8c0] sm:$0xf] }
0x1494   : > { %v7296_v42 = vpop.f32.mrf.mxu1  ;;  %v15061_v39 = vld [vmem:[%s19384_s3 + $0xb5c] sm:$0xf0] }
0x1495   : > { %v7297_v17 = vadd.f32 %v7296_v42, %v17785_v28  ;;  %v13539_v28 = vor.u32 %v15009_v35, %v13536_v15  ;;  %v13440_v42 = vld [vmem:[%s19384_s3 + $0x920] sm:$0xf0] }
0x1497   : > { %8297 = vmatpush.bf16.msra.mxu3 %v13539_v28  ;;  %v15073_v28 = vld [vmem:[%s19384_s3 + $0xbc4] sm:$0xf] }
0x1498   : > { %v6619_v46 = vpop.f32.mrf.mxu2 }
0x149a   : > { %v7270_v14 = vpop.f32.mrf.mxu3 }
0x149b   : > { %v7271_v6 = vadd.f32 %v7270_v14, %v17768_v1  ;;  %v13502_v1 = vld [vmem:[%s19384_s3 + $0x980] sm:$0xf]  ;;  %8298 = vmatpush.bf16.msra.mxu3 %v13507_v23 }
0x149c   : > { %v7298_v19 = vpop.f32.mrf.mxu1  ;;  %v13503_v34 = vor.u32 %v15005_v59, %v13502_v1  ;;  %v14981_v14 = vld [vmem:[%s19384_s3 + $0x8dc] sm:$0xf0] }
0x149d   : > { %13179 = vmatmul.msk.bf16.vlgmr.msra.gmra.mxu0 %vm3423_vm8, %v13177_v61  ;;  %v13407_v46 = vor.u32 %v14981_v14, %v13406_v7  ;;  %v15077_v19 = vld [vmem:[%s19384_s3 + $0xbdc] sm:$0xf0]  ;;  %v13344_v7 = vld [vmem:[%s19384_s3 + $0x860] sm:$0xf0] }
0x149e   : > { %8272 = vmatpush.bf16.msra.mxu1 %v13503_v34  ;;  %v13758_v34 = vld [vmem:[%s19384_s3 + $0xb80] sm:$0xf]  ;;  %v15057_v14 = vld [vmem:[%s19384_s3 + $0xb44] sm:$0xf] }
0x149f   : > { %8299 = vmatpush.bf16.msra.mxu3 %v13475_v63  ;;  %v15069_v23 = vld [vmem:[%s19384_s3 + $0xb9c] sm:$0xf0] }
0x14a0   : > { %v13759_v18 = vor.u32 %v15069_v23, %v13758_v34  ;;  %v15010_v23 = vld [vmem:[%s19384_s3 + $0x9cc] sm:$0xf] }
0x14a2   : > { %v7272_v62 = vpop.f32.mrf.mxu3  ;;  %8273 = vmatpush.bf16.msra.mxu1 %v13471_v49  ;;  %v15065_v49 = vld [vmem:[%s19384_s3 + $0xb84] sm:$0xf] }
0x14a3   : > { %v14977_v62 = vld [vmem:[%s19384_s3 + $0x8c4] sm:$0xf]  ;;  %v13763_v63 = vor.u32 %v15065_v49, %v13760_v38  ;;  %v13662_v49 = vld [vmem:[%s19384_s3 + $0xac0] sm:$0xf] }
0x14a4   : > { %v13411_v15 = vor.u32 %v14977_v62, %v13408_v20  ;;  %v14957_v62 = vld [vmem:[%s19384_s3 + $0x81c] sm:$0xf0] }
0x14a5   : > { %v13694_v20 = vld [vmem:[%s19384_s3 + $0xb00] sm:$0xf] }
0x14a6   : > { %8274 = vmatpush.bf16.msra.mxu1 %v13439_v16  ;;  %v15045_v38 = vld [vmem:[%s19384_s3 + $0xadc] sm:$0xf0] }
0x14aa   : > { %v7283_v27 = vpop.f32.mrf.mxu0  ;;  %8275 = vmatpush.bf16.msra.mxu1 %v13407_v46 }
0x14ab   : > { %v17880_v13 = vadd.f32 %v7283_v27, %v7271_v6  ;;  %v13790_v6 = vld [vmem:[%s19384_s3 + $0xbc0] sm:$0xf]  ;;  %v13792_v27 = vld [vmem:[%s19384_s3 + $0xbe0] sm:$0xf0] }
0x14ac   : > { %v13791_v52 = vor.u32 %v15077_v19, %v13790_v6  ;;  %v13795_v59 = vor.u32 %v15073_v28, %v13792_v27  ;;  %v13310_v19 = vld [vmem:[%s19384_s3 + $0x800] sm:$0xf]  ;;  %v13312_v28 = vld [vmem:[%s19384_s3 + $0x820] sm:$0xf0] }
0x14ae   : > { %8284 = vmatpush.bf16.msra.mxu2 %v13791_v52  ;;  %8310 = vmatpush.bf16.msrb.mxu0 %v13795_v59  ;;  %v15053_v52 = vld [vmem:[%s19384_s3 + $0xb1c] sm:$0xf0]  ;;  %v15049_v59 = vld [vmem:[%s19384_s3 + $0xb04] sm:$0xf] }
0x14af   : > { %v13695_v27 = vor.u32 %v15053_v52, %v13694_v20  ;;  %v14998_v20 = vld [vmem:[%s19384_s3 + $0x964] sm:$0xf0] }
0x14b0   : > { %v7309_v32 = vpop.f32.mrf.mxu2 }
0x14b1   : > { %v17890_v61 = vadd.f32 %v7309_v32, %v7297_v17  ;;  %v13443_v17 = vor.u32 %v14985_v22, %v13440_v42  ;;  %v13379_v32 = vor.u32 %v14969_v43, %v13376_v26  ;;  %v13727_v42 = vor.u32 %v15061_v39, %v13726_v30  ;;  %v13544_v43 = vld [vmem:[%s19384_s3 + $0x9e8] sm:$0xf0]  ;;  %v13664_v30 = vld [vmem:[%s19384_s3 + $0xae0] sm:$0xf0]  ;;  %v13510_v39 = vld [vmem:[%s19384_s3 + $0x988] sm:$0xf] }
0x14b2   : > { %v7285_v12 = vpop.f32.mrf.mxu0  ;;  %8285 = vmatpush.bf16.msra.mxu2 %v13759_v18  ;;  %8311 = vmatpush.bf16.msrb.mxu0 %v13763_v63 }
0x14b3   : > { %8300 = vmatpush.bf16.msra.mxu3 %v13443_v17  ;;  %v14965_v12 = vld [vmem:[%s19384_s3 + $0x85c] sm:$0xf0]  ;;  %v14961_v17 = vld [vmem:[%s19384_s3 + $0x844] sm:$0xf] }
0x14b4   : > { %v7348_v0 = vpop.f32.mrf.mxu1  ;;  %v13347_v6 = vor.u32 %v14961_v17, %v13344_v7  ;;  %v15002_v17 = vld [vmem:[%s19384_s3 + $0x98c] sm:$0xf] }
0x14b5   : > { %v17893_v48 = vadd.f32 %v7348_v0, %v17831_v36  ;;  %v13342_v0 = vld [vmem:[%s19384_s3 + $0x840] sm:$0xf]  ;;  %v13512_v7 = vld [vmem:[%s19384_s3 + $0x9a8] sm:$0xf0] }
0x14b6   : > { %v13343_v16 = vor.u32 %v14965_v12, %v13342_v0  ;;  %8286 = vmatpush.bf16.msra.mxu2 %v13727_v42  ;;  %v15041_v0 = vld [vmem:[%s19384_s3 + $0xac4] sm:$0xf]  ;;  %v13663_v12 = vor.u32 %v15045_v38, %v13662_v49  ;;  %v14986_v38 = vld [vmem:[%s19384_s3 + $0x90c] sm:$0xf] }
0x14b7   : > { %8301 = vmatpush.bf16.msra.mxu3 %v13411_v15  ;;  %v14953_v15 = vld [vmem:[%s19384_s3 + $0x804] sm:$0xf] }
0x14b8   : > { %v7311_v35 = vpop.f32.mrf.mxu2 }
0x14b9   : > { %v13311_v35 = vor.u32 %v14957_v62, %v13310_v19  ;;  %v13632_v19 = vld [vmem:[%s19384_s3 + $0xaa0] sm:$0xf0]  ;;  %v13478_v62 = vld [vmem:[%s19384_s3 + $0x948] sm:$0xf] }
0x14ba   : > { %v7322_v36 = vpop.f32.mrf.mxu3  ;;  %8287 = vmatpush.bf16.msra.mxu2 %v13695_v27  ;;  %v13480_v27 = vld [vmem:[%s19384_s3 + $0x968] sm:$0xf0] }
0x14bb   : > { %v17906_v50 = vadd.f32 %v7322_v36, %v17816_v10  ;;  %v13374_v10 = vld [vmem:[%s19384_s3 + $0x880] sm:$0xf]  ;;  %8302 = vmatpush.bf16.msra.mxu3 %v13379_v32  ;;  %v13728_v36 = vld [vmem:[%s19384_s3 + $0xb60] sm:$0xf0]  ;;  %v13547_v32 = vor.u32 %v15010_v23, %v13544_v43 }
0x14bc   : > { %v7350_v1 = vpop.f32.mrf.mxu1  ;;  %v13375_v24 = vor.u32 %v14973_v54, %v13374_v10  ;;  %v13731_v46 = vor.u32 %v15057_v14, %v13728_v36  ;;  %v13696_v10 = vld [vmem:[%s19384_s3 + $0xb20] sm:$0xf0]  ;;  %v13542_v54 = vld [vmem:[%s19384_s3 + $0x9c8] sm:$0xf]  ;;  %v13515_v14 = vor.u32 %v15002_v17, %v13512_v7  ;;  %v15029_v23 = vld [vmem:[%s19384_s3 + $0xa5c] sm:$0xf0] }
0x14bd   : > { %v13315_v1 = vor.u32 %v14953_v15, %v13312_v28  ;;  %v13699_v34 = vor.u32 %v15049_v59, %v13696_v10  ;;  %v15033_v36 = vld [vmem:[%s19384_s3 + $0xa84] sm:$0xf]  ;;  %v13479_v15 = vor.u32 %v14998_v20, %v13478_v62  ;;  %v14994_v28 = vld [vmem:[%s19384_s3 + $0x94c] sm:$0xf]  ;;  %v13414_v7 = vld [vmem:[%s19384_s3 + $0x8c8] sm:$0xf] }
0x14be   : > { %8276 = vmatpush.bf16.msra.mxu1 %v13375_v24  ;;  %8312 = vmatpush.bf16.msrb.mxu0 %v13731_v46  ;;  %v15014_v24 = vld [vmem:[%s19384_s3 + $0x9e4] sm:$0xf0]  ;;  %v13635_v52 = vor.u32 %v15033_v36, %v13632_v19  ;;  %v13483_v10 = vor.u32 %v14994_v28, %v13480_v27  ;;  %v15025_v43 = vld [vmem:[%s19384_s3 + $0xa44] sm:$0xf]  ;;  %v14978_v20 = vld [vmem:[%s19384_s3 + $0x8cc] sm:$0xf] }
0x14bf   : > { %8303 = vmatpush.bf16.msra.mxu3 %v13347_v6  ;;  %v13543_v18 = vor.u32 %v15014_v24, %v13542_v54  ;;  %8288 = vmatpush.bf16.msra.mxu2 %v13663_v12  ;;  %v15037_v6 = vld [vmem:[%s19384_s3 + $0xa9c] sm:$0xf0]  ;;  %v13568_v17 = vld [vmem:[%s19384_s3 + $0xa20] sm:$0xf0]  ;;  %v13798_v19 = vld [vmem:[%s19384_s3 + $0xbc8] sm:$0xf] }
0x14c0   : > { %v13598_v24 = vld [vmem:[%s19384_s3 + $0xa40] sm:$0xf]  ;;  %v15078_v62 = vld [vmem:[%s19384_s3 + $0xbe4] sm:$0xf0]  ;;  %v15074_v28 = vld [vmem:[%s19384_s3 + $0xbcc] sm:$0xf] }
0x14c2   : > { %v7324_v22 = vpop.f32.mrf.mxu3  ;;  %8277 = vmatpush.bf16.msra.mxu1 %v13343_v16  ;;  %8313 = vmatpush.bf16.msrb.mxu0 %v13699_v34  ;;  %v13667_v16 = vor.u32 %v15041_v0, %v13664_v30  ;;  %v13448_v0 = vld [vmem:[%s19384_s3 + $0x928] sm:$0xf0]  ;;  %v13566_v30 = vld [vmem:[%s19384_s3 + $0xa00] sm:$0xf] }
0x14c3   : > { %8304 = vmatpush.bf16.msra.mxu3 %v13315_v1  ;;  %v15006_v22 = vld [vmem:[%s19384_s3 + $0x9a4] sm:$0xf0]  ;;  %v13451_v12 = vor.u32 %v14986_v38, %v13448_v0 }
0x14c4   : > { %v13511_v42 = vor.u32 %v15006_v22, %v13510_v39  ;;  %v15021_v39 = vld [vmem:[%s19384_s3 + $0xa1c] sm:$0xf0]  ;;  %v15017_v22 = vld [vmem:[%s19384_s3 + $0xa04] sm:$0xf]  ;;  %v13350_v38 = vld [vmem:[%s19384_s3 + $0x848] sm:$0xf] }
0x14c5   : > { %v13571_v36 = vor.u32 %v15017_v22, %v13568_v17  ;;  %v13352_v17 = vld [vmem:[%s19384_s3 + $0x868] sm:$0xf0] }
0x14c6   : > { %8278 = vmatpush.bf16.msra.mxu1 %v13311_v35  ;;  %8314 = vmatpush.bf16.msrb.mxu0 %v13667_v16 }
0x14c7   : > { %8349 = vmatpush.bf16.msrb.mxu3 %v13547_v32  ;;  %v14990_v32 = vld [vmem:[%s19384_s3 + $0x924] sm:$0xf0] }
0x14ca   : > { %v7335_v26 = vpop.f32.mrf.mxu0  ;;  %8323 = vmatpush.bf16.msrb.mxu1 %v13543_v18  ;;  %8315 = vmatpush.bf16.msrb.mxu0 %v13635_v52  ;;  %v13600_v18 = vld [vmem:[%s19384_s3 + $0xa60] sm:$0xf0]  ;;  %v13799_v52 = vor.u32 %v15078_v62, %v13798_v19  ;;  %v13318_v19 = vld [vmem:[%s19384_s3 + $0x808] sm:$0xf] }
0x14cb   : > { %v17942_v63 = vadd.f32 %v7335_v26, %v17906_v50  ;;  %v13630_v50 = vld [vmem:[%s19384_s3 + $0xa80] sm:$0xf]  ;;  %8350 = vmatpush.bf16.msrb.mxu3 %v13515_v14  ;;  %v13599_v26 = vor.u32 %v15029_v23, %v13598_v24  ;;  %v14982_v14 = vld [vmem:[%s19384_s3 + $0x8e4] sm:$0xf0] }
0x14cc   : > { %v13631_v46 = vor.u32 %v15037_v6, %v13630_v50  ;;  %v13766_v24 = vld [vmem:[%s19384_s3 + $0xb88] sm:$0xf] }
0x14cd   : > { %v14958_v62 = vld [vmem:[%s19384_s3 + $0x824] sm:$0xf0] }
0x14ce   : > { %8324 = vmatpush.bf16.msrb.mxu1 %v13511_v42  ;;  %8289 = vmatpush.bf16.msra.mxu2 %v13631_v46  ;;  %v13567_v42 = vor.u32 %v15021_v39, %v13566_v30  ;;  %v13415_v46 = vor.u32 %v14982_v14, %v13414_v7  ;;  %v13734_v30 = vld [vmem:[%s19384_s3 + $0xb48] sm:$0xf]  ;;  %v15058_v7 = vld [vmem:[%s19384_s3 + $0xb4c] sm:$0xf] }
0x14cf   : > { %8351 = vmatpush.bf16.msrb.mxu3 %v13483_v10  ;;  %v13382_v10 = vld [vmem:[%s19384_s3 + $0x888] sm:$0xf] }
0x14d0   : > { %v7361_v35 = vpop.f32.mrf.mxu2  ;;  %v15062_v39 = vld [vmem:[%s19384_s3 + $0xb64] sm:$0xf0] }
0x14d1   : > { %v17958_v1 = vadd.f32 %v7361_v35, %v17893_v48  ;;  %v13446_v48 = vld [vmem:[%s19384_s3 + $0x908] sm:$0xf] }
0x14d2   : > { %v7337_v34 = vpop.f32.mrf.mxu0  ;;  %8325 = vmatpush.bf16.msrb.mxu1 %v13479_v15  ;;  %v13447_v49 = vor.u32 %v14990_v32, %v13446_v48  ;;  %8290 = vmatpush.bf16.msra.mxu2 %v13599_v26  ;;  %v13416_v15 = vld [vmem:[%s19384_s3 + $0x8e8] sm:$0xf0] }
0x14d3   : > { %8352 = vmatpush.bf16.msrb.mxu3 %v13451_v12  ;;  %v13419_v27 = vor.u32 %v14978_v20, %v13416_v15  ;;  %v14974_v34 = vld [vmem:[%s19384_s3 + $0x8a4] sm:$0xf0]  ;;  %v14970_v26 = vld [vmem:[%s19384_s3 + $0x88c] sm:$0xf] }
0x14d4   : > { %v7400_v59 = vpop.f32.mrf.mxu1  ;;  %v13383_v23 = vor.u32 %v14974_v34, %v13382_v10  ;;  %v14966_v12 = vld [vmem:[%s19384_s3 + $0x864] sm:$0xf0]  ;;  %v14954_v15 = vld [vmem:[%s19384_s3 + $0x80c] sm:$0xf] }
0x14d5   : > { %v17961_v54 = vadd.f32 %v7400_v59, %v17858_v9  ;;  %v13603_v9 = vor.u32 %v15025_v43, %v13600_v18  ;;  %v15070_v43 = vld [vmem:[%s19384_s3 + $0xba4] sm:$0xf0]  ;;  %v13384_v18 = vld [vmem:[%s19384_s3 + $0x8a8] sm:$0xf0]  ;;  %v13351_v14 = vor.u32 %v14966_v12, %v13350_v38 }
0x14d6   : > { %8326 = vmatpush.bf16.msrb.mxu1 %v13447_v49  ;;  %8291 = vmatpush.bf16.msra.mxu2 %v13567_v42  ;;  %v13767_v48 = vor.u32 %v15070_v43, %v13766_v24  ;;  %v13387_v32 = vor.u32 %v14970_v26, %v13384_v18  ;;  %v13768_v49 = vld [vmem:[%s19384_s3 + $0xba8] sm:$0xf0]  ;;  %v13702_v20 = vld [vmem:[%s19384_s3 + $0xb08] sm:$0xf] }
0x14d7   : > { %8316 = vmatpush.bf16.msrb.mxu0 %v13603_v9  ;;  %8353 = vmatpush.bf16.msrb.mxu3 %v13419_v27  ;;  %v15066_v9 = vld [vmem:[%s19384_s3 + $0xb8c] sm:$0xf]  ;;  %v13670_v43 = vld [vmem:[%s19384_s3 + $0xac8] sm:$0xf] }
0x14d8   : > { %v7363_v6 = vpop.f32.mrf.mxu2  ;;  %v13771_v0 = vor.u32 %v15066_v9, %v13768_v49  ;;  %v14962_v42 = vld [vmem:[%s19384_s3 + $0x84c] sm:$0xf]  ;;  %v15046_v26 = vld [vmem:[%s19384_s3 + $0xae4] sm:$0xf0] }
0x14d9   : > { %v13355_v6 = vor.u32 %v14962_v42, %v13352_v17  ;;  %v13704_v10 = vld [vmem:[%s19384_s3 + $0xb28] sm:$0xf0]  ;;  %v13638_v49 = vld [vmem:[%s19384_s3 + $0xa88] sm:$0xf] }
0x14da   : > { %v7374_v16 = vpop.f32.mrf.mxu3  ;;  %8336 = vmatpush.bf16.msrb.mxu2 %v13799_v52  ;;  %8327 = vmatpush.bf16.msrb.mxu1 %v13415_v46  ;;  %v15054_v52 = vld [vmem:[%s19384_s3 + $0xb24] sm:$0xf0]  ;;  %v15042_v18 = vld [vmem:[%s19384_s3 + $0xacc] sm:$0xf] }
0x14db   : > { %v17978_v50 = vadd.f32 %v7374_v16, %v17847_v41  ;;  %v13800_v41 = vld [vmem:[%s19384_s3 + $0xbe8] sm:$0xf0]  ;;  %8317 = vmatpush.bf16.msrb.mxu0 %v13571_v36  ;;  %v13735_v16 = vor.u32 %v15062_v39, %v13734_v30  ;;  %8354 = vmatpush.bf16.msrb.mxu3 %v13387_v32  ;;  %v15038_v38 = vld [vmem:[%s19384_s3 + $0xaa4] sm:$0xf0] }
0x14dc   : > { %v7402_v35 = vpop.f32.mrf.mxu1  ;;  %v13803_v59 = vor.u32 %v15074_v28, %v13800_v41  ;;  %v13736_v36 = vld [vmem:[%s19384_s3 + $0xb68] sm:$0xf0]  ;;  %v13703_v41 = vor.u32 %v15054_v52, %v13702_v20  ;;  %v13639_v12 = vor.u32 %v15038_v38, %v13638_v49  ;;  %v15022_v20 = vld [vmem:[%s19384_s3 + $0xa24] sm:$0xf0]  ;;  %v15007_v38 = vld [vmem:[%s19384_s3 + $0x9ac] sm:$0xf0] }
0x14dd   : > { %v13739_v46 = vor.u32 %v15058_v7, %v13736_v36  ;;  %v13319_v35 = vor.u32 %v14958_v62, %v13318_v19  ;;  %v13320_v28 = vld [vmem:[%s19384_s3 + $0x828] sm:$0xf0]  ;;  %v13606_v7 = vld [vmem:[%s19384_s3 + $0xa48] sm:$0xf] }
0x14de   : > { %8337 = vmatpush.bf16.msrb.mxu2 %v13767_v48  ;;  %8328 = vmatpush.bf16.msrb.mxu1 %v13383_v23  ;;  %v13323_v27 = vor.u32 %v14954_v15, %v13320_v28  ;;  %v13671_v48 = vor.u32 %v15046_v26, %v13670_v43  ;;  %v13672_v32 = vld [vmem:[%s19384_s3 + $0xae8] sm:$0xf0]  ;;  %v13574_v62 = vld [vmem:[%s19384_s3 + $0xa08] sm:$0xf]  ;;  %v13552_v43 = vld [vmem:[%s19384_s3 + $0x9f0] sm:$0xf0] }
0x14df   : > { %8362 = vmatpush.bf16.msra.mxu0 %v13803_v59  ;;  %8355 = vmatpush.bf16.msrb.mxu3 %v13355_v6  ;;  %v15050_v59 = vld [vmem:[%s19384_s3 + $0xb0c] sm:$0xf]  ;;  %v13675_v9 = vor.u32 %v15042_v18, %v13672_v32  ;;  %v13575_v15 = vor.u32 %v15022_v20, %v13574_v62  ;;  %v13518_v32 = vld [vmem:[%s19384_s3 + $0x990] sm:$0xf] }
0x14e0   : > { %v13707_v34 = vor.u32 %v15050_v59, %v13704_v10  ;;  %v13640_v30 = vld [vmem:[%s19384_s3 + $0xaa8] sm:$0xf0]  ;;  %v13550_v10 = vld [vmem:[%s19384_s3 + $0x9d0] sm:$0xf] }
0x14e1   : > { %v15026_v6 = vld [vmem:[%s19384_s3 + $0xa4c] sm:$0xf]  ;;  %v14991_v20 = vld [vmem:[%s19384_s3 + $0x92c] sm:$0xf0] }
0x14e2   : > { %v7376_v22 = vpop.f32.mrf.mxu3  ;;  %8338 = vmatpush.bf16.msrb.mxu2 %v13735_v16  ;;  %8329 = vmatpush.bf16.msrb.mxu1 %v13351_v14  ;;  %v15030_v14 = vld [vmem:[%s19384_s3 + $0xa64] sm:$0xf0]  ;;  %v13576_v28 = vld [vmem:[%s19384_s3 + $0xa28] sm:$0xf0] }
0x14e3   : > { %8363 = vmatpush.bf16.msra.mxu0 %v13771_v0  ;;  %8356 = vmatpush.bf16.msrb.mxu3 %v13323_v27  ;;  %v15034_v0 = vld [vmem:[%s19384_s3 + $0xa8c] sm:$0xf]  ;;  %v13607_v36 = vor.u32 %v15030_v14, %v13606_v7  ;;  %v13488_v7 = vld [vmem:[%s19384_s3 + $0x970] sm:$0xf0] }
0x14e4   : > { %v13643_v16 = vor.u32 %v15034_v0, %v13640_v30  ;;  %v15003_v0 = vld [vmem:[%s19384_s3 + $0x994] sm:$0xf] }
0x14e6   : > { %8339 = vmatpush.bf16.msrb.mxu2 %v13703_v41  ;;  %8330 = vmatpush.bf16.msrb.mxu1 %v13319_v35  ;;  %v15018_v35 = vld [vmem:[%s19384_s3 + $0xa0c] sm:$0xf] }
0x14e7   : > { %8364 = vmatpush.bf16.msra.mxu0 %v13739_v46  ;;  %v13608_v46 = vld [vmem:[%s19384_s3 + $0xa68] sm:$0xf0]  ;;  %v13579_v27 = vor.u32 %v15018_v35, %v13576_v28  ;;  %v14987_v35 = vld [vmem:[%s19384_s3 + $0x914] sm:$0xf]  ;;  %v14983_v28 = vld [vmem:[%s19384_s3 + $0x8ec] sm:$0xf0] }
0x14e8   : > { %v13611_v19 = vor.u32 %v15026_v6, %v13608_v46 }
0x14ea   : > { %v7387_v24 = vpop.f32.mrf.mxu0  ;;  %8340 = vmatpush.bf16.msrb.mxu2 %v13671_v48 }
0x14eb   : > { %v18011_v23 = vadd.f32 %v7387_v24, %v17978_v50  ;;  %8365 = vmatpush.bf16.msra.mxu0 %v13707_v34  ;;  %v15015_v34 = vld [vmem:[%s19384_s3 + $0x9ec] sm:$0xf0]  ;;  %v15011_v24 = vld [vmem:[%s19384_s3 + $0x9d4] sm:$0xf] }
0x14ec   : > { %v13551_v18 = vor.u32 %v15015_v34, %v13550_v10  ;;  %v13555_v48 = vor.u32 %v15011_v24, %v13552_v43  ;;  %v14979_v10 = vld [vmem:[%s19384_s3 + $0x8d4] sm:$0xf] }
0x14ed   : > { %v13424_v34 = vld [vmem:[%s19384_s3 + $0x8f0] sm:$0xf0] }
0x14ee   : > { %8341 = vmatpush.bf16.msrb.mxu2 %v13639_v12  ;;  %v13519_v12 = vor.u32 %v15007_v38, %v13518_v32  ;;  %v15075_v24 = vld [vmem:[%s19384_s3 + $0xbd4] sm:$0xf]  ;;  %v13390_v32 = vld [vmem:[%s19384_s3 + $0x890] sm:$0xf] }
0x14ef   : > { %8366 = vmatpush.bf16.msra.mxu0 %v13675_v9  ;;  %v13808_v43 = vld [vmem:[%s19384_s3 + $0xbf0] sm:$0xf0]  ;;  %v14975_v38 = vld [vmem:[%s19384_s3 + $0x8ac] sm:$0xf0] }
0x14f0   : > { %v7413_v50 = vpop.f32.mrf.mxu2 }
0x14f1   : > { %v18022_v39 = vadd.f32 %v7413_v50, %v17961_v54  ;;  %v13520_v50 = vld [vmem:[%s19384_s3 + $0x9b0] sm:$0xf0] }
0x14f2   : > { %v7389_v17 = vpop.f32.mrf.mxu0  ;;  %8342 = vmatpush.bf16.msrb.mxu2 %v13607_v36  ;;  %v13523_v30 = vor.u32 %v15003_v0, %v13520_v50  ;;  %v13427_v0 = vor.u32 %v14979_v10, %v13424_v34  ;;  %v13811_v50 = vor.u32 %v15075_v24, %v13808_v43  ;;  %v14959_v10 = vld [vmem:[%s19384_s3 + $0x82c] sm:$0xf0] }
0x14f3   : > { %8367 = vmatpush.bf16.msra.mxu0 %v13643_v16  ;;  %v14999_v16 = vld [vmem:[%s19384_s3 + $0x96c] sm:$0xf0]  ;;  %v14995_v17 = vld [vmem:[%s19384_s3 + $0x954] sm:$0xf] }
0x14f4   : > { %v7452_v22 = vpop.f32.mrf.mxu1  ;;  %v13710_v34 = vld [vmem:[%s19384_s3 + $0xb10] sm:$0xf] }
0x14f5   : > { %v7453_v42 = vadd.f32 %v7452_v22, %v17871_v25  ;;  %v13486_v22 = vld [vmem:[%s19384_s3 + $0x950] sm:$0xf] }
0x14f6   : > { %8343 = vmatpush.bf16.msrb.mxu2 %v13575_v15  ;;  %v13487_v46 = vor.u32 %v14999_v16, %v13486_v22  ;;  %v13422_v15 = vld [vmem:[%s19384_s3 + $0x8d0] sm:$0xf]  ;;  %v14971_v22 = vld [vmem:[%s19384_s3 + $0x894] sm:$0xf] }
0x14f7   : > { %8368 = vmatpush.bf16.msra.mxu0 %v13611_v19  ;;  %v13491_v19 = vor.u32 %v14995_v17, %v13488_v7  ;;  %v13392_v16 = vld [vmem:[%s19384_s3 + $0x8b0] sm:$0xf0] }
0x14f8   : > { %v7415_v52 = vpop.f32.mrf.mxu2  ;;  %v15067_v17 = vld [vmem:[%s19384_s3 + $0xb94] sm:$0xf] }
0x14f9   : > { %v13776_v7 = vld [vmem:[%s19384_s3 + $0xbb0] sm:$0xf0] }
0x14fa   : > { %v7426_v54 = vpop.f32.mrf.mxu3 }
0x14fb   : > { %v7427_v25 = vadd.f32 %v7426_v54, %v17869_v44  ;;  %8369 = vmatpush.bf16.msra.mxu0 %v13579_v27  ;;  %v13454_v54 = vld [vmem:[%s19384_s3 + $0x910] sm:$0xf] }
0x14fc   : > { %v7454_v41 = vpop.f32.mrf.mxu1  ;;  %v13806_v27 = vld [vmem:[%s19384_s3 + $0xbd0] sm:$0xf] }
0x1502   : > { %v7428_v59 = vpop.f32.mrf.mxu3 }
0x1503   : > { %v15079_v59 = vld [vmem:[%s19384_s3 + $0xbec] sm:$0xf0] }
0x150a   : > { %v7439_v26 = vpop.f32.mrf.mxu0  ;;  %v7483_v44 = vpop.f32.mrf.mxu3 }
0x150b   : > { %v18039_v9 = vadd.f32 %v7439_v26, %v7427_v25  ;;  %v18041_v49 = vpack.c.bf16 %v7483_v44, %v7483_v44  ;;  %v13456_v25 = vld [vmem:[%s19384_s3 + $0x930] sm:$0xf0] }
0x150c   : > { %v13459_v52 = vor.u32 %v14987_v35, %v13456_v25  ;;  %v15063_v35 = vld [vmem:[%s19384_s3 + $0xb6c] sm:$0xf0]  ;;  %v14963_v25 = vld [vmem:[%s19384_s3 + $0x854] sm:$0xf] }
0x150d   : > { %8279 = vmatmul.bf16.vlgmr.msra.gmra.mxu1 %v18041_v49  ;;  %8305 = vmatmul.bf16.vlgmr.msra.gmra.mxu3 %v18041_v49 }
0x150e   : > { %8375 = vmatpush.bf16.msra.mxu1 %v13551_v18  ;;  %8401 = vmatpush.bf16.msra.mxu3 %v13555_v48  ;;  %v13423_v18 = vor.u32 %v14983_v28, %v13422_v15  ;;  %v13807_v48 = vor.u32 %v15079_v59, %v13806_v27  ;;  %v13744_v15 = vld [vmem:[%s19384_s3 + $0xb70] sm:$0xf0]  ;;  %v13326_v59 = vld [vmem:[%s19384_s3 + $0x810] sm:$0xf] }
0x1510   : > { %v7465_v14 = vpop.f32.mrf.mxu2 }
0x1511   : > { %v18052_v6 = vadd.f32 %v7465_v14, %v7453_v42  ;;  %v13455_v42 = vor.u32 %v14991_v20, %v13454_v54  ;;  %v13391_v14 = vor.u32 %v14975_v38, %v13390_v32  ;;  %v13395_v54 = vor.u32 %v14971_v22, %v13392_v16  ;;  %v13742_v20 = vld [vmem:[%s19384_s3 + $0xb50] sm:$0xf]  ;;  %v15051_v32 = vld [vmem:[%s19384_s3 + $0xb14] sm:$0xf] }
0x1512   : > { %8376 = vmatpush.bf16.msra.mxu1 %v13519_v12  ;;  %8402 = vmatpush.bf16.msra.mxu3 %v13523_v30  ;;  %v7441_v36 = vpop.f32.mrf.mxu0  ;;  %v7485_v62 = vpop.f32.mrf.mxu3  ;;  %v13774_v12 = vld [vmem:[%s19384_s3 + $0xb90] sm:$0xf]  ;;  %v13743_v27 = vor.u32 %v15063_v35, %v13742_v20  ;;  %v13712_v38 = vld [vmem:[%s19384_s3 + $0xb30] sm:$0xf0]  ;;  %v13327_v22 = vor.u32 %v14959_v10, %v13326_v59  ;;  %v13526_v20 = vld [vmem:[%s19384_s3 + $0x998] sm:$0xf] }
0x1513   : > { %v15071_v30 = vld [vmem:[%s19384_s3 + $0xbac] sm:$0xf0]  ;;  %v13779_v62 = vor.u32 %v15067_v17, %v13776_v7  ;;  %v13715_v7 = vor.u32 %v15051_v32, %v13712_v38  ;;  %v15008_v35 = vld [vmem:[%s19384_s3 + $0x9b4] sm:$0xf0]  ;;  %v15035_v10 = vld [vmem:[%s19384_s3 + $0xa94] sm:$0xf] }
0x1514   : > { %v13775_v36 = vor.u32 %v15071_v30, %v13774_v12  ;;  %v15012_v12 = vld [vmem:[%s19384_s3 + $0x9dc] sm:$0xf]  ;;  %v13614_v38 = vld [vmem:[%s19384_s3 + $0xa50] sm:$0xf] }
0x1515   : > { %v13560_v30 = vld [vmem:[%s19384_s3 + $0x9f8] sm:$0xf0] }
0x1516   : > { %8377 = vmatpush.bf16.msra.mxu1 %v13487_v46  ;;  %8403 = vmatpush.bf16.msra.mxu3 %v13491_v19  ;;  %v13358_v46 = vld [vmem:[%s19384_s3 + $0x850] sm:$0xf] }
0x1517   : > { %v14967_v19 = vld [vmem:[%s19384_s3 + $0x86c] sm:$0xf0] }
0x1518   : > { %v7467_v41 = vpop.f32.mrf.mxu2 }
0x1519   : > { %v13359_v41 = vor.u32 %v14967_v19, %v13358_v46  ;;  %v13563_v19 = vor.u32 %v15012_v12, %v13560_v30  ;;  %v15027_v30 = vld [vmem:[%s19384_s3 + $0xa54] sm:$0xf] }
0x151a   : > { %8378 = vmatpush.bf16.msra.mxu1 %v13455_v42  ;;  %8404 = vmatpush.bf16.msra.mxu3 %v13459_v52  ;;  %v7496_v26 = vpop.f32.mrf.mxu0  ;;  %v13360_v42 = vld [vmem:[%s19384_s3 + $0x870] sm:$0xf0] }
0x151b   : > { %v18066_v44 = vpack.c.bf16 %v7496_v26, %v7496_v26  ;;  %v15059_v52 = vld [vmem:[%s19384_s3 + $0xb54] sm:$0xf]  ;;  %v13363_v24 = vor.u32 %v14963_v25, %v13360_v42  ;;  %v15055_v26 = vld [vmem:[%s19384_s3 + $0xb2c] sm:$0xf0]  ;;  %v15004_v25 = vld [vmem:[%s19384_s3 + $0x99c] sm:$0xf] }
0x151c   : > { %v13747_v43 = vor.u32 %v15059_v52, %v13744_v15  ;;  %v13711_v16 = vor.u32 %v15055_v26, %v13710_v34  ;;  %v13528_v42 = vld [vmem:[%s19384_s3 + $0x9b8] sm:$0xf0]  ;;  %v13648_v34 = vld [vmem:[%s19384_s3 + $0xab0] sm:$0xf0] }
0x151d   : > { %8292 = vmatmul.bf16.vlgmr.msra.gmra.mxu2 %v18066_v44  ;;  %8318 = vmatmul.bf16.vlgmr.msrb.gmra.mxu0 %v18066_v44  ;;  %v13531_v59 = vor.u32 %v15004_v25, %v13528_v42  ;;  %v14996_v26 = vld [vmem:[%s19384_s3 + $0x95c] sm:$0xf]  ;;  %v13651_v32 = vor.u32 %v15035_v10, %v13648_v34  ;;  %v13430_v42 = vld [vmem:[%s19384_s3 + $0x8d8] sm:$0xf] }
0x151e   : > { %8331 = vmatmul.bf16.vlgmr.msrb.gmra.mxu1 %v18041_v49  ;;  %8357 = vmatmul.bf16.vlgmr.msrb.gmra.mxu3 %v18041_v49  ;;  %v15076_v10 = vld [vmem:[%s19384_s3 + $0xbdc] sm:$0xf] }
0x151f   : > { %8379 = vmatpush.bf16.msra.mxu1 %v13423_v18  ;;  %8388 = vmatpush.bf16.msra.mxu2 %v13807_v48  ;;  %v14955_v18 = vld [vmem:[%s19384_s3 + $0x814] sm:$0xf]  ;;  %v13816_v34 = vld [vmem:[%s19384_s3 + $0xbf8] sm:$0xf0] }
0x1520   : > { %8405 = vmatpush.bf16.msra.mxu3 %v13427_v0  ;;  %8414 = vmatpush.bf16.msrb.mxu0 %v13811_v50  ;;  %v13328_v48 = vld [vmem:[%s19384_s3 + $0x830] sm:$0xf0]  ;;  %v13558_v0 = vld [vmem:[%s19384_s3 + $0x9d8] sm:$0xf] }
0x1521   : > { %v15016_v50 = vld [vmem:[%s19384_s3 + $0x9f4] sm:$0xf0]  ;;  %v13331_v17 = vor.u32 %v14955_v18, %v13328_v48  ;;  %v13496_v18 = vld [vmem:[%s19384_s3 + $0x978] sm:$0xf0] }
0x1522   : > { %v7498_v28 = vpop.f32.mrf.mxu0  ;;  %v13559_v46 = vor.u32 %v15016_v50, %v13558_v0  ;;  %v15031_v0 = vld [vmem:[%s19384_s3 + $0xa6c] sm:$0xf0]  ;;  %v13499_v12 = vor.u32 %v14996_v26, %v13496_v18 }
0x1523   : > { %8380 = vmatpush.bf16.msra.mxu1 %v13391_v14  ;;  %8389 = vmatpush.bf16.msra.mxu2 %v13775_v36  ;;  %v13678_v14 = vld [vmem:[%s19384_s3 + $0xad0] sm:$0xf] }
0x1524   : > { %8406 = vmatpush.bf16.msra.mxu3 %v13395_v54  ;;  %8415 = vmatpush.bf16.msrb.mxu0 %v13779_v62  ;;  %v15047_v36 = vld [vmem:[%s19384_s3 + $0xaec] sm:$0xf0]  ;;  %v15043_v54 = vld [vmem:[%s19384_s3 + $0xad4] sm:$0xf] }
0x1525   : > { %v13680_v62 = vld [vmem:[%s19384_s3 + $0xaf0] sm:$0xf0]  ;;  %v13679_v52 = vor.u32 %v15047_v36, %v13678_v14  ;;  %v13646_v28 = vld [vmem:[%s19384_s3 + $0xa90] sm:$0xf]  ;;  %v13464_v14 = vld [vmem:[%s19384_s3 + $0x938] sm:$0xf0]  ;;  %v13615_v36 = vor.u32 %v15031_v0, %v13614_v38  ;;  %v13819_v0 = vor.u32 %v15076_v10, %v13816_v34 }
0x1526   : > { %v13683_v15 = vor.u32 %v15043_v54, %v13680_v62  ;;  %v15023_v54 = vld [vmem:[%s19384_s3 + $0xa2c] sm:$0xf0]  ;;  %v15019_v62 = vld [vmem:[%s19384_s3 + $0xa14] sm:$0xf]  ;;  %v15072_v38 = vld [vmem:[%s19384_s3 + $0xbb4] sm:$0xf0] }
0x1527   : > { %8381 = vmatpush.bf16.msra.mxu1 %v13359_v41  ;;  %8390 = vmatpush.bf16.msra.mxu2 %v13743_v27  ;;  %v15039_v41 = vld [vmem:[%s19384_s3 + $0xaac] sm:$0xf0]  ;;  %v13527_v27 = vor.u32 %v15008_v35, %v13526_v20  ;;  %v13584_v20 = vld [vmem:[%s19384_s3 + $0xa30] sm:$0xf0]  ;;  %v14960_v34 = vld [vmem:[%s19384_s3 + $0x834] sm:$0xf0] }
0x1528   : > { %8407 = vmatpush.bf16.msra.mxu3 %v13363_v24  ;;  %8416 = vmatpush.bf16.msrb.mxu0 %v13747_v43  ;;  %v13494_v24 = vld [vmem:[%s19384_s3 + $0x958] sm:$0xf]  ;;  %v13647_v48 = vor.u32 %v15039_v41, %v13646_v28  ;;  %v14980_v41 = vld [vmem:[%s19384_s3 + $0x8dc] sm:$0xf] }
0x1529   : > { %v15000_v43 = vld [vmem:[%s19384_s3 + $0x974] sm:$0xf0] }
0x152a   : > { %v13495_v50 = vor.u32 %v15000_v43, %v13494_v24  ;;  %v14984_v28 = vld [vmem:[%s19384_s3 + $0x8f4] sm:$0xf0]  ;;  %v13587_v24 = vor.u32 %v15019_v62, %v13584_v20  ;;  %v14964_v20 = vld [vmem:[%s19384_s3 + $0x85c] sm:$0xf] }
0x152b   : > { %8382 = vmatpush.bf16.msra.mxu1 %v13327_v22  ;;  %8391 = vmatpush.bf16.msra.mxu2 %v13711_v16  ;;  %v13616_v22 = vld [vmem:[%s19384_s3 + $0xa70] sm:$0xf0]  ;;  %v13462_v16 = vld [vmem:[%s19384_s3 + $0x918] sm:$0xf]  ;;  %v13431_v26 = vor.u32 %v14984_v28, %v13430_v42  ;;  %v13752_v42 = vld [vmem:[%s19384_s3 + $0xb78] sm:$0xf0] }
0x152c   : > { %8408 = vmatpush.bf16.msra.mxu3 %v13331_v17  ;;  %8417 = vmatpush.bf16.msrb.mxu0 %v13715_v7  ;;  %v14992_v17 = vld [vmem:[%s19384_s3 + $0x934] sm:$0xf0]  ;;  %v14988_v7 = vld [vmem:[%s19384_s3 + $0x91c] sm:$0xf] }
0x152d   : > { %8344 = vmatmul.bf16.vlgmr.msrb.gmra.mxu2 %v18066_v44  ;;  %8370 = vmatmul.bf16.vlgmr.msra.gmra.mxu0 %v18066_v44  ;;  %v13463_v35 = vor.u32 %v14992_v17, %v13462_v16  ;;  %v13467_v25 = vor.u32 %v14988_v7, %v13464_v14  ;;  %v13784_v16 = vld [vmem:[%s19384_s3 + $0xbb8] sm:$0xf0]  ;;  %v14968_v62 = vld [vmem:[%s19384_s3 + $0x874] sm:$0xf0] }
0x152e   : > { %8383 = vmatmul.bf16.vlgmr.msra.gmra.mxu1 %v18041_v49 }
0x152f   : > { %8427 = vmatpush.bf16.msrb.mxu1 %v13559_v46  ;;  %8392 = vmatpush.bf16.msra.mxu2 %v13679_v52  ;;  %v13582_v46 = vld [vmem:[%s19384_s3 + $0xa10] sm:$0xf]  ;;  %v13814_v52 = vld [vmem:[%s19384_s3 + $0xbd8] sm:$0xf] }
0x1530   : > { %8453 = vmatpush.bf16.msrb.mxu3 %v13563_v19  ;;  %8418 = vmatpush.bf16.msrb.mxu0 %v13683_v15  ;;  %v13619_v19 = vor.u32 %v15027_v30, %v13616_v22  ;;  %v15080_v15 = vld [vmem:[%s19384_s3 + $0xbf4] sm:$0xf0]  ;;  %v13400_v30 = vld [vmem:[%s19384_s3 + $0x8b8] sm:$0xf0] }
0x1531   : > { %8409 = vmatmul.bf16.vlgmr.msra.gmra.mxu3 %v18041_v49  ;;  %v13815_v43 = vor.u32 %v15080_v15, %v13814_v52  ;;  %v15068_v22 = vld [vmem:[%s19384_s3 + $0xb9c] sm:$0xf] }
0x1533   : > { %8428 = vmatpush.bf16.msrb.mxu1 %v13527_v27  ;;  %8393 = vmatpush.bf16.msra.mxu2 %v13647_v48  ;;  %v13432_v27 = vld [vmem:[%s19384_s3 + $0x8f8] sm:$0xf0]  ;;  %v13398_v48 = vld [vmem:[%s19384_s3 + $0x898] sm:$0xf] }
0x1534   : > { %8454 = vmatpush.bf16.msrb.mxu3 %v13531_v59  ;;  %8419 = vmatpush.bf16.msrb.mxu0 %v13651_v32  ;;  %v13583_v59 = vor.u32 %v15023_v54, %v13582_v46  ;;  %v13435_v18 = vor.u32 %v14980_v41, %v13432_v27  ;;  %v13782_v32 = vld [vmem:[%s19384_s3 + $0xb98] sm:$0xf]  ;;  %v13787_v54 = vor.u32 %v15068_v22, %v13784_v16  ;;  %v13688_v22 = vld [vmem:[%s19384_s3 + $0xaf8] sm:$0xf0] }
0x1535   : > { %v13783_v17 = vor.u32 %v15072_v38, %v13782_v32  ;;  %v13750_v46 = vld [vmem:[%s19384_s3 + $0xb58] sm:$0xf] }
0x1536   : > { %v13334_v41 = vld [vmem:[%s19384_s3 + $0x818] sm:$0xf] }
0x1537   : > { %8429 = vmatpush.bf16.msrb.mxu1 %v13495_v50  ;;  %8394 = vmatpush.bf16.msra.mxu2 %v13615_v36  ;;  %v14976_v50 = vld [vmem:[%s19384_s3 + $0x8b4] sm:$0xf0]  ;;  %v13335_v32 = vor.u32 %v14960_v34, %v13334_v41  ;;  %v15141_v34 = vld [vmem:[%s19384_s3 + $0xddc] sm:$0xf0] }
0x1538   : > { %8455 = vmatpush.bf16.msrb.mxu3 %v13499_v12  ;;  %8420 = vmatpush.bf16.msrb.mxu0 %v13619_v19  ;;  %v14972_v12 = vld [vmem:[%s19384_s3 + $0x89c] sm:$0xf]  ;;  %v13399_v7 = vor.u32 %v14976_v50, %v13398_v48  ;;  %v13366_v36 = vld [vmem:[%s19384_s3 + $0x858] sm:$0xf] }
0x1539   : > { %v13403_v14 = vor.u32 %v14972_v12, %v13400_v30  ;;  %v15064_v19 = vld [vmem:[%s19384_s3 + $0xb74] sm:$0xf0]  ;;  %v13367_v15 = vor.u32 %v14968_v62, %v13366_v36  ;;  %v15044_v30 = vld [vmem:[%s19384_s3 + $0xadc] sm:$0xf] }
0x153a   : > { %v13751_v52 = vor.u32 %v15064_v19, %v13750_v46  ;;  %v13718_v27 = vld [vmem:[%s19384_s3 + $0xb18] sm:$0xf]  ;;  %v15036_v36 = vld [vmem:[%s19384_s3 + $0xa9c] sm:$0xf] }
0x153b   : > { %8430 = vmatpush.bf16.msrb.mxu1 %v13463_v35  ;;  %8395 = vmatpush.bf16.msra.mxu2 %v13583_v59  ;;  %v13368_v35 = vld [vmem:[%s19384_s3 + $0x878] sm:$0xf0]  ;;  %v15056_v59 = vld [vmem:[%s19384_s3 + $0xb34] sm:$0xf0] }
0x153c   : > { %8456 = vmatpush.bf16.msrb.mxu3 %v13467_v25  ;;  %8421 = vmatpush.bf16.msrb.mxu0 %v13587_v24  ;;  %v15060_v25 = vld [vmem:[%s19384_s3 + $0xb5c] sm:$0xf]  ;;  %v13371_v28 = vor.u32 %v14964_v20, %v13368_v35  ;;  %v13719_v48 = vor.u32 %v15056_v59, %v13718_v27  ;;  %v13686_v50 = vld [vmem:[%s19384_s3 + $0xad8] sm:$0xf]  ;;  %v13820_v59 = vld [vmem:[%s19385_s0 + $0xc] sm:$0xf] }
0x153d   : > { %v13755_v10 = vor.u32 %v15060_v25, %v13752_v42  ;;  %v14956_v24 = vld [vmem:[%s19384_s3 + $0x81c] sm:$0xf]  ;;  %v15048_v12 = vld [vmem:[%s19384_s3 + $0xaf4] sm:$0xf0]  ;;  %s19387_s0 = smov 1  }
0x153e   : > { %8396 = vmatmul.bf16.vlgmr.msra.gmra.mxu2 %v18066_v44  ;;  %v13687_v16 = vor.u32 %v15048_v12, %v13686_v50  ;;  %v13656_v46 = vld [vmem:[%s19384_s3 + $0xab8] sm:$0xf0]  ;;  %v13622_v62 = vld [vmem:[%s19384_s3 + $0xa58] sm:$0xf]  ;;  %v15125_v50 = vld [vmem:[%s19384_s3 + $0xd5c] sm:$0xf0] }
0x153f   : > { %8440 = vmatpush.bf16.msrb.mxu2 %v13815_v43  ;;  %8431 = vmatpush.bf16.msrb.mxu1 %v13431_v26  ;;  %v13336_v43 = vld [vmem:[%s19384_s3 + $0x838] sm:$0xf0]  ;;  %v15032_v20 = vld [vmem:[%s19384_s3 + $0xa74] sm:$0xf0] }
0x1540   : > { %8457 = vmatpush.bf16.msrb.mxu3 %v13435_v18  ;;  %8466 = vmatpush.bf16.msra.mxu0 %v13819_v0  ;;  %v15052_v26 = vld [vmem:[%s19384_s3 + $0xb1c] sm:$0xf]  ;;  %v13339_v38 = vor.u32 %v14956_v24, %v13336_v43  ;;  %v13623_v25 = vor.u32 %v15032_v20, %v13622_v62  ;;  %v15137_v24 = vld [vmem:[%s19384_s3 + $0xdc4] sm:$0xf]  ;;  %v14049_v20 = vld [vmem:[%s19384_s3 + $0xcc0] sm:$0xf] }
0x1541   : > { %8422 = vmatmul.bf16.vlgmr.msrb.gmra.mxu0 %v18066_v44  ;;  %v13720_v18 = vld [vmem:[%s19384_s3 + $0xb38] sm:$0xf0] }
0x1542   : > { %v13723_v0 = vor.u32 %v15052_v26, %v13720_v18  ;;  %v13624_v35 = vld [vmem:[%s19384_s3 + $0xa78] sm:$0xf0]  ;;  %v14179_v26 = vld [vmem:[%s19384_s3 + $0xde0] sm:$0xf0] }
0x1543   : > { %8441 = vmatpush.bf16.msrb.mxu2 %v13783_v17  ;;  %8432 = vmatpush.bf16.msrb.mxu1 %v13399_v7  ;;  %v13691_v17 = vor.u32 %v15044_v30, %v13688_v22  ;;  %v13654_v7 = vld [vmem:[%s19384_s3 + $0xa98] sm:$0xf]  ;;  %v14182_v18 = vor.u32 %v15137_v24, %v14179_v26  ;;  %v15121_v30 = vld [vmem:[%s19384_s3 + $0xd44] sm:$0xf]  ;;  %v15205_v24 = vld [vmem:[%s19384_s3 + $0xfdc] sm:$0xf0] }
0x1544   : > { %8458 = vmatpush.bf16.msrb.mxu3 %v13403_v14  ;;  %8467 = vmatpush.bf16.msra.mxu0 %v13787_v54  ;;  %v15040_v14 = vld [vmem:[%s19384_s3 + $0xab4] sm:$0xf0]  ;;  %v13659_v54 = vor.u32 %v15036_v36, %v13656_v46  ;;  %v14115_v22 = vld [vmem:[%s19384_s3 + $0xd60] sm:$0xf0]  ;;  %v15117_v36 = vld [vmem:[%s19384_s3 + $0xd1c] sm:$0xf0] }
0x1545   : > { %v13655_v19 = vor.u32 %v15040_v14, %v13654_v7  ;;  %v14081_v14 = vld [vmem:[%s19384_s3 + $0xd00] sm:$0xf]  ;;  %v15113_v46 = vld [vmem:[%s19384_s3 + $0xd04] sm:$0xf] }
0x1547   : > { %8442 = vmatpush.bf16.msrb.mxu2 %v13751_v52  ;;  %8433 = vmatpush.bf16.msrb.mxu1 %v13367_v15  ;;  %v13590_v52 = vld [vmem:[%s19384_s3 + $0xa18] sm:$0xf] }
0x1548   : > { %8459 = vmatpush.bf16.msrb.mxu3 %v13371_v28  ;;  %8468 = vmatpush.bf16.msra.mxu0 %v13755_v10  ;;  %v15024_v15 = vld [vmem:[%s19384_s3 + $0xa34] sm:$0xf0]  ;;  %v15020_v28 = vld [vmem:[%s19384_s3 + $0xa1c] sm:$0xf]  ;;  %v14177_v10 = vld [vmem:[%s19384_s3 + $0xdc0] sm:$0xf] }
0x1549   : > { %v13591_v41 = vor.u32 %v15024_v15, %v13590_v52  ;;  %v14178_v43 = vor.u32 %v15141_v34, %v14177_v10  ;;  %v14019_v10 = vld [vmem:[%s19384_s3 + $0xca0] sm:$0xf0]  ;;  %v14433_v34 = vld [vmem:[%s19384_s3 + $0xfc0] sm:$0xf] }
0x154a   : > { %v14434_v26 = vor.u32 %v15205_v24, %v14433_v34  ;;  %v15189_v24 = vld [vmem:[%s19384_s3 + $0xf5c] sm:$0xf0] }
0x154b   : > { %8443 = vmatpush.bf16.msrb.mxu2 %v13719_v48  ;;  %8434 = vmatpush.bf16.msrb.mxu1 %v13335_v32  ;;  %v15133_v48 = vld [vmem:[%s19384_s3 + $0xd9c] sm:$0xf0]  ;;  %v15129_v32 = vld [vmem:[%s19384_s3 + $0xd84] sm:$0xf] }
0x154c   : > { %8460 = vmatpush.bf16.msrb.mxu3 %v13339_v38  ;;  %8469 = vmatpush.bf16.msra.mxu0 %v13723_v0  ;;  %v14113_v0 = vld [vmem:[%s19384_s3 + $0xd40] sm:$0xf] }
0x154e   : > { %8435 = vmatmul.bf16.vlgmr.msrb.gmra.mxu1 %v18041_v49 }
0x154f   : > { %8499 = vmatpush.bf16.msra.mxu1 %v17267_v55  ;;  %8461 = vmatmul.bf16.vlgmr.msrb.gmra.mxu3 %v18041_v49  ;;  %v15028_v55 = vld [vmem:[%s19384_s3 + $0xa5c] sm:$0xf] }
0x1550   : > { %8444 = vmatpush.bf16.msrb.mxu2 %v13687_v16  ;;  %8470 = vmatpush.bf16.msra.mxu0 %v13691_v17  ;;  %v13627_v42 = vor.u32 %v15028_v55, %v13624_v35  ;;  %v13592_v49 = vld [vmem:[%s19384_s3 + $0xa38] sm:$0xf0]  ;;  %v14114_v16 = vor.u32 %v15125_v50, %v14113_v0  ;;  %v14118_v17 = vor.u32 %v15121_v30, %v14115_v22  ;;  %v15109_v55 = vld [vmem:[%s19384_s3 + $0xcdc] sm:$0xf0]  ;;  %v15105_v35 = vld [vmem:[%s19384_s3 + $0xcc4] sm:$0xf] }
0x1551   : > { %v13595_v27 = vor.u32 %v15020_v28, %v13592_v49  ;;  %9289 = vmatpush.bf16.msra.mxu3 %v14178_v43  ;;  %v14017_v49 = vld [vmem:[%s19384_s3 + $0xc80] sm:$0xf]  ;;  %v13987_v0 = vld [vmem:[%s19384_s3 + $0xc60] sm:$0xf0] }
0x1553   : > { %9315 = vmatpush.bf16.msrb.mxu1 %v14182_v18  ;;  %v15201_v18 = vld [vmem:[%s19384_s3 + $0xfc4] sm:$0xf] }
0x1554   : > { %8445 = vmatpush.bf16.msrb.mxu2 %v13655_v19  ;;  %8471 = vmatpush.bf16.msra.mxu0 %v13659_v54  ;;  %v14082_v19 = vor.u32 %v15117_v36, %v14081_v14  ;;  %v14083_v54 = vld [vmem:[%s19384_s3 + $0xd20] sm:$0xf0] }
0x1555   : > { %v14086_v62 = vor.u32 %v15113_v46, %v14083_v54  ;;  %v15193_v14 = vld [vmem:[%s19384_s3 + $0xf84] sm:$0xf] }
0x1556   : > { %v14403_v54 = vld [vmem:[%s19384_s3 + $0xfa0] sm:$0xf0] }
0x1558   : > { %8446 = vmatpush.bf16.msrb.mxu2 %v13623_v25  ;;  %8472 = vmatpush.bf16.msra.mxu0 %v13627_v42  ;;  %v14050_v25 = vor.u32 %v15109_v55, %v14049_v20  ;;  %v14051_v42 = vld [vmem:[%s19384_s3 + $0xce0] sm:$0xf0]  ;;  %v13953_v20 = vld [vmem:[%s19384_s3 + $0xc00] sm:$0xf] }
0x1559   : > { %v14054_v15 = vor.u32 %v15105_v35, %v14051_v42  ;;  %v15085_v55 = vld [vmem:[%s19384_s3 + $0xc1c] sm:$0xf0]  ;;  %v15081_v35 = vld [vmem:[%s19384_s3 + $0xc04] sm:$0xf] }
0x155a   : > { %v13954_v42 = vor.u32 %v15085_v55, %v13953_v20  ;;  %v14121_v20 = vld [vmem:[%s19384_s3 + $0xd48] sm:$0xf] }
0x155b   : > { %v15126_v55 = vld [vmem:[%s19384_s3 + $0xd64] sm:$0xf0] }
0x155c   : > { %8447 = vmatpush.bf16.msrb.mxu2 %v13591_v41  ;;  %8473 = vmatpush.bf16.msra.mxu0 %v13595_v27  ;;  %v15101_v41 = vld [vmem:[%s19384_s3 + $0xc9c] sm:$0xf0]  ;;  %v15097_v27 = vld [vmem:[%s19384_s3 + $0xc84] sm:$0xf] }
0x155d   : > { %v14022_v43 = vor.u32 %v15097_v27, %v14019_v10  ;;  %v15138_v27 = vld [vmem:[%s19384_s3 + $0xdcc] sm:$0xf]  ;;  %v14369_v10 = vld [vmem:[%s19384_s3 + $0xf40] sm:$0xf] }
0x155e   : > { %13821 = vmatmul.msk.bf16.vlgmr.msra.gmra.mxu1 %vm3423_vm8, %v13820_v59 }
0x155f   : > { %8448 = vmatmul.bf16.vlgmr.msrb.gmra.mxu2 %v18066_v44  ;;  %8474 = vmatmul.bf16.vlgmr.msra.gmra.mxu0 %v18066_v44  ;;  %v14147_v44 = vld [vmem:[%s19384_s3 + $0xda0] sm:$0xf0] }
0x1560   : > { %8512 = vmatpush.bf16.msra.mxu2 %v17292_v60  ;;  %v14145_v60 = vld [vmem:[%s19384_s3 + $0xd80] sm:$0xf]  ;;  %v14150_v12 = vor.u32 %v15129_v32, %v14147_v44  ;;  %v15089_v44 = vld [vmem:[%s19384_s3 + $0xc44] sm:$0xf]  ;;  %9302 = vmatpush.bf16.msrb.mxu0 %v14434_v26 }
0x1561   : > { %v14146_v38 = vor.u32 %v15133_v48, %v14145_v60  ;;  %v14435_v60 = vld [vmem:[%s19384_s3 + $0xfe0] sm:$0xf0]  ;;  %v13985_v48 = vld [vmem:[%s19384_s3 + $0xc40] sm:$0xf]  ;;  %v13990_v30 = vor.u32 %v15089_v44, %v13987_v0  ;;  %v15134_v44 = vld [vmem:[%s19384_s3 + $0xda4] sm:$0xf0] }
0x1562   : > { %9316 = vmatpush.bf16.msrb.mxu1 %v14150_v12  ;;  %v14438_v32 = vor.u32 %v15201_v18, %v14435_v60  ;;  %v14370_v18 = vor.u32 %v15189_v24, %v14369_v10  ;;  %v15130_v0 = vld [vmem:[%s19384_s3 + $0xd8c] sm:$0xf]  ;;  %v14089_v24 = vld [vmem:[%s19384_s3 + $0xd08] sm:$0xf] }
0x1563   : > { %9290 = vmatpush.bf16.msra.mxu3 %v14146_v38  ;;  %v15093_v38 = vld [vmem:[%s19384_s3 + $0xc5c] sm:$0xf0] }
0x1564   : > { %v13986_v12 = vor.u32 %v15093_v38, %v13985_v48  ;;  %9328 = vmatpush.bf16.msrb.mxu2 %v14438_v32  ;;  %v14153_v38 = vld [vmem:[%s19384_s3 + $0xd88] sm:$0xf] }
0x1566   : > { %9317 = vmatpush.bf16.msrb.mxu1 %v14118_v17  ;;  %v15197_v17 = vld [vmem:[%s19384_s3 + $0xf9c] sm:$0xf0] }
0x1567   : > { %9291 = vmatpush.bf16.msra.mxu3 %v14114_v16  ;;  %v14401_v16 = vld [vmem:[%s19384_s3 + $0xf80] sm:$0xf] }
0x156a   : > { %9318 = vmatpush.bf16.msrb.mxu1 %v14086_v62  ;;  %v14406_v62 = vor.u32 %v15193_v14, %v14403_v54  ;;  %v14339_v54 = vld [vmem:[%s19384_s3 + $0xf20] sm:$0xf0] }
0x156b   : > { %9292 = vmatpush.bf16.msra.mxu3 %v14082_v19  ;;  %v14402_v19 = vor.u32 %v15197_v17, %v14401_v16  ;;  %v15181_v16 = vld [vmem:[%s19384_s3 + $0xf1c] sm:$0xf0] }
0x156c   : > { %9329 = vmatpush.bf16.msrb.mxu2 %v14406_v62 }
0x156d   : > { %9303 = vmatpush.bf16.msrb.mxu0 %v14402_v19  ;;  %v15177_v19 = vld [vmem:[%s19384_s3 + $0xf04] sm:$0xf] }
0x156e   : > { %9319 = vmatpush.bf16.msrb.mxu1 %v14054_v15  ;;  %v14185_v15 = vld [vmem:[%s19384_s3 + $0xdc8] sm:$0xf]  ;;  %v14342_v62 = vor.u32 %v15177_v19, %v14339_v54 }
0x156f   : > { %13822 = vmatmul.msk.bf16.vlgmr.msra.gmra.mxu2 %vm3423_vm8, %v13820_v59  ;;  %9293 = vmatpush.bf16.msra.mxu3 %v14050_v25  ;;  %v14018_v59 = vor.u32 %v15101_v41, %v14017_v49 }
0x1571   : > { %9304 = vmatpush.bf16.msrb.mxu0 %v14370_v18  ;;  %v14091_v18 = vld [vmem:[%s19384_s3 + $0xd28] sm:$0xf0] }
0x1572   : > { %9320 = vmatpush.bf16.msrb.mxu1 %v14022_v43  ;;  %v14371_v43 = vld [vmem:[%s19384_s3 + $0xf60] sm:$0xf0] }
0x1573   : > { %9294 = vmatpush.bf16.msra.mxu3 %v14018_v59  ;;  %v14187_v59 = vld [vmem:[%s19384_s3 + $0xde8] sm:$0xf0] }
0x1574   : > { %v14190_v34 = vor.u32 %v15138_v27, %v14187_v59  ;;  %v14307_v27 = vld [vmem:[%s19384_s3 + $0xee0] sm:$0xf0] }
0x1576   : > { %9321 = vmatpush.bf16.msrb.mxu1 %v13990_v30  ;;  %v14155_v30 = vld [vmem:[%s19384_s3 + $0xda8] sm:$0xf0] }
0x1577   : > { %9295 = vmatpush.bf16.msra.mxu3 %v13986_v12  ;;  %v14154_v12 = vor.u32 %v15134_v44, %v14153_v38  ;;  %v14158_v14 = vor.u32 %v15130_v0, %v14155_v30 }
0x157b   : > { %9296 = vmatpush.bf16.msra.mxu3 %v13954_v42  ;;  %v14122_v42 = vor.u32 %v15126_v55, %v14121_v20  ;;  %v15157_v20 = vld [vmem:[%s19384_s3 + $0xe5c] sm:$0xf0] }
0x158a   : > { %v18203_v7 = vpop.f32.mrf.mxu1 }
0x1590   : > { %v8306_v52 = vpop.f32.mrf.mxu3 }
0x1592   : > { %v8282_v28 = vpop.f32.mrf.mxu1 }
0x1593   : > { %v15142_v28 = vld [vmem:[%s19384_s3 + $0xde4] sm:$0xf0] }
0x1594   : > { %v14186_v41 = vor.u32 %v15142_v28, %v14185_v15  ;;  %v15173_v15 = vld [vmem:[%s19384_s3 + $0xedc] sm:$0xf0] }
0x1596   : > { %9341 = vmatpush.bf16.msrb.mxu3 %v14186_v41  ;;  %v15169_v41 = vld [vmem:[%s19384_s3 + $0xec4] sm:$0xf] }
0x1597   : > { %v14310_v59 = vor.u32 %v15169_v41, %v14307_v27 }
0x1598   : > { %v8308_v50 = vpop.f32.mrf.mxu3 }
0x159a   : > { %v8319_v22 = vpop.f32.mrf.mxu0  ;;  %9342 = vmatpush.bf16.msrb.mxu3 %v14154_v12  ;;  %v14275_v12 = vld [vmem:[%s19384_s3 + $0xea0] sm:$0xf0] }
0x159b   : > { %v8320_v36 = vadd.f32 %v8319_v22, %v8306_v52  ;;  %v18228_v46 = vpop.f32.mrf.mxu1  ;;  %v13955_v52 = vld [vmem:[%s19384_s3 + $0xc20] sm:$0xf0]  ;;  %v14337_v22 = vld [vmem:[%s19384_s3 + $0xf00] sm:$0xf] }
0x159c   : > { %v13958_v49 = vor.u32 %v15081_v35, %v13955_v52  ;;  %v15122_v35 = vld [vmem:[%s19384_s3 + $0xd4c] sm:$0xf] }
0x159d   : > { %v18235_v25 = vadd.f32 %v8320_v36, %v17890_v61  ;;  %v15185_v61 = vld [vmem:[%s19384_s3 + $0xf44] sm:$0xf]  ;;  %v14338_v36 = vor.u32 %v15181_v16, %v14337_v22  ;;  %v14123_v52 = vld [vmem:[%s19384_s3 + $0xd68] sm:$0xf0] }
0x159e   : > { %9322 = vmatpush.bf16.msrb.mxu1 %v13958_v49  ;;  %v14374_v60 = vor.u32 %v15185_v61, %v14371_v43  ;;  %v14126_v28 = vor.u32 %v15122_v35, %v14123_v52  ;;  %9343 = vmatpush.bf16.msrb.mxu3 %v14122_v42  ;;  %v15118_v61 = vld [vmem:[%s19384_s3 + $0xd24] sm:$0xf0]  ;;  %v15114_v43 = vld [vmem:[%s19384_s3 + $0xd0c] sm:$0xf]  ;;  %v15153_v42 = vld [vmem:[%s19384_s3 + $0xe44] sm:$0xf] }
0x159f   : > { %9305 = vmatpush.bf16.msrb.mxu0 %v14338_v36  ;;  %v14094_v44 = vor.u32 %v15114_v43, %v14091_v18  ;;  %v15106_v36 = vld [vmem:[%s19384_s3 + $0xccc] sm:$0xf]  ;;  %v14243_v52 = vld [vmem:[%s19384_s3 + $0xe60] sm:$0xf0] }
0x15a0   : > { %v8293_v26 = vpop.f32.mrf.mxu2  ;;  %9330 = vmatpush.bf16.msrb.mxu2 %v14374_v60  ;;  %v14273_v60 = vld [vmem:[%s19384_s3 + $0xe80] sm:$0xf]  ;;  %v15145_v18 = vld [vmem:[%s19384_s3 + $0xe04] sm:$0xf] }
0x15a1   : > { %v8294_v48 = vadd.f32 %v8293_v26, %v18203_v7  ;;  %v8358_v32 = vpop.f32.mrf.mxu3  ;;  %v14090_v26 = vor.u32 %v15118_v61, %v14089_v24 }
0x15a2   : > { %9367 = vmatpush.bf16.msra.mxu1 %v14190_v34  ;;  %v8321_v50 = vpop.f32.mrf.mxu0 }
0x15a3   : > { %v18254_v7 = vadd.f32 %v8294_v48, %v17880_v13  ;;  %v8334_v17 = vpop.f32.mrf.mxu1  ;;  %v14305_v13 = vld [vmem:[%s19384_s3 + $0xec0] sm:$0xf]  ;;  %v15161_v50 = vld [vmem:[%s19384_s3 + $0xe84] sm:$0xf]  ;;  %9344 = vmatpush.bf16.msrb.mxu3 %v14090_v26 }
0x15a4   : > { %9331 = vmatpush.bf16.msrb.mxu2 %v14342_v62  ;;  %v14306_v49 = vor.u32 %v15173_v15, %v14305_v13  ;;  %v15165_v48 = vld [vmem:[%s19384_s3 + $0xe9c] sm:$0xf0]  ;;  %v14278_v16 = vor.u32 %v15161_v50, %v14275_v12  ;;  %v14057_v17 = vld [vmem:[%s19384_s3 + $0xcc8] sm:$0xf]  ;;  %v14246_v13 = vor.u32 %v15153_v42, %v14243_v52  ;;  %v15202_v50 = vld [vmem:[%s19384_s3 + $0xfcc] sm:$0xf] }
0x15a5   : > { %v14274_v0 = vor.u32 %v15165_v48, %v14273_v60  ;;  %v14241_v62 = vld [vmem:[%s19384_s3 + $0xe40] sm:$0xf]  ;;  %v14211_v60 = vld [vmem:[%s19384_s3 + $0xe20] sm:$0xf0]  ;;  %v14441_v48 = vld [vmem:[%s19384_s3 + $0xfc8] sm:$0xf] }
0x15a6   : > { %9368 = vmatpush.bf16.msra.mxu1 %v14158_v14  ;;  %9306 = vmatpush.bf16.msrb.mxu0 %v14306_v49  ;;  %v15110_v14 = vld [vmem:[%s19384_s3 + $0xce4] sm:$0xf0]  ;;  %v14242_v35 = vor.u32 %v15157_v20, %v14241_v62  ;;  %v15098_v49 = vld [vmem:[%s19384_s3 + $0xc8c] sm:$0xf] }
0x15a7   : > { %v14058_v54 = vor.u32 %v15110_v14, %v14057_v17  ;;  %v14443_v12 = vld [vmem:[%s19384_s3 + $0xfe8] sm:$0xf0]  ;;  %v13993_v17 = vld [vmem:[%s19384_s3 + $0xc48] sm:$0xf] }
0x15a8   : > { %v8295_v10 = vpop.f32.mrf.mxu2  ;;  %9332 = vmatpush.bf16.msrb.mxu2 %v14310_v59  ;;  %v14027_v59 = vld [vmem:[%s19384_s3 + $0xca8] sm:$0xf0]  ;;  %v15094_v14 = vld [vmem:[%s19384_s3 + $0xc64] sm:$0xf0] }
0x15a9   : > { %v8360_v34 = vpop.f32.mrf.mxu3  ;;  %9345 = vmatpush.bf16.msrb.mxu3 %v14058_v54  ;;  %v14209_v10 = vld [vmem:[%s19384_s3 + $0xe00] sm:$0xf]  ;;  %v14030_v43 = vor.u32 %v15098_v49, %v14027_v59  ;;  %v13995_v54 = vld [vmem:[%s19384_s3 + $0xc68] sm:$0xf0]  ;;  %v14409_v62 = vld [vmem:[%s19384_s3 + $0xf88] sm:$0xf] }
0x15aa   : > { %9369 = vmatpush.bf16.msra.mxu1 %v14126_v28  ;;  %v8371_v38 = vpop.f32.mrf.mxu0  ;;  %9307 = vmatpush.bf16.msrb.mxu0 %v14274_v0  ;;  %v15102_v28 = vld [vmem:[%s19384_s3 + $0xca4] sm:$0xf0]  ;;  %v15149_v34 = vld [vmem:[%s19384_s3 + $0xe1c] sm:$0xf0]  ;;  %v14411_v42 = vld [vmem:[%s19384_s3 + $0xfa8] sm:$0xf0] }
0x15ab   : > { %v8372_v30 = vadd.f32 %v8371_v38, %v8358_v32  ;;  %v18274_v22 = vpop.f32.mrf.mxu1  ;;  %v14059_v32 = vld [vmem:[%s19384_s3 + $0xce8] sm:$0xf0]  ;;  %v14210_v26 = vor.u32 %v15149_v34, %v14209_v10  ;;  %v15206_v0 = vld [vmem:[%s19384_s3 + $0xfe4] sm:$0xf0] }
0x15ac   : > { %9333 = vmatpush.bf16.msrb.mxu2 %v14278_v16  ;;  %v14062_v55 = vor.u32 %v15106_v36, %v14059_v32  ;;  %v14446_v16 = vor.u32 %v15202_v50, %v14443_v12  ;;  %v15090_v36 = vld [vmem:[%s19384_s3 + $0xc4c] sm:$0xf]  ;;  %v15198_v20 = vld [vmem:[%s19384_s3 + $0xfa4] sm:$0xf0] }
0x15ad   : > { %v18280_v19 = vadd.f32 %v8372_v30, %v17958_v1  ;;  %v14025_v1 = vld [vmem:[%s19384_s3 + $0xc88] sm:$0xf]  ;;  %v14442_v30 = vor.u32 %v15206_v0, %v14441_v48  ;;  %v13998_v32 = vor.u32 %v15090_v36, %v13995_v54  ;;  %v15178_v12 = vld [vmem:[%s19384_s3 + $0xf0c] sm:$0xf] }
0x15ae   : > { %9370 = vmatpush.bf16.msra.mxu1 %v14094_v44  ;;  %9308 = vmatpush.bf16.msrb.mxu0 %v14242_v35  ;;  %v14026_v27 = vor.u32 %v15102_v28, %v14025_v1  ;;  %v14214_v44 = vor.u32 %v15145_v18, %v14211_v60  ;;  %v14410_v35 = vor.u32 %v15198_v20, %v14409_v62  ;;  %v15086_v1 = vld [vmem:[%s19384_s3 + $0xc24] sm:$0xf0]  ;;  %v15082_v28 = vld [vmem:[%s19384_s3 + $0xc0c] sm:$0xf] }
0x15af   : > { %v14377_v10 = vld [vmem:[%s19384_s3 + $0xf48] sm:$0xf]  ;;  %v14315_v62 = vld [vmem:[%s19384_s3 + $0xee8] sm:$0xf0] }
0x15b0   : > { %v8345_v15 = vpop.f32.mrf.mxu2  ;;  %9334 = vmatpush.bf16.msrb.mxu2 %v14246_v13  ;;  %9346 = vmatpush.bf16.msrb.mxu3 %v14026_v27  ;;  %v15182_v0 = vld [vmem:[%s19384_s3 + $0xf24] sm:$0xf0] }
0x15b1   : > { %v8346_v41 = vadd.f32 %v8345_v15, %v18228_v46  ;;  %v13961_v15 = vld [vmem:[%s19384_s3 + $0xc08] sm:$0xf] }
0x15b2   : > { %9371 = vmatpush.bf16.msra.mxu1 %v14062_v55  ;;  %v8373_v61 = vpop.f32.mrf.mxu0  ;;  %9309 = vmatpush.bf16.msrb.mxu0 %v14210_v26  ;;  %v15194_v55 = vld [vmem:[%s19384_s3 + $0xf8c] sm:$0xf]  ;;  %v13962_v49 = vor.u32 %v15086_v1, %v13961_v15  ;;  %v14249_v1 = vld [vmem:[%s19384_s3 + $0xe48] sm:$0xf] }
0x15b3   : > { %v18298_v46 = vadd.f32 %v8346_v41, %v17942_v63  ;;  %v8386_v38 = vpop.f32.mrf.mxu1  ;;  %v13994_v63 = vor.u32 %v15094_v14, %v13993_v17  ;;  %v14414_v13 = vor.u32 %v15194_v55, %v14411_v42  ;;  %v13963_v41 = vld [vmem:[%s19384_s3 + $0xc28] sm:$0xf0]  ;;  %v15190_v61 = vld [vmem:[%s19384_s3 + $0xf64] sm:$0xf0] }
0x15b4   : > { %v8410_v24 = vpop.f32.mrf.mxu3  ;;  %9335 = vmatpush.bf16.msrb.mxu2 %v14214_v44  ;;  %v13966_v59 = vor.u32 %v15082_v28, %v13963_v41  ;;  %v14379_v26 = vld [vmem:[%s19384_s3 + $0xf68] sm:$0xf0]  ;;  %v14378_v60 = vor.u32 %v15190_v61, %v14377_v10  ;;  %v14345_v44 = vld [vmem:[%s19384_s3 + $0xf08] sm:$0xf] }
0x15b5   : > { %9347 = vmatpush.bf16.msrb.mxu3 %v13994_v63  ;;  %v14346_v50 = vor.u32 %v15182_v0, %v14345_v44  ;;  %v15174_v14 = vld [vmem:[%s19384_s3 + $0xee4] sm:$0xf0]  ;;  %v15162_v42 = vld [vmem:[%s19384_s3 + $0xe8c] sm:$0xf]  ;;  %v14193_v44 = vld [vmem:[%s19384_s3 + $0xdd0] sm:$0xf] }
0x15b6   : > { %9372 = vmatpush.bf16.msra.mxu1 %v14030_v43  ;;  %9354 = vmatpush.bf16.msra.mxu0 %v14442_v30  ;;  %v15186_v43 = vld [vmem:[%s19384_s3 + $0xf4c] sm:$0xf]  ;;  %v15166_v55 = vld [vmem:[%s19384_s3 + $0xea4] sm:$0xf0]  ;;  %v15143_v0 = vld [vmem:[%s19384_s3 + $0xdec] sm:$0xf0] }
0x15b7   : > { %v14382_v48 = vor.u32 %v15186_v43, %v14379_v26  ;;  %v14347_v30 = vld [vmem:[%s19384_s3 + $0xf28] sm:$0xf0]  ;;  %v15158_v28 = vld [vmem:[%s19384_s3 + $0xe64] sm:$0xf0] }
0x15b8   : > { %9380 = vmatpush.bf16.msra.mxu2 %v14446_v16  ;;  %v8347_v52 = vpop.f32.mrf.mxu2  ;;  %v15154_v41 = vld [vmem:[%s19384_s3 + $0xe4c] sm:$0xf]  ;;  %v15150_v61 = vld [vmem:[%s19384_s3 + $0xe24] sm:$0xf0] }
0x15b9   : > { %9348 = vmatpush.bf16.msrb.mxu3 %v13962_v49  ;;  %v14283_v52 = vld [vmem:[%s19384_s3 + $0xea8] sm:$0xf0]  ;;  %v14250_v49 = vor.u32 %v15158_v28, %v14249_v1 }
0x15ba   : > { %9373 = vmatpush.bf16.msra.mxu1 %v13998_v32  ;;  %9355 = vmatpush.bf16.msra.mxu0 %v14410_v35  ;;  %v15170_v32 = vld [vmem:[%s19384_s3 + $0xecc] sm:$0xf]  ;;  %v14286_v15 = vor.u32 %v15162_v42, %v14283_v52  ;;  %v14129_v42 = vld [vmem:[%s19384_s3 + $0xd50] sm:$0xf] }
0x15bb   : > { %v14318_v20 = vor.u32 %v15170_v32, %v14315_v62  ;;  %v15146_v26 = vld [vmem:[%s19384_s3 + $0xe0c] sm:$0xf]  ;;  %v15131_v32 = vld [vmem:[%s19384_s3 + $0xd94] sm:$0xf]  ;;  %v15127_v52 = vld [vmem:[%s19384_s3 + $0xd6c] sm:$0xf0] }
0x15bc   : > { %v8412_v27 = vpop.f32.mrf.mxu3  ;;  %9381 = vmatpush.bf16.msra.mxu2 %v14414_v13  ;;  %v14163_v62 = vld [vmem:[%s19384_s3 + $0xdb0] sm:$0xf0] }
0x15bd   : > { %v14251_v27 = vld [vmem:[%s19384_s3 + $0xe68] sm:$0xf0] }
0x15be   : > { %v8423_v34 = vpop.f32.mrf.mxu0  ;;  %9374 = vmatpush.bf16.msra.mxu1 %v13966_v59  ;;  %9356 = vmatpush.bf16.msra.mxu0 %v14378_v60  ;;  %v14254_v59 = vor.u32 %v15154_v41, %v14251_v27  ;;  %v14097_v41 = vld [vmem:[%s19384_s3 + $0xd10] sm:$0xf] }
0x15bf   : > { %v8424_v18 = vadd.f32 %v8423_v34, %v8410_v24  ;;  %v14350_v24 = vor.u32 %v15178_v12, %v14347_v30  ;;  %v14217_v34 = vld [vmem:[%s19384_s3 + $0xe08] sm:$0xf]  ;;  %v14195_v12 = vld [vmem:[%s19384_s3 + $0xdf0] sm:$0xf0] }
0x15c0   : > { %9382 = vmatpush.bf16.msra.mxu2 %v14382_v48  ;;  %v14218_v43 = vor.u32 %v15150_v61, %v14217_v34  ;;  %v15119_v34 = vld [vmem:[%s19384_s3 + $0xd2c] sm:$0xf0]  ;;  %v15115_v61 = vld [vmem:[%s19384_s3 + $0xd14] sm:$0xf] }
0x15c1   : > { %v18320_v38 = vadd.f32 %v8424_v18, %v18022_v39  ;;  %v8397_v16 = vpop.f32.mrf.mxu2  ;;  %v14313_v39 = vld [vmem:[%s19384_s3 + $0xec8] sm:$0xf]  ;;  %v14219_v18 = vld [vmem:[%s19384_s3 + $0xe28] sm:$0xf0] }
0x15c2   : > { %v8398_v17 = vadd.f32 %v8397_v16, %v18274_v22  ;;  %9357 = vmatpush.bf16.msra.mxu0 %v14346_v50  ;;  %v14314_v54 = vor.u32 %v15174_v14, %v14313_v39  ;;  %v14281_v22 = vld [vmem:[%s19384_s3 + $0xe88] sm:$0xf]  ;;  %v14222_v48 = vor.u32 %v15146_v26, %v14219_v18  ;;  %v15139_v50 = vld [vmem:[%s19384_s3 + $0xdd4] sm:$0xf]  ;;  %v14161_v39 = vld [vmem:[%s19384_s3 + $0xd90] sm:$0xf] }
0x15c3   : > { %v14282_v35 = vor.u32 %v15166_v55, %v14281_v22  ;;  %v14065_v18 = vld [vmem:[%s19384_s3 + $0xcd0] sm:$0xf] }
0x15c4   : > { %9383 = vmatpush.bf16.msra.mxu2 %v14350_v24  ;;  %v18330_v36 = vadd.f32 %v8398_v17, %v18011_v23  ;;  %v14194_v24 = vor.u32 %v15143_v0, %v14193_v44  ;;  %v14198_v17 = vor.u32 %v15139_v50, %v14195_v12  ;;  %v14033_v12 = vld [vmem:[%s19384_s3 + $0xc90] sm:$0xf] }
0x15c6   : > { %v8425_v63 = vpop.f32.mrf.mxu0  ;;  %9358 = vmatpush.bf16.msra.mxu0 %v14314_v54  ;;  %v15135_v54 = vld [vmem:[%s19384_s3 + $0xdac] sm:$0xf0] }
0x15c7   : > { %v14162_v55 = vor.u32 %v15135_v54, %v14161_v39  ;;  %v15207_v39 = vld [vmem:[%s19384_s3 + $0xfec] sm:$0xf0]  ;;  %v14451_v54 = vld [vmem:[%s19384_s3 + $0xff0] sm:$0xf0] }
0x15c8   : > { %9384 = vmatpush.bf16.msra.mxu2 %v14318_v20 }
0x15c9   : > { %v8399_v13 = vpop.f32.mrf.mxu2 }
0x15ca   : > { %9359 = vmatpush.bf16.msra.mxu0 %v14282_v35  ;;  %v14166_v35 = vor.u32 %v15131_v32, %v14163_v62  ;;  %v15123_v13 = vld [vmem:[%s19384_s3 + $0xd54] sm:$0xf] }
0x15cb   : > { %v8436_v23 = vpop.f32.mrf.mxu1 }
0x15cc   : > { %9385 = vmatpush.bf16.msra.mxu2 %v14286_v15  ;;  %v14131_v15 = vld [vmem:[%s19384_s3 + $0xd70] sm:$0xf0] }
0x15ce   : > { %9360 = vmatpush.bf16.msra.mxu0 %v14250_v49  ;;  %v14134_v49 = vor.u32 %v15123_v13, %v14131_v15 }
0x15d0   : > { %9386 = vmatpush.bf16.msra.mxu2 %v14254_v59 }
0x15d2   : > { %v8462_v10 = vpop.f32.mrf.mxu3  ;;  %9361 = vmatpush.bf16.msra.mxu0 %v14218_v43  ;;  %v14099_v43 = vld [vmem:[%s19384_s3 + $0xd30] sm:$0xf0] }
0x15d3   : > { %v8438_v60 = vpop.f32.mrf.mxu1  ;;  %v14102_v26 = vor.u32 %v15115_v61, %v14099_v43  ;;  %v15087_v61 = vld [vmem:[%s19384_s3 + $0xc2c] sm:$0xf0]  ;;  %v15083_v43 = vld [vmem:[%s19384_s3 + $0xc14] sm:$0xf] }
0x15d4   : > { %9387 = vmatpush.bf16.msra.mxu2 %v14222_v48  ;;  %v15111_v60 = vld [vmem:[%s19384_s3 + $0xcec] sm:$0xf0]  ;;  %v15107_v48 = vld [vmem:[%s19384_s3 + $0xcd4] sm:$0xf] }
0x15d5   : > { %v14066_v0 = vor.u32 %v15111_v60, %v14065_v18  ;;  %v15144_v18 = vld [vmem:[%s19384_s3 + $0xdf4] sm:$0xf0] }
0x15da   : > { %v8464_v30 = vpop.f32.mrf.mxu3 }
0x15db   : > { %v8501_v16 = vpop.f32.mrf.mxu1  ;;  %v15103_v30 = vld [vmem:[%s19384_s3 + $0xcac] sm:$0xf0] }
0x15dc   : > { %v8475_v14 = vpop.f32.mrf.mxu0  ;;  %v18351_v63 = vpack.c.bf16 %v8501_v16, %v8501_v16  ;;  %v15099_v16 = vld [vmem:[%s19384_s3 + $0xc94] sm:$0xf]  ;;  %v14034_v32 = vor.u32 %v15103_v30, %v14033_v12 }
0x15dd   : > { %v8476_v20 = vadd.f32 %v8475_v14, %v8462_v10  ;;  %v15203_v14 = vld [vmem:[%s19384_s3 + $0xfd4] sm:$0xf] }
0x15de   : > { %9297 = vmatmul.bf16.vlgmr.msra.gmra.mxu3 %v18351_v63  ;;  %9323 = vmatmul.bf16.vlgmr.msrb.gmra.mxu1 %v18351_v63  ;;  %v14454_v15 = vor.u32 %v15203_v14, %v14451_v54  ;;  %v15187_v12 = vld [vmem:[%s19384_s3 + $0xf54] sm:$0xf]  ;;  %v14169_v14 = vld [vmem:[%s19384_s3 + $0xd98] sm:$0xf] }
0x15df   : > { %v18359_v22 = vadd.f32 %v8476_v20, %v18052_v6  ;;  %9393 = vmatpush.bf16.msra.mxu3 %v14194_v24  ;;  %9419 = vmatpush.bf16.msrb.mxu1 %v14198_v17  ;;  %v14130_v6 = vor.u32 %v15127_v52, %v14129_v42  ;;  %v14035_v24 = vld [vmem:[%s19384_s3 + $0xcb0] sm:$0xf0]  ;;  %v14449_v17 = vld [vmem:[%s19384_s3 + $0xfd0] sm:$0xf]  ;;  %v15136_v54 = vld [vmem:[%s19384_s3 + $0xdb4] sm:$0xf0] }
0x15e0   : > { %v14038_v62 = vor.u32 %v15099_v16, %v14035_v24  ;;  %v14001_v20 = vld [vmem:[%s19384_s3 + $0xc50] sm:$0xf]  ;;  %v14003_v42 = vld [vmem:[%s19384_s3 + $0xc70] sm:$0xf0]  ;;  %v14450_v13 = vor.u32 %v15207_v39, %v14449_v17 }
0x15e1   : > { %v14387_v30 = vld [vmem:[%s19384_s3 + $0xf70] sm:$0xf0] }
0x15e2   : > { %v8449_v1 = vpop.f32.mrf.mxu2 }
0x15e3   : > { %v8450_v28 = vadd.f32 %v8449_v1, %v8436_v23  ;;  %9394 = vmatpush.bf16.msra.mxu3 %v14162_v55  ;;  %9420 = vmatpush.bf16.msrb.mxu1 %v14166_v35  ;;  %v8503_v27 = vpop.f32.mrf.mxu1  ;;  %v14098_v23 = vor.u32 %v15119_v34, %v14097_v41  ;;  %v15095_v55 = vld [vmem:[%s19384_s3 + $0xc6c] sm:$0xf0]  ;;  %v15091_v35 = vld [vmem:[%s19384_s3 + $0xc54] sm:$0xf] }
0x15e4   : > { %v8477_v10 = vpop.f32.mrf.mxu0  ;;  %v14417_v1 = vld [vmem:[%s19384_s3 + $0xf90] sm:$0xf]  ;;  %v14419_v41 = vld [vmem:[%s19384_s3 + $0xfb0] sm:$0xf0]  ;;  %v14002_v27 = vor.u32 %v15095_v55, %v14001_v20  ;;  %v14390_v20 = vor.u32 %v15187_v12, %v14387_v30  ;;  %v15132_v55 = vld [vmem:[%s19384_s3 + $0xd9c] sm:$0xf] }
0x15e5   : > { %v18367_v59 = vadd.f32 %v8450_v28, %v18039_v9  ;;  %v14067_v9 = vld [vmem:[%s19384_s3 + $0xcf0] sm:$0xf0]  ;;  %v14006_v10 = vor.u32 %v15091_v35, %v14003_v42  ;;  %v13969_v34 = vld [vmem:[%s19384_s3 + $0xc10] sm:$0xf]  ;;  %v14171_v35 = vld [vmem:[%s19384_s3 + $0xdb8] sm:$0xf0] }
0x15e6   : > { %v14070_v50 = vor.u32 %v15107_v48, %v14067_v9  ;;  %v15140_v9 = vld [vmem:[%s19384_s3 + $0xddc] sm:$0xf]  ;;  %v13970_v16 = vor.u32 %v15087_v61, %v13969_v34  ;;  %v14353_v42 = vld [vmem:[%s19384_s3 + $0xf10] sm:$0xf] }
0x15e7   : > { %9395 = vmatpush.bf16.msra.mxu3 %v14130_v6  ;;  %9421 = vmatpush.bf16.msrb.mxu1 %v14134_v49  ;;  %v15199_v6 = vld [vmem:[%s19384_s3 + $0xfac] sm:$0xf0]  ;;  %v15195_v49 = vld [vmem:[%s19384_s3 + $0xf94] sm:$0xf]  ;;  %v15124_v34 = vld [vmem:[%s19384_s3 + $0xd5c] sm:$0xf] }
0x15e8   : > { %v14418_v60 = vor.u32 %v15199_v6, %v14417_v1  ;;  %v14422_v48 = vor.u32 %v15195_v49, %v14419_v41  ;;  %v14170_v1 = vor.u32 %v15136_v54, %v14169_v14  ;;  %v14174_v6 = vor.u32 %v15132_v55, %v14171_v35  ;;  %v14137_v49 = vld [vmem:[%s19384_s3 + $0xd58] sm:$0xf]  ;;  %v14139_v61 = vld [vmem:[%s19384_s3 + $0xd78] sm:$0xf0] }
0x15e9   : > { %v14075_v55 = vld [vmem:[%s19384_s3 + $0xcf8] sm:$0xf0] }
0x15ea   : > { %v8451_v44 = vpop.f32.mrf.mxu2 }
0x15eb   : > { %9396 = vmatpush.bf16.msra.mxu3 %v14098_v23  ;;  %9422 = vmatpush.bf16.msrb.mxu1 %v14102_v26  ;;  %v13971_v23 = vld [vmem:[%s19384_s3 + $0xc30] sm:$0xf0]  ;;  %v14201_v26 = vld [vmem:[%s19384_s3 + $0xdd8] sm:$0xf]  ;;  %v14203_v44 = vld [vmem:[%s19384_s3 + $0xdf8] sm:$0xf0] }
0x15ec   : > { %v13974_v24 = vor.u32 %v15083_v43, %v13971_v23  ;;  %v14202_v17 = vor.u32 %v15144_v18, %v14201_v26  ;;  %v14206_v39 = vor.u32 %v15140_v9, %v14203_v44  ;;  %v14321_v43 = vld [vmem:[%s19384_s3 + $0xed0] sm:$0xf]  ;;  %v15171_v26 = vld [vmem:[%s19384_s3 + $0xed4] sm:$0xf]  ;;  %v14105_v9 = vld [vmem:[%s19384_s3 + $0xd18] sm:$0xf] }
0x15ed   : > { %v15175_v23 = vld [vmem:[%s19384_s3 + $0xeec] sm:$0xf0]  ;;  %v14323_v18 = vld [vmem:[%s19384_s3 + $0xef0] sm:$0xf0]  ;;  %v15120_v44 = vld [vmem:[%s19384_s3 + $0xd34] sm:$0xf0] }
0x15ee   : > { %9349 = vmatmul.bf16.vlgmr.msrb.gmra.mxu3 %v18351_v63  ;;  %9375 = vmatmul.bf16.vlgmr.msra.gmra.mxu1 %v18351_v63  ;;  %v14322_v12 = vor.u32 %v15175_v23, %v14321_v43  ;;  %v14326_v30 = vor.u32 %v15171_v26, %v14323_v18  ;;  %v14106_v14 = vor.u32 %v15120_v44, %v14105_v9  ;;  %v14225_v23 = vld [vmem:[%s19384_s3 + $0xe10] sm:$0xf]  ;;  %v15147_v18 = vld [vmem:[%s19384_s3 + $0xe14] sm:$0xf]  ;;  %v15208_v9 = vld [vmem:[%s19384_s3 + $0xff4] sm:$0xf0] }
0x15ef   : > { %9397 = vmatpush.bf16.msra.mxu3 %v14066_v0  ;;  %9423 = vmatpush.bf16.msrb.mxu1 %v14070_v50  ;;  %v14385_v0 = vld [vmem:[%s19384_s3 + $0xf50] sm:$0xf] }
0x15f0   : > { %v15191_v50 = vld [vmem:[%s19384_s3 + $0xf6c] sm:$0xf0] }
0x15f1   : > { %v15151_v26 = vld [vmem:[%s19384_s3 + $0xe2c] sm:$0xf0] }
0x15f2   : > { %v8514_v52 = vpop.f32.mrf.mxu2 }
0x15f3   : > { %v18391_v28 = vpack.c.bf16 %v8514_v52, %v8514_v52  ;;  %9398 = vmatpush.bf16.msra.mxu3 %v14034_v32  ;;  %9424 = vmatpush.bf16.msrb.mxu1 %v14038_v62  ;;  %v14386_v62 = vor.u32 %v15191_v50, %v14385_v0  ;;  %v15183_v52 = vld [vmem:[%s19384_s3 + $0xf2c] sm:$0xf0]  ;;  %v15116_v0 = vld [vmem:[%s19384_s3 + $0xd1c] sm:$0xf] }
0x15f4   : > { %v14354_v41 = vor.u32 %v15183_v52, %v14353_v42  ;;  %v14107_v50 = vld [vmem:[%s19384_s3 + $0xd38] sm:$0xf0]  ;;  %v14257_v52 = vld [vmem:[%s19384_s3 + $0xe50] sm:$0xf] }
0x15f5   : > { %9310 = vmatmul.bf16.vlgmr.msrb.gmra.mxu0 %v18391_v28  ;;  %9336 = vmatmul.bf16.vlgmr.msrb.gmra.mxu2 %v18391_v28  ;;  %v14110_v54 = vor.u32 %v15116_v0, %v14107_v50  ;;  %v15204_v50 = vld [vmem:[%s19384_s3 + $0xfdc] sm:$0xf] }
0x15f6   : > { %9406 = vmatpush.bf16.msrb.mxu0 %v14450_v13  ;;  %9432 = vmatpush.bf16.msrb.mxu2 %v14454_v15  ;;  %v15179_v13 = vld [vmem:[%s19384_s3 + $0xf14] sm:$0xf] }
0x15f7   : > { %9399 = vmatpush.bf16.msra.mxu3 %v14002_v27  ;;  %9425 = vmatpush.bf16.msrb.mxu1 %v14006_v10  ;;  %v14355_v15 = vld [vmem:[%s19384_s3 + $0xf30] sm:$0xf0]  ;;  %v15128_v10 = vld [vmem:[%s19384_s3 + $0xd74] sm:$0xf0] }
0x15f8   : > { %v14358_v27 = vor.u32 %v15179_v13, %v14355_v15  ;;  %v15159_v13 = vld [vmem:[%s19384_s3 + $0xe6c] sm:$0xf0]  ;;  %v15155_v15 = vld [vmem:[%s19384_s3 + $0xe54] sm:$0xf] }
0x15fa   : > { %9407 = vmatpush.bf16.msrb.mxu0 %v14418_v60  ;;  %9433 = vmatpush.bf16.msrb.mxu2 %v14422_v48  ;;  %v8516_v32 = vpop.f32.mrf.mxu2  ;;  %v14138_v60 = vor.u32 %v15128_v10, %v14137_v49  ;;  %v14142_v48 = vor.u32 %v15124_v34, %v14139_v61  ;;  %v15100_v10 = vld [vmem:[%s19384_s3 + $0xc9c] sm:$0xf]  ;;  %v14258_v61 = vor.u32 %v15159_v13, %v14257_v52  ;;  %v13977_v13 = vld [vmem:[%s19384_s3 + $0xc18] sm:$0xf] }
0x15fb   : > { %9400 = vmatpush.bf16.msra.mxu3 %v13970_v16  ;;  %9426 = vmatpush.bf16.msrb.mxu1 %v13974_v24  ;;  %v14289_v16 = vld [vmem:[%s19384_s3 + $0xe90] sm:$0xf]  ;;  %v14073_v32 = vld [vmem:[%s19384_s3 + $0xcd8] sm:$0xf]  ;;  %v14043_v34 = vld [vmem:[%s19384_s3 + $0xcb8] sm:$0xf0] }
0x15fc   : > { %v15167_v24 = vld [vmem:[%s19384_s3 + $0xeac] sm:$0xf0]  ;;  %v14046_v0 = vor.u32 %v15100_v10, %v14043_v34  ;;  %v14427_v52 = vld [vmem:[%s19384_s3 + $0xfb8] sm:$0xf0] }
0x15fd   : > { %v14290_v35 = vor.u32 %v15167_v24, %v14289_v16  ;;  %v15096_v16 = vld [vmem:[%s19384_s3 + $0xc74] sm:$0xf0]  ;;  %v15092_v24 = vld [vmem:[%s19384_s3 + $0xc5c] sm:$0xf] }
0x15fe   : > { %9408 = vmatpush.bf16.msrb.mxu0 %v14386_v62  ;;  %9434 = vmatpush.bf16.msrb.mxu2 %v14390_v20  ;;  %v15112_v62 = vld [vmem:[%s19384_s3 + $0xcf4] sm:$0xf0]  ;;  %v15108_v20 = vld [vmem:[%s19384_s3 + $0xcdc] sm:$0xf] }
0x15ff   : > { %9445 = vmatpush.bf16.msrb.mxu3 %v14202_v17  ;;  %9471 = vmatpush.bf16.msra.mxu1 %v14206_v39  ;;  %v15163_v17 = vld [vmem:[%s19384_s3 + $0xe94] sm:$0xf]  ;;  %v14078_v49 = vor.u32 %v15108_v20, %v14075_v55  ;;  %v15200_v20 = vld [vmem:[%s19384_s3 + $0xfb4] sm:$0xf0] }
0x1600   : > { %9401 = vmatmul.bf16.vlgmr.msra.gmra.mxu3 %v18351_v63  ;;  %9427 = vmatmul.bf16.vlgmr.msrb.gmra.mxu1 %v18351_v63  ;;  %v14291_v39 = vld [vmem:[%s19384_s3 + $0xeb0] sm:$0xf0] }
0x1601   : > { %v14294_v42 = vor.u32 %v15163_v17, %v14291_v39  ;;  %v14011_v17 = vld [vmem:[%s19384_s3 + $0xc78] sm:$0xf0]  ;;  %v14226_v39 = vor.u32 %v15151_v26, %v14225_v23 }
0x1602   : > { %9409 = vmatpush.bf16.msrb.mxu0 %v14354_v41  ;;  %9435 = vmatpush.bf16.msrb.mxu2 %v14358_v27  ;;  %v14041_v41 = vld [vmem:[%s19384_s3 + $0xc98] sm:$0xf]  ;;  %v14395_v23 = vld [vmem:[%s19384_s3 + $0xf78] sm:$0xf0] }
0x1603   : > { %9446 = vmatpush.bf16.msrb.mxu3 %v14170_v1  ;;  %9472 = vmatpush.bf16.msra.mxu1 %v14174_v6  ;;  %v14259_v1 = vld [vmem:[%s19384_s3 + $0xe70] sm:$0xf0]  ;;  %v14074_v6 = vor.u32 %v15112_v62, %v14073_v32  ;;  %v15104_v27 = vld [vmem:[%s19384_s3 + $0xcb4] sm:$0xf0] }
0x1604   : > { %v14262_v43 = vor.u32 %v15155_v15, %v14259_v1  ;;  %v14042_v44 = vor.u32 %v15104_v27, %v14041_v41  ;;  %v14425_v62 = vld [vmem:[%s19384_s3 + $0xf98] sm:$0xf]  ;;  %v15084_v1 = vld [vmem:[%s19384_s3 + $0xc1c] sm:$0xf] }
0x1605   : > { %9362 = vmatmul.bf16.vlgmr.msra.gmra.mxu0 %v18391_v28  ;;  %9388 = vmatmul.bf16.vlgmr.msra.gmra.mxu2 %v18391_v28  ;;  %v15088_v15 = vld [vmem:[%s19384_s3 + $0xc34] sm:$0xf0] }
0x1606   : > { %9410 = vmatpush.bf16.msrb.mxu0 %v14322_v12  ;;  %9436 = vmatpush.bf16.msrb.mxu2 %v14326_v30  ;;  %v14459_v12 = vld [vmem:[%s19384_s3 + $0xff8] sm:$0xf0]  ;;  %v14009_v30 = vld [vmem:[%s19384_s3 + $0xc58] sm:$0xf]  ;;  %v13978_v10 = vor.u32 %v15088_v15, %v13977_v13 }
0x1607   : > { %9447 = vmatpush.bf16.msrb.mxu3 %v14138_v60  ;;  %9473 = vmatpush.bf16.msra.mxu1 %v14142_v48  ;;  %v14227_v60 = vld [vmem:[%s19384_s3 + $0xe30] sm:$0xf0]  ;;  %v14457_v48 = vld [vmem:[%s19384_s3 + $0xfd8] sm:$0xf]  ;;  %v14462_v32 = vor.u32 %v15204_v50, %v14459_v12  ;;  %v14010_v55 = vor.u32 %v15096_v16, %v14009_v30  ;;  %v15172_v16 = vld [vmem:[%s19384_s3 + $0xedc] sm:$0xf] }
0x1608   : > { %v14393_v27 = vld [vmem:[%s19384_s3 + $0xf58] sm:$0xf] }
0x1609   : > { %v14329_v12 = vld [vmem:[%s19384_s3 + $0xed8] sm:$0xf] }
0x160a   : > { %9411 = vmatpush.bf16.msrb.mxu0 %v14290_v35  ;;  %9437 = vmatpush.bf16.msrb.mxu2 %v14294_v42  ;;  %v14014_v35 = vor.u32 %v15092_v24, %v14011_v17  ;;  %v15196_v42 = vld [vmem:[%s19384_s3 + $0xf9c] sm:$0xf]  ;;  %v15176_v30 = vld [vmem:[%s19384_s3 + $0xef4] sm:$0xf0] }
0x160b   : > { %9448 = vmatpush.bf16.msrb.mxu3 %v14106_v14  ;;  %9474 = vmatpush.bf16.msra.mxu1 %v14110_v54  ;;  %v14230_v14 = vor.u32 %v15147_v18, %v14227_v60  ;;  %v14458_v54 = vor.u32 %v15208_v9, %v14457_v48  ;;  %v14430_v41 = vor.u32 %v15196_v42, %v14427_v52  ;;  %v14361_v60 = vld [vmem:[%s19384_s3 + $0xf18] sm:$0xf]  ;;  %v15180_v9 = vld [vmem:[%s19384_s3 + $0xf1c] sm:$0xf] }
0x160c   : > { %v15184_v48 = vld [vmem:[%s19384_s3 + $0xf34] sm:$0xf0]  ;;  %v14331_v24 = vld [vmem:[%s19384_s3 + $0xef8] sm:$0xf0]  ;;  %v14330_v17 = vor.u32 %v15176_v30, %v14329_v12 }
0x160d   : > { %v15156_v42 = vld [vmem:[%s19384_s3 + $0xe5c] sm:$0xf] }
0x160e   : > { %9412 = vmatpush.bf16.msrb.mxu0 %v14258_v61  ;;  %9438 = vmatpush.bf16.msrb.mxu2 %v14262_v43  ;;  %v15192_v61 = vld [vmem:[%s19384_s3 + $0xf74] sm:$0xf0]  ;;  %v15188_v43 = vld [vmem:[%s19384_s3 + $0xf5c] sm:$0xf] }
0x160f   : > { %9449 = vmatpush.bf16.msrb.mxu3 %v14074_v6  ;;  %9475 = vmatpush.bf16.msra.mxu1 %v14078_v49  ;;  %v13979_v6 = vld [vmem:[%s19384_s3 + $0xc38] sm:$0xf0]  ;;  %v14426_v49 = vor.u32 %v15200_v20, %v14425_v62  ;;  %v14394_v26 = vor.u32 %v15192_v61, %v14393_v27  ;;  %v14398_v18 = vor.u32 %v15188_v43, %v14395_v23 }
0x1610   : > { %v13982_v34 = vor.u32 %v15084_v1, %v13979_v6  ;;  %v14299_v62 = vld [vmem:[%s19384_s3 + $0xeb8] sm:$0xf0]  ;;  %v14233_v1 = vld [vmem:[%s19384_s3 + $0xe18] sm:$0xf] }
0x1611   : > { %v14267_v52 = vld [vmem:[%s19384_s3 + $0xe78] sm:$0xf0]  ;;  %v15152_v6 = vld [vmem:[%s19384_s3 + $0xe34] sm:$0xf0] }
0x1612   : > { %9413 = vmatpush.bf16.msrb.mxu0 %v14226_v39  ;;  %9439 = vmatpush.bf16.msrb.mxu2 %v14230_v14  ;;  %v14334_v39 = vor.u32 %v15172_v16, %v14331_v24  ;;  %v14297_v14 = vld [vmem:[%s19384_s3 + $0xe98] sm:$0xf]  ;;  %v14270_v15 = vor.u32 %v15156_v42, %v14267_v52  ;;  %v14234_v27 = vor.u32 %v15152_v6, %v14233_v1  ;;  %v18502_v24 = vpop.permute.xlu1 %9508 }
0x1613   : > { %9450 = vmatpush.bf16.msrb.mxu3 %v14042_v44  ;;  %9476 = vmatpush.bf16.msra.mxu1 %v14046_v0  ;;  %v14363_v44 = vld [vmem:[%s19384_s3 + $0xf38] sm:$0xf0]  ;;  %v14362_v0 = vor.u32 %v15184_v48, %v14361_v60 }
0x1614   : > { %v14366_v50 = vor.u32 %v15180_v9, %v14363_v44 }
0x1615   : > { %9414 = vmatmul.bf16.vlgmr.msrb.gmra.mxu0 %v18391_v28  ;;  %9440 = vmatmul.bf16.vlgmr.msrb.gmra.mxu2 %v18391_v28 }
0x1616   : > { %9458 = vmatpush.bf16.msra.mxu0 %v14458_v54  ;;  %9484 = vmatpush.bf16.msra.mxu2 %v14462_v32  ;;  %v15168_v54 = vld [vmem:[%s19384_s3 + $0xeb4] sm:$0xf0]  ;;  %v15164_v32 = vld [vmem:[%s19384_s3 + $0xe9c] sm:$0xf] }
0x1617   : > { %9451 = vmatpush.bf16.msrb.mxu3 %v14010_v55  ;;  %9477 = vmatpush.bf16.msra.mxu1 %v14014_v35  ;;  %v14302_v20 = vor.u32 %v15164_v32, %v14299_v62  ;;  %v14265_v55 = vld [vmem:[%s19384_s3 + $0xe58] sm:$0xf] }
0x1618   : > { %v15160_v35 = vld [vmem:[%s19384_s3 + $0xe74] sm:$0xf0] }
0x1619   : > { %v14266_v13 = vor.u32 %v15160_v35, %v14265_v55 }
0x161a   : > { %9459 = vmatpush.bf16.msra.mxu0 %v14426_v49  ;;  %9485 = vmatpush.bf16.msra.mxu2 %v14430_v41  ;;  %v15148_v49 = vld [vmem:[%s19384_s3 + $0xe1c] sm:$0xf] }
0x161b   : > { %9452 = vmatpush.bf16.msrb.mxu3 %v13978_v10  ;;  %9478 = vmatpush.bf16.msra.mxu1 %v13982_v34  ;;  %v14235_v41 = vld [vmem:[%s19384_s3 + $0xe38] sm:$0xf0]  ;;  %s19388_s3 = smov 32  }
0x161c   : > { %v14238_v10 = vor.u32 %v15148_v49, %v14235_v41 }
0x161e   : > { %9460 = vmatpush.bf16.msra.mxu0 %v14394_v26  ;;  %9486 = vmatpush.bf16.msra.mxu2 %v14398_v18 }
0x161f   : > { %9453 = vmatmul.bf16.vlgmr.msrb.gmra.mxu3 %v18351_v63  ;;  %9479 = vmatmul.bf16.vlgmr.msra.gmra.mxu1 %v18351_v63  ;;  %v14298_v63 = vor.u32 %v15168_v54, %v14297_v14 }
0x1622   : > { %9461 = vmatpush.bf16.msra.mxu0 %v14362_v0  ;;  %9487 = vmatpush.bf16.msra.mxu2 %v14366_v50 }
0x1626   : > { %9462 = vmatpush.bf16.msra.mxu0 %v14330_v17  ;;  %9488 = vmatpush.bf16.msra.mxu2 %v14334_v39 }
0x162a   : > { %9463 = vmatpush.bf16.msra.mxu0 %v14298_v63  ;;  %9489 = vmatpush.bf16.msra.mxu2 %v14302_v20 }
0x162e   : > { %9464 = vmatpush.bf16.msra.mxu0 %v14266_v13  ;;  %9490 = vmatpush.bf16.msra.mxu2 %v14270_v15 }
0x1632   : > { %9465 = vmatpush.bf16.msra.mxu0 %v14234_v27  ;;  %9491 = vmatpush.bf16.msra.mxu2 %v14238_v10 }
0x1635   : > { %9466 = vmatmul.bf16.vlgmr.msra.gmra.mxu0 %v18391_v28  ;;  %9492 = vmatmul.bf16.vlgmr.msra.gmra.mxu2 %v18391_v28 }
0x165b   : > { %v9324_v34 = vpop.f32.mrf.mxu1 }
0x1661   : > { %v9298_v61 = vpop.f32.mrf.mxu3 }
0x1663   : > { %v9326_v43 = vpop.f32.mrf.mxu1 }
0x1669   : > { %v9300_v23 = vpop.f32.mrf.mxu3 }
0x166b   : > { %v9376_v26 = vpop.f32.mrf.mxu1 }
0x1671   : > { %v9350_v60 = vpop.f32.mrf.mxu3 }
0x1672   : > { %v9311_v18 = vpop.f32.mrf.mxu0 }
0x1673   : > { %v9378_v48 = vpop.f32.mrf.mxu1  ;;  %v9312_v9 = vadd.f32 %v9311_v18, %v9298_v61 }
0x1675   : > { %v9497_v0 = vadd.f32 %v9312_v9, %v18254_v7 }
0x1677   : > { %v9511_v17 = vadd.f32 %v18502_v24, %v9497_v0 }
0x1678   : > { %v9337_v44 = vpop.f32.mrf.mxu2 }
0x1679   : > { %v9338_v50 = vadd.f32 %v9337_v44, %v9324_v34  ;;  %v9352_v30 = vpop.f32.mrf.mxu3 }
0x167a   : > { %v9313_v12 = vpop.f32.mrf.mxu0 }
0x167b   : > { %v9498_v16 = vadd.f32 %v9338_v50, %v18235_v25 }
0x167d   : > { %v9428_v28 = vpop.f32.mrf.mxu1  ;;  %v9512_v39 = vadd.f32 %v18502_v24, %v9498_v16 }
0x167f   : > { %v9519_v14 = vpack.c.bf16 %v9512_v39, %v9511_v17 }
0x1680   : > { %v9339_v54 = vpop.f32.mrf.mxu2 }
0x1681   : > { %v9527_v32 = vunpack.c.l.b16 %v9519_v14  ;;  %v9528_v62 = vunpack.c.h.b16 %v9519_v14 }
0x1682   : > { %v9363_v7 = vpop.f32.mrf.mxu0 }
0x1683   : > { %v9402_v63 = vpop.f32.mrf.mxu3  ;;  %v9535_v20 = vpack.c.b16 %v9527_v32, %v9527_v32  ;;  %v9536_v55 = vpack.c.b16 %v9528_v62, %v9528_v62  ;;  %v9364_v52 = vadd.f32 %v9363_v7, %v9350_v60 }
0x1685   : > { %v9430_v35 = vpop.f32.mrf.mxu1  ;;  %v18508_v42 = vsel %vm1312_vm2, %v9536_v55, %v16280_v29  ;;  %v18512_v25 = vsel %vm1312_vm2, %v9535_v20, %v16268_v47  ;;  %v9499_v15 = vadd.f32 %v9364_v52, %v18298_v46 }
0x1686   : > { %10008 = vrot.lane.b32.xlu1 %v18508_v42, %s19386_s2  ;;  %9585 = vrot.lane.b32.xlu0 %v18508_v42, %s19387_s0 }
0x1687   : > { %9583 = vrot.lane.b32.xlu2 %v18512_v25, %s19387_s0  ;;  %v9513_v47 = vadd.f32 %v18502_v24, %v9499_v15 }
0x1688   : > { %v9389_v13 = vpop.f32.mrf.mxu2 }
0x1689   : > { %v9390_v1 = vadd.f32 %v9389_v13, %v9376_v26 }
0x168a   : > { %v9365_v6 = vpop.f32.mrf.mxu0 }
0x168b   : > { %v9404_v29 = vpop.f32.mrf.mxu3  ;;  %v9500_v49 = vadd.f32 %v9390_v1, %v18280_v19 }
0x168d   : > { %v9514_v41 = vadd.f32 %v18502_v24, %v9500_v49 }
0x168e   : > { %9909 = vrot.lane.b32.xlu1 %v18508_v42, %s19388_s3  ;;  %9699 = vrot.lane.b32.xlu0 %v18508_v42, %s19378_s1 }
0x168f   : > { %9697 = vrot.lane.b32.xlu2 %v18512_v25, %s19378_s1  ;;  %v9520_v27 = vpack.c.bf16 %v9514_v41, %v9513_v47  ;;  %v18612_v47 = vld [vmem:[#allocation1 + $0x36] sm:$0xff]  ;;  %v9617_v41 = vld [vmem:[#allocation1] sm:$0xff] }
0x1690   : > { %v9391_v46 = vpop.f32.mrf.mxu2 }
0x1691   : > { %v9529_v10 = vunpack.c.l.b16 %v9520_v27  ;;  %v9530_v43 = vunpack.c.h.b16 %v9520_v27  ;;  %v9618_v27 = vld [vmem:[#allocation1 + $0x9] sm:$0xff]  ;;  %v9619_v46 = vld [vmem:[#allocation1 + $0x12] sm:$0xff] }
0x1692   : > { %v9415_v34 = vpop.f32.mrf.mxu0 }
0x1693   : > { %v9537_v61 = vpack.c.b16 %v9529_v10, %v9529_v10  ;;  %v9416_v19 = vadd.f32 %v9415_v34, %v9402_v63  ;;  %v9538_v18 = vpack.c.b16 %v9530_v43, %v9530_v43  ;;  %v9620_v10 = vld [vmem:[#allocation1 + $0x1b] sm:$0xff]  ;;  %v9625_v43 = vpack.i.b16 %v9617_v41, %v9617_v41 }
0x1695   : > { %v18532_v23 = vsel %vm1312_vm2, %v9537_v61, %v16274_v5  ;;  %v9501_v60 = vadd.f32 %v9416_v19, %v18330_v36  ;;  %v18548_v12 = vsel %vm1312_vm2, %v9538_v18, %v16272_v56  ;;  %v9628_v19 = vpack.i.b16 %v9618_v27, %v9618_v27 }
0x1696   : > { %10006 = vrot.lane.b32.xlu0 %v18512_v25, %s19386_s2  ;;  %9587 = vrot.lane.b32.xlu1 %v18532_v23, %s19387_s0  ;;  %v9627_v18 = vperm.slane %v9625_v43, 0 }
0x1697   : > { %9907 = vrot.lane.b32.xlu2 %v18512_v25, %s19388_s3  ;;  %v9515_v5 = vadd.f32 %v18502_v24, %v9501_v60  ;;  %v9630_v60 = vperm.slane %v9628_v19, 0 }
0x1698   : > { %v9441_v26 = vpop.f32.mrf.mxu2 }
0x1699   : > { %v9442_v48 = vadd.f32 %v9441_v26, %v9428_v28 }
0x169a   : > { %v9417_v44 = vpop.f32.mrf.mxu0 }
0x169b   : > { %v9502_v0 = vadd.f32 %v9442_v48, %v18320_v38 }
0x169c   : > { %v9480_v9 = vpop.f32.mrf.mxu1 }
0x169d   : > { %v9516_v50 = vadd.f32 %v18502_v24, %v9502_v0 }
0x169e   : > { %10010 = vrot.lane.b32.xlu0 %v18532_v23, %s19386_s2  ;;  %9701 = vrot.lane.b32.xlu1 %v18532_v23, %s19378_s1 }
0x169f   : > { %9589 = vrot.lane.b32.xlu2 %v18548_v12, %s19387_s0  ;;  %v9521_v36 = vpack.c.bf16 %v9516_v50, %v9515_v5  ;;  %v9666_v50 = vunpack.c.l.bf16 %v9630_v60 }
0x16a0   : > { %v9443_v38 = vpop.f32.mrf.mxu2 }
0x16a1   : > { %v9532_v16 = vunpack.c.h.b16 %v9521_v36  ;;  %v9531_v39 = vunpack.c.l.b16 %v9521_v36 }
0x16a2   : > { %v9454_v30 = vpop.f32.mrf.mxu3 }
0x16a3   : > { %v9540_v17 = vpack.c.b16 %v9532_v16, %v9532_v16  ;;  %v9539_v54 = vpack.c.b16 %v9531_v39, %v9531_v39 }
0x16a4   : > { %v9482_v28 = vpop.f32.mrf.mxu1 }
0x16a5   : > { %v18556_v14 = vsel %vm1312_vm2, %v9540_v17, %v16304_v51  ;;  %v18566_v32 = vsel %vm1312_vm2, %v9539_v54, %v16290_v8 }
0x16a6   : > { %10012 = vrot.lane.b32.xlu0 %v18548_v12, %s19386_s2  ;;  %9593 = vrot.lane.b32.xlu1 %v18556_v14, %s19387_s0 }
0x16a7   : > { %9703 = vrot.lane.b32.xlu2 %v18548_v12, %s19378_s1 }
0x16aa   : > { %v9456_v56 = vpop.f32.mrf.mxu3 }
0x16ae   : > { %9913 = vrot.lane.b32.xlu0 %v18548_v12, %s19388_s3  ;;  %10014 = vrot.lane.b32.xlu1 %v18566_v32, %s19386_s2 }
0x16af   : > { %9911 = vrot.lane.b32.xlu2 %v18532_v23, %s19388_s3 }
0x16b2   : > { %v9467_v51 = vpop.f32.mrf.mxu0 }
0x16b3   : > { %v9468_v62 = vadd.f32 %v9467_v51, %v9454_v30 }
0x16b5   : > { %v9503_v20 = vadd.f32 %v9468_v62, %v18367_v59 }
0x16b6   : > { %9591 = vrot.lane.b32.xlu0 %v18566_v32, %s19387_s0  ;;  %9915 = vrot.lane.b32.xlu1 %v18566_v32, %s19388_s3 }
0x16b7   : > { %9707 = vrot.lane.b32.xlu2 %v18556_v14, %s19378_s1  ;;  %v9517_v35 = vadd.f32 %v18502_v24, %v9503_v20 }
0x16b8   : > { %v9493_v63 = vpop.f32.mrf.mxu2 }
0x16b9   : > { %v9494_v55 = vadd.f32 %v9493_v63, %v9480_v9  ;;  %v9665_v9 = vunpack.c.l.bf16 %v9627_v18 }
0x16ba   : > { %v9469_v8 = vpop.f32.mrf.mxu0 }
0x16bb   : > { %v9504_v7 = vadd.f32 %v9494_v55, %v18359_v22 }
0x16bd   : > { %v9518_v52 = vadd.f32 %v18502_v24, %v9504_v7  ;;  %v18610_v24 = vld [vmem:[#allocation1 + $0x2d] sm:$0xff] }
0x16be   : > { %9705 = vrot.lane.b32.xlu0 %v18566_v32, %s19378_s1 }
0x16bf   : > { %v9522_v13 = vpack.c.bf16 %v9518_v52, %v9517_v35  ;;  %10016 = vrot.lane.b32.xlu2 %v18556_v14, %s19386_s2  ;;  %v9631_v52 = vpack.i.b16 %v9619_v46, %v9619_v46 }
0x16c0   : > { %v9495_v15 = vpop.f32.mrf.mxu2 }
0x16c1   : > { %v9533_v59 = vunpack.c.l.b16 %v9522_v13  ;;  %v9534_v1 = vunpack.c.h.b16 %v9522_v13  ;;  %v9634_v13 = vpack.i.b16 %v9620_v10, %v9620_v10 }
0x16c3   : > { %v9541_v29 = vpack.c.b16 %v9533_v59, %v9533_v59  ;;  %v9542_v6 = vpack.c.b16 %v9534_v1, %v9534_v1 }
0x16c5   : > { %v18590_v49 = vsel %vm1312_vm2, %v9541_v29, %v16302_v53  ;;  %v18598_v22 = vsel %vm1312_vm2, %v9542_v6, %v16300_v3  ;;  %v18606_v53 = vld [vmem:[#allocation1 + $0x24] sm:$0xff]  ;;  %v9633_v29 = vperm.slane %v9631_v52, 0  ;;  %v9636_v6 = vperm.slane %v9634_v13, 0 }
0x16c6   : > { %9595 = vrot.lane.b32.xlu1 %v18590_v49, %s19387_s0  ;;  %9709 = vrot.lane.b32.xlu0 %v18590_v49, %s19378_s1  ;;  %v18614_v3 = vld [vmem:[#allocation1 + $0x3f] sm:$0xff] }
0x16c7   : > { %9597 = vrot.lane.b32.xlu2 %v18598_v22, %s19387_s0  ;;  %9730 = vst [vmem:[#allocation1] ss:$9 sm:$0xff] %v15561_v21  ;;  %v9667_v19 = vunpack.c.l.bf16 %v9633_v29  ;;  %v9668_v46 = vunpack.c.l.bf16 %v9636_v6 }
0x16ce   : > { %9711 = vrot.lane.b32.xlu1 %v18598_v22, %s19378_s1  ;;  %10020 = vrot.lane.b32.xlu0 %v18598_v22, %s19386_s2  ;;  %v9731_v1 = vld [vmem:[#allocation1] sm:$0xff]  ;;  %v9732_v41 = vld [vmem:[#allocation1 + $0x9] sm:$0xff] }
0x16cf   : > { %v9739_v27 = vpack.i.b16 %v9731_v1, %v9731_v1  ;;  %v9742_v43 = vpack.i.b16 %v9732_v41, %v9732_v41 }
0x16d6   : > { %10018 = vrot.lane.b32.xlu1 %v18590_v49, %s19386_s2 }
0x16e1   : > { %v9584_v34 = vpop.permute.xlu2 %9583 }
0x16e2   : > { %v9614_v48 = vsel %vm1093_vm1, 0, %v9584_v34 }
0x16e3   : > { %v9649_v44 = vunpack.c.l.bf16 %v9614_v48  ;;  %v9657_v0 = vunpack.c.h.bf16 %v9614_v48 }
0x16e5   : > { %v9673_v28 = vmul.f32 %v9665_v9, %v9649_v44  ;;  %v9681_v17 = vmul.f32 %v9665_v9, %v9657_v0 }
0x16e9   : > { %v18617_v61 = vpop.permute.xlu2 %9697 }
0x16f1   : > { %v18619_v26 = vpop.permute.xlu2 %9907 }
0x16f8   : > { %v18622_v5 = vpop.permute.xlu1 %10008  ;;  %v9586_v36 = vpop.permute.xlu0 %9585 }
0x16f9   : > { %v9599_v21 = vsel %vm1093_vm1, %v9584_v34, %v9586_v36  ;;  %v18625_v30 = vpop.permute.xlu2 %9589 }
0x16fa   : > { %v9650_v38 = vunpack.c.l.bf16 %v9599_v21  ;;  %v9658_v16 = vunpack.c.h.bf16 %v9599_v21 }
0x16fc   : > { %v9674_v39 = vmul.f32 %v9666_v50, %v9650_v38  ;;  %v9682_v56 = vmul.f32 %v9666_v50, %v9658_v16  ;;  %v9741_v38 = vperm.slane %v9739_v27, 0  ;;  %v9744_v16 = vperm.slane %v9742_v43, 0 }
0x16fe   : > { %v9689_v54 = vpack.c.bf16 %v9674_v39, %v9673_v28  ;;  %v9693_v51 = vpack.c.bf16 %v9682_v56, %v9681_v17 }
0x1700   : > { %v9819_v62 = vunpack.c.l.b16 %v9689_v54  ;;  %v9820_v63 = vunpack.c.h.b16 %v9689_v54  ;;  %v9827_v20 = vunpack.c.l.b16 %v9693_v51  ;;  %v9828_v55 = vunpack.c.h.b16 %v9693_v51  ;;  %v18627_v8 = vpop.permute.xlu1 %9909  ;;  %v9700_v7 = vpop.permute.xlu0 %9699 }
0x1701   : > { %v18629_v35 = vpop.permute.xlu2 %9703  ;;  %v9713_v54 = vsel %vm1191_vm0, %v18617_v61, %v9700_v7 }
0x1702   : > { %v18631_v15 = vpack.c.b16 %v9828_v55, %v9820_v63  ;;  %v18633_v59 = vpack.c.b16 %v9827_v20, %v9819_v62  ;;  %v9779_v63 = vunpack.c.l.bf16 %v9741_v38  ;;  %v9780_v20 = vunpack.c.l.bf16 %v9744_v16 }
0x1703   : > { %v9763_v52 = vunpack.c.l.bf16 %v9713_v54  ;;  %v9771_v13 = vunpack.c.h.bf16 %v9713_v54 }
0x1704   : > { %9992 = vrot.lane.b32.xlu2 %v18631_v15, %s19386_s2  ;;  %9990 = vrot.lane.b32.xlu1 %v18633_v59, %s19386_s2 }
0x1708   : > { %v10007_v34 = vpop.permute.xlu0 %10006  ;;  %v9588_v10 = vpop.permute.xlu1 %9587 }
0x1709   : > { %v10045_v18 = vsel %vm1437_vm3, %v10007_v34, %v18622_v5  ;;  %v18641_v60 = vpop.permute.xlu2 %9911  ;;  %v9600_v48 = vsel %vm1093_vm1, %v9586_v36, %v9588_v10  ;;  %v9601_v9 = vsel %vm1093_vm1, %v9588_v10, %v18625_v30 }
0x170a   : > { %10105 = vmatpush.bf16.msra.mxu3 %v10045_v18  ;;  %v9651_v44 = vunpack.c.l.bf16 %v9600_v48  ;;  %v9652_v0 = vunpack.c.l.bf16 %v9601_v9  ;;  %v9659_v50 = vunpack.c.h.bf16 %v9600_v48  ;;  %v9660_v21 = vunpack.c.h.bf16 %v9601_v9 }
0x170b   : > { %v18651_v28 = vsel %vm1377_vm4, %v18627_v8, %v18641_v60 }
0x170c   : > { %9891 = vrot.lane.b32.xlu1 %v18633_v59, %s19388_s3  ;;  %v9675_v17 = vmul.f32 %v9667_v19, %v9651_v44  ;;  %v9676_v36 = vmul.f32 %v9668_v46, %v9652_v0  ;;  %v9683_v39 = vmul.f32 %v9667_v19, %v9659_v50  ;;  %v9684_v56 = vmul.f32 %v9668_v46, %v9660_v21 }
0x170d   : > { %v9787_v19 = vmul.f32 %v9779_v63, %v9763_v52  ;;  %v9795_v46 = vmul.f32 %v9779_v63, %v9771_v13  ;;  %v9640_v63 = vpack.i.b16 %v18610_v24, %v18610_v24  ;;  %v9733_v13 = vld [vmem:[#allocation1 + $0x12] sm:$0xff] }
0x170e   : > { %v9690_v51 = vpack.c.bf16 %v9676_v36, %v9675_v17  ;;  %v9694_v62 = vpack.c.bf16 %v9684_v56, %v9683_v39  ;;  %v9745_v24 = vpack.i.b16 %v9733_v13, %v9733_v13 }
0x1710   : > { %v10011_v55 = vpop.permute.xlu0 %10010  ;;  %v9821_v1 = vunpack.c.l.b16 %v9690_v51  ;;  %v9829_v29 = vunpack.c.l.b16 %v9694_v62  ;;  %v9702_v6 = vpop.permute.xlu1 %9701  ;;  %v9830_v44 = vunpack.c.h.b16 %v9694_v62  ;;  %v9637_v62 = vpack.i.b16 %v18606_v53, %v18606_v53 }
0x1711   : > { %v9714_v41 = vsel %vm1191_vm0, %v9700_v7, %v9702_v6  ;;  %v10046_v27 = vsel %vm1437_vm3, %v18622_v5, %v10011_v55  ;;  %v18664_v9 = vpop.permute.xlu2 %9707  ;;  %v9822_v5 = vunpack.c.h.b16 %v9690_v51 }
0x1712   : > { %v9764_v34 = vunpack.c.l.bf16 %v9714_v41  ;;  %v9772_v43 = vunpack.c.h.bf16 %v9714_v41  ;;  %10131 = vmatpush.bf16.msrb.mxu1 %v10046_v27  ;;  %v18660_v61 = vpack.c.b16 %v9829_v29, %v9821_v1  ;;  %v9639_v53 = vperm.slane %v9637_v62, 0  ;;  %v9734_v27 = vld [vmem:[#allocation1 + $0x1b] sm:$0xff] }
0x1713   : > { %v18675_v54 = vpack.c.b16 %v9830_v44, %v9822_v5  ;;  %v9642_v41 = vperm.slane %v9640_v63, 0 }
0x1714   : > { %9893 = vrot.lane.b32.xlu1 %v18631_v15, %s19388_s3  ;;  %v9788_v10 = vmul.f32 %v9780_v20, %v9764_v34  ;;  %v9796_v18 = vmul.f32 %v9780_v20, %v9772_v43  ;;  %9994 = vrot.lane.b32.xlu2 %v18660_v61, %s19386_s2  ;;  %v9669_v34 = vunpack.c.l.bf16 %v9639_v53 }
0x1715   : > { %v9670_v43 = vunpack.c.l.bf16 %v9642_v41 }
0x1716   : > { %v9803_v48 = vpack.c.bf16 %v9788_v10, %v9787_v19  ;;  %v9807_v7 = vpack.c.bf16 %v9796_v18, %v9795_v46  ;;  %v9747_v46 = vperm.slane %v9745_v24, 0  ;;  %v9646_v24 = vpack.i.b16 %v18614_v3, %v18614_v3 }
0x1718   : > { %v10013_v0 = vpop.permute.xlu0 %10012  ;;  %v9859_v50 = vunpack.c.l.b16 %v9803_v48  ;;  %v9860_v21 = vunpack.c.h.b16 %v9803_v48  ;;  %v9867_v38 = vunpack.c.l.b16 %v9807_v7  ;;  %v9868_v16 = vunpack.c.h.b16 %v9807_v7  ;;  %v18666_v17 = vpop.permute.xlu1 %9593 }
0x1719   : > { %v18669_v36 = vsel %vm1437_vm3, %v10011_v55, %v10013_v0  ;;  %v18689_v20 = vpop.permute.xlu2 %10016  ;;  %v9781_v63 = vunpack.c.l.bf16 %v9747_v46 }
0x171a   : > { %v18671_v39 = vpack.c.b16 %v9868_v16, %v9860_v21  ;;  %v18673_v56 = vpack.c.b16 %v9867_v38, %v9859_v50 }
0x171c   : > { %9925 = vrot.lane.b32.xlu0 %v18671_v39, %s19388_s3  ;;  %9923 = vrot.lane.b32.xlu1 %v18673_v56, %s19388_s3 }
0x171d   : > { %9996 = vrot.lane.b32.xlu2 %v18675_v54, %s19386_s2 }
0x1720   : > { %v18683_v51 = vpop.permute.xlu0 %9913  ;;  %v10015_v55 = vpop.permute.xlu1 %10014 }
0x1721   : > { %v18694_v52 = vsel %vm1377_vm4, %v18641_v60, %v18683_v51  ;;  %v18697_v1 = vsel %vm1437_vm3, %v10013_v0, %v10015_v55  ;;  %v18701_v29 = vsel %vm1437_vm3, %v10015_v55, %v18689_v20  ;;  %v9748_v60 = vpack.i.b16 %v9734_v27, %v9734_v27 }
0x1722   : > { %v9715_v0 = vsel %vm1191_vm0, %v9702_v6, %v18629_v35  ;;  %v9643_v6 = vpack.i.b16 %v18612_v47, %v18612_v47 }
0x1723   : > { %v9750_v50 = vperm.slane %v9748_v60, 0  ;;  %v9773_v41 = vunpack.c.h.bf16 %v9715_v0 }
0x1724   : > { %10022 = vrot.lane.b32.xlu0 %v18673_v56, %s19386_s2 }
0x1725   : > { %10024 = vrot.lane.b32.xlu2 %v18671_v39, %s19386_s2  ;;  %v9782_v27 = vunpack.c.l.bf16 %v9750_v50 }
0x1728   : > { %v9592_v19 = vpop.permute.xlu0 %9591  ;;  %v18715_v55 = vpop.permute.xlu1 %9915 }
0x1729   : > { %v9602_v10 = vsel %vm1093_vm1, %v18625_v30, %v9592_v19  ;;  %v9603_v18 = vsel %vm1093_vm1, %v9592_v19, %v18666_v17  ;;  %v9765_v30 = vunpack.c.l.bf16 %v9715_v0 }
0x172a   : > { %v9653_v48 = vunpack.c.l.bf16 %v9602_v10  ;;  %v9654_v7 = vunpack.c.l.bf16 %v9603_v18  ;;  %v9661_v5 = vunpack.c.h.bf16 %v9602_v10  ;;  %v9662_v44 = vunpack.c.h.bf16 %v9603_v18 }
0x172b   : > { %v9789_v47 = vmul.f32 %v9781_v63, %v9765_v30 }
0x172c   : > { %v9677_v21 = vmul.f32 %v9669_v34, %v9653_v48  ;;  %v9678_v38 = vmul.f32 %v9670_v43, %v9654_v7  ;;  %v9685_v16 = vmul.f32 %v9669_v34, %v9661_v5  ;;  %v9686_v62 = vmul.f32 %v9670_v43, %v9662_v44  ;;  %9897 = vrot.lane.b32.xlu0 %v18675_v54, %s19388_s3  ;;  %v9735_v7 = vld [vmem:[#allocation1 + $0x24] sm:$0xff] }
0x172d   : > { %9895 = vrot.lane.b32.xlu2 %v18660_v61, %s19388_s3  ;;  %v9645_v5 = vperm.slane %v9643_v6, 0  ;;  %v9648_v44 = vperm.slane %v9646_v24, 0 }
0x172e   : > { %v9691_v13 = vpack.c.bf16 %v9678_v38, %v9677_v21  ;;  %v9695_v53 = vpack.c.bf16 %v9686_v62, %v9685_v16  ;;  %v9797_v21 = vmul.f32 %v9781_v63, %v9773_v41  ;;  %v9737_v16 = vld [vmem:[#allocation1 + $0x36] sm:$0xff]  ;;  %v9598_v62 = vpop.permute.xlu2 %9597  ;;  %v9738_v41 = vld [vmem:[#allocation1 + $0x3f] sm:$0xff] }
0x1730   : > { %v9823_v60 = vunpack.c.l.b16 %v9691_v13  ;;  %v9824_v34 = vunpack.c.h.b16 %v9691_v13  ;;  %v9831_v43 = vunpack.c.l.b16 %v9695_v53  ;;  %v9832_v19 = vunpack.c.h.b16 %v9695_v53  ;;  %v9706_v46 = vpop.permute.xlu0 %9705 }
0x1731   : > { %v9716_v10 = vsel %vm1191_vm0, %v18629_v35, %v9706_v46  ;;  %v9736_v35 = vld [vmem:[#allocation1 + $0x2d] sm:$0xff]  ;;  %v9751_v13 = vpack.i.b16 %v9735_v7, %v9735_v7  ;;  %v9760_v7 = vpack.i.b16 %v9738_v41, %v9738_v41 }
0x1732   : > { %v9766_v18 = vunpack.c.l.bf16 %v9716_v10  ;;  %v9774_v48 = vunpack.c.h.bf16 %v9716_v10  ;;  %v18725_v0 = vpack.c.b16 %v9832_v19, %v9824_v34  ;;  %v18727_v50 = vpack.c.b16 %v9831_v43, %v9823_v60 }
0x1733   : > { %v9671_v34 = vunpack.c.l.bf16 %v9645_v5  ;;  %v9672_v60 = vunpack.c.l.bf16 %v9648_v44  ;;  %v9754_v19 = vpack.i.b16 %v9736_v35, %v9736_v35  ;;  %v9757_v10 = vpack.i.b16 %v9737_v16, %v9737_v16 }
0x1734   : > { %v9790_v3 = vmul.f32 %v9782_v27, %v9766_v18  ;;  %v9798_v38 = vmul.f32 %v9782_v27, %v9774_v48  ;;  %10000 = vrot.lane.b32.xlu1 %v18725_v0, %s19386_s2  ;;  %9998 = vrot.lane.b32.xlu0 %v18727_v50, %s19386_s2  ;;  %v9762_v41 = vperm.slane %v9760_v7, 0 }
0x1735   : > { %v9756_v35 = vperm.slane %v9754_v19, 0  ;;  %v9759_v16 = vperm.slane %v9757_v10, 0 }
0x1736   : > { %v9804_v53 = vpack.c.bf16 %v9790_v3, %v9789_v47  ;;  %v9808_v6 = vpack.c.bf16 %v9798_v38, %v9797_v21  ;;  %v9753_v38 = vperm.slane %v9751_v13, 0 }
0x1738   : > { %v9596_v24 = vpop.permute.xlu1 %9595  ;;  %v9861_v27 = vunpack.c.l.b16 %v9804_v53  ;;  %v9869_v43 = vunpack.c.l.b16 %v9808_v6 }
0x1739   : > { %v9604_v63 = vsel %vm1093_vm1, %v18666_v17, %v9596_v24  ;;  %v9605_v30 = vsel %vm1093_vm1, %v9596_v24, %v9598_v62  ;;  %v9710_v17 = vpop.permute.xlu0 %9709 }
0x173a   : > { %v9655_v18 = vunpack.c.l.bf16 %v9604_v63  ;;  %v9656_v48 = vunpack.c.l.bf16 %v9605_v30  ;;  %v9663_v4 = vunpack.c.h.bf16 %v9604_v63  ;;  %v9664_v58 = vunpack.c.h.bf16 %v9605_v30 }
0x173b   : > { %v18736_v47 = vpack.c.b16 %v9869_v43, %v9861_v27  ;;  %v9862_v63 = vunpack.c.h.b16 %v9804_v53  ;;  %v9870_v30 = vunpack.c.h.b16 %v9808_v6  ;;  %v9785_v53 = vunpack.c.l.bf16 %v9759_v16 }
0x173c   : > { %v9679_v21 = vmul.f32 %v9671_v34, %v9655_v18  ;;  %v9680_v5 = vmul.f32 %v9672_v60, %v9656_v48  ;;  %v9687_v44 = vmul.f32 %v9671_v34, %v9663_v4  ;;  %v9688_v3 = vmul.f32 %v9672_v60, %v9664_v58  ;;  %9901 = vrot.lane.b32.xlu1 %v18725_v0, %s19388_s3 }
0x173d   : > { %9927 = vrot.lane.b32.xlu2 %v18736_v47, %s19388_s3  ;;  %10026 = vrot.lane.b32.xlu0 %v18736_v47, %s19386_s2  ;;  %v9717_v58 = vsel %vm1191_vm0, %v9706_v46, %v18664_v9  ;;  %v9718_v60 = vsel %vm1191_vm0, %v18664_v9, %v9710_v17  ;;  %v9783_v18 = vunpack.c.l.bf16 %v9753_v38  ;;  %v9784_v48 = vunpack.c.l.bf16 %v9756_v35 }
0x173e   : > { %v9692_v62 = vpack.c.bf16 %v9680_v5, %v9679_v21  ;;  %v9696_v24 = vpack.c.bf16 %v9688_v3, %v9687_v44  ;;  %v9768_v6 = vunpack.c.l.bf16 %v9718_v60  ;;  %v9776_v7 = vunpack.c.h.bf16 %v9718_v60 }
0x173f   : > { %v9786_v21 = vunpack.c.l.bf16 %v9762_v41  ;;  %v18750_v5 = vpack.c.b16 %v9870_v30, %v9862_v63  ;;  %v9767_v46 = vunpack.c.l.bf16 %v9717_v58  ;;  %v9775_v44 = vunpack.c.h.bf16 %v9717_v58 }
0x1740   : > { %v9712_v4 = vpop.permute.xlu1 %9711  ;;  %v9825_v13 = vunpack.c.l.b16 %v9692_v62  ;;  %v9826_v34 = vunpack.c.h.b16 %v9692_v62  ;;  %v9833_v27 = vunpack.c.l.b16 %v9696_v24  ;;  %v9834_v43 = vunpack.c.h.b16 %v9696_v24 }
0x1741   : > { %v9719_v19 = vsel %vm1191_vm0, %v9710_v17, %v9712_v4  ;;  %v9728_v10 = vsel %vm1191_vm0, %v9712_v4, 0  ;;  %v9792_v38 = vmul.f32 %v9784_v48, %v9768_v6  ;;  %v9800_v35 = vmul.f32 %v9784_v48, %v9776_v7 }
0x1742   : > { %v9769_v3 = vunpack.c.l.bf16 %v9719_v19  ;;  %v9770_v62 = vunpack.c.l.bf16 %v9728_v10  ;;  %v9777_v57 = vunpack.c.h.bf16 %v9719_v19  ;;  %v9778_v9 = vunpack.c.h.bf16 %v9728_v10 }
0x1743   : > { %v18754_v17 = vpack.c.b16 %v9833_v27, %v9825_v13  ;;  %v18756_v24 = vpack.c.b16 %v9834_v43, %v9826_v34  ;;  %v9791_v63 = vmul.f32 %v9783_v18, %v9767_v46  ;;  %v9799_v30 = vmul.f32 %v9783_v18, %v9775_v44 }
0x1744   : > { %v9793_v41 = vmul.f32 %v9785_v53, %v9769_v3  ;;  %v9794_v4 = vmul.f32 %v9786_v21, %v9770_v62  ;;  %v9801_v58 = vmul.f32 %v9785_v53, %v9777_v57  ;;  %v9802_v60 = vmul.f32 %v9786_v21, %v9778_v9 }
0x1745   : > { %10028 = vrot.lane.b32.xlu2 %v18750_v5, %s19386_s2  ;;  %9929 = vrot.lane.b32.xlu0 %v18750_v5, %s19388_s3  ;;  %v9805_v34 = vpack.c.bf16 %v9792_v38, %v9791_v63  ;;  %v9809_v27 = vpack.c.bf16 %v9800_v35, %v9799_v30  ;;  %v10090_v35 = vld [vmem:[%s19389_s4] sm:$0xff]  ;;  %s19402_s4 = sshll.u32 %s19404_s16, 5 }
0x1746   : > { %10002 = vrot.lane.b32.xlu1 %v18754_v17, %s19386_s2  ;;  %v9806_v43 = vpack.c.bf16 %v9794_v4, %v9793_v41  ;;  %v9810_v19 = vpack.c.bf16 %v9802_v60, %v9801_v58 }
0x1747   : > { %v9863_v10 = vunpack.c.l.b16 %v9805_v34  ;;  %v9871_v18 = vunpack.c.l.b16 %v9809_v27  ;;  %v9864_v6 = vunpack.c.h.b16 %v9805_v34  ;;  %v9872_v7 = vunpack.c.h.b16 %v9809_v27 }
0x1748   : > { %v18760_v16 = vpop.permute.xlu1 %10018  ;;  %v9865_v57 = vunpack.c.l.b16 %v9806_v43  ;;  %v9873_v48 = vunpack.c.l.b16 %v9810_v19  ;;  %v9866_v46 = vunpack.c.h.b16 %v9806_v43  ;;  %v9874_v44 = vunpack.c.h.b16 %v9810_v19 }
0x1749   : > { %v18767_v13 = vsel %vm1437_vm3, %v18689_v20, %v18760_v16  ;;  %v18775_v53 = vpack.c.b16 %v9871_v18, %v9863_v10  ;;  %v18785_v21 = vpack.c.b16 %v9872_v7, %v9864_v6 }
0x174a   : > { %v18779_v20 = vpack.c.b16 %v9873_v48, %v9865_v57  ;;  %v18793_v3 = vpack.c.b16 %v9874_v44, %v9866_v46 }
0x174d   : > { %9899 = vrot.lane.b32.xlu2 %v18727_v50, %s19388_s3  ;;  %9917 = vrot.lane.b32.xlu0 %v18556_v14, %s19388_s3 }
0x174e   : > { %10004 = vrot.lane.b32.xlu1 %v18756_v24, %s19386_s2 }
0x1755   : > { %10030 = vrot.lane.b32.xlu2 %v18775_v53, %s19386_s2  ;;  %9931 = vrot.lane.b32.xlu0 %v18775_v53, %s19388_s3 }
0x1756   : > { %10034 = vrot.lane.b32.xlu1 %v18779_v20, %s19386_s2 }
0x175d   : > { %9933 = vrot.lane.b32.xlu2 %v18785_v21, %s19388_s3  ;;  %10032 = vrot.lane.b32.xlu0 %v18785_v21, %s19386_s2 }
0x175e   : > { %9919 = vrot.lane.b32.xlu1 %v18590_v49, %s19388_s3  ;;  %v9993_v62 = vpop.permute.xlu2 %9992 }
0x1765   : > { %9935 = vrot.lane.b32.xlu2 %v18779_v20, %s19388_s3  ;;  %9937 = vrot.lane.b32.xlu0 %v18793_v3, %s19388_s3 }
0x1766   : > { %9905 = vrot.lane.b32.xlu1 %v18756_v24, %s19388_s3 }
0x176d   : > { %9921 = vrot.lane.b32.xlu2 %v18598_v22, %s19388_s3  ;;  %9903 = vrot.lane.b32.xlu0 %v18754_v17, %s19388_s3 }
0x176e   : > { %v9995_v9 = vpop.permute.xlu2 %9994 }
0x176f   : > { %v10039_v38 = vsel %vm1437_vm3, %v9993_v62, %v9995_v9 }
0x1770   : > { %10132 = vmatpush.bf16.msrb.mxu1 %v10039_v38 }
0x1774   : > { %10133 = vmatpush.bf16.msrb.mxu1 %v18671_v39  ;;  %v18816_v39 = vpop.permute.xlu0 %10020 }
0x1775   : > { %10036 = vrot.lane.b32.xlu2 %v18793_v3, %s19386_s2  ;;  %10093 = vperm.xlu0 %15260, %v10090_v35  }
0x1776   : > { %v9991_v63 = vpop.permute.xlu1 %9990 }
0x1777   : > { %v10038_v30 = vsel %vm1437_vm3, %v9991_v63, %v9993_v62  ;;  %v9997_v41 = vpop.permute.xlu2 %9996 }
0x1778   : > { %10106 = vmatpush.bf16.msra.mxu3 %v10038_v30  ;;  %10134 = vmatpush.bf16.msrb.mxu1 %v18508_v42 }
0x177c   : > { %10107 = vmatpush.bf16.msra.mxu3 %v18673_v56  ;;  %10135 = vmatpush.bf16.msrb.mxu1 %v18631_v15  ;;  %v10089_v56 = vld [vmem:[%s19390_s5] sm:$0xff]  ;;  %s19401_s5 = sld [smem:[#allocation21_spill]] }
0x177d   : > { %v10097_v15 = vunpack.c.l.b16 %v10089_v56 }
0x177e   : > { %v9892_v4 = vpop.permute.xlu1 %9891 }
0x177f   : > { %v10025_v58 = vpop.permute.xlu2 %10024  ;;  %v18830_v18 = vpack.c.b16 %v10097_v15, %v10097_v15  ;;  %v10051_v15 = vsel %vm1437_vm3, %v18760_v16, %v18816_v39 }
0x1780   : > { %10108 = vmatpush.bf16.msra.mxu3 %v18512_v25  ;;  %v9946_v25 = vsel %vm1377_vm4, %v18619_v26, %v18627_v8 }
0x1784   : > { %10109 = vmatpush.bf16.msra.mxu3 %v18633_v59  ;;  %v10098_v59 = vunpack.c.h.b16 %v10089_v56 }
0x1786   : > { %v9894_v60 = vpop.permute.xlu1 %9893  ;;  %v18836_v6 = vpack.c.b16 %v10098_v59, %v10098_v59 }
0x1787   : > { %v18818_v34 = vpop.permute.xlu2 %9895  ;;  %v9939_v48 = vsel %vm1377_vm4, %v9892_v4, %v9894_v60 }
0x178e   : > { %v9926_v27 = vpop.permute.xlu0 %9925  ;;  %v9924_v43 = vpop.permute.xlu1 %9923 }
0x178f   : > { %14464 = vmatpush.bf16.msk.msra.mxu3 %vm15881_vm6, %v9924_v43  ;;  %v9953_v42 = vsel %vm1377_vm4, %v9924_v43, %v9926_v27 }
0x1790   : > { %10136 = vmatpush.bf16.msrb.mxu1 %v9953_v42 }
0x1793   : > { %14466 = vmatpush.bf16.msk.msra.mxu3 %vm15881_vm6, %v18619_v26  ;;  %v10040_v26 = vsel %vm1437_vm3, %v9995_v9, %v9997_v41 }
0x1794   : > { %10137 = vmatpush.bf16.msrb.mxu1 %v9946_v25  ;;  %v10084_v25 = vsel %vm1437_vm3, %v18816_v39, 0 }
0x1796   : > { %v10023_v10 = vpop.permute.xlu0 %10022 }
0x1797   : > { %v9928_v19 = vpop.permute.xlu2 %9927  ;;  %v10052_v57 = vsel %vm1437_vm3, %v10023_v10, %v10025_v58  ;;  %14468 = vmatpush.bf16.msk.msra.mxu3 %vm15881_vm6, %v9892_v4 }
0x1798   : > { %10125 = vmatpush.bf16.msrb.mxu0 %v10052_v57  ;;  %10138 = vmatpush.bf16.msrb.mxu1 %v9939_v48  ;;  %v9954_v62 = vsel %vm1377_vm4, %v9926_v27, %v9928_v19 }
0x179a   : > { %10113 = vmatmul.bf16.vlgmr.msra.gmra.mxu3 %v18830_v18 }
0x179b   : > { %10183 = vmatpush.bf16.msrb.mxu3 %v18697_v1  ;;  %10139 = vmatmul.bf16.vlgmr.msrb.gmra.mxu1 %v18830_v18 }
0x179c   : > { %10157 = vmatpush.bf16.msra.mxu0 %v18669_v36 }
0x179d   : > { %14469 = vmatmul.msk.bf16.vlgmr.msrb.gmra.mxu0 %vm3423_vm8, %v18836_v6 }
0x179e   : > { %v18845_v7 = vpop.permute.xlu0 %9897 }
0x179f   : > { %v10029_v8 = vpop.permute.xlu2 %10028  ;;  %v9941_v4 = vsel %vm1377_vm4, %v18818_v34, %v18845_v7 }
0x17a0   : > { %10158 = vmatpush.bf16.msra.mxu0 %v10040_v26 }
0x17a4   : > { %10159 = vmatpush.bf16.msra.mxu0 %v18736_v47 }
0x17a6   : > { %v10001_v36 = vpop.permute.xlu1 %10000  ;;  %v9999_v46 = vpop.permute.xlu0 %9998 }
0x17a7   : > { %v18849_v1 = vpop.permute.xlu2 %9899  ;;  %v10041_v44 = vsel %vm1437_vm3, %v9997_v41, %v9999_v46  ;;  %v10042_v30 = vsel %vm1437_vm3, %v9999_v46, %v10001_v36 }
0x17a8   : > { %10160 = vmatpush.bf16.msra.mxu0 %v18532_v23  ;;  %10184 = vmatpush.bf16.msrb.mxu3 %v10041_v44 }
0x17ac   : > { %10161 = vmatpush.bf16.msra.mxu0 %v18660_v61  ;;  %10185 = vmatpush.bf16.msrb.mxu3 %v18750_v5  ;;  %v9940_v61 = vsel %vm1377_vm4, %v9894_v60, %v18818_v34 }
0x17ae   : > { %v18855_v38 = vpop.permute.xlu1 %9901 }
0x17af   : > { %v10031_v9 = vpop.permute.xlu2 %10030  ;;  %v10027_v47 = vpop.permute.xlu0 %10026 }
0x17b0   : > { %10162 = vmatpush.bf16.msra.mxu0 %v9954_v62  ;;  %v10055_v23 = vsel %vm1437_vm3, %v10029_v8, %v10031_v9  ;;  %v10053_v35 = vsel %vm1437_vm3, %v10025_v58, %v10027_v47  ;;  %v10054_v63 = vsel %vm1437_vm3, %v10027_v47, %v10029_v8  ;;  %10186 = vmatpush.bf16.msrb.mxu3 %v18548_v12 }
0x17b1   : > { %10203 = vmatpush.bf16.msra.mxu1 %v10055_v23  ;;  %10151 = vmatpush.bf16.msrb.mxu2 %v10053_v35 }
0x17b4   : > { %10163 = vmatpush.bf16.msra.mxu0 %v18651_v28  ;;  %14470 = vmatmul.msk.bf16.vlgmr.msrb.gmra.mxu2 %vm3423_vm8, %v18836_v6 }
0x17b5   : > { %10177 = vmatpush.bf16.msra.mxu2 %v10054_v63  ;;  %10235 = vmatpush.bf16.msrb.mxu1 %v18767_v13 }
0x17b6   : > { %14472 = vmatmul.msk.bf16.vlgmr.msra.gmra.mxu1 %vm3423_vm8, %v18836_v6  ;;  %10187 = vmatpush.bf16.msrb.mxu3 %v18675_v54 }
0x17b7   : > { %v18871_v12 = vpop.permute.xlu2 %9933  ;;  %v9930_v28 = vpop.permute.xlu0 %9929 }
0x17b8   : > { %10164 = vmatpush.bf16.msra.mxu0 %v9940_v61  ;;  %v10003_v5 = vpop.permute.xlu1 %10002  ;;  %v9955_v13 = vsel %vm1377_vm4, %v9928_v19, %v9930_v28 }
0x17b9   : > { %10209 = vmatpush.bf16.msrb.mxu2 %v18701_v29  ;;  %v10043_v41 = vsel %vm1437_vm3, %v10001_v36, %v10003_v5 }
0x17ba   : > { %10188 = vmatpush.bf16.msrb.mxu3 %v9955_v13  ;;  %10236 = vmatpush.bf16.msrb.mxu1 %v10043_v41 }
0x17bb   : > { %10165 = vmatmul.bf16.vlgmr.msra.gmra.mxu0 %v18830_v18 }
0x17bd   : > { %10210 = vmatpush.bf16.msrb.mxu2 %v10042_v30 }
0x17be   : > { %10189 = vmatpush.bf16.msrb.mxu3 %v18694_v52  ;;  %10237 = vmatpush.bf16.msrb.mxu1 %v18785_v21 }
0x17bf   : > { %v9936_v54 = vpop.permute.xlu2 %9935  ;;  %v9918_v29 = vpop.permute.xlu0 %9917 }
0x17c0   : > { %v10005_v52 = vpop.permute.xlu1 %10004 }
0x17c1   : > { %10211 = vmatpush.bf16.msrb.mxu2 %v18775_v53  ;;  %v10044_v59 = vsel %vm1437_vm3, %v10003_v5, %v10005_v52  ;;  %v10081_v16 = vsel %vm1437_vm3, %v10005_v52, 0 }
0x17c2   : > { %10190 = vmatpush.bf16.msrb.mxu3 %v9941_v4  ;;  %10238 = vmatpush.bf16.msrb.mxu1 %v18556_v14  ;;  %v9949_v14 = vsel %vm1377_vm4, %v18683_v51, %v18715_v55  ;;  %v9942_v51 = vsel %vm1377_vm4, %v18845_v7, %v18849_v1 }
0x17c4   : > { %14471 = vmatmul.msk.bf16.vlgmr.msra.gmra.mxu2 %vm3423_vm8, %v18836_v6 }
0x17c5   : > { %10212 = vmatpush.bf16.msrb.mxu2 %v18566_v32  ;;  %10191 = vmatmul.bf16.vlgmr.msrb.gmra.mxu3 %v18830_v18  ;;  %v9950_v32 = vsel %vm1377_vm4, %v18715_v55, %v9918_v29  ;;  %v9943_v55 = vsel %vm1377_vm4, %v18849_v1, %v18855_v38 }
0x17c6   : > { %10239 = vmatpush.bf16.msrb.mxu1 %v18725_v0 }
0x17c7   : > { %v9922_v53 = vpop.permute.xlu2 %9921  ;;  %v9932_v21 = vpop.permute.xlu0 %9931 }
0x17c8   : > { %v9956_v58 = vsel %vm1377_vm4, %v9930_v28, %v9932_v21  ;;  %v9957_v60 = vsel %vm1377_vm4, %v9932_v21, %v18871_v12  ;;  %v10035_v0 = vpop.permute.xlu1 %10034 }
0x17c9   : > { %10213 = vmatpush.bf16.msrb.mxu2 %v18727_v50 }
0x17ca   : > { %10240 = vmatpush.bf16.msrb.mxu1 %v9957_v60 }
0x17cd   : > { %10214 = vmatpush.bf16.msrb.mxu2 %v9956_v58 }
0x17ce   : > { %10241 = vmatpush.bf16.msrb.mxu1 %v9950_v32 }
0x17cf   : > { %v10037_v50 = vpop.permute.xlu2 %10036  ;;  %v10033_v34 = vpop.permute.xlu0 %10032 }
0x17d0   : > { %v10056_v27 = vsel %vm1437_vm3, %v10031_v9, %v10033_v34  ;;  %v10057_v43 = vsel %vm1437_vm3, %v10033_v34, %v10035_v0  ;;  %v10058_v42 = vsel %vm1437_vm3, %v10035_v0, %v10037_v50  ;;  %v10087_v56 = vsel %vm1437_vm3, %v10037_v50, 0  ;;  %v9920_v19 = vpop.permute.xlu1 %9919 }
0x17d1   : > { %10215 = vmatpush.bf16.msrb.mxu2 %v9949_v14  ;;  %10229 = vmatpush.bf16.msrb.mxu0 %v10056_v27 }
0x17d2   : > { %10255 = vmatpush.bf16.msra.mxu3 %v10057_v43  ;;  %10242 = vmatpush.bf16.msrb.mxu1 %v9943_v55 }
0x17d4   : > { %14473 = vmatmul.msk.bf16.vlgmr.msrb.gmra.mxu0 %vm3423_vm8, %v18836_v6 }
0x17d5   : > { %10216 = vmatpush.bf16.msrb.mxu2 %v9942_v51  ;;  %10261 = vmatpush.bf16.msra.mxu0 %v10051_v15 }
0x17d6   : > { %10287 = vmatpush.bf16.msrb.mxu3 %v10084_v25  ;;  %10307 = vmatpush.bf16.msra.mxu1 %v10087_v56 }
0x17d7   : > { %10243 = vmatmul.bf16.vlgmr.msrb.gmra.mxu1 %v18830_v18  ;;  %14474 = vmatmul.msk.bf16.vlgmr.msra.gmra.mxu3 %vm3423_vm8, %v18836_v6  ;;  %v9938_v39 = vpop.permute.xlu0 %9937 }
0x17d8   : > { %10217 = vmatmul.bf16.vlgmr.msrb.gmra.mxu2 %v18830_v18 }
0x17d9   : > { %10281 = vmatpush.bf16.msra.mxu2 %v10058_v42  ;;  %10262 = vmatpush.bf16.msra.mxu0 %v10044_v59 }
0x17da   : > { %10288 = vmatpush.bf16.msrb.mxu3 %v10081_v16 }
0x17dd   : > { %10263 = vmatpush.bf16.msra.mxu0 %v18779_v20  ;;  %v9958_v20 = vsel %vm1377_vm4, %v18871_v12, %v9936_v54 }
0x17de   : > { %10289 = vmatpush.bf16.msrb.mxu3 %v18793_v3 }
0x17df   : > { %v9904_v3 = vpop.permute.xlu0 %9903 }
0x17e0   : > { %v9944_v10 = vsel %vm1377_vm4, %v18855_v38, %v9904_v3 }
0x17e1   : > { %10264 = vmatpush.bf16.msra.mxu0 %v18590_v49  ;;  %v9959_v49 = vsel %vm1377_vm4, %v9936_v54, %v9938_v39 }
0x17e2   : > { %10290 = vmatpush.bf16.msrb.mxu3 %v18598_v22  ;;  %v9951_v22 = vsel %vm1377_vm4, %v9918_v29, %v9920_v19 }
0x17e5   : > { %10265 = vmatpush.bf16.msra.mxu0 %v18754_v17  ;;  %v9952_v17 = vsel %vm1377_vm4, %v9920_v19, %v9922_v53 }
0x17e6   : > { %10291 = vmatpush.bf16.msrb.mxu3 %v18756_v24  ;;  %v9906_v24 = vpop.permute.xlu1 %9905 }
0x17e7   : > { %14476 = vmatmul.msk.bf16.vlgmr.msra.gmra.mxu1 %vm3423_vm8, %v18836_v6  ;;  %v9945_v57 = vsel %vm1377_vm4, %v9904_v3, %v9906_v24  ;;  %v18941_v36 = vpop.permute.xlu0 %10093 }
0x17e8   : > { %14475 = vmatmul.msk.bf16.vlgmr.msra.gmra.mxu2 %vm3423_vm8, %v18836_v6 }
0x17e9   : > { %10266 = vmatpush.bf16.msra.mxu0 %v9958_v20 }
0x17ea   : > { %10292 = vmatpush.bf16.msrb.mxu3 %v9959_v49 }
0x17ed   : > { %10267 = vmatpush.bf16.msra.mxu0 %v9951_v22 }
0x17ee   : > { %10293 = vmatpush.bf16.msrb.mxu3 %v9952_v17 }
0x17f1   : > { %10268 = vmatpush.bf16.msra.mxu0 %v9944_v10 }
0x17f2   : > { %10294 = vmatpush.bf16.msrb.mxu3 %v9945_v57 }
0x17f4   : > { %10269 = vmatmul.bf16.vlgmr.msra.gmra.mxu0 %v18830_v18 }
0x17f5   : > { %10295 = vmatmul.bf16.vlgmr.msrb.gmra.mxu3 %v18830_v18 }
0x1818   : > { %v10140_v48 = vpop.f32.mrf.mxu1 }
0x1819   : > { %v10141_v62 = vadd.f32 %v10140_v48, %v18941_v36 }
0x181a   : > { %v10127_v6 = vpop.f32.mrf.mxu0 }
0x181d   : > { %v10114_v26 = vpop.f32.mrf.mxu3 }
0x181e   : > { %v10115_v44 = vadd.f32 %v10114_v26, %v18941_v36 }
0x1820   : > { %v10142_v7 = vpop.f32.mrf.mxu1  ;;  %v10128_v9 = vadd.f32 %v10127_v6, %v10115_v44 }
0x1822   : > { %v10129_v8 = vpop.f32.mrf.mxu0  ;;  %v10313_v63 = vmax.f32 %v10128_v9, 0.0 }
0x1825   : > { %v10116_v1 = vpop.f32.mrf.mxu3 }
0x1833   : > { %v10205_v46 = vpop.f32.mrf.mxu1 }
0x1837   : > { %v10153_v47 = vpop.f32.mrf.mxu2 }
0x1838   : > { %v10166_v38 = vpop.f32.mrf.mxu0  ;;  %v10154_v23 = vadd.f32 %v10153_v47, %v10141_v62 }
0x1839   : > { %v10167_v54 = vadd.f32 %v10166_v38, %v18941_v36 }
0x183a   : > { %v10314_v18 = vmax.f32 %v10154_v23, 0.0 }
0x183b   : > { %v10207_v35 = vpop.f32.mrf.mxu1 }
0x183c   : > { %v10321_v61 = vpack.c.bf16 %v10314_v18, %v10313_v63 }
0x183e   : > { %v10329_v12 = vunpack.c.l.b16 %v10321_v61  ;;  %v10330_v28 = vunpack.c.h.b16 %v10321_v61 }
0x183f   : > { %v10155_v13 = vpop.f32.mrf.mxu2 }
0x1840   : > { %v10168_v5 = vpop.f32.mrf.mxu0  ;;  %v18945_v30 = vpack.c.b16 %v10329_v12, %v10329_v12  ;;  %v18947_v41 = vpack.c.b16 %v10330_v28, %v10330_v28 }
0x1842   : > { %10400 = vrot.lane.b32.xlu2 %v18947_v41, %s19378_s1  ;;  %10398 = vrot.lane.b32.xlu1 %v18945_v30, %s19378_s1 }
0x1847   : > { %v10179_v29 = vpop.f32.mrf.mxu2 }
0x1848   : > { %v10192_v4 = vpop.f32.mrf.mxu3  ;;  %v10180_v52 = vadd.f32 %v10179_v29, %v10167_v54 }
0x1849   : > { %v10193_v53 = vadd.f32 %v10192_v4, %v18941_v36 }
0x184a   : > { %10347 = vrot.lane.b32.xlu2 %v18947_v41, %s19387_s0  ;;  %10345 = vrot.lane.b32.xlu1 %v18945_v30, %s19387_s0  ;;  %v10315_v58 = vmax.f32 %v10180_v52, 0.0 }
0x184b   : > { %v10206_v21 = vadd.f32 %v10205_v46, %v10193_v53 }
0x184d   : > { %v10316_v60 = vmax.f32 %v10206_v21, 0.0 }
0x184f   : > { %v10322_v14 = vpack.c.bf16 %v10316_v60, %v10315_v58  ;;  %v10181_v32 = vpop.f32.mrf.mxu2 }
0x1850   : > { %v10194_v50 = vpop.f32.mrf.mxu3 }
0x1851   : > { %v10331_v0 = vunpack.c.l.b16 %v10322_v14  ;;  %v10332_v34 = vunpack.c.h.b16 %v10322_v14  ;;  %v10231_v56 = vpop.f32.mrf.mxu0 }
0x1853   : > { %v18959_v43 = vpack.c.b16 %v10332_v34, %v10332_v34  ;;  %v18961_v42 = vpack.c.b16 %v10331_v0, %v10331_v0 }
0x1854   : > { %v10244_v27 = vpop.f32.mrf.mxu1 }
0x1855   : > { %10351 = vrot.lane.b32.xlu2 %v18959_v43, %s19387_s0  ;;  %10349 = vrot.lane.b32.xlu1 %v18961_v42, %s19387_s0  ;;  %v10245_v51 = vadd.f32 %v10244_v27, %v18941_v36 }
0x1856   : > { %10402 = vrot.lane.b32.xlu0 %v18961_v42, %s19378_s1 }
0x1859   : > { %v10233_v19 = vpop.f32.mrf.mxu0 }
0x185a   : > { %v10257_v25 = vpop.f32.mrf.mxu3 }
0x185b   : > { %v10218_v55 = vpop.f32.mrf.mxu2  ;;  %v10258_v59 = vadd.f32 %v10257_v25, %v10245_v51 }
0x185c   : > { %v10219_v15 = vadd.f32 %v10218_v55, %v18941_v36  ;;  %v10246_v16 = vpop.f32.mrf.mxu1 }
0x185d   : > { %v10318_v20 = vmax.f32 %v10258_v59, 0.0 }
0x185e   : > { %v10232_v39 = vadd.f32 %v10231_v56, %v10219_v15  ;;  %10404 = vrot.lane.b32.xlu0 %v18959_v43, %s19378_s1 }
0x1860   : > { %v10317_v49 = vmax.f32 %v10232_v39, 0.0 }
0x1862   : > { %v10323_v22 = vpack.c.bf16 %v10318_v20, %v10317_v49  ;;  %v10259_v10 = vpop.f32.mrf.mxu3 }
0x1863   : > { %v10220_v3 = vpop.f32.mrf.mxu2 }
0x1864   : > { %v10333_v17 = vunpack.c.l.b16 %v10323_v22  ;;  %v10334_v24 = vunpack.c.h.b16 %v10323_v22  ;;  %v10309_v57 = vpop.f32.mrf.mxu1 }
0x1866   : > { %v18973_v48 = vpack.c.b16 %v10333_v17, %v10333_v17  ;;  %v18975_v6 = vpack.c.b16 %v10334_v24, %v10334_v24 }
0x1868   : > { %10408 = vrot.lane.b32.xlu2 %v18975_v6, %s19378_s1  ;;  %10353 = vrot.lane.b32.xlu0 %v18973_v48, %s19387_s0 }
0x1869   : > { %10406 = vrot.lane.b32.xlu1 %v18973_v48, %s19378_s1 }
0x186b   : > { %v10283_v26 = vpop.f32.mrf.mxu2 }
0x186c   : > { %v10311_v8 = vpop.f32.mrf.mxu1 }
0x1871   : > { %10355 = vrot.lane.b32.xlu1 %v18975_v6, %s19387_s0  ;;  %v10270_v7 = vpop.f32.mrf.mxu0 }
0x1872   : > { %v10271_v46 = vadd.f32 %v10270_v7, %v18941_v36 }
0x1873   : > { %v10285_v1 = vpop.f32.mrf.mxu2 }
0x1874   : > { %v10284_v62 = vadd.f32 %v10283_v26, %v10271_v46 }
0x1876   : > { %v10319_v23 = vmax.f32 %v10284_v62, 0.0 }
0x1878   : > { %v10296_v44 = vpop.f32.mrf.mxu3 }
0x1879   : > { %v10297_v9 = vadd.f32 %v10296_v44, %v18941_v36  ;;  %v10272_v38 = vpop.f32.mrf.mxu0 }
0x187b   : > { %v10310_v47 = vadd.f32 %v10309_v57, %v10297_v9 }
0x187d   : > { %v10320_v35 = vmax.f32 %v10310_v47, 0.0 }
0x187f   : > { %v10324_v63 = vpack.c.bf16 %v10320_v35, %v10319_v23 }
0x1880   : > { %v10298_v18 = vpop.f32.mrf.mxu3 }
0x1881   : > { %v10335_v61 = vunpack.c.l.b16 %v10324_v63  ;;  %v10336_v12 = vunpack.c.h.b16 %v10324_v63  ;;  %v19391_v63 = vld [vmem:[#allocation24_spill] sm:$0xff] }
0x1883   : > { %v18987_v28 = vpack.c.b16 %v10336_v12, %v10336_v12  ;;  %v18989_v5 = vpack.c.b16 %v10335_v61, %v10335_v61  ;;  %v19392_v61 = vld [vmem:[#allocation25_spill] sm:$0xff] }
0x1885   : > { %10359 = vrot.lane.b32.xlu1 %v18987_v28, %s19387_s0  ;;  %10412 = vrot.lane.b32.xlu2 %v18987_v28, %s19378_s1 }
0x1886   : > { %10410 = vrot.lane.b32.xlu0 %v18989_v5, %s19378_s1  ;;  %s1042_s1 = scalar_lea.vmem %s15492_s24, %s19402_s4 }
0x188e   : > { %10357 = vrot.lane.b32.xlu0 %v18989_v5, %s19387_s0 }
0x189c   : > { %v10401_v36 = vpop.permute.xlu2 %10400 }
0x18a4   : > { %v10348_v54 = vpop.permute.xlu2 %10347 }
0x18af   : > { %v10352_v34 = vpop.permute.xlu2 %10351 }
0x18b4   : > { %v10399_v13 = vpop.permute.xlu1 %10398 }
0x18b5   : > { %v10414_v32 = vsel %vm1191_vm0, %v10399_v13, %v10401_v36 }
0x18b6   : > { %v10431_v55 = vunpack.c.l.bf16 %v10414_v32  ;;  %v19393_v32 = vld [vmem:[#allocation26_spill] sm:$0xff] }
0x18bc   : > { %v10346_v29 = vpop.permute.xlu1 %10345 }
0x18bd   : > { %v10361_v4 = vsel %vm1093_vm1, %v10346_v29, %v10348_v54  ;;  %v10376_v52 = vsel %vm1093_vm1, 0, %v10346_v29 }
0x18be   : > { %v10378_v53 = vunpack.c.l.bf16 %v10376_v52  ;;  %v10379_v21 = vunpack.c.l.bf16 %v10361_v4 }
0x18c0   : > { %v10386_v58 = vmul.f32 %v10378_v53, %v15660_v40  ;;  %v10387_v60 = vmul.f32 %v10379_v21, %v15675_v45 }
0x18c2   : > { %v10394_v14 = vpack.c.bf16 %v10387_v60, %v10386_v58 }
0x18c4   : > { %v10455_v50 = vunpack.c.l.b16 %v10394_v14  ;;  %v10456_v0 = vunpack.c.h.b16 %v10394_v14 }
0x18c6   : > { %v10464_v56 = vpack.c.b16 %v10456_v0, %v10456_v0  ;;  %v10463_v51 = vpack.c.b16 %v10455_v50, %v10455_v50  ;;  %v19394_v0 = vld [vmem:[#allocation27_spill] sm:$0xff] }
0x18c7   : > { %v10350_v27 = vpop.permute.xlu1 %10349 }
0x18c8   : > { %v10362_v15 = vsel %vm1093_vm1, %v10348_v54, %v10350_v27  ;;  %v10363_v25 = vsel %vm1093_vm1, %v10350_v27, %v10352_v34  ;;  %v10403_v59 = vpop.permute.xlu0 %10402  ;;  %v19009_v45 = vsel %vm1312_vm2, %v10464_v56, %v18947_v41  ;;  %v19015_v20 = vsel %vm1312_vm2, %v10463_v51, %v18945_v30 }
0x18c9   : > { %v10380_v16 = vunpack.c.l.bf16 %v10362_v15  ;;  %v10381_v39 = vunpack.c.l.bf16 %v10363_v25  ;;  %v10415_v40 = vsel %vm1191_vm0, %v10401_v36, %v10403_v59  ;;  %10583 = vrot.lane.b32.xlu2 %v19009_v45, %s19386_s2  ;;  %10523 = vrot.lane.b32.xlu0 %v19015_v20, %s19388_s3  ;;  %v10439_v41 = vmul.f32 %v10431_v55, %v15654_v11  ;;  %v10409_v25 = vpop.permute.xlu2 %10408 }
0x18ca   : > { %v10432_v19 = vunpack.c.l.bf16 %v10415_v40  ;;  %10581 = vrot.lane.b32.xlu1 %v19015_v20, %s19386_s2  ;;  %v10639_v46 = vrot.slane %v19015_v20, 4 }
0x18cb   : > { %v10388_v49 = vmul.f32 %v10380_v16, %v15614_v31  ;;  %v10389_v22 = vmul.f32 %v10381_v39, %v15616_v33 }
0x18cc   : > { %v10440_v3 = vmul.f32 %v10432_v19, %v15648_v2 }
0x18cd   : > { %v10395_v17 = vpack.c.bf16 %v10389_v22, %v10388_v49 }
0x18ce   : > { %v10447_v24 = vpack.c.bf16 %v10440_v3, %v10439_v41 }
0x18cf   : > { %v10458_v10 = vunpack.c.h.b16 %v10395_v17  ;;  %v10457_v33 = vunpack.c.l.b16 %v10395_v17 }
0x18d0   : > { %v10475_v57 = vunpack.c.l.b16 %v10447_v24  ;;  %v10476_v30 = vunpack.c.h.b16 %v10447_v24  ;;  %v10405_v26 = vpop.permute.xlu0 %10404 }
0x18d1   : > { %v10466_v8 = vpack.c.b16 %v10458_v10, %v10458_v10  ;;  %v10416_v11 = vsel %vm1191_vm0, %v10403_v59, %v10405_v26 }
0x18d2   : > { %v10483_v31 = vpack.c.b16 %v10475_v57, %v10475_v57  ;;  %v19025_v7 = vpack.c.b16 %v10476_v30, %v10476_v30  ;;  %v10433_v62 = vunpack.c.l.bf16 %v10416_v11  ;;  %v19395_v30 = vld [vmem:[#allocation22_spill] sm:$0xff]  ;;  %v19398_v11 = vld [vmem:[#allocation28_spill] sm:$0xff] }
0x18d3   : > { %v19029_v1 = vsel %vm1312_vm2, %v10466_v8, %v18959_v43  ;;  %v10465_v43 = vpack.c.b16 %v10457_v33, %v10457_v33  ;;  %v19396_v8 = vld [vmem:[#allocation29_spill] sm:$0xff]  ;;  %v19397_v33 = vld [vmem:[#allocation23_spill] sm:$0xff] }
0x18d4   : > { %10597 = vrot.lane.b32.xlu2 %v10483_v31, %s19386_s2  ;;  %10599 = vrot.lane.b32.xlu0 %v19025_v7, %s19386_s2  ;;  %v10647_v2 = vrot.slane %v10483_v31, 4  ;;  %v10441_v18 = vmul.f32 %v10433_v62, %v19391_v63  ;;  %v10642_v60 = vrot.slane %v19029_v1, 4 }
0x18d5   : > { %10587 = vrot.lane.b32.xlu1 %v19029_v1, %s19386_s2  ;;  %v19046_v35 = vsel %vm1312_vm2, %v10465_v43, %v18961_v42 }
0x18d6   : > { %v19041_v44 = vsel %vm1312_vm2, %v10639_v46, %v10647_v2  ;;  %v10641_v14 = vrot.slane %v19046_v35, 4 }
0x18da   : > { %v10354_v47 = vpop.permute.xlu0 %10353 }
0x18db   : > { %v10407_v9 = vpop.permute.xlu1 %10406  ;;  %v10364_v36 = vsel %vm1093_vm1, %v10352_v34, %v10354_v47 }
0x18dc   : > { %v10417_v38 = vsel %vm1191_vm0, %v10405_v26, %v10407_v9  ;;  %10539 = vrot.lane.b32.xlu0 %v10483_v31, %s19388_s3  ;;  %10527 = vrot.lane.b32.xlu2 %v19046_v35, %s19388_s3  ;;  %v10382_v54 = vunpack.c.l.bf16 %v10364_v36  ;;  %v10418_v19 = vsel %vm1191_vm0, %v10407_v9, %v10409_v25 }
0x18dd   : > { %v10434_v23 = vunpack.c.l.bf16 %v10417_v38  ;;  %10585 = vrot.lane.b32.xlu1 %v19046_v35, %s19386_s2  ;;  %v10435_v22 = vunpack.c.l.bf16 %v10418_v19 }
0x18de   : > { %v10390_v50 = vmul.f32 %v10382_v54, %v19393_v32  ;;  %v19399_v32 = vld [vmem:[#allocation30_spill] sm:$0xff] }
0x18df   : > { %v10442_v12 = vmul.f32 %v10434_v23, %v19392_v61  ;;  %v10413_v40 = vpop.permute.xlu2 %10412  ;;  %v10443_v26 = vmul.f32 %v10435_v22, %v19395_v30  ;;  %v10848_v30 = vld [vmem:[%s15487_s19] sm:$0x7] }
0x18e0   : > { %v10429_v49 = vsel %vm1191_vm0, %v10413_v40, 0 }
0x18e1   : > { %v10448_v13 = vpack.c.bf16 %v10442_v12, %v10441_v18  ;;  %v10438_v41 = vunpack.c.l.bf16 %v10429_v49 }
0x18e3   : > { %v10356_v29 = vpop.permute.xlu1 %10355  ;;  %v10477_v4 = vunpack.c.l.b16 %v10448_v13  ;;  %v10478_v42 = vunpack.c.h.b16 %v10448_v13  ;;  %v10446_v31 = vmul.f32 %v10438_v41, %v19396_v8 }
0x18e4   : > { %v10365_v52 = vsel %vm1093_vm1, %v10354_v47, %v10356_v29  ;;  %10529 = vrot.lane.b32.xlu0 %v19029_v1, %s19388_s3 }
0x18e5   : > { %v10383_v53 = vunpack.c.l.bf16 %v10365_v52  ;;  %v10485_v21 = vpack.c.b16 %v10477_v4, %v10477_v4  ;;  %v10486_v58 = vpack.c.b16 %v10478_v42, %v10478_v42 }
0x18e7   : > { %v10391_v34 = vmul.f32 %v10383_v53, %v19394_v0  ;;  %10601 = vrot.lane.b32.xlu2 %v10485_v21, %s19386_s2  ;;  %10603 = vrot.lane.b32.xlu1 %v10486_v58, %s19386_s2  ;;  %v10651_v27 = vrot.slane %v10485_v21, 4  ;;  %v10653_v56 = vrot.slane %v10486_v58, 4  ;;  %v19400_v0 = vld [vmem:[#allocation31_spill] sm:$0xff] }
0x18e9   : > { %v10396_v51 = vpack.c.bf16 %v10391_v34, %v10390_v50  ;;  %v19068_v55 = vsel %vm1312_vm2, %v10641_v14, %v10651_v27  ;;  %v19073_v15 = vsel %vm1312_vm2, %v10642_v60, %v10653_v56 }
0x18eb   : > { %v10459_v59 = vunpack.c.l.b16 %v10396_v51  ;;  %v10460_v3 = vunpack.c.h.b16 %v10396_v51 }
0x18ec   : > { %10543 = vrot.lane.b32.xlu0 %v10485_v21, %s19388_s3 }
0x18ed   : > { %v10467_v16 = vpack.c.b16 %v10459_v59, %v10459_v59  ;;  %v10468_v62 = vpack.c.b16 %v10460_v3, %v10460_v3 }
0x18ef   : > { %10545 = vrot.lane.b32.xlu1 %v10486_v58, %s19388_s3  ;;  %v19079_v39 = vsel %vm1312_vm2, %v10467_v16, %v18973_v48  ;;  %v19095_v12 = vsel %vm1312_vm2, %v10468_v62, %v18975_v6 }
0x18f0   : > { %10589 = vrot.lane.b32.xlu2 %v19079_v39, %s19386_s2  ;;  %v10643_v53 = vrot.slane %v19079_v39, 4  ;;  %v10644_v58 = vrot.slane %v19095_v12, 4 }
0x18f7   : > { %10541 = vrot.lane.b32.xlu1 %v19025_v7, %s19388_s3  ;;  %v10360_v47 = vpop.permute.xlu1 %10359 }
0x18f8   : > { %v10411_v17 = vpop.permute.xlu0 %10410 }
0x18f9   : > { %v10419_v24 = vsel %vm1191_vm0, %v10409_v25, %v10411_v17  ;;  %v10420_v48 = vsel %vm1191_vm0, %v10411_v17, %v10413_v40 }
0x18fa   : > { %v10436_v10 = vunpack.c.l.bf16 %v10419_v24  ;;  %v10437_v57 = vunpack.c.l.bf16 %v10420_v48 }
0x18fc   : > { %v10444_v2 = vmul.f32 %v10436_v10, %v19397_v33  ;;  %v10445_v43 = vmul.f32 %v10437_v57, %v19398_v11 }
0x18fe   : > { %v10449_v9 = vpack.c.bf16 %v10444_v2, %v10443_v26  ;;  %v10450_v38 = vpack.c.bf16 %v10446_v31, %v10445_v43 }
0x1900   : > { %v10358_v23 = vpop.permute.xlu0 %10357  ;;  %v10480_v63 = vunpack.c.h.b16 %v10449_v9  ;;  %v10479_v18 = vunpack.c.l.b16 %v10449_v9  ;;  %v10482_v61 = vunpack.c.h.b16 %v10450_v38  ;;  %v10481_v27 = vunpack.c.l.b16 %v10450_v38 }
0x1901   : > { %v10366_v36 = vsel %vm1093_vm1, %v10356_v29, %v10358_v23  ;;  %v10367_v13 = vsel %vm1093_vm1, %v10358_v23, %v10360_v47 }
0x1902   : > { %v10384_v54 = vunpack.c.l.bf16 %v10366_v36  ;;  %v10385_v4 = vunpack.c.l.bf16 %v10367_v13  ;;  %v10488_v42 = vpack.c.b16 %v10480_v63, %v10480_v63  ;;  %v10487_v52 = vpack.c.b16 %v10479_v18, %v10479_v18 }
0x1903   : > { %v10490_v21 = vpack.c.b16 %v10482_v61, %v10482_v61  ;;  %v10489_v40 = vpack.c.b16 %v10481_v27, %v10481_v27  ;;  %v10649_v36 = vrot.slane %v19025_v7, 4 }
0x1904   : > { %v10392_v50 = vmul.f32 %v10384_v54, %v19399_v32  ;;  %v10393_v34 = vmul.f32 %v10385_v4, %v19400_v0  ;;  %10607 = vrot.lane.b32.xlu0 %v10488_v42, %s19386_s2  ;;  %10605 = vrot.lane.b32.xlu2 %v10487_v52, %s19386_s2  ;;  %v10655_v6 = vrot.slane %v10487_v52, 4  ;;  %v10657_v29 = vrot.slane %v10488_v42, 4 }
0x1905   : > { %10611 = vrot.lane.b32.xlu1 %v10490_v21, %s19386_s2  ;;  %v10661_v24 = vrot.slane %v10490_v21, 4  ;;  %v10659_v48 = vrot.slane %v10489_v40, 4  ;;  %v10640_v54 = vrot.slane %v19009_v45, 4 }
0x1906   : > { %v10397_v56 = vpack.c.bf16 %v10393_v34, %v10392_v50  ;;  %v19109_v51 = vsel %vm1312_vm2, %v10643_v53, %v10655_v6  ;;  %v19114_v25 = vsel %vm1312_vm2, %v10644_v58, %v10657_v29 }
0x1908   : > { %v10461_v59 = vunpack.c.l.b16 %v10397_v56  ;;  %v10462_v16 = vunpack.c.h.b16 %v10397_v56 }
0x190a   : > { %v10470_v19 = vpack.c.b16 %v10462_v16, %v10462_v16  ;;  %v10469_v49 = vpack.c.b16 %v10461_v59, %v10461_v59 }
0x190c   : > { %10591 = vrot.lane.b32.xlu2 %v19095_v12, %s19386_s2  ;;  %10551 = vrot.lane.b32.xlu0 %v10489_v40, %s19388_s3  ;;  %v19121_v22 = vsel %vm1312_vm2, %v10470_v19, %v18987_v28  ;;  %v19125_v41 = vsel %vm1312_vm2, %v10469_v49, %v18989_v5  ;;  %v10703_v5 = vld [vmem:[%s15477_s30] sm:$0xff] }
0x190d   : > { %10553 = vrot.lane.b32.xlu1 %v10490_v21, %s19388_s3  ;;  %v10646_v3 = vrot.slane %v19121_v22, 4  ;;  %v10645_v17 = vrot.slane %v19125_v41, 4 }
0x190f   : > { %v19133_v10 = vsel %vm1312_vm2, %v10646_v3, %v10661_v24  ;;  %v19138_v28 = vsel %vm1312_vm2, %v10645_v17, %v10659_v48 }
0x1914   : > { %10547 = vrot.lane.b32.xlu2 %v10487_v52, %s19388_s3  ;;  %10595 = vrot.lane.b32.xlu0 %v19121_v22, %s19386_s2 }
0x1915   : > { %10531 = vrot.lane.b32.xlu1 %v19079_v39, %s19388_s3 }
0x191c   : > { %10609 = vrot.lane.b32.xlu2 %v10489_v40, %s19386_s2  ;;  %10525 = vrot.lane.b32.xlu0 %v19009_v45, %s19388_s3 }
0x191d   : > { %10593 = vrot.lane.b32.xlu1 %v19125_v41, %s19386_s2 }
0x1923   : > { %v10584_v57 = vpop.permute.xlu2 %10583 }
0x1924   : > { %10535 = vrot.lane.b32.xlu2 %v19125_v41, %s19388_s3  ;;  %10537 = vrot.lane.b32.xlu0 %v19121_v22, %s19388_s3 }
0x1925   : > { %10706 = vperm.xlu1 %15262, %v10703_v5  }
0x192c   : > { %10549 = vrot.lane.b32.xlu2 %v10488_v42, %s19388_s3  ;;  %10533 = vrot.lane.b32.xlu0 %v19095_v12, %s19388_s3  ;;  %v10650_v42 = vsel %vm1312_vm2, %v10640_v54, %v10649_v36 }
0x192e   : > { %v10598_v26 = vpop.permute.xlu2 %10597 }
0x1934   : > { %10851 = vperm.xlu2 %15261, %v10848_v30  }
0x1936   : > { %v19159_v8 = vpop.permute.xlu2 %10527 }
0x193b   : > { %v19161_v31 = vpop.permute.xlu0 %10523 }
0x193c   : > { %v10582_v33 = vpop.permute.xlu1 %10581 }
0x193d   : > { %v10613_v23 = vsel %vm1437_vm3, %v10582_v33, %v10584_v57 }
0x1941   : > { %v10602_v2 = vpop.permute.xlu2 %10601 }
0x1946   : > { %v10600_v11 = vpop.permute.xlu0 %10599 }
0x1947   : > { %v10620_v43 = vsel %vm1437_vm3, %v10598_v26, %v10600_v11  ;;  %v10621_v62 = vsel %vm1437_vm3, %v10600_v11, %v10602_v2  ;;  %v10588_v9 = vpop.permute.xlu1 %10587 }
0x1948   : > { %v10713_v38 = vsel %vm1312_vm2, %v10620_v43, 0  ;;  %v10716_v47 = vsel %vm1312_vm2, %v10621_v62, 0 }
0x1949   : > { %10738 = vmatpush.bf16.msrb.mxu2 %v10713_v38  ;;  %10751 = vmatpush.bf16.msrb.mxu0 %v10716_v47 }
0x194a   : > { %v10590_v52 = vpop.permute.xlu2 %10589 }
0x194b   : > { %v10616_v37 = vsel %vm1437_vm3, %v10588_v9, %v10590_v52 }
0x194d   : > { %10739 = vmatpush.bf16.msrb.mxu2 %v10613_v23 }
0x194e   : > { %v10540_v63 = vpop.permute.xlu0 %10539 }
0x194f   : > { %v10586_v18 = vpop.permute.xlu1 %10585  ;;  %v10580_v13 = vsel %vm1377_vm4, 0, %v10540_v63 }
0x1950   : > { %v10614_v61 = vsel %vm1437_vm3, %v10584_v57, %v10586_v18  ;;  %v10672_v4 = vsel %vm1312_vm2, %v10580_v13, %v10639_v46  ;;  %v10615_v46 = vsel %vm1437_vm3, %v10586_v18, %v10588_v9 }
0x1951   : > { %10740 = vmatpush.bf16.msrb.mxu2 %v19041_v44  ;;  %10752 = vmatpush.bf16.msrb.mxu0 %v10614_v61  ;;  %v19183_v44 = vld [vmem:[%s19401_s5] sm:$0xf] }
0x1955   : > { %10741 = vmatpush.bf16.msrb.mxu2 %v10672_v4  ;;  %10753 = vmatpush.bf16.msrb.mxu0 %v10650_v42 }
0x1956   : > { %v10530_v45 = vpop.permute.xlu0 %10529 }
0x1959   : > { %v10604_v21 = vpop.permute.xlu1 %10603  ;;  %14478 = vmatpush.bf16.msk.msrb.mxu2 %vm15881_vm6, %v19161_v31 }
0x195a   : > { %v10622_v32 = vsel %vm1437_vm3, %v10602_v2, %v10604_v21 }
0x195b   : > { %v10719_v7 = vsel %vm1312_vm2, %v10622_v32, 0 }
0x195c   : > { %10764 = vmatpush.bf16.msrb.mxu1 %v10719_v7  ;;  %14479 = vmatmul.msk.bf16.vlgmr.msrb.gmra.mxu2 %vm1536_vm5, %v19183_v44  ;;  %v10847_v7 = vld [vmem:[%s15482_s14] sm:$0x3] }
0x195e   : > { %v10606_v20 = vpop.permute.xlu2 %10605  ;;  %v10544_v6 = vpop.permute.xlu0 %10543 }
0x195f   : > { %v10623_v50 = vsel %vm1437_vm3, %v10604_v21, %v10606_v20 }
0x1960   : > { %10765 = vmatpush.bf16.msrb.mxu1 %v10615_v46  ;;  %v10722_v0 = vsel %vm1312_vm2, %v10623_v50, 0 }
0x1961   : > { %v10546_v34 = vpop.permute.xlu1 %10545  ;;  %10777 = vmatpush.bf16.msra.mxu3 %v10722_v0 }
0x1962   : > { %v10564_v27 = vsel %vm1377_vm4, %v10544_v6, %v10546_v34 }
0x1964   : > { %10766 = vmatpush.bf16.msrb.mxu1 %v19068_v55  ;;  %v10684_v55 = vsel %vm1312_vm2, %v10564_v27, %v10642_v60 }
0x1965   : > { %10778 = vmatpush.bf16.msra.mxu3 %v10616_v37 }
0x1966   : > { %v10592_v19 = vpop.permute.xlu2 %10591 }
0x1967   : > { %v10617_v5 = vsel %vm1437_vm3, %v10590_v52, %v10592_v19 }
0x1969   : > { %v10542_v29 = vpop.permute.xlu1 %10541  ;;  %10779 = vmatpush.bf16.msra.mxu3 %v19073_v15  ;;  %v10557_v15 = vsel %vm1377_vm4, %v19159_v8, %v10530_v45 }
0x196a   : > { %v10562_v56 = vsel %vm1377_vm4, %v10540_v63, %v10542_v29  ;;  %v10563_v59 = vsel %vm1377_vm4, %v10542_v29, %v10544_v6 }
0x196b   : > { %v10676_v16 = vsel %vm1312_vm2, %v10562_v56, %v10640_v54  ;;  %v10680_v40 = vsel %vm1312_vm2, %v10563_v59, %v10641_v14 }
0x196c   : > { %10754 = vmatpush.bf16.msrb.mxu0 %v10676_v16  ;;  %10767 = vmatpush.bf16.msrb.mxu1 %v10680_v40 }
0x196d   : > { %10780 = vmatpush.bf16.msra.mxu3 %v10684_v55 }
0x196e   : > { %v10548_v14 = vpop.permute.xlu2 %10547 }
0x196f   : > { %v10565_v26 = vsel %vm1377_vm4, %v10546_v34, %v10548_v14 }
0x1970   : > { %v10688_v2 = vsel %vm1312_vm2, %v10565_v26, %v10643_v53 }
0x1971   : > { %10781 = vmatpush.bf16.msra.mxu3 %v10557_v15 }
0x1974   : > { %14482 = vmatmul.msk.bf16.vlgmr.msra.gmra.mxu3 %vm1536_vm5, %v19183_v44 }
0x1976   : > { %v10608_v49 = vpop.permute.xlu0 %10607  ;;  %v10610_v33 = vpop.permute.xlu2 %10609 }
0x1977   : > { %v10624_v35 = vsel %vm1437_vm3, %v10606_v20, %v10608_v49  ;;  %v10612_v24 = vpop.permute.xlu1 %10611 }
0x1978   : > { %v10725_v48 = vsel %vm1312_vm2, %v10624_v35, 0  ;;  %v10638_v1 = vsel %vm1437_vm3, %v10612_v24, 0  ;;  %v10626_v53 = vsel %vm1437_vm3, %v10610_v33, %v10612_v24 }
0x1979   : > { %v10733_v60 = vsel %vm1312_vm2, %v10638_v1, 0  ;;  %10790 = vmatpush.bf16.msra.mxu2 %v10725_v48  ;;  %v10731_v61 = vsel %vm1312_vm2, %v10626_v53, 0 }
0x197a   : > { %10829 = vmatpush.bf16.msrb.mxu3 %v10733_v60 }
0x197d   : > { %10791 = vmatpush.bf16.msra.mxu2 %v10617_v5 }
0x197e   : > { %v10552_v57 = vpop.permute.xlu0 %10551  ;;  %v10536_v38 = vpop.permute.xlu2 %10535 }
0x197f   : > { %v10554_v30 = vpop.permute.xlu1 %10553 }
0x1980   : > { %v10568_v39 = vsel %vm1377_vm4, %v10552_v57, %v10554_v30 }
0x1981   : > { %10792 = vmatpush.bf16.msra.mxu2 %v19109_v51  ;;  %v10625_v51 = vsel %vm1437_vm3, %v10608_v49, %v10610_v33 }
0x1982   : > { %v10728_v18 = vsel %vm1312_vm2, %v10625_v51, 0 }
0x1985   : > { %10793 = vmatpush.bf16.msra.mxu2 %v10688_v2 }
0x1986   : > { %v10596_v11 = vpop.permute.xlu0 %10595  ;;  %v10550_v22 = vpop.permute.xlu2 %10549 }
0x1987   : > { %v10532_v43 = vpop.permute.xlu1 %10531  ;;  %v10635_v62 = vsel %vm1437_vm3, %v10596_v11, 0  ;;  %v10566_v54 = vsel %vm1377_vm4, %v10548_v14, %v10550_v22  ;;  %v10567_v4 = vsel %vm1377_vm4, %v10550_v22, %v10552_v57 }
0x1988   : > { %10830 = vmatpush.bf16.msrb.mxu3 %v10635_v62  ;;  %v10558_v9 = vsel %vm1377_vm4, %v10530_v45, %v10532_v43  ;;  %v10692_v42 = vsel %vm1312_vm2, %v10566_v54, %v10644_v58  ;;  %v10696_v52 = vsel %vm1312_vm2, %v10567_v4, %v10645_v17 }
0x1989   : > { %10794 = vmatpush.bf16.msra.mxu2 %v10558_v9 }
0x198c   : > { %14483 = vmatmul.msk.bf16.vlgmr.msra.gmra.mxu2 %vm1536_vm5, %v19183_v44  ;;  %10831 = vmatpush.bf16.msrb.mxu3 %v19133_v10  ;;  %v10700_v10 = vsel %vm1312_vm2, %v10568_v39, %v10646_v3 }
0x198e   : > { %v10526_v47 = vpop.permute.xlu0 %10525 }
0x198f   : > { %v10555_v23 = vsel %vm1377_vm4, %v19161_v31, %v10526_v47  ;;  %v10556_v63 = vsel %vm1377_vm4, %v10526_v47, %v19159_v8  ;;  %v10594_v36 = vpop.permute.xlu1 %10593 }
0x1990   : > { %10755 = vmatpush.bf16.msrb.mxu0 %v10555_v23  ;;  %10768 = vmatpush.bf16.msrb.mxu1 %v10556_v63  ;;  %v10618_v8 = vsel %vm1437_vm3, %v10592_v19, %v10594_v36  ;;  %v10619_v31 = vsel %vm1437_vm3, %v10594_v36, %v10596_v11  ;;  %v10852_v23 = vpop.permute.xlu2 %10851 }
0x1991   : > { %10832 = vmatpush.bf16.msrb.mxu3 %v10700_v10 }
0x1993   : > { %14480 = vmatmul.msk.bf16.vlgmr.msrb.gmra.mxu0 %vm1536_vm5, %v19183_v44  ;;  %14481 = vmatmul.msk.bf16.vlgmr.msrb.gmra.mxu1 %vm1536_vm5, %v19183_v44 }
0x1994   : > { %10803 = vmatpush.bf16.msra.mxu0 %v10728_v18  ;;  %10816 = vmatpush.bf16.msra.mxu1 %v10731_v61 }
0x1996   : > { %v10538_v3 = vpop.permute.xlu0 %10537 }
0x1997   : > { %v10561_v13 = vsel %vm1377_vm4, %v10536_v38, %v10538_v3  ;;  %v10707_v12 = vpop.permute.xlu1 %10706 }
0x1998   : > { %10804 = vmatpush.bf16.msra.mxu0 %v10618_v8  ;;  %10817 = vmatpush.bf16.msra.mxu1 %v10619_v31 }
0x1999   : > { %10833 = vmatpush.bf16.msrb.mxu3 %v10561_v13 }
0x199c   : > { %10805 = vmatpush.bf16.msra.mxu0 %v19114_v25  ;;  %10818 = vmatpush.bf16.msra.mxu1 %v19138_v28 }
0x199d   : > { %14486 = vmatmul.msk.bf16.vlgmr.msrb.gmra.mxu3 %vm1536_vm5, %v19183_v44 }
0x199e   : > { %v10534_v21 = vpop.permute.xlu0 %10533 }
0x199f   : > { %v10559_v25 = vsel %vm1377_vm4, %v10532_v43, %v10534_v21  ;;  %v10560_v32 = vsel %vm1377_vm4, %v10534_v21, %v10536_v38 }
0x19a0   : > { %10806 = vmatpush.bf16.msra.mxu0 %v10692_v42  ;;  %10819 = vmatpush.bf16.msra.mxu1 %v10696_v52 }
0x19a4   : > { %10807 = vmatpush.bf16.msra.mxu0 %v10559_v25  ;;  %10820 = vmatpush.bf16.msra.mxu1 %v10560_v32 }
0x19a7   : > { %14484 = vmatmul.msk.bf16.vlgmr.msra.gmra.mxu0 %vm1536_vm5, %v19183_v44  ;;  %14485 = vmatmul.msk.bf16.vlgmr.msra.gmra.mxu1 %vm1536_vm5, %v19183_v44 }
0x19df   : > { %v10744_v58 = vpop.f32.mrf.mxu2 }
0x19e0   : > { %v10745_v41 = vadd.f32 %v10744_v58, %v10707_v12 }
0x19e2   : > { %v10839_v28 = vpack.c.bf16 %v10745_v41, %v10745_v41 }
0x19e4   : > { %v10858_v17 = vsel %vm1312_vm2, %v10839_v28, 0 }
0x19e5   : > { %10888 = vmatpush.bf16.msrb.mxu2 %v10858_v17 }
0x19e7   : > { %v10746_v45 = vpop.f32.mrf.mxu2 }
0x19e8   : > { %14487 = vmatmul.msk.bf16.vlgmr.msrb.gmra.mxu2 %vm4032_vm12, %v10847_v7 }
0x19f7   : > { %v10783_v20 = vpop.f32.mrf.mxu3 }
0x19f8   : > { %v10784_v46 = vadd.f32 %v10783_v20, %v10707_v12 }
0x19fa   : > { %v10842_v50 = vpack.c.bf16 %v10784_v46, %v10784_v46 }
0x19fc   : > { %v10867_v0 = vsel %vm1312_vm2, %v10842_v50, 0 }
0x19fd   : > { %10927 = vmatpush.bf16.msra.mxu2 %v10867_v0 }
0x19ff   : > { %v10785_v34 = vpop.f32.mrf.mxu3 }
0x1a00   : > { %14490 = vmatmul.msk.bf16.vlgmr.msra.gmra.mxu2 %vm4032_vm12, %v10847_v7 }
0x1a0f   : > { %v10796_v44 = vpop.f32.mrf.mxu2 }
0x1a10   : > { %v10797_v37 = vadd.f32 %v10796_v44, %v10707_v12  ;;  %v10757_v6 = vpop.f32.mrf.mxu0  ;;  %v10770_v29 = vpop.f32.mrf.mxu1 }
0x1a11   : > { %v10758_v27 = vadd.f32 %v10757_v6, %v10707_v12  ;;  %v10771_v56 = vadd.f32 %v10770_v29, %v10707_v12 }
0x1a12   : > { %v10843_v59 = vpack.c.bf16 %v10797_v37, %v10797_v37 }
0x1a13   : > { %v10840_v16 = vpack.c.bf16 %v10758_v27, %v10758_v27  ;;  %v10841_v40 = vpack.c.bf16 %v10771_v56, %v10771_v56 }
0x1a14   : > { %v10870_v55 = vsel %vm1312_vm2, %v10843_v59, 0 }
0x1a15   : > { %v10861_v19 = vsel %vm1312_vm2, %v10840_v16, 0  ;;  %v10864_v15 = vsel %vm1312_vm2, %v10841_v40, 0  ;;  %10940 = vmatpush.bf16.msra.mxu3 %v10870_v55 }
0x1a16   : > { %10901 = vmatpush.bf16.msrb.mxu0 %v10861_v19  ;;  %10914 = vmatpush.bf16.msrb.mxu1 %v10864_v15 }
0x1a17   : > { %v10798_v49 = vpop.f32.mrf.mxu2 }
0x1a18   : > { %v10759_v35 = vpop.f32.mrf.mxu0  ;;  %v10772_v24 = vpop.f32.mrf.mxu1  ;;  %14491 = vmatmul.msk.bf16.vlgmr.msra.gmra.mxu3 %vm4032_vm12, %v10847_v7 }
0x1a19   : > { %14488 = vmatmul.msk.bf16.vlgmr.msrb.gmra.mxu0 %vm4032_vm12, %v10847_v7  ;;  %14489 = vmatmul.msk.bf16.vlgmr.msrb.gmra.mxu1 %vm4032_vm12, %v10847_v7 }
0x1a20   : > { %v10835_v14 = vpop.f32.mrf.mxu3 }
0x1a21   : > { %v10836_v48 = vadd.f32 %v10835_v14, %v10707_v12 }
0x1a23   : > { %v10846_v1 = vpack.c.bf16 %v10836_v48, %v10836_v48 }
0x1a24   : > { %v10809_v60 = vpop.f32.mrf.mxu0  ;;  %v10822_v57 = vpop.f32.mrf.mxu1 }
0x1a25   : > { %v10810_v5 = vadd.f32 %v10809_v60, %v10707_v12  ;;  %v10879_v30 = vsel %vm1312_vm2, %v10846_v1, 0  ;;  %v10823_v26 = vadd.f32 %v10822_v57, %v10707_v12 }
0x1a26   : > { %10979 = vmatpush.bf16.msrb.mxu2 %v10879_v30 }
0x1a27   : > { %v10844_v33 = vpack.c.bf16 %v10810_v5, %v10810_v5  ;;  %v10845_v2 = vpack.c.bf16 %v10823_v26, %v10823_v26 }
0x1a28   : > { %v10837_v43 = vpop.f32.mrf.mxu3 }
0x1a29   : > { %v10873_v11 = vsel %vm1312_vm2, %v10844_v33, 0  ;;  %v10876_v62 = vsel %vm1312_vm2, %v10845_v2, 0  ;;  %14494 = vmatmul.msk.bf16.vlgmr.msrb.gmra.mxu2 %vm4032_vm12, %v10847_v7 }
0x1a2a   : > { %10953 = vmatpush.bf16.msra.mxu0 %v10873_v11  ;;  %10966 = vmatpush.bf16.msra.mxu1 %v10876_v62 }
0x1a2c   : > { %v10811_v9 = vpop.f32.mrf.mxu0  ;;  %v10824_v38 = vpop.f32.mrf.mxu1 }
0x1a2d   : > { %14492 = vmatmul.msk.bf16.vlgmr.msra.gmra.mxu0 %vm4032_vm12, %v10847_v7  ;;  %14493 = vmatmul.msk.bf16.vlgmr.msra.gmra.mxu1 %vm4032_vm12, %v10847_v7 }
0x1a6b   : > { %v10890_v51 = vpop.f32.mrf.mxu2 }
0x1a6c   : > { %v10891_v31 = vadd.f32 %v10890_v51, %v10852_v23 }
0x1a73   : > { %v10892_v39 = vpop.f32.mrf.mxu2 }
0x1a83   : > { %v10929_v53 = vpop.f32.mrf.mxu2 }
0x1a84   : > { %v10930_v63 = vadd.f32 %v10929_v53, %v10852_v23 }
0x1a86   : > { %v10994_v61 = vrot.slane %v10930_v63, 4 }
0x1a8b   : > { %v10931_v47 = vpop.f32.mrf.mxu2 }
0x1a96   : > { %v10903_v18 = vpop.f32.mrf.mxu0  ;;  %v10916_v10 = vpop.f32.mrf.mxu1 }
0x1a97   : > { %v10904_v36 = vadd.f32 %v10903_v18, %v10852_v23  ;;  %v10917_v8 = vadd.f32 %v10916_v10, %v10852_v23 }
0x1a99   : > { %v10993_v22 = vrot.slane %v10904_v36, 4  ;;  %v10998_v3 = vsel %vm1312_vm2, %v10917_v8, %v10994_v61 }
0x1a9a   : > { %11006 = vst [vmem:[%s1042_s1 + $0x8] sm:$0x77] %v10998_v3 }
0x1a9b   : > { %v10997_v13 = vsel %vm1312_vm2, %v10891_v31, %v10993_v22  ;;  %v10942_v54 = vpop.f32.mrf.mxu3 }
0x1a9c   : > { %11005 = vst [vmem:[%s1042_s1] sm:$0x77] %v10997_v13  ;;  %v10943_v12 = vadd.f32 %v10942_v54, %v10852_v23 }
0x1a9e   : > { %v10905_v4 = vpop.f32.mrf.mxu0  ;;  %v10918_v42 = vpop.f32.mrf.mxu1 }
0x1aa3   : > { %v10944_v52 = vpop.f32.mrf.mxu3 }
0x1aaa   : > { %v10955_v21 = vpop.f32.mrf.mxu0  ;;  %v10968_v32 = vpop.f32.mrf.mxu1 }
0x1aab   : > { %v10956_v25 = vadd.f32 %v10955_v21, %v10852_v23  ;;  %v10969_v7 = vadd.f32 %v10968_v32, %v10852_v23 }
0x1aac   : > { %v10981_v41 = vpop.f32.mrf.mxu2 }
0x1aad   : > { %v10995_v58 = vrot.slane %v10956_v25, 4  ;;  %v10982_v28 = vadd.f32 %v10981_v41, %v10852_v23 }
0x1aaf   : > { %v10999_v17 = vsel %vm1312_vm2, %v10943_v12, %v10995_v58  ;;  %v10996_v45 = vrot.slane %v10982_v28, 4 }
0x1ab0   : > { %11007 = vst [vmem:[%s1042_s1 + $0x10] sm:$0x77] %v10999_v17 }
0x1ab1   : > { %v11000_v20 = vsel %vm1312_vm2, %v10969_v7, %v10996_v45 }
0x1ab2   : > { %v10957_v46 = vpop.f32.mrf.mxu0  ;;  %11008 = vst [vmem:[%s1042_s1 + $0x18] sm:$0x77] %v11000_v20  ;;  %v10970_v50 = vpop.f32.mrf.mxu1 }
0x1ab4   : > { %v10983_v0 = vpop.f32.mrf.mxu2 }
0x1ab5 PF: > { %s79_s15 = sadd.s32 1, %s15269_s15  }
0x1ab6   : > { %p76_p4 = scmp.ge.s32.totalorder %s79_s15, 4  }
0x1ab8   :  { %78 = sbr.rel (!%p76_p4) target bundleno = 63 (0x3f), region = 235 }

</bundles_post_ra>
